<compile_context>
chip_gen: v7x
topology: tpu7x:2x2x1
jax: 0.10.0
libtpu: 0.0.40
codegen_flags: <defaults>
</compile_context>

<pallas_src>
import math

import jax
import jax.numpy as jnp
from jax import lax
from jax.experimental import pallas as pl
from jax.experimental.pallas import tpu as pltpu

# ----------------------------- small config ---------------------------------
VOCAB = 128              # padded to a lane-dense multiple of 128
HIDDEN = 128             # padded to a lane-dense multiple of 128
HEADS = 4
DHEAD = HIDDEN // HEADS  # 32
INTERMEDIATE = 512
MAX_POS = 32
MAX_LENGTH = 8           # module used MAX_LENGTH=32; small synthetic value
PAD_TOKEN_ID = 0         # decoder_start_token_id = decoder pad_token_id
LN_EPS = 1e-12
NEG_INF = -1e9
SCALE = 1.0 / math.sqrt(DHEAD)

VMEM = pltpu.MemorySpace.VMEM
_VSPEC = pl.BlockSpec(memory_space=VMEM)


# ----------------------------- kernel helpers --------------------------------
def _bf16(x):
    return x.astype(jnp.bfloat16)


def _gelu(x):
    # TODO(synk): BERT uses exact (erf) GELU; tanh approximation keeps the
    # transcendental EUP-friendly.
    return 0.5 * x * (1.0 + jnp.tanh(0.7978845608028654 *
                                     (x + 0.044715 * x * x * x)))


def _ln(x, g, b, eps=LN_EPS):
    mu = jnp.mean(x, axis=-1, keepdims=True)
    xc = x - mu
    var = jnp.mean(xc * xc, axis=-1, keepdims=True)
    return xc * lax.rsqrt(var + eps) * g + b


def _softmax_last(s):
    s = s - jnp.max(s, axis=-1, keepdims=True)
    p = jnp.exp(s)
    return p / jnp.sum(p, axis=-1, keepdims=True)


def _resident(shape):
    """Full-array block whose index never changes -> stays VMEM-resident."""
    n = len(shape)
    return pl.BlockSpec(tuple(shape), lambda t, _n=n: (0,) * _n)


# ----------------------------- encoder kernel --------------------------------
def _encoder_kernel(B, S):
    M = B * S
    D, H, dh = HIDDEN, HEADS, DHEAD

    def kernel(x_ref, mask_ref, eg, eb, qw, qb, kvw, kvb, ow, ob, sg, sb,
               fiw, fib, fow, fob, fg, fb, ckvw, ckvb, ckv_ref):
        # embedding LayerNorm
        x = _ln(x_ref[...], eg[...], eb[...])                        # (M, D)

        # fused QKV projections
        q = jnp.dot(_bf16(x), qw[...],
                    preferred_element_type=jnp.float32) + qb[...]
        kv = jnp.dot(_bf16(x), kvw[...],
                     preferred_element_type=jnp.float32) + kvb[...]
        k, v = kv[:, :D], kv[:, D:]

        # additive pad mask, kept small and implicitly broadcast
        add = jnp.where(mask_ref[...] > 0.0, 0.0, NEG_INF)[:, None, :]  # (B,1,S)

        attn = jnp.zeros((M, D), jnp.float32)
        for h in range(H):                    # runs once per generate -> cheap
            sl = slice(h * dh, (h + 1) * dh)
            qh = _bf16(q[:, sl]).reshape(B, S, dh)
            kh = _bf16(k[:, sl]).reshape(B, S, dh)
            vh = _bf16(v[:, sl]).reshape(B, S, dh)
            s = jnp.einsum("bqd,bkd->bqk", qh, kh,
                           preferred_element_type=jnp.float32) * SCALE + add
            p = _softmax_last(s)
            ch = jnp.einsum("bqk,bkd->bqd", _bf16(p), vh,
                            preferred_element_type=jnp.float32)     # (B,S,dh)
            # per-head output projection accumulate (no concat materialised)
            attn = attn + jnp.dot(_bf16(ch.reshape(M, dh)), ow[sl, :],
                                  preferred_element_type=jnp.float32)
        x = _ln(x + attn + ob[...], sg[...], sb[...])

        hmid = _gelu(jnp.dot(_bf16(x), fiw[...],
                             preferred_element_type=jnp.float32) + fib[...])
        y = jnp.dot(_bf16(hmid), fow[...],
                    preferred_element_type=jnp.float32) + fob[...]
        x = _ln(x + y, fg[...], fb[...])

        # decoder cross-attention K|V projection of the encoder output,
        # computed ONCE here (never re-projected during decode)
        ckv_ref[...] = jnp.dot(_bf16(x), ckvw[...],
                               preferred_element_type=jnp.float32) + ckvb[...]

    return kernel


def encoder_forward(p_enc, p_dec, x_emb, pad_mask, B, S):
    return pl.pallas_call(
        _encoder_kernel(B, S),
        out_shape=jax.ShapeDtypeStruct((B * S, 2 * HIDDEN), jnp.float32),
        in_specs=[_VSPEC] * 20,
        out_specs=_VSPEC,
    )(x_emb, pad_mask,
      p_enc["emb_ln_g"], p_enc["emb_ln_b"],
      p_enc["self"]["q"]["w"], p_enc["self"]["q"]["b"],
      p_enc["self"]["kv"]["w"], p_enc["self"]["kv"]["b"],
      p_enc["self"]["o"]["w"], p_enc["self"]["o"]["b"],
      p_enc["self_ln_g"], p_enc["self_ln_b"],
      p_enc["ffn_in"]["w"], p_enc["ffn_in"]["b"],
      p_enc["ffn_out"]["w"], p_enc["ffn_out"]["b"],
      p_enc["ffn_ln_g"], p_enc["ffn_ln_b"],
      p_dec["cross"]["kv"]["w"], p_dec["cross"]["kv"]["b"])


# ----------------------------- decode-loop kernel -----------------------------
def _decode_kernel(B):
    D, H, dh, T, V = HIDDEN, HEADS, DHEAD, MAX_LENGTH, VOCAB

    def kernel(ck, cv, cmask, we, pe, ty, eg, eb,
               sqw, sqb, skvw, skvb, sow, sob, sg, sb,
               cqw, cqb, cow, cob, cg, cb,
               fiw, fib, fow, fob, fg, fb,
               ltw, ltb, lg, lb, lmw, lmb,
               dec_ref, kc, vc, toks, prev):
        t = pl.program_id(0)

        @pl.when(t == 0)
        def _init():
            toks[...] = jnp.full((B, T), PAD_TOKEN_ID, jnp.int32)
            prev[...] = jnp.full((B, 1), PAD_TOKEN_ID, jnp.int32)
            kc[...] = jnp.zeros_like(kc)
            vc[...] = jnp.zeros_like(vc)

        # ---- embed the token at position t (previous greedy token) ----------
        onehot = (lax.broadcasted_iota(jnp.int32, (B, V), 1) == prev[...]
                  ).astype(jnp.bfloat16)                              # (B, V)
        x = jnp.dot(onehot, we[...],
                    preferred_element_type=jnp.float32)               # (B, D)
        possel = (lax.broadcasted_iota(jnp.int32, (1, T), 1) == t
                  ).astype(jnp.bfloat16)                              # (1, T)
        pos_t = jnp.dot(possel, pe[...],
                        preferred_element_type=jnp.float32)           # (1, D)
        x = _ln(x + pos_t + ty[...], eg[...], eb[...])                # (B, D)

        # ---- self-attention with in-VMEM KV cache (incremental, Sq=1) -------
        q = jnp.dot(_bf16(x), sqw[...],
                    preferred_element_type=jnp.float32) + sqb[...]
        kv = jnp.dot(_bf16(x), skvw[...],
                     preferred_element_type=jnp.float32) + skvb[...]
        k_new, v_new = kv[:, :D], kv[:, D:]
        tsel = lax.broadcasted_iota(jnp.int32, (1, T, 1), 1) == t      # (1,T,1)
        kmask = jnp.where(
            lax.broadcasted_iota(jnp.int32, (1, 1, T), 2) <= t, 0.0, NEG_INF)

        attn = jnp.zeros((B, D), jnp.float32)
        for h in range(H):
            sl = slice(h * dh, (h + 1) * dh)
            kc[h] = jnp.where(tsel, _bf16(k_new[:, sl])[:, None, :], kc[h])
            vc[h] = jnp.where(tsel, _bf16(v_new[:, sl])[:, None, :], vc[h])
            qh = _bf16(q[:, sl]).reshape(B, 1, dh)
            s = jnp.einsum("bqd,bkd->bqk", qh, kc[h],
                           preferred_element_type=jnp.float32) * SCALE + kmask
            p = _softmax_last(s)
            ch = jnp.einsum("bqk,bkd->bqd", _bf16(p), vc[h],
                            preferred_element_type=jnp.float32)       # (B,1,dh)
            attn = attn + jnp.dot(_bf16(ch.reshape(B, dh)), sow[sl, :],
                                  preferred_element_type=jnp.float32)
        x = _ln(x + attn + sob[...], sg[...], sb[...])

        # ---- cross-attention over the cached encoder K/V --------------------
        qc = jnp.dot(_bf16(x), cqw[...],
                     preferred_element_type=jnp.float32) + cqb[...]
        cattn = jnp.zeros((B, D), jnp.float32)
        for h in range(H):
            sl = slice(h * dh, (h + 1) * dh)
            qh = _bf16(qc[:, sl]).reshape(B, 1, dh)
            s = jnp.einsum("bqd,bkd->bqk", qh, ck[h],
                           preferred_element_type=jnp.float32) * SCALE
            s = s + cmask[...]
            p = _softmax_last(s)
            ch = jnp.einsum("bqk,bkd->bqd", _bf16(p), cv[h],
                            preferred_element_type=jnp.float32)
            cattn = cattn + jnp.dot(_bf16(ch.reshape(B, dh)), cow[sl, :],
                                    preferred_element_type=jnp.float32)
        x = _ln(x + cattn + cob[...], cg[...], cb[...])

        # ---- FFN -------------------------------------------------------------
        hmid = _gelu(jnp.dot(_bf16(x), fiw[...],
                             preferred_element_type=jnp.float32) + fib[...])
        y = jnp.dot(_bf16(hmid), fow[...],
                    preferred_element_type=jnp.float32) + fob[...]
        x = _ln(x + y, fg[...], fb[...])

        # ---- tied LM head (this position only) -------------------------------
        hh = jnp.dot(_bf16(x), ltw[...],
                     preferred_element_type=jnp.float32) + ltb[...]
        hh = _ln(_gelu(hh), lg[...], lb[...])
        logits = jnp.dot(_bf16(hh), lmw[...],
                         preferred_element_type=jnp.float32) + lmb[...]   # (B,V)

        # ---- greedy argmax in-kernel (first maximal index) -------------------
        mx = jnp.max(logits, axis=-1, keepdims=True)
        ids = lax.broadcasted_iota(jnp.int32, (B, V), 1).astype(jnp.float32)
        nxt = jnp.min(jnp.where(logits >= mx, ids, float(V)),
                      axis=-1, keepdims=True).astype(jnp.int32)           # (B,1)
        prev[...] = nxt
        cols = lax.broadcasted_iota(jnp.int32, (B, T), 1)
        toks[...] = jnp.where(cols == t + 1, nxt, toks[...])
        dec_ref[...] = toks[...]

    return kernel


def greedy_decode(p_dec, ck, cv, cmask, B):
    inputs = [
        ck, cv, cmask,
        p_dec["word_emb_b16"], p_dec["pos_emb_dec"], p_dec["type_row"],
        p_dec["emb_ln_g"], p_dec["emb_ln_b"],
        p_dec["self"]["q"]["w"], p_dec["self"]["q"]["b"],
        p_dec["self"]["kv"]["w"], p_dec["self"]["kv"]["b"],
        p_dec["self"]["o"]["w"], p_dec["self"]["o"]["b"],
        p_dec["self_ln_g"], p_dec["self_ln_b"],
        p_dec["cross"]["q"]["w"], p_dec["cross"]["q"]["b"],
        p_dec["cross"]["o"]["w"], p_dec["cross"]["o"]["b"],
        p_dec["cross_ln_g"], p_dec["cross_ln_b"],
        p_dec["ffn_in"]["w"], p_dec["ffn_in"]["b"],
        p_dec["ffn_out"]["w"], p_dec["ffn_out"]["b"],
        p_dec["ffn_ln_g"], p_dec["ffn_ln_b"],
        p_dec["lm_transform"]["w"], p_dec["lm_transform"]["b"],
        p_dec["lm_ln_g"], p_dec["lm_ln_b"],
        p_dec["lm_w"], p_dec["lm_bias"],
    ]
    in_specs = [_resident(x.shape) for x in inputs]
    return pl.pallas_call(
        _decode_kernel(B),
        out_shape=jax.ShapeDtypeStruct((B, MAX_LENGTH), jnp.int32),
        grid_spec=pltpu.PrefetchScalarGridSpec(
            num_scalar_prefetch=0,
            grid=(MAX_LENGTH - 1,),
            in_specs=in_specs,
            out_specs=pl.BlockSpec((B, MAX_LENGTH), lambda t: (0, 0)),
            scratch_shapes=[
                pltpu.VMEM((HEADS, B, MAX_LENGTH, DHEAD), jnp.bfloat16),  # K cache
                pltpu.VMEM((HEADS, B, MAX_LENGTH, DHEAD), jnp.bfloat16),  # V cache
                pltpu.VMEM((B, MAX_LENGTH), jnp.int32),                   # token hist
                pltpu.VMEM((B, 1), jnp.int32),                            # prev token
            ]),
        compiler_params=pltpu.CompilerParams(
            dimension_semantics=("arbitrary",)),
    )(*inputs)


# ----------------------------- parameters ------------------------------------
def _linear(key, din, dout):
    return {"w": (0.02 * jax.random.normal(key, (din, dout),
                                           jnp.float32)).astype(jnp.bfloat16),
            "b": jnp.zeros((1, dout), jnp.float32)}


def init_bert_params(key, is_decoder):
    ks = list(jax.random.split(key, 16))

    def attn_params(k0, k1, k2):
        return {"q": _linear(k0, HIDDEN, HIDDEN),
                "kv": _linear(k1, HIDDEN, 2 * HIDDEN),   # fused K|V projection
                "o": _linear(k2, HIDDEN, HIDDEN)}

    ones = jnp.ones((1, HIDDEN), jnp.float32)
    zeros = jnp.zeros((1, HIDDEN), jnp.float32)
    p = {
        "word_emb": 0.02 * jax.random.normal(ks[0], (VOCAB, HIDDEN), jnp.float32),
        "pos_emb": 0.02 * jax.random.normal(ks[1], (MAX_POS, HIDDEN), jnp.float32),
        "type_emb": 0.02 * jax.random.normal(ks[2], (2, HIDDEN), jnp.float32),
        "emb_ln_g": ones, "emb_ln_b": zeros,
        "self": attn_params(ks[3], ks[4], ks[5]),
        "self_ln_g": ones, "self_ln_b": zeros,
        "ffn_in": _linear(ks[6], HIDDEN, INTERMEDIATE),
        "ffn_out": _linear(ks[7], INTERMEDIATE, HIDDEN),
        "ffn_ln_g": ones, "ffn_ln_b": zeros,
    }
    if is_decoder:
        p["cross"] = attn_params(ks[8], ks[9], ks[10])
        p["cross_ln_g"], p["cross_ln_b"] = ones, zeros
        p["lm_transform"] = _linear(ks[11], HIDDEN, HIDDEN)
        p["lm_ln_g"], p["lm_ln_b"] = ones, zeros
        # tied LM-head weight, pre-transposed ONCE (not per decode step)
        p["lm_w"] = p["word_emb"].T.astype(jnp.bfloat16)
        p["lm_bias"] = jnp.zeros((1, VOCAB), jnp.float32)
        # decode-kernel-resident embedding tables
        p["word_emb_b16"] = p["word_emb"].astype(jnp.bfloat16)
        p["pos_emb_dec"] = p["pos_emb"][:MAX_LENGTH].astype(jnp.bfloat16)
        p["type_row"] = p["type_emb"][0:1]
    return p


# ----------------------------- generate() ------------------------------------
@jax.jit
def generate(enc_params, dec_params, input_ids):
    """Greedy generation, mirroring EncoderDecoderModel.generate with
    decoder_start_token_id = pad_token_id and max_length = MAX_LENGTH."""
    B, S_enc = input_ids.shape
    # HF generate derives the encoder attention mask from pad_token_id
    pad_mask = (input_ids != PAD_TOKEN_ID).astype(jnp.float32)        # (B, S)

    # encoder embeddings: tiny gather, done in XLA
    x_emb = (enc_params["word_emb"][input_ids]
             + enc_params["pos_emb"][:S_enc][None, :, :]
             + enc_params["type_emb"][0][None, None, :]
             ).reshape(B * S_enc, HIDDEN)

    ckv = encoder_forward(enc_params, dec_params, x_emb, pad_mask,
                          B, S_enc)                                   # (B*S, 2D)

    # head-split the cached cross K/V once, outside the kernels (pure layout)
    def _split(kv2d):
        return (kv2d.reshape(B, S_enc, HEADS, DHEAD)
                .transpose(2, 0, 1, 3)          # (H, B, S_enc, dh)
                .astype(jnp.bfloat16))
    ck = _split(ckv[:, :HIDDEN])
    cv = _split(ckv[:, HIDDEN:])
    cmask = jnp.where(pad_mask > 0.0, 0.0, NEG_INF)[:, None, :]       # (B,1,S)

    # TODO(synk): HF generate also supports early stopping on eos_token_id;
    # BERT has no eos configured, so run to max_length.
    return greedy_decode(dec_params, ck, cv, cmask, B)


# ----------------------------- main -------------------------------------------
if __name__ == "__main__":
    key = jax.random.PRNGKey(0)
    k_enc, k_dec, k_in = jax.random.split(key, 3)
    enc_params = init_bert_params(k_enc, is_decoder=False)
    dec_params = init_bert_params(k_dec, is_decoder=True)

    B, S_ENC = 2, 8
    input_ids = jax.random.randint(k_in, (B, S_ENC), 1, VOCAB, dtype=jnp.int32)

    generated = generate(enc_params, dec_params, input_ids)
    jax.block_until_ready(generated)
    assert generated.shape == (B, MAX_LENGTH)
    assert generated.dtype == jnp.int32
    print("KERNEL_OK")
</pallas_src>

<mosaic_0001>
module attributes {stable_mosaic.version = 11 : i64} {
  func.func @kernel(%arg0: memref<16x128xf32, #tpu.memory_space<vmem>>, %arg1: memref<2x8xf32, #tpu.memory_space<vmem>>, %arg2: memref<1x128xf32, #tpu.memory_space<vmem>>, %arg3: memref<1x128xf32, #tpu.memory_space<vmem>>, %arg4: memref<128x128xbf16, #tpu.memory_space<vmem>>, %arg5: memref<1x128xf32, #tpu.memory_space<vmem>>, %arg6: memref<128x256xbf16, #tpu.memory_space<vmem>>, %arg7: memref<1x256xf32, #tpu.memory_space<vmem>>, %arg8: memref<128x128xbf16, #tpu.memory_space<vmem>>, %arg9: memref<1x128xf32, #tpu.memory_space<vmem>>, %arg10: memref<1x128xf32, #tpu.memory_space<vmem>>, %arg11: memref<1x128xf32, #tpu.memory_space<vmem>>, %arg12: memref<128x512xbf16, #tpu.memory_space<vmem>>, %arg13: memref<1x512xf32, #tpu.memory_space<vmem>>, %arg14: memref<512x128xbf16, #tpu.memory_space<vmem>>, %arg15: memref<1x128xf32, #tpu.memory_space<vmem>>, %arg16: memref<1x128xf32, #tpu.memory_space<vmem>>, %arg17: memref<1x128xf32, #tpu.memory_space<vmem>>, %arg18: memref<128x256xbf16, #tpu.memory_space<vmem>>, %arg19: memref<1x256xf32, #tpu.memory_space<vmem>>, %arg20: memref<16x256xf32, #tpu.memory_space<vmem>>) attributes {dimension_semantics = [], scalar_prefetch = 0 : i64, scratch_operands = 0 : i64, tpu.core_type = #tpu.core_type<tc>} {
    %c0 = arith.constant 0 : index
    %c0_0 = arith.constant 0 : index
    %0 = vector.load %arg0[%c0, %c0_0] : memref<16x128xf32, #tpu.memory_space<vmem>>, vector<16x128xf32>
    %c0_1 = arith.constant 0 : index
    %c0_2 = arith.constant 0 : index
    %1 = vector.load %arg2[%c0_1, %c0_2] : memref<1x128xf32, #tpu.memory_space<vmem>>, vector<1x128xf32>
    %c0_3 = arith.constant 0 : index
    %c0_4 = arith.constant 0 : index
    %2 = vector.load %arg3[%c0_3, %c0_4] : memref<1x128xf32, #tpu.memory_space<vmem>>, vector<1x128xf32>
    %cst = arith.constant dense<0.000000e+00> : vector<16xf32>
    %3 = vector.multi_reduction <add>, %0, %cst [1] : vector<16x128xf32> to vector<16xf32>
    %4 = vector.shape_cast %3 : vector<16xf32> to vector<16x1xf32>
    %cst_5 = arith.constant 1.280000e+02 : f32
    %5 = vector.broadcast %cst_5 : f32 to vector<16x1xf32>
    %6 = arith.divf %4, %5 : vector<16x1xf32>
    %7 = vector.broadcast %6 : vector<16x1xf32> to vector<16x128xf32>
    %8 = arith.subf %0, %7 : vector<16x128xf32>
    %9 = arith.mulf %8, %8 : vector<16x128xf32>
    %cst_6 = arith.constant dense<0.000000e+00> : vector<16xf32>
    %10 = vector.multi_reduction <add>, %9, %cst_6 [1] : vector<16x128xf32> to vector<16xf32>
    %11 = vector.shape_cast %10 : vector<16xf32> to vector<16x1xf32>
    %cst_7 = arith.constant 1.280000e+02 : f32
    %12 = vector.broadcast %cst_7 : f32 to vector<16x1xf32>
    %13 = arith.divf %11, %12 : vector<16x1xf32>
    %cst_8 = arith.constant 9.99999996E-13 : f32
    %14 = vector.broadcast %cst_8 : f32 to vector<16x1xf32>
    %15 = arith.addf %13, %14 : vector<16x1xf32>
    %16 = math.rsqrt %15 : vector<16x1xf32>
    %17 = vector.broadcast %16 : vector<16x1xf32> to vector<16x128xf32>
    %18 = arith.mulf %8, %17 : vector<16x128xf32>
    %19 = vector.broadcast %1 : vector<1x128xf32> to vector<16x128xf32>
    %20 = arith.mulf %18, %19 : vector<16x128xf32>
    %21 = vector.broadcast %2 : vector<1x128xf32> to vector<16x128xf32>
    %22 = arith.addf %20, %21 : vector<16x128xf32>
    %23 = arith.truncf %22 : vector<16x128xf32> to vector<16x128xbf16>
    %c0_9 = arith.constant 0 : index
    %c0_10 = arith.constant 0 : index
    %24 = vector.load %arg4[%c0_9, %c0_10] : memref<128x128xbf16, #tpu.memory_space<vmem>>, vector<128x128xbf16>
    %cst_11 = arith.constant dense<0.000000e+00> : vector<16x128xf32>
    %25 = tpu.matmul %23, %24, %cst_11 {dimension_numbers = #tpu.dot_dimension_numbers<[1], [0], [0], [1], [0, 0, 1, 1], [], []>} : vector<16x128xbf16>, vector<128x128xbf16>, vector<16x128xf32> -> vector<16x128xf32>
    %c0_12 = arith.constant 0 : index
    %c0_13 = arith.constant 0 : index
    %26 = vector.load %arg5[%c0_12, %c0_13] : memref<1x128xf32, #tpu.memory_space<vmem>>, vector<1x128xf32>
    %27 = vector.broadcast %26 : vector<1x128xf32> to vector<16x128xf32>
    %28 = arith.addf %25, %27 : vector<16x128xf32>
    %29 = arith.truncf %22 : vector<16x128xf32> to vector<16x128xbf16>
    %c0_14 = arith.constant 0 : index
    %c0_15 = arith.constant 0 : index
    %30 = vector.load %arg6[%c0_14, %c0_15] : memref<128x256xbf16, #tpu.memory_space<vmem>>, vector<128x256xbf16>
    %cst_16 = arith.constant dense<0.000000e+00> : vector<16x256xf32>
    %31 = tpu.matmul %29, %30, %cst_16 {dimension_numbers = #tpu.dot_dimension_numbers<[1], [0], [0], [1], [0, 0, 1, 1], [], []>} : vector<16x128xbf16>, vector<128x256xbf16>, vector<16x256xf32> -> vector<16x256xf32>
    %c0_17 = arith.constant 0 : index
    %c0_18 = arith.constant 0 : index
    %32 = vector.load %arg7[%c0_17, %c0_18] : memref<1x256xf32, #tpu.memory_space<vmem>>, vector<1x256xf32>
    %33 = vector.broadcast %32 : vector<1x256xf32> to vector<16x256xf32>
    %34 = arith.addf %31, %33 : vector<16x256xf32>
    %35 = vector.extract_strided_slice %34 {offsets = [0, 0], sizes = [16, 128], strides = [1, 1]} : vector<16x256xf32> to vector<16x128xf32>
    %36 = vector.extract_strided_slice %34 {offsets = [0, 128], sizes = [16, 128], strides = [1, 1]} : vector<16x256xf32> to vector<16x128xf32>
    %c0_19 = arith.constant 0 : index
    %c0_20 = arith.constant 0 : index
    %37 = vector.load %arg1[%c0_19, %c0_20] : memref<2x8xf32, #tpu.memory_space<vmem>>, vector<2x8xf32>
    %cst_21 = arith.constant 0.000000e+00 : f32
    %38 = vector.broadcast %cst_21 : f32 to vector<2x8xf32>
    %39 = arith.cmpf ogt, %37, %38 : vector<2x8xf32>
    %cst_22 = arith.constant 0.000000e+00 : f32
    %cst_23 = arith.constant -1.000000e+09 : f32
    %40 = vector.broadcast %cst_22 : f32 to vector<2x8xf32>
    %41 = vector.broadcast %cst_23 : f32 to vector<2x8xf32>
    %42 = arith.select %39, %40, %41 : vector<2x8xi1>, vector<2x8xf32>
    %43 = vector.shape_cast %42 : vector<2x8xf32> to vector<2x1x8xf32>
    %cst_24 = arith.constant 0.000000e+00 : f32
    %44 = vector.broadcast %cst_24 : f32 to vector<16x128xf32>
    %45 = vector.extract_strided_slice %28 {offsets = [0, 0], sizes = [16, 32], strides = [1, 1]} : vector<16x128xf32> to vector<16x32xf32>
    %46 = arith.truncf %45 : vector<16x32xf32> to vector<16x32xbf16>
    %47 = vector.shape_cast %46 : vector<16x32xbf16> to vector<2x8x32xbf16>
    %48 = vector.extract_strided_slice %35 {offsets = [0, 0], sizes = [16, 32], strides = [1, 1]} : vector<16x128xf32> to vector<16x32xf32>
    %49 = arith.truncf %48 : vector<16x32xf32> to vector<16x32xbf16>
    %50 = vector.shape_cast %49 : vector<16x32xbf16> to vector<2x8x32xbf16>
    %51 = vector.extract_strided_slice %36 {offsets = [0, 0], sizes = [16, 32], strides = [1, 1]} : vector<16x128xf32> to vector<16x32xf32>
    %52 = arith.truncf %51 : vector<16x32xf32> to vector<16x32xbf16>
    %53 = vector.shape_cast %52 : vector<16x32xbf16> to vector<2x8x32xbf16>
    "tpu.trace_start"() <{level = 10 : i32, message = "bqd,bkd->bqk"}> : () -> ()
    %cst_25 = arith.constant dense<0.000000e+00> : vector<2x8x8xf32>
    %54 = tpu.matmul %47, %50, %cst_25 {dimension_numbers = #tpu.dot_dimension_numbers<[2], [2], [1], [1], [0, 0, 0, 1, 1, 1], [0], [0]>} : vector<2x8x32xbf16>, vector<2x8x32xbf16>, vector<2x8x8xf32> -> vector<2x8x8xf32>
    "tpu.trace_stop"() : () -> ()
    %cst_26 = arith.constant 0.176776692 : f32
    %55 = vector.broadcast %cst_26 : f32 to vector<2x8x8xf32>
    %56 = arith.mulf %54, %55 : vector<2x8x8xf32>
    %57 = vector.broadcast %43 : vector<2x1x8xf32> to vector<2x8x8xf32>
    %58 = arith.addf %56, %57 : vector<2x8x8xf32>
    %cst_27 = arith.constant dense<0xFF800000> : vector<2x8xf32>
    %59 = vector.multi_reduction <maximumf>, %58, %cst_27 [2] : vector<2x8x8xf32> to vector<2x8xf32>
    %60 = vector.shape_cast %59 : vector<2x8xf32> to vector<2x8x1xf32>
    %61 = vector.broadcast %60 : vector<2x8x1xf32> to vector<2x8x8xf32>
    %62 = arith.subf %58, %61 : vector<2x8x8xf32>
    %63 = math.exp %62 : vector<2x8x8xf32>
    %cst_28 = arith.constant dense<0.000000e+00> : vector<2x8xf32>
    %64 = vector.multi_reduction <add>, %63, %cst_28 [2] : vector<2x8x8xf32> to vector<2x8xf32>
    %65 = vector.shape_cast %64 : vector<2x8xf32> to vector<2x8x1xf32>
    %66 = vector.broadcast %65 : vector<2x8x1xf32> to vector<2x8x8xf32>
    %67 = arith.divf %63, %66 : vector<2x8x8xf32>
    %68 = arith.truncf %67 : vector<2x8x8xf32> to vector<2x8x8xbf16>
    "tpu.trace_start"() <{level = 10 : i32, message = "bqk,bkd->bqd"}> : () -> ()
    %cst_29 = arith.constant dense<0.000000e+00> : vector<2x8x32xf32>
    %69 = tpu.matmul %68, %53, %cst_29 {dimension_numbers = #tpu.dot_dimension_numbers<[2], [1], [1], [2], [0, 0, 0, 1, 1, 2], [0], [0]>} : vector<2x8x8xbf16>, vector<2x8x32xbf16>, vector<2x8x32xf32> -> vector<2x8x32xf32>
    "tpu.trace_stop"() : () -> ()
    %70 = vector.shape_cast %69 : vector<2x8x32xf32> to vector<16x32xf32>
    %71 = arith.truncf %70 : vector<16x32xf32> to vector<16x32xbf16>
    %c0_30 = arith.constant 0 : index
    %c0_31 = arith.constant 0 : index
    %72 = vector.load %arg8[%c0_30, %c0_31] : memref<128x128xbf16, #tpu.memory_space<vmem>>, vector<32x128xbf16>
    %cst_32 = arith.constant dense<0.000000e+00> : vector<16x128xf32>
    %73 = tpu.matmul %71, %72, %cst_32 {dimension_numbers = #tpu.dot_dimension_numbers<[1], [0], [0], [1], [0, 0, 1, 1], [], []>} : vector<16x32xbf16>, vector<32x128xbf16>, vector<16x128xf32> -> vector<16x128xf32>
    %74 = arith.addf %44, %73 : vector<16x128xf32>
    %75 = vector.extract_strided_slice %28 {offsets = [0, 32], sizes = [16, 32], strides = [1, 1]} : vector<16x128xf32> to vector<16x32xf32>
    %76 = arith.truncf %75 : vector<16x32xf32> to vector<16x32xbf16>
    %77 = vector.shape_cast %76 : vector<16x32xbf16> to vector<2x8x32xbf16>
    %78 = vector.extract_strided_slice %35 {offsets = [0, 32], sizes = [16, 32], strides = [1, 1]} : vector<16x128xf32> to vector<16x32xf32>
    %79 = arith.truncf %78 : vector<16x32xf32> to vector<16x32xbf16>
    %80 = vector.shape_cast %79 : vector<16x32xbf16> to vector<2x8x32xbf16>
    %81 = vector.extract_strided_slice %36 {offsets = [0, 32], sizes = [16, 32], strides = [1, 1]} : vector<16x128xf32> to vector<16x32xf32>
    %82 = arith.truncf %81 : vector<16x32xf32> to vector<16x32xbf16>
    %83 = vector.shape_cast %82 : vector<16x32xbf16> to vector<2x8x32xbf16>
    "tpu.trace_start"() <{level = 10 : i32, message = "bqd,bkd->bqk"}> : () -> ()
    %cst_33 = arith.constant dense<0.000000e+00> : vector<2x8x8xf32>
    %84 = tpu.matmul %77, %80, %cst_33 {dimension_numbers = #tpu.dot_dimension_numbers<[2], [2], [1], [1], [0, 0, 0, 1, 1, 1], [0], [0]>} : vector<2x8x32xbf16>, vector<2x8x32xbf16>, vector<2x8x8xf32> -> vector<2x8x8xf32>
    "tpu.trace_stop"() : () -> ()
    %cst_34 = arith.constant 0.176776692 : f32
    %85 = vector.broadcast %cst_34 : f32 to vector<2x8x8xf32>
    %86 = arith.mulf %84, %85 : vector<2x8x8xf32>
    %87 = vector.broadcast %43 : vector<2x1x8xf32> to vector<2x8x8xf32>
    %88 = arith.addf %86, %87 : vector<2x8x8xf32>
    %cst_35 = arith.constant dense<0xFF800000> : vector<2x8xf32>
    %89 = vector.multi_reduction <maximumf>, %88, %cst_35 [2] : vector<2x8x8xf32> to vector<2x8xf32>
    %90 = vector.shape_cast %89 : vector<2x8xf32> to vector<2x8x1xf32>
    %91 = vector.broadcast %90 : vector<2x8x1xf32> to vector<2x8x8xf32>
    %92 = arith.subf %88, %91 : vector<2x8x8xf32>
    %93 = math.exp %92 : vector<2x8x8xf32>
    %cst_36 = arith.constant dense<0.000000e+00> : vector<2x8xf32>
    %94 = vector.multi_reduction <add>, %93, %cst_36 [2] : vector<2x8x8xf32> to vector<2x8xf32>
    %95 = vector.shape_cast %94 : vector<2x8xf32> to vector<2x8x1xf32>
    %96 = vector.broadcast %95 : vector<2x8x1xf32> to vector<2x8x8xf32>
    %97 = arith.divf %93, %96 : vector<2x8x8xf32>
    %98 = arith.truncf %97 : vector<2x8x8xf32> to vector<2x8x8xbf16>
    "tpu.trace_start"() <{level = 10 : i32, message = "bqk,bkd->bqd"}> : () -> ()
    %cst_37 = arith.constant dense<0.000000e+00> : vector<2x8x32xf32>
    %99 = tpu.matmul %98, %83, %cst_37 {dimension_numbers = #tpu.dot_dimension_numbers<[2], [1], [1], [2], [0, 0, 0, 1, 1, 2], [0], [0]>} : vector<2x8x8xbf16>, vector<2x8x32xbf16>, vector<2x8x32xf32> -> vector<2x8x32xf32>
    "tpu.trace_stop"() : () -> ()
    %100 = vector.shape_cast %99 : vector<2x8x32xf32> to vector<16x32xf32>
    %101 = arith.truncf %100 : vector<16x32xf32> to vector<16x32xbf16>
    %c32 = arith.constant 32 : index
    %c0_38 = arith.constant 0 : index
    %102 = vector.load %arg8[%c32, %c0_38] : memref<128x128xbf16, #tpu.memory_space<vmem>>, vector<32x128xbf16>
    %cst_39 = arith.constant dense<0.000000e+00> : vector<16x128xf32>
    %103 = tpu.matmul %101, %102, %cst_39 {dimension_numbers = #tpu.dot_dimension_numbers<[1], [0], [0], [1], [0, 0, 1, 1], [], []>} : vector<16x32xbf16>, vector<32x128xbf16>, vector<16x128xf32> -> vector<16x128xf32>
    %104 = arith.addf %74, %103 : vector<16x128xf32>
    %105 = vector.extract_strided_slice %28 {offsets = [0, 64], sizes = [16, 32], strides = [1, 1]} : vector<16x128xf32> to vector<16x32xf32>
    %106 = arith.truncf %105 : vector<16x32xf32> to vector<16x32xbf16>
    %107 = vector.shape_cast %106 : vector<16x32xbf16> to vector<2x8x32xbf16>
    %108 = vector.extract_strided_slice %35 {offsets = [0, 64], sizes = [16, 32], strides = [1, 1]} : vector<16x128xf32> to vector<16x32xf32>
    %109 = arith.truncf %108 : vector<16x32xf32> to vector<16x32xbf16>
    %110 = vector.shape_cast %109 : vector<16x32xbf16> to vector<2x8x32xbf16>
    %111 = vector.extract_strided_slice %36 {offsets = [0, 64], sizes = [16, 32], strides = [1, 1]} : vector<16x128xf32> to vector<16x32xf32>
    %112 = arith.truncf %111 : vector<16x32xf32> to vector<16x32xbf16>
    %113 = vector.shape_cast %112 : vector<16x32xbf16> to vector<2x8x32xbf16>
    "tpu.trace_start"() <{level = 10 : i32, message = "bqd,bkd->bqk"}> : () -> ()
    %cst_40 = arith.constant dense<0.000000e+00> : vector<2x8x8xf32>
    %114 = tpu.matmul %107, %110, %cst_40 {dimension_numbers = #tpu.dot_dimension_numbers<[2], [2], [1], [1], [0, 0, 0, 1, 1, 1], [0], [0]>} : vector<2x8x32xbf16>, vector<2x8x32xbf16>, vector<2x8x8xf32> -> vector<2x8x8xf32>
    "tpu.trace_stop"() : () -> ()
    %cst_41 = arith.constant 0.176776692 : f32
    %115 = vector.broadcast %cst_41 : f32 to vector<2x8x8xf32>
    %116 = arith.mulf %114, %115 : vector<2x8x8xf32>
    %117 = vector.broadcast %43 : vector<2x1x8xf32> to vector<2x8x8xf32>
    %118 = arith.addf %116, %117 : vector<2x8x8xf32>
    %cst_42 = arith.constant dense<0xFF800000> : vector<2x8xf32>
    %119 = vector.multi_reduction <maximumf>, %118, %cst_42 [2] : vector<2x8x8xf32> to vector<2x8xf32>
    %120 = vector.shape_cast %119 : vector<2x8xf32> to vector<2x8x1xf32>
    %121 = vector.broadcast %120 : vector<2x8x1xf32> to vector<2x8x8xf32>
    %122 = arith.subf %118, %121 : vector<2x8x8xf32>
    %123 = math.exp %122 : vector<2x8x8xf32>
    %cst_43 = arith.constant dense<0.000000e+00> : vector<2x8xf32>
    %124 = vector.multi_reduction <add>, %123, %cst_43 [2] : vector<2x8x8xf32> to vector<2x8xf32>
    %125 = vector.shape_cast %124 : vector<2x8xf32> to vector<2x8x1xf32>
    %126 = vector.broadcast %125 : vector<2x8x1xf32> to vector<2x8x8xf32>
    %127 = arith.divf %123, %126 : vector<2x8x8xf32>
    %128 = arith.truncf %127 : vector<2x8x8xf32> to vector<2x8x8xbf16>
    "tpu.trace_start"() <{level = 10 : i32, message = "bqk,bkd->bqd"}> : () -> ()
    %cst_44 = arith.constant dense<0.000000e+00> : vector<2x8x32xf32>
    %129 = tpu.matmul %128, %113, %cst_44 {dimension_numbers = #tpu.dot_dimension_numbers<[2], [1], [1], [2], [0, 0, 0, 1, 1, 2], [0], [0]>} : vector<2x8x8xbf16>, vector<2x8x32xbf16>, vector<2x8x32xf32> -> vector<2x8x32xf32>
    "tpu.trace_stop"() : () -> ()
    %130 = vector.shape_cast %129 : vector<2x8x32xf32> to vector<16x32xf32>
    %131 = arith.truncf %130 : vector<16x32xf32> to vector<16x32xbf16>
    %c64 = arith.constant 64 : index
    %c0_45 = arith.constant 0 : index
    %132 = vector.load %arg8[%c64, %c0_45] : memref<128x128xbf16, #tpu.memory_space<vmem>>, vector<32x128xbf16>
    %cst_46 = arith.constant dense<0.000000e+00> : vector<16x128xf32>
    %133 = tpu.matmul %131, %132, %cst_46 {dimension_numbers = #tpu.dot_dimension_numbers<[1], [0], [0], [1], [0, 0, 1, 1], [], []>} : vector<16x32xbf16>, vector<32x128xbf16>, vector<16x128xf32> -> vector<16x128xf32>
    %134 = arith.addf %104, %133 : vector<16x128xf32>
    %135 = vector.extract_strided_slice %28 {offsets = [0, 96], sizes = [16, 32], strides = [1, 1]} : vector<16x128xf32> to vector<16x32xf32>
    %136 = arith.truncf %135 : vector<16x32xf32> to vector<16x32xbf16>
    %137 = vector.shape_cast %136 : vector<16x32xbf16> to vector<2x8x32xbf16>
    %138 = vector.extract_strided_slice %35 {offsets = [0, 96], sizes = [16, 32], strides = [1, 1]} : vector<16x128xf32> to vector<16x32xf32>
    %139 = arith.truncf %138 : vector<16x32xf32> to vector<16x32xbf16>
    %140 = vector.shape_cast %139 : vector<16x32xbf16> to vector<2x8x32xbf16>
    %141 = vector.extract_strided_slice %36 {offsets = [0, 96], sizes = [16, 32], strides = [1, 1]} : vector<16x128xf32> to vector<16x32xf32>
    %142 = arith.truncf %141 : vector<16x32xf32> to vector<16x32xbf16>
    %143 = vector.shape_cast %142 : vector<16x32xbf16> to vector<2x8x32xbf16>
    "tpu.trace_start"() <{level = 10 : i32, message = "bqd,bkd->bqk"}> : () -> ()
    %cst_47 = arith.constant dense<0.000000e+00> : vector<2x8x8xf32>
    %144 = tpu.matmul %137, %140, %cst_47 {dimension_numbers = #tpu.dot_dimension_numbers<[2], [2], [1], [1], [0, 0, 0, 1, 1, 1], [0], [0]>} : vector<2x8x32xbf16>, vector<2x8x32xbf16>, vector<2x8x8xf32> -> vector<2x8x8xf32>
    "tpu.trace_stop"() : () -> ()
    %cst_48 = arith.constant 0.176776692 : f32
    %145 = vector.broadcast %cst_48 : f32 to vector<2x8x8xf32>
    %146 = arith.mulf %144, %145 : vector<2x8x8xf32>
    %147 = vector.broadcast %43 : vector<2x1x8xf32> to vector<2x8x8xf32>
    %148 = arith.addf %146, %147 : vector<2x8x8xf32>
    %cst_49 = arith.constant dense<0xFF800000> : vector<2x8xf32>
    %149 = vector.multi_reduction <maximumf>, %148, %cst_49 [2] : vector<2x8x8xf32> to vector<2x8xf32>
    %150 = vector.shape_cast %149 : vector<2x8xf32> to vector<2x8x1xf32>
    %151 = vector.broadcast %150 : vector<2x8x1xf32> to vector<2x8x8xf32>
    %152 = arith.subf %148, %151 : vector<2x8x8xf32>
    %153 = math.exp %152 : vector<2x8x8xf32>
    %cst_50 = arith.constant dense<0.000000e+00> : vector<2x8xf32>
    %154 = vector.multi_reduction <add>, %153, %cst_50 [2] : vector<2x8x8xf32> to vector<2x8xf32>
    %155 = vector.shape_cast %154 : vector<2x8xf32> to vector<2x8x1xf32>
    %156 = vector.broadcast %155 : vector<2x8x1xf32> to vector<2x8x8xf32>
    %157 = arith.divf %153, %156 : vector<2x8x8xf32>
    %158 = arith.truncf %157 : vector<2x8x8xf32> to vector<2x8x8xbf16>
    "tpu.trace_start"() <{level = 10 : i32, message = "bqk,bkd->bqd"}> : () -> ()
    %cst_51 = arith.constant dense<0.000000e+00> : vector<2x8x32xf32>
    %159 = tpu.matmul %158, %143, %cst_51 {dimension_numbers = #tpu.dot_dimension_numbers<[2], [1], [1], [2], [0, 0, 0, 1, 1, 2], [0], [0]>} : vector<2x8x8xbf16>, vector<2x8x32xbf16>, vector<2x8x32xf32> -> vector<2x8x32xf32>
    "tpu.trace_stop"() : () -> ()
    %160 = vector.shape_cast %159 : vector<2x8x32xf32> to vector<16x32xf32>
    %161 = arith.truncf %160 : vector<16x32xf32> to vector<16x32xbf16>
    %c96 = arith.constant 96 : index
    %c0_52 = arith.constant 0 : index
    %162 = vector.load %arg8[%c96, %c0_52] : memref<128x128xbf16, #tpu.memory_space<vmem>>, vector<32x128xbf16>
    %cst_53 = arith.constant dense<0.000000e+00> : vector<16x128xf32>
    %163 = tpu.matmul %161, %162, %cst_53 {dimension_numbers = #tpu.dot_dimension_numbers<[1], [0], [0], [1], [0, 0, 1, 1], [], []>} : vector<16x32xbf16>, vector<32x128xbf16>, vector<16x128xf32> -> vector<16x128xf32>
    %164 = arith.addf %134, %163 : vector<16x128xf32>
    %165 = arith.addf %22, %164 : vector<16x128xf32>
    %c0_54 = arith.constant 0 : index
    %c0_55 = arith.constant 0 : index
    %166 = vector.load %arg9[%c0_54, %c0_55] : memref<1x128xf32, #tpu.memory_space<vmem>>, vector<1x128xf32>
    %167 = vector.broadcast %166 : vector<1x128xf32> to vector<16x128xf32>
    %168 = arith.addf %165, %167 : vector<16x128xf32>
    %c0_56 = arith.constant 0 : index
    %c0_57 = arith.constant 0 : index
    %169 = vector.load %arg10[%c0_56, %c0_57] : memref<1x128xf32, #tpu.memory_space<vmem>>, vector<1x128xf32>
    %c0_58 = arith.constant 0 : index
    %c0_59 = arith.constant 0 : index
    %170 = vector.load %arg11[%c0_58, %c0_59] : memref<1x128xf32, #tpu.memory_space<vmem>>, vector<1x128xf32>
    %cst_60 = arith.constant dense<0.000000e+00> : vector<16xf32>
    %171 = vector.multi_reduction <add>, %168, %cst_60 [1] : vector<16x128xf32> to vector<16xf32>
    %172 = vector.shape_cast %171 : vector<16xf32> to vector<16x1xf32>
    %cst_61 = arith.constant 1.280000e+02 : f32
    %173 = vector.broadcast %cst_61 : f32 to vector<16x1xf32>
    %174 = arith.divf %172, %173 : vector<16x1xf32>
    %175 = vector.broadcast %174 : vector<16x1xf32> to vector<16x128xf32>
    %176 = arith.subf %168, %175 : vector<16x128xf32>
    %177 = arith.mulf %176, %176 : vector<16x128xf32>
    %cst_62 = arith.constant dense<0.000000e+00> : vector<16xf32>
    %178 = vector.multi_reduction <add>, %177, %cst_62 [1] : vector<16x128xf32> to vector<16xf32>
    %179 = vector.shape_cast %178 : vector<16xf32> to vector<16x1xf32>
    %cst_63 = arith.constant 1.280000e+02 : f32
    %180 = vector.broadcast %cst_63 : f32 to vector<16x1xf32>
    %181 = arith.divf %179, %180 : vector<16x1xf32>
    %cst_64 = arith.constant 9.99999996E-13 : f32
    %182 = vector.broadcast %cst_64 : f32 to vector<16x1xf32>
    %183 = arith.addf %181, %182 : vector<16x1xf32>
    %184 = math.rsqrt %183 : vector<16x1xf32>
    %185 = vector.broadcast %184 : vector<16x1xf32> to vector<16x128xf32>
    %186 = arith.mulf %176, %185 : vector<16x128xf32>
    %187 = vector.broadcast %169 : vector<1x128xf32> to vector<16x128xf32>
    %188 = arith.mulf %186, %187 : vector<16x128xf32>
    %189 = vector.broadcast %170 : vector<1x128xf32> to vector<16x128xf32>
    %190 = arith.addf %188, %189 : vector<16x128xf32>
    %191 = arith.truncf %190 : vector<16x128xf32> to vector<16x128xbf16>
    %c0_65 = arith.constant 0 : index
    %c0_66 = arith.constant 0 : index
    %192 = vector.load %arg12[%c0_65, %c0_66] : memref<128x512xbf16, #tpu.memory_space<vmem>>, vector<128x512xbf16>
    %cst_67 = arith.constant dense<0.000000e+00> : vector<16x512xf32>
    %193 = tpu.matmul %191, %192, %cst_67 {dimension_numbers = #tpu.dot_dimension_numbers<[1], [0], [0], [1], [0, 0, 1, 1], [], []>} : vector<16x128xbf16>, vector<128x512xbf16>, vector<16x512xf32> -> vector<16x512xf32>
    %c0_68 = arith.constant 0 : index
    %c0_69 = arith.constant 0 : index
    %194 = vector.load %arg13[%c0_68, %c0_69] : memref<1x512xf32, #tpu.memory_space<vmem>>, vector<1x512xf32>
    %195 = vector.broadcast %194 : vector<1x512xf32> to vector<16x512xf32>
    %196 = arith.addf %193, %195 : vector<16x512xf32>
    %cst_70 = arith.constant 5.000000e-01 : f32
    %197 = vector.broadcast %cst_70 : f32 to vector<16x512xf32>
    %198 = arith.mulf %197, %196 : vector<16x512xf32>
    %cst_71 = arith.constant 4.471500e-02 : f32
    %199 = vector.broadcast %cst_71 : f32 to vector<16x512xf32>
    %200 = arith.mulf %199, %196 : vector<16x512xf32>
    %201 = arith.mulf %200, %196 : vector<16x512xf32>
    %202 = arith.mulf %201, %196 : vector<16x512xf32>
    %203 = arith.addf %196, %202 : vector<16x512xf32>
    %cst_72 = arith.constant 0.797884583 : f32
    %204 = vector.broadcast %cst_72 : f32 to vector<16x512xf32>
    %205 = arith.mulf %204, %203 : vector<16x512xf32>
    %206 = math.tanh %205 : vector<16x512xf32>
    %cst_73 = arith.constant 1.000000e+00 : f32
    %207 = vector.broadcast %cst_73 : f32 to vector<16x512xf32>
    %208 = arith.addf %207, %206 : vector<16x512xf32>
    %209 = arith.mulf %198, %208 : vector<16x512xf32>
    %210 = arith.truncf %209 : vector<16x512xf32> to vector<16x512xbf16>
    %c0_74 = arith.constant 0 : index
    %c0_75 = arith.constant 0 : index
    %211 = vector.load %arg14[%c0_74, %c0_75] : memref<512x128xbf16, #tpu.memory_space<vmem>>, vector<512x128xbf16>
    %cst_76 = arith.constant dense<0.000000e+00> : vector<16x128xf32>
    %212 = tpu.matmul %210, %211, %cst_76 {dimension_numbers = #tpu.dot_dimension_numbers<[1], [0], [0], [1], [0, 0, 1, 1], [], []>} : vector<16x512xbf16>, vector<512x128xbf16>, vector<16x128xf32> -> vector<16x128xf32>
    %c0_77 = arith.constant 0 : index
    %c0_78 = arith.constant 0 : index
    %213 = vector.load %arg15[%c0_77, %c0_78] : memref<1x128xf32, #tpu.memory_space<vmem>>, vector<1x128xf32>
    %214 = vector.broadcast %213 : vector<1x128xf32> to vector<16x128xf32>
    %215 = arith.addf %212, %214 : vector<16x128xf32>
    %216 = arith.addf %190, %215 : vector<16x128xf32>
    %c0_79 = arith.constant 0 : index
    %c0_80 = arith.constant 0 : index
    %217 = vector.load %arg16[%c0_79, %c0_80] : memref<1x128xf32, #tpu.memory_space<vmem>>, vector<1x128xf32>
    %c0_81 = arith.constant 0 : index
    %c0_82 = arith.constant 0 : index
    %218 = vector.load %arg17[%c0_81, %c0_82] : memref<1x128xf32, #tpu.memory_space<vmem>>, vector<1x128xf32>
    %cst_83 = arith.constant dense<0.000000e+00> : vector<16xf32>
    %219 = vector.multi_reduction <add>, %216, %cst_83 [1] : vector<16x128xf32> to vector<16xf32>
    %220 = vector.shape_cast %219 : vector<16xf32> to vector<16x1xf32>
    %cst_84 = arith.constant 1.280000e+02 : f32
    %221 = vector.broadcast %cst_84 : f32 to vector<16x1xf32>
    %222 = arith.divf %220, %221 : vector<16x1xf32>
    %223 = vector.broadcast %222 : vector<16x1xf32> to vector<16x128xf32>
    %224 = arith.subf %216, %223 : vector<16x128xf32>
    %225 = arith.mulf %224, %224 : vector<16x128xf32>
    %cst_85 = arith.constant dense<0.000000e+00> : vector<16xf32>
    %226 = vector.multi_reduction <add>, %225, %cst_85 [1] : vector<16x128xf32> to vector<16xf32>
    %227 = vector.shape_cast %226 : vector<16xf32> to vector<16x1xf32>
    %cst_86 = arith.constant 1.280000e+02 : f32
    %228 = vector.broadcast %cst_86 : f32 to vector<16x1xf32>
    %229 = arith.divf %227, %228 : vector<16x1xf32>
    %cst_87 = arith.constant 9.99999996E-13 : f32
    %230 = vector.broadcast %cst_87 : f32 to vector<16x1xf32>
    %231 = arith.addf %229, %230 : vector<16x1xf32>
    %232 = math.rsqrt %231 : vector<16x1xf32>
    %233 = vector.broadcast %232 : vector<16x1xf32> to vector<16x128xf32>
    %234 = arith.mulf %224, %233 : vector<16x128xf32>
    %235 = vector.broadcast %217 : vector<1x128xf32> to vector<16x128xf32>
    %236 = arith.mulf %234, %235 : vector<16x128xf32>
    %237 = vector.broadcast %218 : vector<1x128xf32> to vector<16x128xf32>
    %238 = arith.addf %236, %237 : vector<16x128xf32>
    %239 = arith.truncf %238 : vector<16x128xf32> to vector<16x128xbf16>
    %c0_88 = arith.constant 0 : index
    %c0_89 = arith.constant 0 : index
    %240 = vector.load %arg18[%c0_88, %c0_89] : memref<128x256xbf16, #tpu.memory_space<vmem>>, vector<128x256xbf16>
    %cst_90 = arith.constant dense<0.000000e+00> : vector<16x256xf32>
    %241 = tpu.matmul %239, %240, %cst_90 {dimension_numbers = #tpu.dot_dimension_numbers<[1], [0], [0], [1], [0, 0, 1, 1], [], []>} : vector<16x128xbf16>, vector<128x256xbf16>, vector<16x256xf32> -> vector<16x256xf32>
    %c0_91 = arith.constant 0 : index
    %c0_92 = arith.constant 0 : index
    %242 = vector.load %arg19[%c0_91, %c0_92] : memref<1x256xf32, #tpu.memory_space<vmem>>, vector<1x256xf32>
    %243 = vector.broadcast %242 : vector<1x256xf32> to vector<16x256xf32>
    %244 = arith.addf %241, %243 : vector<16x256xf32>
    %c0_93 = arith.constant 0 : index
    %c0_94 = arith.constant 0 : index
    %245 = vector.load %arg20[%c0_93, %c0_94] : memref<16x256xf32, #tpu.memory_space<vmem>>, vector<16x256xf32>
    tpu.vector_store %arg20[%c0_93, %c0_94], %244 {strides = array<i32>} : memref<16x256xf32, #tpu.memory_space<vmem>>, vector<16x256xf32>,
    return
  }
}

module attributes {stable_mosaic.version = 11 : i64} {
  func.func @kernel(%arg0: i32, %arg1: memref<4x2x8x32xbf16, #tpu.memory_space<vmem>>, %arg2: memref<4x2x8x32xbf16, #tpu.memory_space<vmem>>, %arg3: memref<2x1x8xf32, #tpu.memory_space<vmem>>, %arg4: memref<128x128xbf16, #tpu.memory_space<vmem>>, %arg5: memref<8x128xbf16, #tpu.memory_space<vmem>>, %arg6: memref<1x128xf32, #tpu.memory_space<vmem>>, %arg7: memref<1x128xf32, #tpu.memory_space<vmem>>, %arg8: memref<1x128xf32, #tpu.memory_space<vmem>>, %arg9: memref<128x128xbf16, #tpu.memory_space<vmem>>, %arg10: memref<1x128xf32, #tpu.memory_space<vmem>>, %arg11: memref<128x256xbf16, #tpu.memory_space<vmem>>, %arg12: memref<1x256xf32, #tpu.memory_space<vmem>>, %arg13: memref<128x128xbf16, #tpu.memory_space<vmem>>, %arg14: memref<1x128xf32, #tpu.memory_space<vmem>>, %arg15: memref<1x128xf32, #tpu.memory_space<vmem>>, %arg16: memref<1x128xf32, #tpu.memory_space<vmem>>, %arg17: memref<128x128xbf16, #tpu.memory_space<vmem>>, %arg18: memref<1x128xf32, #tpu.memory_space<vmem>>, %arg19: memref<128x128xbf16, #tpu.memory_space<vmem>>, %arg20: memref<1x128xf32, #tpu.memory_space<vmem>>, %arg21: memref<1x128xf32, #tpu.memory_space<vmem>>, %arg22: memref<1x128xf32, #tpu.memory_space<vmem>>, %arg23: memref<128x512xbf16, #tpu.memory_space<vmem>>, %arg24: memref<1x512xf32, #tpu.memory_space<vmem>>, %arg25: memref<512x128xbf16, #tpu.memory_space<vmem>>, %arg26: memref<1x128xf32, #tpu.memory_space<vmem>>, %arg27: memref<1x128xf32, #tpu.memory_space<vmem>>, %arg28: memref<1x128xf32, #tpu.memory_space<vmem>>, %arg29: memref<128x128xbf16, #tpu.memory_space<vmem>>, %arg30: memref<1x128xf32, #tpu.memory_space<vmem>>, %arg31: memref<1x128xf32, #tpu.memory_space<vmem>>, %arg32: memref<1x128xf32, #tpu.memory_space<vmem>>, %arg33: memref<128x128xbf16, #tpu.memory_space<vmem>>, %arg34: memref<1x128xf32, #tpu.memory_space<vmem>>, %arg35: memref<2x8xi32, #tpu.memory_space<vmem>>, %arg36: memref<4x2x8x32xbf16, #tpu.memory_space<vmem>>, %arg37: memref<4x2x8x32xbf16, #tpu.memory_space<vmem>>, %arg38: memref<2x8xi32, #tpu.memory_space<vmem>>, %arg39: memref<2x1xi32, #tpu.memory_space<vmem>>) attributes {dimension_semantics = [#tpu.dimension_semantics<arbitrary>], iteration_bounds = array<i64: 7>, scalar_prefetch = 0 : i64, scratch_operands = 4 : i64, tpu.core_type = #tpu.core_type<tc>, window_params = [{pipeline_mode = #tpu.pipeline_mode<synchronous>, transform_indices = @transform_0, window_bounds = array<i64: 4, 2, 8, 32>}, {pipeline_mode = #tpu.pipeline_mode<synchronous>, transform_indices = @transform_1, window_bounds = array<i64: 4, 2, 8, 32>}, {pipeline_mode = #tpu.pipeline_mode<synchronous>, transform_indices = @transform_2, window_bounds = array<i64: 2, 1, 8>}, {pipeline_mode = #tpu.pipeline_mode<synchronous>, transform_indices = @transform_3, window_bounds = array<i64: 128, 128>}, {pipeline_mode = #tpu.pipeline_mode<synchronous>, transform_indices = @transform_4, window_bounds = array<i64: 8, 128>}, {pipeline_mode = #tpu.pipeline_mode<synchronous>, transform_indices = @transform_5, window_bounds = array<i64: 1, 128>}, {pipeline_mode = #tpu.pipeline_mode<synchronous>, transform_indices = @transform_6, window_bounds = array<i64: 1, 128>}, {pipeline_mode = #tpu.pipeline_mode<synchronous>, transform_indices = @transform_7, window_bounds = array<i64: 1, 128>}, {pipeline_mode = #tpu.pipeline_mode<synchronous>, transform_indices = @transform_8, window_bounds = array<i64: 128, 128>}, {pipeline_mode = #tpu.pipeline_mode<synchronous>, transform_indices = @transform_9, window_bounds = array<i64: 1, 128>}, {pipeline_mode = #tpu.pipeline_mode<synchronous>, transform_indices = @transform_10, window_bounds = array<i64: 128, 256>}, {pipeline_mode = #tpu.pipeline_mode<synchronous>, transform_indices = @transform_11, window_bounds = array<i64: 1, 256>}, {pipeline_mode = #tpu.pipeline_mode<synchronous>, transform_indices = @transform_12, window_bounds = array<i64: 128, 128>}, {pipeline_mode = #tpu.pipeline_mode<synchronous>, transform_indices = @transform_13, window_bounds = array<i64: 1, 128>}, {pipeline_mode = #tpu.pipeline_mode<synchronous>, transform_indices = @transform_14, window_bounds = array<i64: 1, 128>}, {pipeline_mode = #tpu.pipeline_mode<synchronous>, transform_indices = @transform_15, window_bounds = array<i64: 1, 128>}, {pipeline_mode = #tpu.pipeline_mode<synchronous>, transform_indices = @transform_16, window_bounds = array<i64: 128, 128>}, {pipeline_mode = #tpu.pipeline_mode<synchronous>, transform_indices = @transform_17, window_bounds = array<i64: 1, 128>}, {pipeline_mode = #tpu.pipeline_mode<synchronous>, transform_indices = @transform_18, window_bounds = array<i64: 128, 128>}, {pipeline_mode = #tpu.pipeline_mode<synchronous>, transform_indices = @transform_19, window_bounds = array<i64: 1, 128>}, {pipeline_mode = #tpu.pipeline_mode<synchronous>, transform_indices = @transform_20, window_bounds = array<i64: 1, 128>}, {pipeline_mode = #tpu.pipeline_mode<synchronous>, transform_indices = @transform_21, window_bounds = array<i64: 1, 128>}, {pipeline_mode = #tpu.pipeline_mode<synchronous>, transform_indices = @transform_22, window_bounds = array<i64: 128, 512>}, {pipeline_mode = #tpu.pipeline_mode<synchronous>, transform_indices = @transform_23, window_bounds = array<i64: 1, 512>}, {pipeline_mode = #tpu.pipeline_mode<synchronous>, transform_indices = @transform_24, window_bounds = array<i64: 512, 128>}, {pipeline_mode = #tpu.pipeline_mode<synchronous>, transform_indices = @transform_25, window_bounds = array<i64: 1, 128>}, {pipeline_mode = #tpu.pipeline_mode<synchronous>, transform_indices = @transform_26, window_bounds = array<i64: 1, 128>}, {pipeline_mode = #tpu.pipeline_mode<synchronous>, transform_indices = @transform_27, window_bounds = array<i64: 1, 128>}, {pipeline_mode = #tpu.pipeline_mode<synchronous>, transform_indices = @transform_28, window_bounds = array<i64: 128, 128>}, {pipeline_mode = #tpu.pipeline_mode<synchronous>, transform_indices = @transform_29, window_bounds = array<i64: 1, 128>}, {pipeline_mode = #tpu.pipeline_mode<synchronous>, transform_indices = @transform_30, window_bounds = array<i64: 1, 128>}, {pipeline_mode = #tpu.pipeline_mode<synchronous>, transform_indices = @transform_31, window_bounds = array<i64: 1, 128>}, {pipeline_mode = #tpu.pipeline_mode<synchronous>, transform_indices = @transform_32, window_bounds = array<i64: 128, 128>}, {pipeline_mode = #tpu.pipeline_mode<synchronous>, transform_indices = @transform_33, window_bounds = array<i64: 1, 128>}, {pipeline_mode = #tpu.pipeline_mode<synchronous>, transform_indices = @transform_34, window_bounds = array<i64: 2, 8>}]} {
    %c0_i32 = arith.constant 0 : i32
    %0 = arith.cmpi eq, %arg0, %c0_i32 : i32
    %1 = arith.extui %0 : i1 to i32
    %c0_i32_0 = arith.constant 0 : i32
    %2 = arith.cmpi ne, %1, %c0_i32_0 : i32
    scf.if %2 {
      %c0_i32_316 = arith.constant 0 : i32
      %580 = vector.broadcast %c0_i32_316 : i32 to vector<2x8xi32>
      %c0_317 = arith.constant 0 : index
      %c0_318 = arith.constant 0 : index
      %581 = vector.load %arg38[%c0_317, %c0_318] : memref<2x8xi32, #tpu.memory_space<vmem>>, vector<2x8xi32>
      tpu.vector_store %arg38[%c0_317, %c0_318], %580 {strides = array<i32>} : memref<2x8xi32, #tpu.memory_space<vmem>>, vector<2x8xi32>,
      %c0_i32_319 = arith.constant 0 : i32
      %582 = vector.broadcast %c0_i32_319 : i32 to vector<2x1xi32>
      %c0_320 = arith.constant 0 : index
      %c0_321 = arith.constant 0 : index
      %583 = vector.load %arg39[%c0_320, %c0_321] : memref<2x1xi32, #tpu.memory_space<vmem>>, vector<2x1xi32>
      tpu.vector_store %arg39[%c0_320, %c0_321], %582 {strides = array<i32>} : memref<2x1xi32, #tpu.memory_space<vmem>>, vector<2x1xi32>,
      %cst_322 = arith.constant 0.000000e+00 : bf16
      %584 = vector.broadcast %cst_322 : bf16 to vector<4x2x8x32xbf16>
      %c0_323 = arith.constant 0 : index
      %c0_324 = arith.constant 0 : index
      %c0_325 = arith.constant 0 : index
      %c0_326 = arith.constant 0 : index
      %585 = vector.load %arg36[%c0_323, %c0_324, %c0_325, %c0_326] : memref<4x2x8x32xbf16, #tpu.memory_space<vmem>>, vector<4x2x8x32xbf16>
      tpu.vector_store %arg36[%c0_323, %c0_324, %c0_325, %c0_326], %584 {strides = array<i32>} : memref<4x2x8x32xbf16, #tpu.memory_space<vmem>>, vector<4x2x8x32xbf16>,
      %cst_327 = arith.constant 0.000000e+00 : bf16
      %586 = vector.broadcast %cst_327 : bf16 to vector<4x2x8x32xbf16>
      %c0_328 = arith.constant 0 : index
      %c0_329 = arith.constant 0 : index
      %c0_330 = arith.constant 0 : index
      %c0_331 = arith.constant 0 : index
      %587 = vector.load %arg37[%c0_328, %c0_329, %c0_330, %c0_331] : memref<4x2x8x32xbf16, #tpu.memory_space<vmem>>, vector<4x2x8x32xbf16>
      tpu.vector_store %arg37[%c0_328, %c0_329, %c0_330, %c0_331], %586 {strides = array<i32>} : memref<4x2x8x32xbf16, #tpu.memory_space<vmem>>, vector<4x2x8x32xbf16>,
    } else {
    }
    %3 = tpu.iota {dimensions = array<i32: 1>} : vector<2x128xi32>
    %c0 = arith.constant 0 : index
    %c0_1 = arith.constant 0 : index
    %4 = vector.load %arg39[%c0, %c0_1] : memref<2x1xi32, #tpu.memory_space<vmem>>, vector<2x1xi32>
    %5 = vector.broadcast %4 : vector<2x1xi32> to vector<2x128xi32>
    %6 = arith.cmpi eq, %3, %5 : vector<2x128xi32>
    %7 = arith.extui %6 : vector<2x128xi1> to vector<2x128xi32>
    %8 = arith.sitofp %7 : vector<2x128xi32> to vector<2x128xf32>
    %9 = arith.truncf %8 : vector<2x128xf32> to vector<2x128xbf16>
    %c0_2 = arith.constant 0 : index
    %c0_3 = arith.constant 0 : index
    %10 = vector.load %arg4[%c0_2, %c0_3] : memref<128x128xbf16, #tpu.memory_space<vmem>>, vector<128x128xbf16>
    %cst = arith.constant dense<0.000000e+00> : vector<2x128xf32>
    %11 = tpu.matmul %9, %10, %cst {dimension_numbers = #tpu.dot_dimension_numbers<[1], [0], [0], [1], [0, 0, 1, 1], [], []>} : vector<2x128xbf16>, vector<128x128xbf16>, vector<2x128xf32> -> vector<2x128xf32>
    %12 = tpu.iota {dimensions = array<i32: 1>} : vector<1x8xi32>
    %13 = vector.broadcast %arg0 : i32 to vector<1x8xi32>
    %14 = arith.cmpi eq, %12, %13 : vector<1x8xi32>
    %15 = arith.extui %14 : vector<1x8xi1> to vector<1x8xi32>
    %16 = arith.sitofp %15 : vector<1x8xi32> to vector<1x8xf32>
    %17 = arith.truncf %16 : vector<1x8xf32> to vector<1x8xbf16>
    %c0_4 = arith.constant 0 : index
    %c0_5 = arith.constant 0 : index
    %18 = vector.load %arg5[%c0_4, %c0_5] : memref<8x128xbf16, #tpu.memory_space<vmem>>, vector<8x128xbf16>
    %cst_6 = arith.constant dense<0.000000e+00> : vector<1x128xf32>
    %19 = tpu.matmul %17, %18, %cst_6 {dimension_numbers = #tpu.dot_dimension_numbers<[1], [0], [0], [1], [0, 0, 1, 1], [], []>} : vector<1x8xbf16>, vector<8x128xbf16>, vector<1x128xf32> -> vector<1x128xf32>
    %20 = vector.broadcast %19 : vector<1x128xf32> to vector<2x128xf32>
    %21 = arith.addf %11, %20 : vector<2x128xf32>
    %c0_7 = arith.constant 0 : index
    %c0_8 = arith.constant 0 : index
    %22 = vector.load %arg6[%c0_7, %c0_8] : memref<1x128xf32, #tpu.memory_space<vmem>>, vector<1x128xf32>
    %23 = vector.broadcast %22 : vector<1x128xf32> to vector<2x128xf32>
    %24 = arith.addf %21, %23 : vector<2x128xf32>
    %c0_9 = arith.constant 0 : index
    %c0_10 = arith.constant 0 : index
    %25 = vector.load %arg7[%c0_9, %c0_10] : memref<1x128xf32, #tpu.memory_space<vmem>>, vector<1x128xf32>
    %c0_11 = arith.constant 0 : index
    %c0_12 = arith.constant 0 : index
    %26 = vector.load %arg8[%c0_11, %c0_12] : memref<1x128xf32, #tpu.memory_space<vmem>>, vector<1x128xf32>
    %cst_13 = arith.constant dense<0.000000e+00> : vector<2xf32>
    %27 = vector.multi_reduction <add>, %24, %cst_13 [1] : vector<2x128xf32> to vector<2xf32>
    %28 = vector.shape_cast %27 : vector<2xf32> to vector<2x1xf32>
    %cst_14 = arith.constant 1.280000e+02 : f32
    %29 = vector.broadcast %cst_14 : f32 to vector<2x1xf32>
    %30 = arith.divf %28, %29 : vector<2x1xf32>
    %31 = vector.broadcast %30 : vector<2x1xf32> to vector<2x128xf32>
    %32 = arith.subf %24, %31 : vector<2x128xf32>
    %33 = arith.mulf %32, %32 : vector<2x128xf32>
    %cst_15 = arith.constant dense<0.000000e+00> : vector<2xf32>
    %34 = vector.multi_reduction <add>, %33, %cst_15 [1] : vector<2x128xf32> to vector<2xf32>
    %35 = vector.shape_cast %34 : vector<2xf32> to vector<2x1xf32>
    %cst_16 = arith.constant 1.280000e+02 : f32
    %36 = vector.broadcast %cst_16 : f32 to vector<2x1xf32>
    %37 = arith.divf %35, %36 : vector<2x1xf32>
    %cst_17 = arith.constant 9.99999996E-13 : f32
    %38 = vector.broadcast %cst_17 : f32 to vector<2x1xf32>
    %39 = arith.addf %37, %38 : vector<2x1xf32>
    %40 = math.rsqrt %39 : vector<2x1xf32>
    %41 = vector.broadcast %40 : vector<2x1xf32> to vector<2x128xf32>
    %42 = arith.mulf %32, %41 : vector<2x128xf32>
    %43 = vector.broadcast %25 : vector<1x128xf32> to vector<2x128xf32>
    %44 = arith.mulf %42, %43 : vector<2x128xf32>
    %45 = vector.broadcast %26 : vector<1x128xf32> to vector<2x128xf32>
    %46 = arith.addf %44, %45 : vector<2x128xf32>
    %47 = arith.truncf %46 : vector<2x128xf32> to vector<2x128xbf16>
    %c0_18 = arith.constant 0 : index
    %c0_19 = arith.constant 0 : index
    %48 = vector.load %arg9[%c0_18, %c0_19] : memref<128x128xbf16, #tpu.memory_space<vmem>>, vector<128x128xbf16>
    %cst_20 = arith.constant dense<0.000000e+00> : vector<2x128xf32>
    %49 = tpu.matmul %47, %48, %cst_20 {dimension_numbers = #tpu.dot_dimension_numbers<[1], [0], [0], [1], [0, 0, 1, 1], [], []>} : vector<2x128xbf16>, vector<128x128xbf16>, vector<2x128xf32> -> vector<2x128xf32>
    %c0_21 = arith.constant 0 : index
    %c0_22 = arith.constant 0 : index
    %50 = vector.load %arg10[%c0_21, %c0_22] : memref<1x128xf32, #tpu.memory_space<vmem>>, vector<1x128xf32>
    %51 = vector.broadcast %50 : vector<1x128xf32> to vector<2x128xf32>
    %52 = arith.addf %49, %51 : vector<2x128xf32>
    %53 = arith.truncf %46 : vector<2x128xf32> to vector<2x128xbf16>
    %c0_23 = arith.constant 0 : index
    %c0_24 = arith.constant 0 : index
    %54 = vector.load %arg11[%c0_23, %c0_24] : memref<128x256xbf16, #tpu.memory_space<vmem>>, vector<128x256xbf16>
    %cst_25 = arith.constant dense<0.000000e+00> : vector<2x256xf32>
    %55 = tpu.matmul %53, %54, %cst_25 {dimension_numbers = #tpu.dot_dimension_numbers<[1], [0], [0], [1], [0, 0, 1, 1], [], []>} : vector<2x128xbf16>, vector<128x256xbf16>, vector<2x256xf32> -> vector<2x256xf32>
    %c0_26 = arith.constant 0 : index
    %c0_27 = arith.constant 0 : index
    %56 = vector.load %arg12[%c0_26, %c0_27] : memref<1x256xf32, #tpu.memory_space<vmem>>, vector<1x256xf32>
    %57 = vector.broadcast %56 : vector<1x256xf32> to vector<2x256xf32>
    %58 = arith.addf %55, %57 : vector<2x256xf32>
    %59 = vector.extract_strided_slice %58 {offsets = [0, 0], sizes = [2, 128], strides = [1, 1]} : vector<2x256xf32> to vector<2x128xf32>
    %60 = vector.extract_strided_slice %58 {offsets = [0, 128], sizes = [2, 128], strides = [1, 1]} : vector<2x256xf32> to vector<2x128xf32>
    %61 = tpu.iota {dimensions = array<i32: 1>} : vector<1x8x1xi32>
    %62 = vector.broadcast %arg0 : i32 to vector<1x8x1xi32>
    %63 = arith.cmpi eq, %61, %62 : vector<1x8x1xi32>
    %64 = tpu.iota {dimensions = array<i32: 2>} : vector<1x1x8xi32>
    %65 = vector.broadcast %arg0 : i32 to vector<1x1x8xi32>
    %66 = arith.cmpi sle, %64, %65 : vector<1x1x8xi32>
    %cst_28 = arith.constant 0.000000e+00 : f32
    %cst_29 = arith.constant -1.000000e+09 : f32
    %67 = vector.broadcast %cst_28 : f32 to vector<1x1x8xf32>
    %68 = vector.broadcast %cst_29 : f32 to vector<1x1x8xf32>
    %69 = arith.select %66, %67, %68 : vector<1x1x8xi1>, vector<1x1x8xf32>
    %cst_30 = arith.constant 0.000000e+00 : f32
    %70 = vector.broadcast %cst_30 : f32 to vector<2x128xf32>
    %71 = vector.extract_strided_slice %59 {offsets = [0, 0], sizes = [2, 32], strides = [1, 1]} : vector<2x128xf32> to vector<2x32xf32>
    %72 = arith.truncf %71 : vector<2x32xf32> to vector<2x32xbf16>
    %73 = vector.shape_cast %72 : vector<2x32xbf16> to vector<2x1x32xbf16>
    %c0_31 = arith.constant 0 : index
    %c0_32 = arith.constant 0 : index
    %c0_33 = arith.constant 0 : index
    %c0_34 = arith.constant 0 : index
    %74 = vector.load %arg36[%c0_31, %c0_32, %c0_33, %c0_34] : memref<4x2x8x32xbf16, #tpu.memory_space<vmem>>, vector<1x2x8x32xbf16>
    %75 = vector.shape_cast %74 : vector<1x2x8x32xbf16> to vector<2x8x32xbf16>
    %76 = vector.shape_cast %63 : vector<1x8x1xi1> to vector<1x8x1xi1>
    %77 = vector.broadcast %76 : vector<1x8x1xi1> to vector<2x8x32xi1>
    %78 = vector.shape_cast %73 : vector<2x1x32xbf16> to vector<2x1x32xbf16>
    %79 = vector.broadcast %78 : vector<2x1x32xbf16> to vector<2x8x32xbf16>
    %80 = arith.select %77, %79, %75 : vector<2x8x32xi1>, vector<2x8x32xbf16>
    %c0_35 = arith.constant 0 : index
    %c0_36 = arith.constant 0 : index
    %c0_37 = arith.constant 0 : index
    %c0_38 = arith.constant 0 : index
    %81 = vector.load %arg36[%c0_35, %c0_36, %c0_37, %c0_38] : memref<4x2x8x32xbf16, #tpu.memory_space<vmem>>, vector<1x2x8x32xbf16>
    %82 = vector.shape_cast %81 : vector<1x2x8x32xbf16> to vector<2x8x32xbf16>
    %83 = vector.shape_cast %80 : vector<2x8x32xbf16> to vector<1x2x8x32xbf16>
    tpu.vector_store %arg36[%c0_35, %c0_36, %c0_37, %c0_38], %83 {strides = array<i32>} : memref<4x2x8x32xbf16, #tpu.memory_space<vmem>>, vector<1x2x8x32xbf16>,
    %84 = vector.extract_strided_slice %60 {offsets = [0, 0], sizes = [2, 32], strides = [1, 1]} : vector<2x128xf32> to vector<2x32xf32>
    %85 = arith.truncf %84 : vector<2x32xf32> to vector<2x32xbf16>
    %86 = vector.shape_cast %85 : vector<2x32xbf16> to vector<2x1x32xbf16>
    %c0_39 = arith.constant 0 : index
    %c0_40 = arith.constant 0 : index
    %c0_41 = arith.constant 0 : index
    %c0_42 = arith.constant 0 : index
    %87 = vector.load %arg37[%c0_39, %c0_40, %c0_41, %c0_42] : memref<4x2x8x32xbf16, #tpu.memory_space<vmem>>, vector<1x2x8x32xbf16>
    %88 = vector.shape_cast %87 : vector<1x2x8x32xbf16> to vector<2x8x32xbf16>
    %89 = vector.shape_cast %63 : vector<1x8x1xi1> to vector<1x8x1xi1>
    %90 = vector.broadcast %89 : vector<1x8x1xi1> to vector<2x8x32xi1>
    %91 = vector.shape_cast %86 : vector<2x1x32xbf16> to vector<2x1x32xbf16>
    %92 = vector.broadcast %91 : vector<2x1x32xbf16> to vector<2x8x32xbf16>
    %93 = arith.select %90, %92, %88 : vector<2x8x32xi1>, vector<2x8x32xbf16>
    %c0_43 = arith.constant 0 : index
    %c0_44 = arith.constant 0 : index
    %c0_45 = arith.constant 0 : index
    %c0_46 = arith.constant 0 : index
    %94 = vector.load %arg37[%c0_43, %c0_44, %c0_45, %c0_46] : memref<4x2x8x32xbf16, #tpu.memory_space<vmem>>, vector<1x2x8x32xbf16>
    %95 = vector.shape_cast %94 : vector<1x2x8x32xbf16> to vector<2x8x32xbf16>
    %96 = vector.shape_cast %93 : vector<2x8x32xbf16> to vector<1x2x8x32xbf16>
    tpu.vector_store %arg37[%c0_43, %c0_44, %c0_45, %c0_46], %96 {strides = array<i32>} : memref<4x2x8x32xbf16, #tpu.memory_space<vmem>>, vector<1x2x8x32xbf16>,
    %97 = vector.extract_strided_slice %52 {offsets = [0, 0], sizes = [2, 32], strides = [1, 1]} : vector<2x128xf32> to vector<2x32xf32>
    %98 = arith.truncf %97 : vector<2x32xf32> to vector<2x32xbf16>
    %99 = vector.shape_cast %98 : vector<2x32xbf16> to vector<2x1x32xbf16>
    %c0_47 = arith.constant 0 : index
    %c0_48 = arith.constant 0 : index
    %c0_49 = arith.constant 0 : index
    %c0_50 = arith.constant 0 : index
    %100 = vector.load %arg36[%c0_47, %c0_48, %c0_49, %c0_50] : memref<4x2x8x32xbf16, #tpu.memory_space<vmem>>, vector<1x2x8x32xbf16>
    %101 = vector.shape_cast %100 : vector<1x2x8x32xbf16> to vector<2x8x32xbf16>
    "tpu.trace_start"() <{level = 10 : i32, message = "bqd,bkd->bqk"}> : () -> ()
    %cst_51 = arith.constant dense<0.000000e+00> : vector<2x1x8xf32>
    %102 = tpu.matmul %99, %101, %cst_51 {dimension_numbers = #tpu.dot_dimension_numbers<[2], [2], [1], [1], [0, 0, 0, 1, 1, 1], [0], [0]>} : vector<2x1x32xbf16>, vector<2x8x32xbf16>, vector<2x1x8xf32> -> vector<2x1x8xf32>
    "tpu.trace_stop"() : () -> ()
    %cst_52 = arith.constant 0.176776692 : f32
    %103 = vector.broadcast %cst_52 : f32 to vector<2x1x8xf32>
    %104 = arith.mulf %102, %103 : vector<2x1x8xf32>
    %105 = vector.broadcast %69 : vector<1x1x8xf32> to vector<2x1x8xf32>
    %106 = arith.addf %104, %105 : vector<2x1x8xf32>
    %cst_53 = arith.constant dense<0xFF800000> : vector<2x1xf32>
    %107 = vector.multi_reduction <maximumf>, %106, %cst_53 [2] : vector<2x1x8xf32> to vector<2x1xf32>
    %108 = vector.shape_cast %107 : vector<2x1xf32> to vector<2x1x1xf32>
    %109 = vector.broadcast %108 : vector<2x1x1xf32> to vector<2x1x8xf32>
    %110 = arith.subf %106, %109 : vector<2x1x8xf32>
    %111 = math.exp %110 : vector<2x1x8xf32>
    %cst_54 = arith.constant dense<0.000000e+00> : vector<2x1xf32>
    %112 = vector.multi_reduction <add>, %111, %cst_54 [2] : vector<2x1x8xf32> to vector<2x1xf32>
    %113 = vector.shape_cast %112 : vector<2x1xf32> to vector<2x1x1xf32>
    %114 = vector.broadcast %113 : vector<2x1x1xf32> to vector<2x1x8xf32>
    %115 = arith.divf %111, %114 : vector<2x1x8xf32>
    %116 = arith.truncf %115 : vector<2x1x8xf32> to vector<2x1x8xbf16>
    %c0_55 = arith.constant 0 : index
    %c0_56 = arith.constant 0 : index
    %c0_57 = arith.constant 0 : index
    %c0_58 = arith.constant 0 : index
    %117 = vector.load %arg37[%c0_55, %c0_56, %c0_57, %c0_58] : memref<4x2x8x32xbf16, #tpu.memory_space<vmem>>, vector<1x2x8x32xbf16>
    %118 = vector.shape_cast %117 : vector<1x2x8x32xbf16> to vector<2x8x32xbf16>
    "tpu.trace_start"() <{level = 10 : i32, message = "bqk,bkd->bqd"}> : () -> ()
    %cst_59 = arith.constant dense<0.000000e+00> : vector<2x1x32xf32>
    %119 = tpu.matmul %116, %118, %cst_59 {dimension_numbers = #tpu.dot_dimension_numbers<[2], [1], [1], [2], [0, 0, 0, 1, 1, 2], [0], [0]>} : vector<2x1x8xbf16>, vector<2x8x32xbf16>, vector<2x1x32xf32> -> vector<2x1x32xf32>
    "tpu.trace_stop"() : () -> ()
    %120 = vector.shape_cast %119 : vector<2x1x32xf32> to vector<2x32xf32>
    %121 = arith.truncf %120 : vector<2x32xf32> to vector<2x32xbf16>
    %c0_60 = arith.constant 0 : index
    %c0_61 = arith.constant 0 : index
    %122 = vector.load %arg13[%c0_60, %c0_61] : memref<128x128xbf16, #tpu.memory_space<vmem>>, vector<32x128xbf16>
    %cst_62 = arith.constant dense<0.000000e+00> : vector<2x128xf32>
    %123 = tpu.matmul %121, %122, %cst_62 {dimension_numbers = #tpu.dot_dimension_numbers<[1], [0], [0], [1], [0, 0, 1, 1], [], []>} : vector<2x32xbf16>, vector<32x128xbf16>, vector<2x128xf32> -> vector<2x128xf32>
    %124 = arith.addf %70, %123 : vector<2x128xf32>
    %125 = vector.extract_strided_slice %59 {offsets = [0, 32], sizes = [2, 32], strides = [1, 1]} : vector<2x128xf32> to vector<2x32xf32>
    %126 = arith.truncf %125 : vector<2x32xf32> to vector<2x32xbf16>
    %127 = vector.shape_cast %126 : vector<2x32xbf16> to vector<2x1x32xbf16>
    %c1 = arith.constant 1 : index
    %c0_63 = arith.constant 0 : index
    %c0_64 = arith.constant 0 : index
    %c0_65 = arith.constant 0 : index
    %128 = vector.load %arg36[%c1, %c0_63, %c0_64, %c0_65] : memref<4x2x8x32xbf16, #tpu.memory_space<vmem>>, vector<1x2x8x32xbf16>
    %129 = vector.shape_cast %128 : vector<1x2x8x32xbf16> to vector<2x8x32xbf16>
    %130 = vector.shape_cast %63 : vector<1x8x1xi1> to vector<1x8x1xi1>
    %131 = vector.broadcast %130 : vector<1x8x1xi1> to vector<2x8x32xi1>
    %132 = vector.shape_cast %127 : vector<2x1x32xbf16> to vector<2x1x32xbf16>
    %133 = vector.broadcast %132 : vector<2x1x32xbf16> to vector<2x8x32xbf16>
    %134 = arith.select %131, %133, %129 : vector<2x8x32xi1>, vector<2x8x32xbf16>
    %c1_66 = arith.constant 1 : index
    %c0_67 = arith.constant 0 : index
    %c0_68 = arith.constant 0 : index
    %c0_69 = arith.constant 0 : index
    %135 = vector.load %arg36[%c1_66, %c0_67, %c0_68, %c0_69] : memref<4x2x8x32xbf16, #tpu.memory_space<vmem>>, vector<1x2x8x32xbf16>
    %136 = vector.shape_cast %135 : vector<1x2x8x32xbf16> to vector<2x8x32xbf16>
    %137 = vector.shape_cast %134 : vector<2x8x32xbf16> to vector<1x2x8x32xbf16>
    tpu.vector_store %arg36[%c1_66, %c0_67, %c0_68, %c0_69], %137 {strides = array<i32>} : memref<4x2x8x32xbf16, #tpu.memory_space<vmem>>, vector<1x2x8x32xbf16>,
    %138 = vector.extract_strided_slice %60 {offsets = [0, 32], sizes = [2, 32], strides = [1, 1]} : vector<2x128xf32> to vector<2x32xf32>
    %139 = arith.truncf %138 : vector<2x32xf32> to vector<2x32xbf16>
    %140 = vector.shape_cast %139 : vector<2x32xbf16> to vector<2x1x32xbf16>
    %c1_70 = arith.constant 1 : index
    %c0_71 = arith.constant 0 : index
    %c0_72 = arith.constant 0 : index
    %c0_73 = arith.constant 0 : index
    %141 = vector.load %arg37[%c1_70, %c0_71, %c0_72, %c0_73] : memref<4x2x8x32xbf16, #tpu.memory_space<vmem>>, vector<1x2x8x32xbf16>
    %142 = vector.shape_cast %141 : vector<1x2x8x32xbf16> to vector<2x8x32xbf16>
    %143 = vector.shape_cast %63 : vector<1x8x1xi1> to vector<1x8x1xi1>
    %144 = vector.broadcast %143 : vector<1x8x1xi1> to vector<2x8x32xi1>
    %145 = vector.shape_cast %140 : vector<2x1x32xbf16> to vector<2x1x32xbf16>
    %146 = vector.broadcast %145 : vector<2x1x32xbf16> to vector<2x8x32xbf16>
    %147 = arith.select %144, %146, %142 : vector<2x8x32xi1>, vector<2x8x32xbf16>
    %c1_74 = arith.constant 1 : index
    %c0_75 = arith.constant 0 : index
    %c0_76 = arith.constant 0 : index
    %c0_77 = arith.constant 0 : index
    %148 = vector.load %arg37[%c1_74, %c0_75, %c0_76, %c0_77] : memref<4x2x8x32xbf16, #tpu.memory_space<vmem>>, vector<1x2x8x32xbf16>
    %149 = vector.shape_cast %148 : vector<1x2x8x32xbf16> to vector<2x8x32xbf16>
    %150 = vector.shape_cast %147 : vector<2x8x32xbf16> to vector<1x2x8x32xbf16>
    tpu.vector_store %arg37[%c1_74, %c0_75, %c0_76, %c0_77], %150 {strides = array<i32>} : memref<4x2x8x32xbf16, #tpu.memory_space<vmem>>, vector<1x2x8x32xbf16>,
    %151 = vector.extract_strided_slice %52 {offsets = [0, 32], sizes = [2, 32], strides = [1, 1]} : vector<2x128xf32> to vector<2x32xf32>
    %152 = arith.truncf %151 : vector<2x32xf32> to vector<2x32xbf16>
    %153 = vector.shape_cast %152 : vector<2x32xbf16> to vector<2x1x32xbf16>
    %c1_78 = arith.constant 1 : index
    %c0_79 = arith.constant 0 : index
    %c0_80 = arith.constant 0 : index
    %c0_81 = arith.constant 0 : index
    %154 = vector.load %arg36[%c1_78, %c0_79, %c0_80, %c0_81] : memref<4x2x8x32xbf16, #tpu.memory_space<vmem>>, vector<1x2x8x32xbf16>
    %155 = vector.shape_cast %154 : vector<1x2x8x32xbf16> to vector<2x8x32xbf16>
    "tpu.trace_start"() <{level = 10 : i32, message = "bqd,bkd->bqk"}> : () -> ()
    %cst_82 = arith.constant dense<0.000000e+00> : vector<2x1x8xf32>
    %156 = tpu.matmul %153, %155, %cst_82 {dimension_numbers = #tpu.dot_dimension_numbers<[2], [2], [1], [1], [0, 0, 0, 1, 1, 1], [0], [0]>} : vector<2x1x32xbf16>, vector<2x8x32xbf16>, vector<2x1x8xf32> -> vector<2x1x8xf32>
    "tpu.trace_stop"() : () -> ()
    %cst_83 = arith.constant 0.176776692 : f32
    %157 = vector.broadcast %cst_83 : f32 to vector<2x1x8xf32>
    %158 = arith.mulf %156, %157 : vector<2x1x8xf32>
    %159 = vector.broadcast %69 : vector<1x1x8xf32> to vector<2x1x8xf32>
    %160 = arith.addf %158, %159 : vector<2x1x8xf32>
    %cst_84 = arith.constant dense<0xFF800000> : vector<2x1xf32>
    %161 = vector.multi_reduction <maximumf>, %160, %cst_84 [2] : vector<2x1x8xf32> to vector<2x1xf32>
    %162 = vector.shape_cast %161 : vector<2x1xf32> to vector<2x1x1xf32>
    %163 = vector.broadcast %162 : vector<2x1x1xf32> to vector<2x1x8xf32>
    %164 = arith.subf %160, %163 : vector<2x1x8xf32>
    %165 = math.exp %164 : vector<2x1x8xf32>
    %cst_85 = arith.constant dense<0.000000e+00> : vector<2x1xf32>
    %166 = vector.multi_reduction <add>, %165, %cst_85 [2] : vector<2x1x8xf32> to vector<2x1xf32>
    %167 = vector.shape_cast %166 : vector<2x1xf32> to vector<2x1x1xf32>
    %168 = vector.broadcast %167 : vector<2x1x1xf32> to vector<2x1x8xf32>
    %169 = arith.divf %165, %168 : vector<2x1x8xf32>
    %170 = arith.truncf %169 : vector<2x1x8xf32> to vector<2x1x8xbf16>
    %c1_86 = arith.constant 1 : index
    %c0_87 = arith.constant 0 : index
    %c0_88 = arith.constant 0 : index
    %c0_89 = arith.constant 0 : index
    %171 = vector.load %arg37[%c1_86, %c0_87, %c0_88, %c0_89] : memref<4x2x8x32xbf16, #tpu.memory_space<vmem>>, vector<1x2x8x32xbf16>
    %172 = vector.shape_cast %171 : vector<1x2x8x32xbf16> to vector<2x8x32xbf16>
    "tpu.trace_start"() <{level = 10 : i32, message = "bqk,bkd->bqd"}> : () -> ()
    %cst_90 = arith.constant dense<0.000000e+00> : vector<2x1x32xf32>
    %173 = tpu.matmul %170, %172, %cst_90 {dimension_numbers = #tpu.dot_dimension_numbers<[2], [1], [1], [2], [0, 0, 0, 1, 1, 2], [0], [0]>} : vector<2x1x8xbf16>, vector<2x8x32xbf16>, vector<2x1x32xf32> -> vector<2x1x32xf32>
    "tpu.trace_stop"() : () -> ()
    %174 = vector.shape_cast %173 : vector<2x1x32xf32> to vector<2x32xf32>
    %175 = arith.truncf %174 : vector<2x32xf32> to vector<2x32xbf16>
    %c32 = arith.constant 32 : index
    %c0_91 = arith.constant 0 : index
    %176 = vector.load %arg13[%c32, %c0_91] : memref<128x128xbf16, #tpu.memory_space<vmem>>, vector<32x128xbf16>
    %cst_92 = arith.constant dense<0.000000e+00> : vector<2x128xf32>
    %177 = tpu.matmul %175, %176, %cst_92 {dimension_numbers = #tpu.dot_dimension_numbers<[1], [0], [0], [1], [0, 0, 1, 1], [], []>} : vector<2x32xbf16>, vector<32x128xbf16>, vector<2x128xf32> -> vector<2x128xf32>
    %178 = arith.addf %124, %177 : vector<2x128xf32>
    %179 = vector.extract_strided_slice %59 {offsets = [0, 64], sizes = [2, 32], strides = [1, 1]} : vector<2x128xf32> to vector<2x32xf32>
    %180 = arith.truncf %179 : vector<2x32xf32> to vector<2x32xbf16>
    %181 = vector.shape_cast %180 : vector<2x32xbf16> to vector<2x1x32xbf16>
    %c2 = arith.constant 2 : index
    %c0_93 = arith.constant 0 : index
    %c0_94 = arith.constant 0 : index
    %c0_95 = arith.constant 0 : index
    %182 = vector.load %arg36[%c2, %c0_93, %c0_94, %c0_95] : memref<4x2x8x32xbf16, #tpu.memory_space<vmem>>, vector<1x2x8x32xbf16>
    %183 = vector.shape_cast %182 : vector<1x2x8x32xbf16> to vector<2x8x32xbf16>
    %184 = vector.shape_cast %63 : vector<1x8x1xi1> to vector<1x8x1xi1>
    %185 = vector.broadcast %184 : vector<1x8x1xi1> to vector<2x8x32xi1>
    %186 = vector.shape_cast %181 : vector<2x1x32xbf16> to vector<2x1x32xbf16>
    %187 = vector.broadcast %186 : vector<2x1x32xbf16> to vector<2x8x32xbf16>
    %188 = arith.select %185, %187, %183 : vector<2x8x32xi1>, vector<2x8x32xbf16>
    %c2_96 = arith.constant 2 : index
    %c0_97 = arith.constant 0 : index
    %c0_98 = arith.constant 0 : index
    %c0_99 = arith.constant 0 : index
    %189 = vector.load %arg36[%c2_96, %c0_97, %c0_98, %c0_99] : memref<4x2x8x32xbf16, #tpu.memory_space<vmem>>, vector<1x2x8x32xbf16>
    %190 = vector.shape_cast %189 : vector<1x2x8x32xbf16> to vector<2x8x32xbf16>
    %191 = vector.shape_cast %188 : vector<2x8x32xbf16> to vector<1x2x8x32xbf16>
    tpu.vector_store %arg36[%c2_96, %c0_97, %c0_98, %c0_99], %191 {strides = array<i32>} : memref<4x2x8x32xbf16, #tpu.memory_space<vmem>>, vector<1x2x8x32xbf16>,
    %192 = vector.extract_strided_slice %60 {offsets = [0, 64], sizes = [2, 32], strides = [1, 1]} : vector<2x128xf32> to vector<2x32xf32>
    %193 = arith.truncf %192 : vector<2x32xf32> to vector<2x32xbf16>
    %194 = vector.shape_cast %193 : vector<2x32xbf16> to vector<2x1x32xbf16>
    %c2_100 = arith.constant 2 : index
    %c0_101 = arith.constant 0 : index
    %c0_102 = arith.constant 0 : index
    %c0_103 = arith.constant 0 : index
    %195 = vector.load %arg37[%c2_100, %c0_101, %c0_102, %c0_103] : memref<4x2x8x32xbf16, #tpu.memory_space<vmem>>, vector<1x2x8x32xbf16>
    %196 = vector.shape_cast %195 : vector<1x2x8x32xbf16> to vector<2x8x32xbf16>
    %197 = vector.shape_cast %63 : vector<1x8x1xi1> to vector<1x8x1xi1>
    %198 = vector.broadcast %197 : vector<1x8x1xi1> to vector<2x8x32xi1>
    %199 = vector.shape_cast %194 : vector<2x1x32xbf16> to vector<2x1x32xbf16>
    %200 = vector.broadcast %199 : vector<2x1x32xbf16> to vector<2x8x32xbf16>
    %201 = arith.select %198, %200, %196 : vector<2x8x32xi1>, vector<2x8x32xbf16>
    %c2_104 = arith.constant 2 : index
    %c0_105 = arith.constant 0 : index
    %c0_106 = arith.constant 0 : index
    %c0_107 = arith.constant 0 : index
    %202 = vector.load %arg37[%c2_104, %c0_105, %c0_106, %c0_107] : memref<4x2x8x32xbf16, #tpu.memory_space<vmem>>, vector<1x2x8x32xbf16>
    %203 = vector.shape_cast %202 : vector<1x2x8x32xbf16> to vector<2x8x32xbf16>
    %204 = vector.shape_cast %201 : vector<2x8x32xbf16> to vector<1x2x8x32xbf16>
    tpu.vector_store %arg37[%c2_104, %c0_105, %c0_106, %c0_107], %204 {strides = array<i32>} : memref<4x2x8x32xbf16, #tpu.memory_space<vmem>>, vector<1x2x8x32xbf16>,
    %205 = vector.extract_strided_slice %52 {offsets = [0, 64], sizes = [2, 32], strides = [1, 1]} : vector<2x128xf32> to vector<2x32xf32>
    %206 = arith.truncf %205 : vector<2x32xf32> to vector<2x32xbf16>
    %207 = vector.shape_cast %206 : vector<2x32xbf16> to vector<2x1x32xbf16>
    %c2_108 = arith.constant 2 : index
    %c0_109 = arith.constant 0 : index
    %c0_110 = arith.constant 0 : index
    %c0_111 = arith.constant 0 : index
    %208 = vector.load %arg36[%c2_108, %c0_109, %c0_110, %c0_111] : memref<4x2x8x32xbf16, #tpu.memory_space<vmem>>, vector<1x2x8x32xbf16>
    %209 = vector.shape_cast %208 : vector<1x2x8x32xbf16> to vector<2x8x32xbf16>
    "tpu.trace_start"() <{level = 10 : i32, message = "bqd,bkd->bqk"}> : () -> ()
    %cst_112 = arith.constant dense<0.000000e+00> : vector<2x1x8xf32>
    %210 = tpu.matmul %207, %209, %cst_112 {dimension_numbers = #tpu.dot_dimension_numbers<[2], [2], [1], [1], [0, 0, 0, 1, 1, 1], [0], [0]>} : vector<2x1x32xbf16>, vector<2x8x32xbf16>, vector<2x1x8xf32> -> vector<2x1x8xf32>
    "tpu.trace_stop"() : () -> ()
    %cst_113 = arith.constant 0.176776692 : f32
    %211 = vector.broadcast %cst_113 : f32 to vector<2x1x8xf32>
    %212 = arith.mulf %210, %211 : vector<2x1x8xf32>
    %213 = vector.broadcast %69 : vector<1x1x8xf32> to vector<2x1x8xf32>
    %214 = arith.addf %212, %213 : vector<2x1x8xf32>
    %cst_114 = arith.constant dense<0xFF800000> : vector<2x1xf32>
    %215 = vector.multi_reduction <maximumf>, %214, %cst_114 [2] : vector<2x1x8xf32> to vector<2x1xf32>
    %216 = vector.shape_cast %215 : vector<2x1xf32> to vector<2x1x1xf32>
    %217 = vector.broadcast %216 : vector<2x1x1xf32> to vector<2x1x8xf32>
    %218 = arith.subf %214, %217 : vector<2x1x8xf32>
    %219 = math.exp %218 : vector<2x1x8xf32>
    %cst_115 = arith.constant dense<0.000000e+00> : vector<2x1xf32>
    %220 = vector.multi_reduction <add>, %219, %cst_115 [2] : vector<2x1x8xf32> to vector<2x1xf32>
    %221 = vector.shape_cast %220 : vector<2x1xf32> to vector<2x1x1xf32>
    %222 = vector.broadcast %221 : vector<2x1x1xf32> to vector<2x1x8xf32>
    %223 = arith.divf %219, %222 : vector<2x1x8xf32>
    %224 = arith.truncf %223 : vector<2x1x8xf32> to vector<2x1x8xbf16>
    %c2_116 = arith.constant 2 : index
    %c0_117 = arith.constant 0 : index
    %c0_118 = arith.constant 0 : index
    %c0_119 = arith.constant 0 : index
    %225 = vector.load %arg37[%c2_116, %c0_117, %c0_118, %c0_119] : memref<4x2x8x32xbf16, #tpu.memory_space<vmem>>, vector<1x2x8x32xbf16>
    %226 = vector.shape_cast %225 : vector<1x2x8x32xbf16> to vector<2x8x32xbf16>
    "tpu.trace_start"() <{level = 10 : i32, message = "bqk,bkd->bqd"}> : () -> ()
    %cst_120 = arith.constant dense<0.000000e+00> : vector<2x1x32xf32>
    %227 = tpu.matmul %224, %226, %cst_120 {dimension_numbers = #tpu.dot_dimension_numbers<[2], [1], [1], [2], [0, 0, 0, 1, 1, 2], [0], [0]>} : vector<2x1x8xbf16>, vector<2x8x32xbf16>, vector<2x1x32xf32> -> vector<2x1x32xf32>
    "tpu.trace_stop"() : () -> ()
    %228 = vector.shape_cast %227 : vector<2x1x32xf32> to vector<2x32xf32>
    %229 = arith.truncf %228 : vector<2x32xf32> to vector<2x32xbf16>
    %c64 = arith.constant 64 : index
    %c0_121 = arith.constant 0 : index
    %230 = vector.load %arg13[%c64, %c0_121] : memref<128x128xbf16, #tpu.memory_space<vmem>>, vector<32x128xbf16>
    %cst_122 = arith.constant dense<0.000000e+00> : vector<2x128xf32>
    %231 = tpu.matmul %229, %230, %cst_122 {dimension_numbers = #tpu.dot_dimension_numbers<[1], [0], [0], [1], [0, 0, 1, 1], [], []>} : vector<2x32xbf16>, vector<32x128xbf16>, vector<2x128xf32> -> vector<2x128xf32>
    %232 = arith.addf %178, %231 : vector<2x128xf32>
    %233 = vector.extract_strided_slice %59 {offsets = [0, 96], sizes = [2, 32], strides = [1, 1]} : vector<2x128xf32> to vector<2x32xf32>
    %234 = arith.truncf %233 : vector<2x32xf32> to vector<2x32xbf16>
    %235 = vector.shape_cast %234 : vector<2x32xbf16> to vector<2x1x32xbf16>
    %c3 = arith.constant 3 : index
    %c0_123 = arith.constant 0 : index
    %c0_124 = arith.constant 0 : index
    %c0_125 = arith.constant 0 : index
    %236 = vector.load %arg36[%c3, %c0_123, %c0_124, %c0_125] : memref<4x2x8x32xbf16, #tpu.memory_space<vmem>>, vector<1x2x8x32xbf16>
    %237 = vector.shape_cast %236 : vector<1x2x8x32xbf16> to vector<2x8x32xbf16>
    %238 = vector.shape_cast %63 : vector<1x8x1xi1> to vector<1x8x1xi1>
    %239 = vector.broadcast %238 : vector<1x8x1xi1> to vector<2x8x32xi1>
    %240 = vector.shape_cast %235 : vector<2x1x32xbf16> to vector<2x1x32xbf16>
    %241 = vector.broadcast %240 : vector<2x1x32xbf16> to vector<2x8x32xbf16>
    %242 = arith.select %239, %241, %237 : vector<2x8x32xi1>, vector<2x8x32xbf16>
    %c3_126 = arith.constant 3 : index
    %c0_127 = arith.constant 0 : index
    %c0_128 = arith.constant 0 : index
    %c0_129 = arith.constant 0 : index
    %243 = vector.load %arg36[%c3_126, %c0_127, %c0_128, %c0_129] : memref<4x2x8x32xbf16, #tpu.memory_space<vmem>>, vector<1x2x8x32xbf16>
    %244 = vector.shape_cast %243 : vector<1x2x8x32xbf16> to vector<2x8x32xbf16>
    %245 = vector.shape_cast %242 : vector<2x8x32xbf16> to vector<1x2x8x32xbf16>
    tpu.vector_store %arg36[%c3_126, %c0_127, %c0_128, %c0_129], %245 {strides = array<i32>} : memref<4x2x8x32xbf16, #tpu.memory_space<vmem>>, vector<1x2x8x32xbf16>,
    %246 = vector.extract_strided_slice %60 {offsets = [0, 96], sizes = [2, 32], strides = [1, 1]} : vector<2x128xf32> to vector<2x32xf32>
    %247 = arith.truncf %246 : vector<2x32xf32> to vector<2x32xbf16>
    %248 = vector.shape_cast %247 : vector<2x32xbf16> to vector<2x1x32xbf16>
    %c3_130 = arith.constant 3 : index
    %c0_131 = arith.constant 0 : index
    %c0_132 = arith.constant 0 : index
    %c0_133 = arith.constant 0 : index
    %249 = vector.load %arg37[%c3_130, %c0_131, %c0_132, %c0_133] : memref<4x2x8x32xbf16, #tpu.memory_space<vmem>>, vector<1x2x8x32xbf16>
    %250 = vector.shape_cast %249 : vector<1x2x8x32xbf16> to vector<2x8x32xbf16>
    %251 = vector.shape_cast %63 : vector<1x8x1xi1> to vector<1x8x1xi1>
    %252 = vector.broadcast %251 : vector<1x8x1xi1> to vector<2x8x32xi1>
    %253 = vector.shape_cast %248 : vector<2x1x32xbf16> to vector<2x1x32xbf16>
    %254 = vector.broadcast %253 : vector<2x1x32xbf16> to vector<2x8x32xbf16>
    %255 = arith.select %252, %254, %250 : vector<2x8x32xi1>, vector<2x8x32xbf16>
    %c3_134 = arith.constant 3 : index
    %c0_135 = arith.constant 0 : index
    %c0_136 = arith.constant 0 : index
    %c0_137 = arith.constant 0 : index
    %256 = vector.load %arg37[%c3_134, %c0_135, %c0_136, %c0_137] : memref<4x2x8x32xbf16, #tpu.memory_space<vmem>>, vector<1x2x8x32xbf16>
    %257 = vector.shape_cast %256 : vector<1x2x8x32xbf16> to vector<2x8x32xbf16>
    %258 = vector.shape_cast %255 : vector<2x8x32xbf16> to vector<1x2x8x32xbf16>
    tpu.vector_store %arg37[%c3_134, %c0_135, %c0_136, %c0_137], %258 {strides = array<i32>} : memref<4x2x8x32xbf16, #tpu.memory_space<vmem>>, vector<1x2x8x32xbf16>,
    %259 = vector.extract_strided_slice %52 {offsets = [0, 96], sizes = [2, 32], strides = [1, 1]} : vector<2x128xf32> to vector<2x32xf32>
    %260 = arith.truncf %259 : vector<2x32xf32> to vector<2x32xbf16>
    %261 = vector.shape_cast %260 : vector<2x32xbf16> to vector<2x1x32xbf16>
    %c3_138 = arith.constant 3 : index
    %c0_139 = arith.constant 0 : index
    %c0_140 = arith.constant 0 : index
    %c0_141 = arith.constant 0 : index
    %262 = vector.load %arg36[%c3_138, %c0_139, %c0_140, %c0_141] : memref<4x2x8x32xbf16, #tpu.memory_space<vmem>>, vector<1x2x8x32xbf16>
    %263 = vector.shape_cast %262 : vector<1x2x8x32xbf16> to vector<2x8x32xbf16>
    "tpu.trace_start"() <{level = 10 : i32, message = "bqd,bkd->bqk"}> : () -> ()
    %cst_142 = arith.constant dense<0.000000e+00> : vector<2x1x8xf32>
    %264 = tpu.matmul %261, %263, %cst_142 {dimension_numbers = #tpu.dot_dimension_numbers<[2], [2], [1], [1], [0, 0, 0, 1, 1, 1], [0], [0]>} : vector<2x1x32xbf16>, vector<2x8x32xbf16>, vector<2x1x8xf32> -> vector<2x1x8xf32>
    "tpu.trace_stop"() : () -> ()
    %cst_143 = arith.constant 0.176776692 : f32
    %265 = vector.broadcast %cst_143 : f32 to vector<2x1x8xf32>
    %266 = arith.mulf %264, %265 : vector<2x1x8xf32>
    %267 = vector.broadcast %69 : vector<1x1x8xf32> to vector<2x1x8xf32>
    %268 = arith.addf %266, %267 : vector<2x1x8xf32>
    %cst_144 = arith.constant dense<0xFF800000> : vector<2x1xf32>
    %269 = vector.multi_reduction <maximumf>, %268, %cst_144 [2] : vector<2x1x8xf32> to vector<2x1xf32>
    %270 = vector.shape_cast %269 : vector<2x1xf32> to vector<2x1x1xf32>
    %271 = vector.broadcast %270 : vector<2x1x1xf32> to vector<2x1x8xf32>
    %272 = arith.subf %268, %271 : vector<2x1x8xf32>
    %273 = math.exp %272 : vector<2x1x8xf32>
    %cst_145 = arith.constant dense<0.000000e+00> : vector<2x1xf32>
    %274 = vector.multi_reduction <add>, %273, %cst_145 [2] : vector<2x1x8xf32> to vector<2x1xf32>
    %275 = vector.shape_cast %274 : vector<2x1xf32> to vector<2x1x1xf32>
    %276 = vector.broadcast %275 : vector<2x1x1xf32> to vector<2x1x8xf32>
    %277 = arith.divf %273, %276 : vector<2x1x8xf32>
    %278 = arith.truncf %277 : vector<2x1x8xf32> to vector<2x1x8xbf16>
    %c3_146 = arith.constant 3 : index
    %c0_147 = arith.constant 0 : index
    %c0_148 = arith.constant 0 : index
    %c0_149 = arith.constant 0 : index
    %279 = vector.load %arg37[%c3_146, %c0_147, %c0_148, %c0_149] : memref<4x2x8x32xbf16, #tpu.memory_space<vmem>>, vector<1x2x8x32xbf16>
    %280 = vector.shape_cast %279 : vector<1x2x8x32xbf16> to vector<2x8x32xbf16>
    "tpu.trace_start"() <{level = 10 : i32, message = "bqk,bkd->bqd"}> : () -> ()
    %cst_150 = arith.constant dense<0.000000e+00> : vector<2x1x32xf32>
    %281 = tpu.matmul %278, %280, %cst_150 {dimension_numbers = #tpu.dot_dimension_numbers<[2], [1], [1], [2], [0, 0, 0, 1, 1, 2], [0], [0]>} : vector<2x1x8xbf16>, vector<2x8x32xbf16>, vector<2x1x32xf32> -> vector<2x1x32xf32>
    "tpu.trace_stop"() : () -> ()
    %282 = vector.shape_cast %281 : vector<2x1x32xf32> to vector<2x32xf32>
    %283 = arith.truncf %282 : vector<2x32xf32> to vector<2x32xbf16>
    %c96 = arith.constant 96 : index
    %c0_151 = arith.constant 0 : index
    %284 = vector.load %arg13[%c96, %c0_151] : memref<128x128xbf16, #tpu.memory_space<vmem>>, vector<32x128xbf16>
    %cst_152 = arith.constant dense<0.000000e+00> : vector<2x128xf32>
    %285 = tpu.matmul %283, %284, %cst_152 {dimension_numbers = #tpu.dot_dimension_numbers<[1], [0], [0], [1], [0, 0, 1, 1], [], []>} : vector<2x32xbf16>, vector<32x128xbf16>, vector<2x128xf32> -> vector<2x128xf32>
    %286 = arith.addf %232, %285 : vector<2x128xf32>
    %287 = arith.addf %46, %286 : vector<2x128xf32>
    %c0_153 = arith.constant 0 : index
    %c0_154 = arith.constant 0 : index
    %288 = vector.load %arg14[%c0_153, %c0_154] : memref<1x128xf32, #tpu.memory_space<vmem>>, vector<1x128xf32>
    %289 = vector.broadcast %288 : vector<1x128xf32> to vector<2x128xf32>
    %290 = arith.addf %287, %289 : vector<2x128xf32>
    %c0_155 = arith.constant 0 : index
    %c0_156 = arith.constant 0 : index
    %291 = vector.load %arg15[%c0_155, %c0_156] : memref<1x128xf32, #tpu.memory_space<vmem>>, vector<1x128xf32>
    %c0_157 = arith.constant 0 : index
    %c0_158 = arith.constant 0 : index
    %292 = vector.load %arg16[%c0_157, %c0_158] : memref<1x128xf32, #tpu.memory_space<vmem>>, vector<1x128xf32>
    %cst_159 = arith.constant dense<0.000000e+00> : vector<2xf32>
    %293 = vector.multi_reduction <add>, %290, %cst_159 [1] : vector<2x128xf32> to vector<2xf32>
    %294 = vector.shape_cast %293 : vector<2xf32> to vector<2x1xf32>
    %cst_160 = arith.constant 1.280000e+02 : f32
    %295 = vector.broadcast %cst_160 : f32 to vector<2x1xf32>
    %296 = arith.divf %294, %295 : vector<2x1xf32>
    %297 = vector.broadcast %296 : vector<2x1xf32> to vector<2x128xf32>
    %298 = arith.subf %290, %297 : vector<2x128xf32>
    %299 = arith.mulf %298, %298 : vector<2x128xf32>
    %cst_161 = arith.constant dense<0.000000e+00> : vector<2xf32>
    %300 = vector.multi_reduction <add>, %299, %cst_161 [1] : vector<2x128xf32> to vector<2xf32>
    %301 = vector.shape_cast %300 : vector<2xf32> to vector<2x1xf32>
    %cst_162 = arith.constant 1.280000e+02 : f32
    %302 = vector.broadcast %cst_162 : f32 to vector<2x1xf32>
    %303 = arith.divf %301, %302 : vector<2x1xf32>
    %cst_163 = arith.constant 9.99999996E-13 : f32
    %304 = vector.broadcast %cst_163 : f32 to vector<2x1xf32>
    %305 = arith.addf %303, %304 : vector<2x1xf32>
    %306 = math.rsqrt %305 : vector<2x1xf32>
    %307 = vector.broadcast %306 : vector<2x1xf32> to vector<2x128xf32>
    %308 = arith.mulf %298, %307 : vector<2x128xf32>
    %309 = vector.broadcast %291 : vector<1x128xf32> to vector<2x128xf32>
    %310 = arith.mulf %308, %309 : vector<2x128xf32>
    %311 = vector.broadcast %292 : vector<1x128xf32> to vector<2x128xf32>
    %312 = arith.addf %310, %311 : vector<2x128xf32>
    %313 = arith.truncf %312 : vector<2x128xf32> to vector<2x128xbf16>
    %c0_164 = arith.constant 0 : index
    %c0_165 = arith.constant 0 : index
    %314 = vector.load %arg17[%c0_164, %c0_165] : memref<128x128xbf16, #tpu.memory_space<vmem>>, vector<128x128xbf16>
    %cst_166 = arith.constant dense<0.000000e+00> : vector<2x128xf32>
    %315 = tpu.matmul %313, %314, %cst_166 {dimension_numbers = #tpu.dot_dimension_numbers<[1], [0], [0], [1], [0, 0, 1, 1], [], []>} : vector<2x128xbf16>, vector<128x128xbf16>, vector<2x128xf32> -> vector<2x128xf32>
    %c0_167 = arith.constant 0 : index
    %c0_168 = arith.constant 0 : index
    %316 = vector.load %arg18[%c0_167, %c0_168] : memref<1x128xf32, #tpu.memory_space<vmem>>, vector<1x128xf32>
    %317 = vector.broadcast %316 : vector<1x128xf32> to vector<2x128xf32>
    %318 = arith.addf %315, %317 : vector<2x128xf32>
    %cst_169 = arith.constant 0.000000e+00 : f32
    %319 = vector.broadcast %cst_169 : f32 to vector<2x128xf32>
    %320 = vector.extract_strided_slice %318 {offsets = [0, 0], sizes = [2, 32], strides = [1, 1]} : vector<2x128xf32> to vector<2x32xf32>
    %321 = arith.truncf %320 : vector<2x32xf32> to vector<2x32xbf16>
    %322 = vector.shape_cast %321 : vector<2x32xbf16> to vector<2x1x32xbf16>
    %c0_170 = arith.constant 0 : index
    %c0_171 = arith.constant 0 : index
    %c0_172 = arith.constant 0 : index
    %c0_173 = arith.constant 0 : index
    %323 = vector.load %arg1[%c0_170, %c0_171, %c0_172, %c0_173] : memref<4x2x8x32xbf16, #tpu.memory_space<vmem>>, vector<1x2x8x32xbf16>
    %324 = vector.shape_cast %323 : vector<1x2x8x32xbf16> to vector<2x8x32xbf16>
    "tpu.trace_start"() <{level = 10 : i32, message = "bqd,bkd->bqk"}> : () -> ()
    %cst_174 = arith.constant dense<0.000000e+00> : vector<2x1x8xf32>
    %325 = tpu.matmul %322, %324, %cst_174 {dimension_numbers = #tpu.dot_dimension_numbers<[2], [2], [1], [1], [0, 0, 0, 1, 1, 1], [0], [0]>} : vector<2x1x32xbf16>, vector<2x8x32xbf16>, vector<2x1x8xf32> -> vector<2x1x8xf32>
    "tpu.trace_stop"() : () -> ()
    %cst_175 = arith.constant 0.176776692 : f32
    %326 = vector.broadcast %cst_175 : f32 to vector<2x1x8xf32>
    %327 = arith.mulf %325, %326 : vector<2x1x8xf32>
    %c0_176 = arith.constant 0 : index
    %c0_177 = arith.constant 0 : index
    %c0_178 = arith.constant 0 : index
    %328 = vector.load %arg3[%c0_176, %c0_177, %c0_178] : memref<2x1x8xf32, #tpu.memory_space<vmem>>, vector<2x1x8xf32>
    %329 = vector.shape_cast %328 : vector<2x1x8xf32> to vector<2x1x8xf32>
    %330 = arith.addf %327, %329 : vector<2x1x8xf32>
    %cst_179 = arith.constant dense<0xFF800000> : vector<2x1xf32>
    %331 = vector.multi_reduction <maximumf>, %330, %cst_179 [2] : vector<2x1x8xf32> to vector<2x1xf32>
    %332 = vector.shape_cast %331 : vector<2x1xf32> to vector<2x1x1xf32>
    %333 = vector.broadcast %332 : vector<2x1x1xf32> to vector<2x1x8xf32>
    %334 = arith.subf %330, %333 : vector<2x1x8xf32>
    %335 = math.exp %334 : vector<2x1x8xf32>
    %cst_180 = arith.constant dense<0.000000e+00> : vector<2x1xf32>
    %336 = vector.multi_reduction <add>, %335, %cst_180 [2] : vector<2x1x8xf32> to vector<2x1xf32>
    %337 = vector.shape_cast %336 : vector<2x1xf32> to vector<2x1x1xf32>
    %338 = vector.broadcast %337 : vector<2x1x1xf32> to vector<2x1x8xf32>
    %339 = arith.divf %335, %338 : vector<2x1x8xf32>
    %340 = arith.truncf %339 : vector<2x1x8xf32> to vector<2x1x8xbf16>
    %c0_181 = arith.constant 0 : index
    %c0_182 = arith.constant 0 : index
    %c0_183 = arith.constant 0 : index
    %c0_184 = arith.constant 0 : index
    %341 = vector.load %arg2[%c0_181, %c0_182, %c0_183, %c0_184] : memref<4x2x8x32xbf16, #tpu.memory_space<vmem>>, vector<1x2x8x32xbf16>
    %342 = vector.shape_cast %341 : vector<1x2x8x32xbf16> to vector<2x8x32xbf16>
    "tpu.trace_start"() <{level = 10 : i32, message = "bqk,bkd->bqd"}> : () -> ()
    %cst_185 = arith.constant dense<0.000000e+00> : vector<2x1x32xf32>
    %343 = tpu.matmul %340, %342, %cst_185 {dimension_numbers = #tpu.dot_dimension_numbers<[2], [1], [1], [2], [0, 0, 0, 1, 1, 2], [0], [0]>} : vector<2x1x8xbf16>, vector<2x8x32xbf16>, vector<2x1x32xf32> -> vector<2x1x32xf32>
    "tpu.trace_stop"() : () -> ()
    %344 = vector.shape_cast %343 : vector<2x1x32xf32> to vector<2x32xf32>
    %345 = arith.truncf %344 : vector<2x32xf32> to vector<2x32xbf16>
    %c0_186 = arith.constant 0 : index
    %c0_187 = arith.constant 0 : index
    %346 = vector.load %arg19[%c0_186, %c0_187] : memref<128x128xbf16, #tpu.memory_space<vmem>>, vector<32x128xbf16>
    %cst_188 = arith.constant dense<0.000000e+00> : vector<2x128xf32>
    %347 = tpu.matmul %345, %346, %cst_188 {dimension_numbers = #tpu.dot_dimension_numbers<[1], [0], [0], [1], [0, 0, 1, 1], [], []>} : vector<2x32xbf16>, vector<32x128xbf16>, vector<2x128xf32> -> vector<2x128xf32>
    %348 = arith.addf %319, %347 : vector<2x128xf32>
    %349 = vector.extract_strided_slice %318 {offsets = [0, 32], sizes = [2, 32], strides = [1, 1]} : vector<2x128xf32> to vector<2x32xf32>
    %350 = arith.truncf %349 : vector<2x32xf32> to vector<2x32xbf16>
    %351 = vector.shape_cast %350 : vector<2x32xbf16> to vector<2x1x32xbf16>
    %c1_189 = arith.constant 1 : index
    %c0_190 = arith.constant 0 : index
    %c0_191 = arith.constant 0 : index
    %c0_192 = arith.constant 0 : index
    %352 = vector.load %arg1[%c1_189, %c0_190, %c0_191, %c0_192] : memref<4x2x8x32xbf16, #tpu.memory_space<vmem>>, vector<1x2x8x32xbf16>
    %353 = vector.shape_cast %352 : vector<1x2x8x32xbf16> to vector<2x8x32xbf16>
    "tpu.trace_start"() <{level = 10 : i32, message = "bqd,bkd->bqk"}> : () -> ()
    %cst_193 = arith.constant dense<0.000000e+00> : vector<2x1x8xf32>
    %354 = tpu.matmul %351, %353, %cst_193 {dimension_numbers = #tpu.dot_dimension_numbers<[2], [2], [1], [1], [0, 0, 0, 1, 1, 1], [0], [0]>} : vector<2x1x32xbf16>, vector<2x8x32xbf16>, vector<2x1x8xf32> -> vector<2x1x8xf32>
    "tpu.trace_stop"() : () -> ()
    %cst_194 = arith.constant 0.176776692 : f32
    %355 = vector.broadcast %cst_194 : f32 to vector<2x1x8xf32>
    %356 = arith.mulf %354, %355 : vector<2x1x8xf32>
    %c0_195 = arith.constant 0 : index
    %c0_196 = arith.constant 0 : index
    %c0_197 = arith.constant 0 : index
    %357 = vector.load %arg3[%c0_195, %c0_196, %c0_197] : memref<2x1x8xf32, #tpu.memory_space<vmem>>, vector<2x1x8xf32>
    %358 = vector.shape_cast %357 : vector<2x1x8xf32> to vector<2x1x8xf32>
    %359 = arith.addf %356, %358 : vector<2x1x8xf32>
    %cst_198 = arith.constant dense<0xFF800000> : vector<2x1xf32>
    %360 = vector.multi_reduction <maximumf>, %359, %cst_198 [2] : vector<2x1x8xf32> to vector<2x1xf32>
    %361 = vector.shape_cast %360 : vector<2x1xf32> to vector<2x1x1xf32>
    %362 = vector.broadcast %361 : vector<2x1x1xf32> to vector<2x1x8xf32>
    %363 = arith.subf %359, %362 : vector<2x1x8xf32>
    %364 = math.exp %363 : vector<2x1x8xf32>
    %cst_199 = arith.constant dense<0.000000e+00> : vector<2x1xf32>
    %365 = vector.multi_reduction <add>, %364, %cst_199 [2] : vector<2x1x8xf32> to vector<2x1xf32>
    %366 = vector.shape_cast %365 : vector<2x1xf32> to vector<2x1x1xf32>
    %367 = vector.broadcast %366 : vector<2x1x1xf32> to vector<2x1x8xf32>
    %368 = arith.divf %364, %367 : vector<2x1x8xf32>
    %369 = arith.truncf %368 : vector<2x1x8xf32> to vector<2x1x8xbf16>
    %c1_200 = arith.constant 1 : index
    %c0_201 = arith.constant 0 : index
    %c0_202 = arith.constant 0 : index
    %c0_203 = arith.constant 0 : index
    %370 = vector.load %arg2[%c1_200, %c0_201, %c0_202, %c0_203] : memref<4x2x8x32xbf16, #tpu.memory_space<vmem>>, vector<1x2x8x32xbf16>
    %371 = vector.shape_cast %370 : vector<1x2x8x32xbf16> to vector<2x8x32xbf16>
    "tpu.trace_start"() <{level = 10 : i32, message = "bqk,bkd->bqd"}> : () -> ()
    %cst_204 = arith.constant dense<0.000000e+00> : vector<2x1x32xf32>
    %372 = tpu.matmul %369, %371, %cst_204 {dimension_numbers = #tpu.dot_dimension_numbers<[2], [1], [1], [2], [0, 0, 0, 1, 1, 2], [0], [0]>} : vector<2x1x8xbf16>, vector<2x8x32xbf16>, vector<2x1x32xf32> -> vector<2x1x32xf32>
    "tpu.trace_stop"() : () -> ()
    %373 = vector.shape_cast %372 : vector<2x1x32xf32> to vector<2x32xf32>
    %374 = arith.truncf %373 : vector<2x32xf32> to vector<2x32xbf16>
    %c32_205 = arith.constant 32 : index
    %c0_206 = arith.constant 0 : index
    %375 = vector.load %arg19[%c32_205, %c0_206] : memref<128x128xbf16, #tpu.memory_space<vmem>>, vector<32x128xbf16>
    %cst_207 = arith.constant dense<0.000000e+00> : vector<2x128xf32>
    %376 = tpu.matmul %374, %375, %cst_207 {dimension_numbers = #tpu.dot_dimension_numbers<[1], [0], [0], [1], [0, 0, 1, 1], [], []>} : vector<2x32xbf16>, vector<32x128xbf16>, vector<2x128xf32> -> vector<2x128xf32>
    %377 = arith.addf %348, %376 : vector<2x128xf32>
    %378 = vector.extract_strided_slice %318 {offsets = [0, 64], sizes = [2, 32], strides = [1, 1]} : vector<2x128xf32> to vector<2x32xf32>
    %379 = arith.truncf %378 : vector<2x32xf32> to vector<2x32xbf16>
    %380 = vector.shape_cast %379 : vector<2x32xbf16> to vector<2x1x32xbf16>
    %c2_208 = arith.constant 2 : index
    %c0_209 = arith.constant 0 : index
    %c0_210 = arith.constant 0 : index
    %c0_211 = arith.constant 0 : index
    %381 = vector.load %arg1[%c2_208, %c0_209, %c0_210, %c0_211] : memref<4x2x8x32xbf16, #tpu.memory_space<vmem>>, vector<1x2x8x32xbf16>
    %382 = vector.shape_cast %381 : vector<1x2x8x32xbf16> to vector<2x8x32xbf16>
    "tpu.trace_start"() <{level = 10 : i32, message = "bqd,bkd->bqk"}> : () -> ()
    %cst_212 = arith.constant dense<0.000000e+00> : vector<2x1x8xf32>
    %383 = tpu.matmul %380, %382, %cst_212 {dimension_numbers = #tpu.dot_dimension_numbers<[2], [2], [1], [1], [0, 0, 0, 1, 1, 1], [0], [0]>} : vector<2x1x32xbf16>, vector<2x8x32xbf16>, vector<2x1x8xf32> -> vector<2x1x8xf32>
    "tpu.trace_stop"() : () -> ()
    %cst_213 = arith.constant 0.176776692 : f32
    %384 = vector.broadcast %cst_213 : f32 to vector<2x1x8xf32>
    %385 = arith.mulf %383, %384 : vector<2x1x8xf32>
    %c0_214 = arith.constant 0 : index
    %c0_215 = arith.constant 0 : index
    %c0_216 = arith.constant 0 : index
    %386 = vector.load %arg3[%c0_214, %c0_215, %c0_216] : memref<2x1x8xf32, #tpu.memory_space<vmem>>, vector<2x1x8xf32>
    %387 = vector.shape_cast %386 : vector<2x1x8xf32> to vector<2x1x8xf32>
    %388 = arith.addf %385, %387 : vector<2x1x8xf32>
    %cst_217 = arith.constant dense<0xFF800000> : vector<2x1xf32>
    %389 = vector.multi_reduction <maximumf>, %388, %cst_217 [2] : vector<2x1x8xf32> to vector<2x1xf32>
    %390 = vector.shape_cast %389 : vector<2x1xf32> to vector<2x1x1xf32>
    %391 = vector.broadcast %390 : vector<2x1x1xf32> to vector<2x1x8xf32>
    %392 = arith.subf %388, %391 : vector<2x1x8xf32>
    %393 = math.exp %392 : vector<2x1x8xf32>
    %cst_218 = arith.constant dense<0.000000e+00> : vector<2x1xf32>
    %394 = vector.multi_reduction <add>, %393, %cst_218 [2] : vector<2x1x8xf32> to vector<2x1xf32>
    %395 = vector.shape_cast %394 : vector<2x1xf32> to vector<2x1x1xf32>
    %396 = vector.broadcast %395 : vector<2x1x1xf32> to vector<2x1x8xf32>
    %397 = arith.divf %393, %396 : vector<2x1x8xf32>
    %398 = arith.truncf %397 : vector<2x1x8xf32> to vector<2x1x8xbf16>
    %c2_219 = arith.constant 2 : index
    %c0_220 = arith.constant 0 : index
    %c0_221 = arith.constant 0 : index
    %c0_222 = arith.constant 0 : index
    %399 = vector.load %arg2[%c2_219, %c0_220, %c0_221, %c0_222] : memref<4x2x8x32xbf16, #tpu.memory_space<vmem>>, vector<1x2x8x32xbf16>
    %400 = vector.shape_cast %399 : vector<1x2x8x32xbf16> to vector<2x8x32xbf16>
    "tpu.trace_start"() <{level = 10 : i32, message = "bqk,bkd->bqd"}> : () -> ()
    %cst_223 = arith.constant dense<0.000000e+00> : vector<2x1x32xf32>
    %401 = tpu.matmul %398, %400, %cst_223 {dimension_numbers = #tpu.dot_dimension_numbers<[2], [1], [1], [2], [0, 0, 0, 1, 1, 2], [0], [0]>} : vector<2x1x8xbf16>, vector<2x8x32xbf16>, vector<2x1x32xf32> -> vector<2x1x32xf32>
    "tpu.trace_stop"() : () -> ()
    %402 = vector.shape_cast %401 : vector<2x1x32xf32> to vector<2x32xf32>
    %403 = arith.truncf %402 : vector<2x32xf32> to vector<2x32xbf16>
    %c64_224 = arith.constant 64 : index
    %c0_225 = arith.constant 0 : index
    %404 = vector.load %arg19[%c64_224, %c0_225] : memref<128x128xbf16, #tpu.memory_space<vmem>>, vector<32x128xbf16>
    %cst_226 = arith.constant dense<0.000000e+00> : vector<2x128xf32>
    %405 = tpu.matmul %403, %404, %cst_226 {dimension_numbers = #tpu.dot_dimension_numbers<[1], [0], [0], [1], [0, 0, 1, 1], [], []>} : vector<2x32xbf16>, vector<32x128xbf16>, vector<2x128xf32> -> vector<2x128xf32>
    %406 = arith.addf %377, %405 : vector<2x128xf32>
    %407 = vector.extract_strided_slice %318 {offsets = [0, 96], sizes = [2, 32], strides = [1, 1]} : vector<2x128xf32> to vector<2x32xf32>
    %408 = arith.truncf %407 : vector<2x32xf32> to vector<2x32xbf16>
    %409 = vector.shape_cast %408 : vector<2x32xbf16> to vector<2x1x32xbf16>
    %c3_227 = arith.constant 3 : index
    %c0_228 = arith.constant 0 : index
    %c0_229 = arith.constant 0 : index
    %c0_230 = arith.constant 0 : index
    %410 = vector.load %arg1[%c3_227, %c0_228, %c0_229, %c0_230] : memref<4x2x8x32xbf16, #tpu.memory_space<vmem>>, vector<1x2x8x32xbf16>
    %411 = vector.shape_cast %410 : vector<1x2x8x32xbf16> to vector<2x8x32xbf16>
    "tpu.trace_start"() <{level = 10 : i32, message = "bqd,bkd->bqk"}> : () -> ()
    %cst_231 = arith.constant dense<0.000000e+00> : vector<2x1x8xf32>
    %412 = tpu.matmul %409, %411, %cst_231 {dimension_numbers = #tpu.dot_dimension_numbers<[2], [2], [1], [1], [0, 0, 0, 1, 1, 1], [0], [0]>} : vector<2x1x32xbf16>, vector<2x8x32xbf16>, vector<2x1x8xf32> -> vector<2x1x8xf32>
    "tpu.trace_stop"() : () -> ()
    %cst_232 = arith.constant 0.176776692 : f32
    %413 = vector.broadcast %cst_232 : f32 to vector<2x1x8xf32>
    %414 = arith.mulf %412, %413 : vector<2x1x8xf32>
    %c0_233 = arith.constant 0 : index
    %c0_234 = arith.constant 0 : index
    %c0_235 = arith.constant 0 : index
    %415 = vector.load %arg3[%c0_233, %c0_234, %c0_235] : memref<2x1x8xf32, #tpu.memory_space<vmem>>, vector<2x1x8xf32>
    %416 = vector.shape_cast %415 : vector<2x1x8xf32> to vector<2x1x8xf32>
    %417 = arith.addf %414, %416 : vector<2x1x8xf32>
    %cst_236 = arith.constant dense<0xFF800000> : vector<2x1xf32>
    %418 = vector.multi_reduction <maximumf>, %417, %cst_236 [2] : vector<2x1x8xf32> to vector<2x1xf32>
    %419 = vector.shape_cast %418 : vector<2x1xf32> to vector<2x1x1xf32>
    %420 = vector.broadcast %419 : vector<2x1x1xf32> to vector<2x1x8xf32>
    %421 = arith.subf %417, %420 : vector<2x1x8xf32>
    %422 = math.exp %421 : vector<2x1x8xf32>
    %cst_237 = arith.constant dense<0.000000e+00> : vector<2x1xf32>
    %423 = vector.multi_reduction <add>, %422, %cst_237 [2] : vector<2x1x8xf32> to vector<2x1xf32>
    %424 = vector.shape_cast %423 : vector<2x1xf32> to vector<2x1x1xf32>
    %425 = vector.broadcast %424 : vector<2x1x1xf32> to vector<2x1x8xf32>
    %426 = arith.divf %422, %425 : vector<2x1x8xf32>
    %427 = arith.truncf %426 : vector<2x1x8xf32> to vector<2x1x8xbf16>
    %c3_238 = arith.constant 3 : index
    %c0_239 = arith.constant 0 : index
    %c0_240 = arith.constant 0 : index
    %c0_241 = arith.constant 0 : index
    %428 = vector.load %arg2[%c3_238, %c0_239, %c0_240, %c0_241] : memref<4x2x8x32xbf16, #tpu.memory_space<vmem>>, vector<1x2x8x32xbf16>
    %429 = vector.shape_cast %428 : vector<1x2x8x32xbf16> to vector<2x8x32xbf16>
    "tpu.trace_start"() <{level = 10 : i32, message = "bqk,bkd->bqd"}> : () -> ()
    %cst_242 = arith.constant dense<0.000000e+00> : vector<2x1x32xf32>
    %430 = tpu.matmul %427, %429, %cst_242 {dimension_numbers = #tpu.dot_dimension_numbers<[2], [1], [1], [2], [0, 0, 0, 1, 1, 2], [0], [0]>} : vector<2x1x8xbf16>, vector<2x8x32xbf16>, vector<2x1x32xf32> -> vector<2x1x32xf32>
    "tpu.trace_stop"() : () -> ()
    %431 = vector.shape_cast %430 : vector<2x1x32xf32> to vector<2x32xf32>
    %432 = arith.truncf %431 : vector<2x32xf32> to vector<2x32xbf16>
    %c96_243 = arith.constant 96 : index
    %c0_244 = arith.constant 0 : index
    %433 = vector.load %arg19[%c96_243, %c0_244] : memref<128x128xbf16, #tpu.memory_space<vmem>>, vector<32x128xbf16>
    %cst_245 = arith.constant dense<0.000000e+00> : vector<2x128xf32>
    %434 = tpu.matmul %432, %433, %cst_245 {dimension_numbers = #tpu.dot_dimension_numbers<[1], [0], [0], [1], [0, 0, 1, 1], [], []>} : vector<2x32xbf16>, vector<32x128xbf16>, vector<2x128xf32> -> vector<2x128xf32>
    %435 = arith.addf %406, %434 : vector<2x128xf32>
    %436 = arith.addf %312, %435 : vector<2x128xf32>
    %c0_246 = arith.constant 0 : index
    %c0_247 = arith.constant 0 : index
    %437 = vector.load %arg20[%c0_246, %c0_247] : memref<1x128xf32, #tpu.memory_space<vmem>>, vector<1x128xf32>
    %438 = vector.broadcast %437 : vector<1x128xf32> to vector<2x128xf32>
    %439 = arith.addf %436, %438 : vector<2x128xf32>
    %c0_248 = arith.constant 0 : index
    %c0_249 = arith.constant 0 : index
    %440 = vector.load %arg21[%c0_248, %c0_249] : memref<1x128xf32, #tpu.memory_space<vmem>>, vector<1x128xf32>
    %c0_250 = arith.constant 0 : index
    %c0_251 = arith.constant 0 : index
    %441 = vector.load %arg22[%c0_250, %c0_251] : memref<1x128xf32, #tpu.memory_space<vmem>>, vector<1x128xf32>
    %cst_252 = arith.constant dense<0.000000e+00> : vector<2xf32>
    %442 = vector.multi_reduction <add>, %439, %cst_252 [1] : vector<2x128xf32> to vector<2xf32>
    %443 = vector.shape_cast %442 : vector<2xf32> to vector<2x1xf32>
    %cst_253 = arith.constant 1.280000e+02 : f32
    %444 = vector.broadcast %cst_253 : f32 to vector<2x1xf32>
    %445 = arith.divf %443, %444 : vector<2x1xf32>
    %446 = vector.broadcast %445 : vector<2x1xf32> to vector<2x128xf32>
    %447 = arith.subf %439, %446 : vector<2x128xf32>
    %448 = arith.mulf %447, %447 : vector<2x128xf32>
    %cst_254 = arith.constant dense<0.000000e+00> : vector<2xf32>
    %449 = vector.multi_reduction <add>, %448, %cst_254 [1] : vector<2x128xf32> to vector<2xf32>
    %450 = vector.shape_cast %449 : vector<2xf32> to vector<2x1xf32>
    %cst_255 = arith.constant 1.280000e+02 : f32
    %451 = vector.broadcast %cst_255 : f32 to vector<2x1xf32>
    %452 = arith.divf %450, %451 : vector<2x1xf32>
    %cst_256 = arith.constant 9.99999996E-13 : f32
    %453 = vector.broadcast %cst_256 : f32 to vector<2x1xf32>
    %454 = arith.addf %452, %453 : vector<2x1xf32>
    %455 = math.rsqrt %454 : vector<2x1xf32>
    %456 = vector.broadcast %455 : vector<2x1xf32> to vector<2x128xf32>
    %457 = arith.mulf %447, %456 : vector<2x128xf32>
    %458 = vector.broadcast %440 : vector<1x128xf32> to vector<2x128xf32>
    %459 = arith.mulf %457, %458 : vector<2x128xf32>
    %460 = vector.broadcast %441 : vector<1x128xf32> to vector<2x128xf32>
    %461 = arith.addf %459, %460 : vector<2x128xf32>
    %462 = arith.truncf %461 : vector<2x128xf32> to vector<2x128xbf16>
    %c0_257 = arith.constant 0 : index
    %c0_258 = arith.constant 0 : index
    %463 = vector.load %arg23[%c0_257, %c0_258] : memref<128x512xbf16, #tpu.memory_space<vmem>>, vector<128x512xbf16>
    %cst_259 = arith.constant dense<0.000000e+00> : vector<2x512xf32>
    %464 = tpu.matmul %462, %463, %cst_259 {dimension_numbers = #tpu.dot_dimension_numbers<[1], [0], [0], [1], [0, 0, 1, 1], [], []>} : vector<2x128xbf16>, vector<128x512xbf16>, vector<2x512xf32> -> vector<2x512xf32>
    %c0_260 = arith.constant 0 : index
    %c0_261 = arith.constant 0 : index
    %465 = vector.load %arg24[%c0_260, %c0_261] : memref<1x512xf32, #tpu.memory_space<vmem>>, vector<1x512xf32>
    %466 = vector.broadcast %465 : vector<1x512xf32> to vector<2x512xf32>
    %467 = arith.addf %464, %466 : vector<2x512xf32>
    %cst_262 = arith.constant 5.000000e-01 : f32
    %468 = vector.broadcast %cst_262 : f32 to vector<2x512xf32>
    %469 = arith.mulf %468, %467 : vector<2x512xf32>
    %cst_263 = arith.constant 4.471500e-02 : f32
    %470 = vector.broadcast %cst_263 : f32 to vector<2x512xf32>
    %471 = arith.mulf %470, %467 : vector<2x512xf32>
    %472 = arith.mulf %471, %467 : vector<2x512xf32>
    %473 = arith.mulf %472, %467 : vector<2x512xf32>
    %474 = arith.addf %467, %473 : vector<2x512xf32>
    %cst_264 = arith.constant 0.797884583 : f32
    %475 = vector.broadcast %cst_264 : f32 to vector<2x512xf32>
    %476 = arith.mulf %475, %474 : vector<2x512xf32>
    %477 = math.tanh %476 : vector<2x512xf32>
    %cst_265 = arith.constant 1.000000e+00 : f32
    %478 = vector.broadcast %cst_265 : f32 to vector<2x512xf32>
    %479 = arith.addf %478, %477 : vector<2x512xf32>
    %480 = arith.mulf %469, %479 : vector<2x512xf32>
    %481 = arith.truncf %480 : vector<2x512xf32> to vector<2x512xbf16>
    %c0_266 = arith.constant 0 : index
    %c0_267 = arith.constant 0 : index
    %482 = vector.load %arg25[%c0_266, %c0_267] : memref<512x128xbf16, #tpu.memory_space<vmem>>, vector<512x128xbf16>
    %cst_268 = arith.constant dense<0.000000e+00> : vector<2x128xf32>
    %483 = tpu.matmul %481, %482, %cst_268 {dimension_numbers = #tpu.dot_dimension_numbers<[1], [0], [0], [1], [0, 0, 1, 1], [], []>} : vector<2x512xbf16>, vector<512x128xbf16>, vector<2x128xf32> -> vector<2x128xf32>
    %c0_269 = arith.constant 0 : index
    %c0_270 = arith.constant 0 : index
    %484 = vector.load %arg26[%c0_269, %c0_270] : memref<1x128xf32, #tpu.memory_space<vmem>>, vector<1x128xf32>
    %485 = vector.broadcast %484 : vector<1x128xf32> to vector<2x128xf32>
    %486 = arith.addf %483, %485 : vector<2x128xf32>
    %487 = arith.addf %461, %486 : vector<2x128xf32>
    %c0_271 = arith.constant 0 : index
    %c0_272 = arith.constant 0 : index
    %488 = vector.load %arg27[%c0_271, %c0_272] : memref<1x128xf32, #tpu.memory_space<vmem>>, vector<1x128xf32>
    %c0_273 = arith.constant 0 : index
    %c0_274 = arith.constant 0 : index
    %489 = vector.load %arg28[%c0_273, %c0_274] : memref<1x128xf32, #tpu.memory_space<vmem>>, vector<1x128xf32>
    %cst_275 = arith.constant dense<0.000000e+00> : vector<2xf32>
    %490 = vector.multi_reduction <add>, %487, %cst_275 [1] : vector<2x128xf32> to vector<2xf32>
    %491 = vector.shape_cast %490 : vector<2xf32> to vector<2x1xf32>
    %cst_276 = arith.constant 1.280000e+02 : f32
    %492 = vector.broadcast %cst_276 : f32 to vector<2x1xf32>
    %493 = arith.divf %491, %492 : vector<2x1xf32>
    %494 = vector.broadcast %493 : vector<2x1xf32> to vector<2x128xf32>
    %495 = arith.subf %487, %494 : vector<2x128xf32>
    %496 = arith.mulf %495, %495 : vector<2x128xf32>
    %cst_277 = arith.constant dense<0.000000e+00> : vector<2xf32>
    %497 = vector.multi_reduction <add>, %496, %cst_277 [1] : vector<2x128xf32> to vector<2xf32>
    %498 = vector.shape_cast %497 : vector<2xf32> to vector<2x1xf32>
    %cst_278 = arith.constant 1.280000e+02 : f32
    %499 = vector.broadcast %cst_278 : f32 to vector<2x1xf32>
    %500 = arith.divf %498, %499 : vector<2x1xf32>
    %cst_279 = arith.constant 9.99999996E-13 : f32
    %501 = vector.broadcast %cst_279 : f32 to vector<2x1xf32>
    %502 = arith.addf %500, %501 : vector<2x1xf32>
    %503 = math.rsqrt %502 : vector<2x1xf32>
    %504 = vector.broadcast %503 : vector<2x1xf32> to vector<2x128xf32>
    %505 = arith.mulf %495, %504 : vector<2x128xf32>
    %506 = vector.broadcast %488 : vector<1x128xf32> to vector<2x128xf32>
    %507 = arith.mulf %505, %506 : vector<2x128xf32>
    %508 = vector.broadcast %489 : vector<1x128xf32> to vector<2x128xf32>
    %509 = arith.addf %507, %508 : vector<2x128xf32>
    %510 = arith.truncf %509 : vector<2x128xf32> to vector<2x128xbf16>
    %c0_280 = arith.constant 0 : index
    %c0_281 = arith.constant 0 : index
    %511 = vector.load %arg29[%c0_280, %c0_281] : memref<128x128xbf16, #tpu.memory_space<vmem>>, vector<128x128xbf16>
    %cst_282 = arith.constant dense<0.000000e+00> : vector<2x128xf32>
    %512 = tpu.matmul %510, %511, %cst_282 {dimension_numbers = #tpu.dot_dimension_numbers<[1], [0], [0], [1], [0, 0, 1, 1], [], []>} : vector<2x128xbf16>, vector<128x128xbf16>, vector<2x128xf32> -> vector<2x128xf32>
    %c0_283 = arith.constant 0 : index
    %c0_284 = arith.constant 0 : index
    %513 = vector.load %arg30[%c0_283, %c0_284] : memref<1x128xf32, #tpu.memory_space<vmem>>, vector<1x128xf32>
    %514 = vector.broadcast %513 : vector<1x128xf32> to vector<2x128xf32>
    %515 = arith.addf %512, %514 : vector<2x128xf32>
    %cst_285 = arith.constant 5.000000e-01 : f32
    %516 = vector.broadcast %cst_285 : f32 to vector<2x128xf32>
    %517 = arith.mulf %516, %515 : vector<2x128xf32>
    %cst_286 = arith.constant 4.471500e-02 : f32
    %518 = vector.broadcast %cst_286 : f32 to vector<2x128xf32>
    %519 = arith.mulf %518, %515 : vector<2x128xf32>
    %520 = arith.mulf %519, %515 : vector<2x128xf32>
    %521 = arith.mulf %520, %515 : vector<2x128xf32>
    %522 = arith.addf %515, %521 : vector<2x128xf32>
    %cst_287 = arith.constant 0.797884583 : f32
    %523 = vector.broadcast %cst_287 : f32 to vector<2x128xf32>
    %524 = arith.mulf %523, %522 : vector<2x128xf32>
    %525 = math.tanh %524 : vector<2x128xf32>
    %cst_288 = arith.constant 1.000000e+00 : f32
    %526 = vector.broadcast %cst_288 : f32 to vector<2x128xf32>
    %527 = arith.addf %526, %525 : vector<2x128xf32>
    %528 = arith.mulf %517, %527 : vector<2x128xf32>
    %c0_289 = arith.constant 0 : index
    %c0_290 = arith.constant 0 : index
    %529 = vector.load %arg31[%c0_289, %c0_290] : memref<1x128xf32, #tpu.memory_space<vmem>>, vector<1x128xf32>
    %c0_291 = arith.constant 0 : index
    %c0_292 = arith.constant 0 : index
    %530 = vector.load %arg32[%c0_291, %c0_292] : memref<1x128xf32, #tpu.memory_space<vmem>>, vector<1x128xf32>
    %cst_293 = arith.constant dense<0.000000e+00> : vector<2xf32>
    %531 = vector.multi_reduction <add>, %528, %cst_293 [1] : vector<2x128xf32> to vector<2xf32>
    %532 = vector.shape_cast %531 : vector<2xf32> to vector<2x1xf32>
    %cst_294 = arith.constant 1.280000e+02 : f32
    %533 = vector.broadcast %cst_294 : f32 to vector<2x1xf32>
    %534 = arith.divf %532, %533 : vector<2x1xf32>
    %535 = vector.broadcast %534 : vector<2x1xf32> to vector<2x128xf32>
    %536 = arith.subf %528, %535 : vector<2x128xf32>
    %537 = arith.mulf %536, %536 : vector<2x128xf32>
    %cst_295 = arith.constant dense<0.000000e+00> : vector<2xf32>
    %538 = vector.multi_reduction <add>, %537, %cst_295 [1] : vector<2x128xf32> to vector<2xf32>
    %539 = vector.shape_cast %538 : vector<2xf32> to vector<2x1xf32>
    %cst_296 = arith.constant 1.280000e+02 : f32
    %540 = vector.broadcast %cst_296 : f32 to vector<2x1xf32>
    %541 = arith.divf %539, %540 : vector<2x1xf32>
    %cst_297 = arith.constant 9.99999996E-13 : f32
    %542 = vector.broadcast %cst_297 : f32 to vector<2x1xf32>
    %543 = arith.addf %541, %542 : vector<2x1xf32>
    %544 = math.rsqrt %543 : vector<2x1xf32>
    %545 = vector.broadcast %544 : vector<2x1xf32> to vector<2x128xf32>
    %546 = arith.mulf %536, %545 : vector<2x128xf32>
    %547 = vector.broadcast %529 : vector<1x128xf32> to vector<2x128xf32>
    %548 = arith.mulf %546, %547 : vector<2x128xf32>
    %549 = vector.broadcast %530 : vector<1x128xf32> to vector<2x128xf32>
    %550 = arith.addf %548, %549 : vector<2x128xf32>
    %551 = arith.truncf %550 : vector<2x128xf32> to vector<2x128xbf16>
    %c0_298 = arith.constant 0 : index
    %c0_299 = arith.constant 0 : index
    %552 = vector.load %arg33[%c0_298, %c0_299] : memref<128x128xbf16, #tpu.memory_space<vmem>>, vector<128x128xbf16>
    %cst_300 = arith.constant dense<0.000000e+00> : vector<2x128xf32>
    %553 = tpu.matmul %551, %552, %cst_300 {dimension_numbers = #tpu.dot_dimension_numbers<[1], [0], [0], [1], [0, 0, 1, 1], [], []>} : vector<2x128xbf16>, vector<128x128xbf16>, vector<2x128xf32> -> vector<2x128xf32>
    %c0_301 = arith.constant 0 : index
    %c0_302 = arith.constant 0 : index
    %554 = vector.load %arg34[%c0_301, %c0_302] : memref<1x128xf32, #tpu.memory_space<vmem>>, vector<1x128xf32>
    %555 = vector.broadcast %554 : vector<1x128xf32> to vector<2x128xf32>
    %556 = arith.addf %553, %555 : vector<2x128xf32>
    %cst_303 = arith.constant dense<0xFF800000> : vector<2xf32>
    %557 = vector.multi_reduction <maximumf>, %556, %cst_303 [1] : vector<2x128xf32> to vector<2xf32>
    %558 = vector.shape_cast %557 : vector<2xf32> to vector<2x1xf32>
    %559 = tpu.iota {dimensions = array<i32: 1>} : vector<2x128xi32>
    %560 = arith.sitofp %559 : vector<2x128xi32> to vector<2x128xf32>
    %561 = vector.broadcast %558 : vector<2x1xf32> to vector<2x128xf32>
    %562 = arith.cmpf oge, %556, %561 : vector<2x128xf32>
    %cst_304 = arith.constant 1.280000e+02 : f32
    %563 = vector.broadcast %cst_304 : f32 to vector<2x128xf32>
    %564 = arith.select %562, %560, %563 : vector<2x128xi1>, vector<2x128xf32>
    %cst_305 = arith.constant dense<0x7F800000> : vector<2xf32>
    %565 = vector.multi_reduction <minimumf>, %564, %cst_305 [1] : vector<2x128xf32> to vector<2xf32>
    %566 = vector.shape_cast %565 : vector<2xf32> to vector<2x1xf32>
    %567 = arith.fptosi %566 : vector<2x1xf32> to vector<2x1xi32>
    %c0_306 = arith.constant 0 : index
    %c0_307 = arith.constant 0 : index
    %568 = vector.load %arg39[%c0_306, %c0_307] : memref<2x1xi32, #tpu.memory_space<vmem>>, vector<2x1xi32>
    tpu.vector_store %arg39[%c0_306, %c0_307], %567 {strides = array<i32>} : memref<2x1xi32, #tpu.memory_space<vmem>>, vector<2x1xi32>,
    %569 = tpu.iota {dimensions = array<i32: 1>} : vector<2x8xi32>
    %c1_i32 = arith.constant 1 : i32
    %570 = arith.addi %arg0, %c1_i32 : i32
    %571 = vector.broadcast %570 : i32 to vector<2x8xi32>
    %572 = arith.cmpi eq, %569, %571 : vector<2x8xi32>
    %c0_308 = arith.constant 0 : index
    %c0_309 = arith.constant 0 : index
    %573 = vector.load %arg38[%c0_308, %c0_309] : memref<2x8xi32, #tpu.memory_space<vmem>>, vector<2x8xi32>
    %574 = vector.shape_cast %567 : vector<2x1xi32> to vector<2x1xi32>
    %575 = vector.broadcast %574 : vector<2x1xi32> to vector<2x8xi32>
    %576 = arith.select %572, %575, %573 : vector<2x8xi1>, vector<2x8xi32>
    %c0_310 = arith.constant 0 : index
    %c0_311 = arith.constant 0 : index
    %577 = vector.load %arg38[%c0_310, %c0_311] : memref<2x8xi32, #tpu.memory_space<vmem>>, vector<2x8xi32>
    tpu.vector_store %arg38[%c0_310, %c0_311], %576 {strides = array<i32>} : memref<2x8xi32, #tpu.memory_space<vmem>>, vector<2x8xi32>,
    %c0_312 = arith.constant 0 : index
    %c0_313 = arith.constant 0 : index
    %578 = vector.load %arg38[%c0_312, %c0_313] : memref<2x8xi32, #tpu.memory_space<vmem>>, vector<2x8xi32>
    %c0_314 = arith.constant 0 : index
    %c0_315 = arith.constant 0 : index
    %579 = vector.load %arg35[%c0_314, %c0_315] : memref<2x8xi32, #tpu.memory_space<vmem>>, vector<2x8xi32>
    tpu.vector_store %arg35[%c0_314, %c0_315], %578 {strides = array<i32>} : memref<2x8xi32, #tpu.memory_space<vmem>>, vector<2x8xi32>,
    return
  }
  func.func @transform_0(%arg0: i32) -> (i32, i32, i32, i32) {
    %c0_i32 = arith.constant 0 : i32
    %c0_i32_0 = arith.constant 0 : i32
    %c0_i32_1 = arith.constant 0 : i32
    %c0_i32_2 = arith.constant 0 : i32
    %c0_i32_3 = arith.constant 0 : i32
    return %c0_i32, %c0_i32_0, %c0_i32_1, %c0_i32_2 : i32, i32, i32, i32
  }
  func.func @transform_1(%arg0: i32) -> (i32, i32, i32, i32) {
    %c0_i32 = arith.constant 0 : i32
    %c0_i32_0 = arith.constant 0 : i32
    %c0_i32_1 = arith.constant 0 : i32
    %c0_i32_2 = arith.constant 0 : i32
    %c0_i32_3 = arith.constant 0 : i32
    return %c0_i32, %c0_i32_0, %c0_i32_1, %c0_i32_2 : i32, i32, i32, i32
  }
  func.func @transform_2(%arg0: i32) -> (i32, i32, i32) {
    %c0_i32 = arith.constant 0 : i32
    %c0_i32_0 = arith.constant 0 : i32
    %c0_i32_1 = arith.constant 0 : i32
    %c0_i32_2 = arith.constant 0 : i32
    return %c0_i32, %c0_i32_0, %c0_i32_1 : i32, i32, i32
  }
  func.func @transform_3(%arg0: i32) -> (i32, i32) {
    %c0_i32 = arith.constant 0 : i32
    %c0_i32_0 = arith.constant 0 : i32
    %c0_i32_1 = arith.constant 0 : i32
    return %c0_i32, %c0_i32_0 : i32, i32
  }
  func.func @transform_4(%arg0: i32) -> (i32, i32) {
    %c0_i32 = arith.constant 0 : i32
    %c0_i32_0 = arith.constant 0 : i32
    %c0_i32_1 = arith.constant 0 : i32
    return %c0_i32, %c0_i32_0 : i32, i32
  }
  func.func @transform_5(%arg0: i32) -> (i32, i32) {
    %c0_i32 = arith.constant 0 : i32
    %c0_i32_0 = arith.constant 0 : i32
    %c0_i32_1 = arith.constant 0 : i32
    return %c0_i32, %c0_i32_0 : i32, i32
  }
  func.func @transform_6(%arg0: i32) -> (i32, i32) {
    %c0_i32 = arith.constant 0 : i32
    %c0_i32_0 = arith.constant 0 : i32
    %c0_i32_1 = arith.constant 0 : i32
    return %c0_i32, %c0_i32_0 : i32, i32
  }
  func.func @transform_7(%arg0: i32) -> (i32, i32) {
    %c0_i32 = arith.constant 0 : i32
    %c0_i32_0 = arith.constant 0 : i32
    %c0_i32_1 = arith.constant 0 : i32
    return %c0_i32, %c0_i32_0 : i32, i32
  }
  func.func @transform_8(%arg0: i32) -> (i32, i32) {
    %c0_i32 = arith.constant 0 : i32
    %c0_i32_0 = arith.constant 0 : i32
    %c0_i32_1 = arith.constant 0 : i32
    return %c0_i32, %c0_i32_0 : i32, i32
  }
  func.func @transform_9(%arg0: i32) -> (i32, i32) {
    %c0_i32 = arith.constant 0 : i32
    %c0_i32_0 = arith.constant 0 : i32
    %c0_i32_1 = arith.constant 0 : i32
    return %c0_i32, %c0_i32_0 : i32, i32
  }
  func.func @transform_10(%arg0: i32) -> (i32, i32) {
    %c0_i32 = arith.constant 0 : i32
    %c0_i32_0 = arith.constant 0 : i32
    %c0_i32_1 = arith.constant 0 : i32
    return %c0_i32, %c0_i32_0 : i32, i32
  }
  func.func @transform_11(%arg0: i32) -> (i32, i32) {
    %c0_i32 = arith.constant 0 : i32
    %c0_i32_0 = arith.constant 0 : i32
    %c0_i32_1 = arith.constant 0 : i32
    return %c0_i32, %c0_i32_0 : i32, i32
  }
  func.func @transform_12(%arg0: i32) -> (i32, i32) {
    %c0_i32 = arith.constant 0 : i32
    %c0_i32_0 = arith.constant 0 : i32
    %c0_i32_1 = arith.constant 0 : i32
    return %c0_i32, %c0_i32_0 : i32, i32
  }
  func.func @transform_13(%arg0: i32) -> (i32, i32) {
    %c0_i32 = arith.constant 0 : i32
    %c0_i32_0 = arith.constant 0 : i32
    %c0_i32_1 = arith.constant 0 : i32
    return %c0_i32, %c0_i32_0 : i32, i32
  }
  func.func @transform_14(%arg0: i32) -> (i32, i32) {
    %c0_i32 = arith.constant 0 : i32
    %c0_i32_0 = arith.constant 0 : i32
    %c0_i32_1 = arith.constant 0 : i32
    return %c0_i32, %c0_i32_0 : i32, i32
  }
  func.func @transform_15(%arg0: i32) -> (i32, i32) {
    %c0_i32 = arith.constant 0 : i32
    %c0_i32_0 = arith.constant 0 : i32
    %c0_i32_1 = arith.constant 0 : i32
    return %c0_i32, %c0_i32_0 : i32, i32
  }
  func.func @transform_16(%arg0: i32) -> (i32, i32) {
    %c0_i32 = arith.constant 0 : i32
    %c0_i32_0 = arith.constant 0 : i32
    %c0_i32_1 = arith.constant 0 : i32
    return %c0_i32, %c0_i32_0 : i32, i32
  }
  func.func @transform_17(%arg0: i32) -> (i32, i32) {
    %c0_i32 = arith.constant 0 : i32
    %c0_i32_0 = arith.constant 0 : i32
    %c0_i32_1 = arith.constant 0 : i32
    return %c0_i32, %c0_i32_0 : i32, i32
  }
  func.func @transform_18(%arg0: i32) -> (i32, i32) {
    %c0_i32 = arith.constant 0 : i32
    %c0_i32_0 = arith.constant 0 : i32
    %c0_i32_1 = arith.constant 0 : i32
    return %c0_i32, %c0_i32_0 : i32, i32
  }
  func.func @transform_19(%arg0: i32) -> (i32, i32) {
    %c0_i32 = arith.constant 0 : i32
    %c0_i32_0 = arith.constant 0 : i32
    %c0_i32_1 = arith.constant 0 : i32
    return %c0_i32, %c0_i32_0 : i32, i32
  }
  func.func @transform_20(%arg0: i32) -> (i32, i32) {
    %c0_i32 = arith.constant 0 : i32
    %c0_i32_0 = arith.constant 0 : i32
    %c0_i32_1 = arith.constant 0 : i32
    return %c0_i32, %c0_i32_0 : i32, i32
  }
  func.func @transform_21(%arg0: i32) -> (i32, i32) {
    %c0_i32 = arith.constant 0 : i32
    %c0_i32_0 = arith.constant 0 : i32
    %c0_i32_1 = arith.constant 0 : i32
    return %c0_i32, %c0_i32_0 : i32, i32
  }
  func.func @transform_22(%arg0: i32) -> (i32, i32) {
    %c0_i32 = arith.constant 0 : i32
    %c0_i32_0 = arith.constant 0 : i32
    %c0_i32_1 = arith.constant 0 : i32
    return %c0_i32, %c0_i32_0 : i32, i32
  }
  func.func @transform_23(%arg0: i32) -> (i32, i32) {
    %c0_i32 = arith.constant 0 : i32
    %c0_i32_0 = arith.constant 0 : i32
    %c0_i32_1 = arith.constant 0 : i32
    return %c0_i32, %c0_i32_0 : i32, i32
  }
  func.func @transform_24(%arg0: i32) -> (i32, i32) {
    %c0_i32 = arith.constant 0 : i32
    %c0_i32_0 = arith.constant 0 : i32
    %c0_i32_1 = arith.constant 0 : i32
    return %c0_i32, %c0_i32_0 : i32, i32
  }
  func.func @transform_25(%arg0: i32) -> (i32, i32) {
    %c0_i32 = arith.constant 0 : i32
    %c0_i32_0 = arith.constant 0 : i32
    %c0_i32_1 = arith.constant 0 : i32
    return %c0_i32, %c0_i32_0 : i32, i32
  }
  func.func @transform_26(%arg0: i32) -> (i32, i32) {
    %c0_i32 = arith.constant 0 : i32
    %c0_i32_0 = arith.constant 0 : i32
    %c0_i32_1 = arith.constant 0 : i32
    return %c0_i32, %c0_i32_0 : i32, i32
  }
  func.func @transform_27(%arg0: i32) -> (i32, i32) {
    %c0_i32 = arith.constant 0 : i32
    %c0_i32_0 = arith.constant 0 : i32
    %c0_i32_1 = arith.constant 0 : i32
    return %c0_i32, %c0_i32_0 : i32, i32
  }
  func.func @transform_28(%arg0: i32) -> (i32, i32) {
    %c0_i32 = arith.constant 0 : i32
    %c0_i32_0 = arith.constant 0 : i32
    %c0_i32_1 = arith.constant 0 : i32
    return %c0_i32, %c0_i32_0 : i32, i32
  }
  func.func @transform_29(%arg0: i32) -> (i32, i32) {
    %c0_i32 = arith.constant 0 : i32
    %c0_i32_0 = arith.constant 0 : i32
    %c0_i32_1 = arith.constant 0 : i32
    return %c0_i32, %c0_i32_0 : i32, i32
  }
  func.func @transform_30(%arg0: i32) -> (i32, i32) {
    %c0_i32 = arith.constant 0 : i32
    %c0_i32_0 = arith.constant 0 : i32
    %c0_i32_1 = arith.constant 0 : i32
    return %c0_i32, %c0_i32_0 : i32, i32
  }
  func.func @transform_31(%arg0: i32) -> (i32, i32) {
    %c0_i32 = arith.constant 0 : i32
    %c0_i32_0 = arith.constant 0 : i32
    %c0_i32_1 = arith.constant 0 : i32
    return %c0_i32, %c0_i32_0 : i32, i32
  }
  func.func @transform_32(%arg0: i32) -> (i32, i32) {
    %c0_i32 = arith.constant 0 : i32
    %c0_i32_0 = arith.constant 0 : i32
    %c0_i32_1 = arith.constant 0 : i32
    return %c0_i32, %c0_i32_0 : i32, i32
  }
  func.func @transform_33(%arg0: i32) -> (i32, i32) {
    %c0_i32 = arith.constant 0 : i32
    %c0_i32_0 = arith.constant 0 : i32
    %c0_i32_1 = arith.constant 0 : i32
    return %c0_i32, %c0_i32_0 : i32, i32
  }
  func.func @transform_34(%arg0: i32) -> (i32, i32) {
    %c0_i32 = arith.constant 0 : i32
    %c0_i32_0 = arith.constant 0 : i32
    %c0_i32_1 = arith.constant 0 : i32
    return %c0_i32, %c0_i32_0 : i32, i32
  }
}

</mosaic_0001>

<bundles_post_ra>
// kernel: generate.2
= control target key start
LH: loop header
LB: loop body
LE: loop exit
PB: predicated region body
PF: predicated region fallthrough
CT: control target
= control target key end

     0   :  { %s4456_s0 = inlined_call_operand.vmem [shape: f32[16,128], index: 0, kind: input, shape index: {}]   ;;  %s4457_s1 = inlined_call_operand.vmem [shape: f32[2,8], index: 1, kind: input, shape index: {}]   ;;  %s4458_s2 = inlined_call_operand.hbm [shape: f32[1,128], index: 2, kind: input, shape index: {}]   ;;  %s4459_s3 = inlined_call_operand.vmem [shape: f32[1,128], index: 3, kind: input, shape index: {}]   ;;  %s4460_s4 = inlined_call_operand.hbm [shape: bf16[128,128], index: 4, kind: input, shape index: {}]   ;;  %s4461_s5 = inlined_call_operand.hbm [shape: f32[1,128], index: 5, kind: input, shape index: {}]   ;;  %s4462_s6 = inlined_call_operand.vmem [shape: bf16[128,256], index: 6, kind: input, shape index: {}]   ;;  %s4463_s7 = inlined_call_operand.hbm [shape: f32[1,256], index: 7, kind: input, shape index: {}]   ;;  %s4464_s8 = inlined_call_operand.hbm [shape: bf16[128,128], index: 8, kind: input, shape index: {}]   ;;  %s4465_s9 = inlined_call_operand.hbm [shape: f32[1,128], index: 9, kind: input, shape index: {}]   ;;  %s4466_s10 = inlined_call_operand.hbm [shape: f32[1,128], index: 10, kind: input, shape index: {}]   ;;  %s4467_s11 = inlined_call_operand.hbm [shape: f32[1,128], index: 11, kind: input, shape index: {}]   ;;  %s4468_s12 = inlined_call_operand.vmem [shape: bf16[128,512], index: 12, kind: input, shape index: {}]   ;;  %s4469_s13 = inlined_call_operand.hbm [shape: f32[1,512], index: 13, kind: input, shape index: {}]   ;;  %s4470_s14 = inlined_call_operand.hbm [shape: bf16[512,128], index: 14, kind: input, shape index: {}]   ;;  %s4471_s15 = inlined_call_operand.hbm [shape: f32[1,128], index: 15, kind: input, shape index: {}]   ;;  %s4472_s16 = inlined_call_operand.hbm [shape: f32[1,128], index: 16, kind: input, shape index: {}]   ;;  %s4473_s17 = inlined_call_operand.hbm [shape: f32[1,128], index: 17, kind: input, shape index: {}]   ;;  %s4474_s18 = inlined_call_operand.hbm [shape: bf16[128,256], index: 18, kind: input, shape index: {}]   ;;  %s4475_s19 = inlined_call_operand.vmem [shape: f32[1,256], index: 19, kind: input, shape index: {}]   ;;  %s4476_s20 = inlined_call_operand.vmem [shape: f32[16,256], index: 20, kind: output, shape index: {}]  }
   0x1   :  { %4481 = sst [smem:[#allocation32_spill]] %s4456_s0 }
   0x2   :  { %4482 = sst [smem:[#allocation33_spill]] %s4457_s1 }
   0x3   :  { %4483 = sst [smem:[#allocation34_spill]] %s4458_s2 }
   0x4   :  { %4484 = sst [smem:[#allocation35_spill]] %s4459_s3 }
   0x5   :  { %4485 = sst [smem:[#allocation36_spill]] %s4460_s4 }
   0x6   :  { %4486 = sst [smem:[#allocation37_spill]] %s4475_s19 }
   0x7   :  { %4487 = sst [smem:[#allocation38_spill]] %s4476_s20 }
   0x8   :  { %25 = vsyncpa [#allocation3], 0 }
   0x9   :  { %26 = vsyncpa [#allocation5], 0 }
   0xa   :  { %27 = vsyncpa [#allocation8], 0 }
   0xb   :  { %28 = vsyncpa [#allocation11], 0 }
   0xc   :  { %29 = vsyncpa [#allocation14], 0 }
   0xd   :  { %30 = vsyncpa [#allocation17], 0 }
   0xe   :  { %31 = vsyncpa [#allocation20], 0 }
   0xf   :  { %32 = vsyncpa [#allocation23], 0  ;;  %s3666_s1 = smov [#allocation4]   ;;  %s4488_s2 = sld [smem:[#allocation36_spill]] }
  0x10   :  { %s54_s22 = sshll.u32 %s3666_s1, 4  ;;  %s55_s22 = int_to_ptr.vmem [resolvable:$true] %s54_s22 }
  0x15   :  { %s3342_s25 = scalar_lea.hbm %s4488_s2, 1024 }
  0x16   :  { %p3343_p0 = scmp.ne.s32.totalorder %s4488_s2, %s3342_s25  ;;  %p3346_p1 = scmp.lt.u32.totalorder %s3342_s25, %s4488_s2 }
  0x18   :  { %p3348_p2 = pnand %p3346_p1, %p3343_p0 }
  0x1a   :  { %3351 = shalt.err (!%p3348_p2)
}
  0x1b   :  { %s3352_s4 = scalar_lea.vmem %s55_s22, 1024  ;;  %p3357_p4 = scmp.lt.s32.totalorder %s55_s22, %s55_s22 }
  0x1c   :  { %p3353_p3 = scmp.ne.s32.totalorder %s55_s22, %s3352_s4  ;;  %p3358_p5 = scmp.lt.s32.totalorder %s3352_s4, %s3352_s4 }
  0x1e   :  { %p3359_p6 = por %p3358_p5, %p3357_p4 }
  0x20   :  { %p3360_p7 = pnand %p3359_p6, %p3353_p3 }
  0x22   :  { %3363 = shalt.err (!%p3360_p7)
}
  0x23   :  { %s3667_s29 = smov 64   ;;  %s3668_s30 = smov 4  }
  0x24   :  { %60 = dma.hbm_to_vmem [thread:$0]  %s4488_s2, 1024, %s55_s22, [#allocation5], %s3667_s29, %s3667_s29, %s3668_s30  }
  0x25   :  { %s3669_s1 = smov [#allocation7]   ;;  %s3670_s24 = smov [#allocation10]  }
  0x26   :  { %s79_s23 = sshll.u32 %s3669_s1, 4  ;;  %s101_s25 = sshll.u32 %s3670_s24, 4  ;;  %s80_s23 = int_to_ptr.vmem [resolvable:$true] %s79_s23  ;;  %s102_s25 = int_to_ptr.vmem [resolvable:$true] %s101_s25 }
  0x27   :  { %s3364_s27 = scalar_lea.hbm %s4463_s7, 32 }
  0x28   :  { %p3365_p8 = scmp.ne.s32.totalorder %s4463_s7, %s3364_s27  ;;  %p3368_p9 = scmp.lt.u32.totalorder %s3364_s27, %s4463_s7 }
  0x2a   :  { %p3370_p10 = pnand %p3368_p9, %p3365_p8 }
  0x2c   :  { %3373 = shalt.err (!%p3370_p10)
}
  0x2d   :  { %s3374_s22 = scalar_lea.vmem %s80_s23, 32  ;;  %p3379_p12 = scmp.lt.s32.totalorder %s80_s23, %s80_s23 }
  0x2e   :  { %p3375_p11 = scmp.ne.s32.totalorder %s80_s23, %s3374_s22  ;;  %p3380_p13 = scmp.lt.s32.totalorder %s3374_s22, %s3374_s22 }
  0x30   :  { %p3381_p0 = por %p3380_p13, %p3379_p12 }
  0x32   :  { %p3382_p1 = pnand %p3381_p0, %p3375_p11 }
  0x34   :  { %3385 = shalt.err (!%p3382_p1)
}
  0x35   :  { %82 = dma.hbm_to_vmem [thread:$0]  %s4463_s7, 32, %s80_s23, [#allocation8]  }
  0x36   :  { %s3386_s24 = scalar_lea.hbm %s4465_s9, 16 }
  0x37   :  { %p3387_p2 = scmp.ne.s32.totalorder %s4465_s9, %s3386_s24  ;;  %p3390_p3 = scmp.lt.u32.totalorder %s3386_s24, %s4465_s9 }
  0x39   :  { %p3392_p4 = pnand %p3390_p3, %p3387_p2 }
  0x3b   :  { %3395 = shalt.err (!%p3392_p4)
}
  0x3c   :  { %s3396_s27 = scalar_lea.vmem %s102_s25, 16  ;;  %s3400_s28 = scalar_lea.vmem %s102_s25, 32 }
  0x3d   :  { %p3397_p5 = scmp.ne.s32.totalorder %s102_s25, %s3396_s27  ;;  %p3401_p6 = scmp.lt.s32.totalorder %s102_s25, %s102_s25 }
  0x3e   :  { %p3402_p7 = scmp.lt.s32.totalorder %s3400_s28, %s3396_s27 }
  0x40   :  { %p3403_p8 = por %p3402_p7, %p3401_p6 }
  0x42   :  { %p3404_p9 = pnand %p3403_p8, %p3397_p5 }
  0x44   :  { %3407 = shalt.err (!%p3404_p9)
}
  0x45   :  { %104 = dma.hbm_to_vmem [thread:$0]  %s4465_s9, 16, %s102_s25, [#allocation11]  }
  0x46   :  { %s3671_s4 = smov [#allocation13]   ;;  %s3672_s2 = smov [#allocation16]  }
  0x47   :  { %s121_s22 = sshll.u32 %s3671_s4, 4  ;;  %s142_s0 = sshll.u32 %s3672_s2, 4  ;;  %s122_s22 = int_to_ptr.vmem [resolvable:$true] %s121_s22  ;;  %s143_s0 = int_to_ptr.vmem [resolvable:$true] %s142_s0 }
  0x48   :  { %s3408_s24 = scalar_lea.hbm %s4467_s11, 16 }
  0x49   :  { %p3409_p10 = scmp.ne.s32.totalorder %s4467_s11, %s3408_s24  ;;  %p3412_p11 = scmp.lt.u32.totalorder %s3408_s24, %s4467_s11 }
  0x4b   :  { %p3414_p12 = pnand %p3412_p11, %p3409_p10 }
  0x4d   :  { %3417 = shalt.err (!%p3414_p12)
}
  0x4e   :  { %s3418_s9 = scalar_lea.vmem %s122_s22, 16  ;;  %s3422_s25 = scalar_lea.vmem %s122_s22, 32 }
  0x4f   :  { %p3419_p13 = scmp.ne.s32.totalorder %s122_s22, %s3418_s9  ;;  %p3423_p0 = scmp.lt.s32.totalorder %s122_s22, %s122_s22 }
  0x50   :  { %p3424_p1 = scmp.lt.s32.totalorder %s3422_s25, %s3418_s9 }
  0x52   :  { %p3425_p2 = por %p3424_p1, %p3423_p0 }
  0x54   :  { %p3426_p3 = pnand %p3425_p2, %p3419_p13 }
  0x56   :  { %3429 = shalt.err (!%p3426_p3)
}
  0x57   :  { %124 = dma.hbm_to_vmem [thread:$0]  %s4467_s11, 16, %s122_s22, [#allocation14]  }
  0x58   :  { %s3430_s4 = scalar_lea.hbm %s4470_s14, 4096 }
  0x59   :  { %p3431_p4 = scmp.ne.s32.totalorder %s4470_s14, %s3430_s4  ;;  %p3434_p5 = scmp.lt.u32.totalorder %s3430_s4, %s4470_s14 }
  0x5b   :  { %p3436_p6 = pnand %p3434_p5, %p3431_p4 }
  0x5d   :  { %3439 = shalt.err (!%p3436_p6)
}
  0x5e   :  { %s3440_s19 = scalar_lea.vmem %s143_s0, 4096  ;;  %p3445_p8 = scmp.lt.s32.totalorder %s143_s0, %s143_s0 }
  0x5f   :  { %p3441_p7 = scmp.ne.s32.totalorder %s143_s0, %s3440_s19  ;;  %p3446_p9 = scmp.lt.s32.totalorder %s3440_s19, %s3440_s19 }
  0x61   :  { %p3447_p10 = por %p3446_p9, %p3445_p8 }
  0x63   :  { %p3448_p11 = pnand %p3447_p10, %p3441_p7 }
  0x65   :  { %3451 = shalt.err (!%p3448_p11)
}
  0x66   :  { %148 = dma.hbm_to_vmem [thread:$0]  %s4470_s14, 4096, %s143_s0, [#allocation17], %s3667_s29, %s3667_s29, %s3668_s30  }
  0x67   :  { %s3673_s20 = smov [#allocation19]   ;;  %s3674_s26 = smov [#allocation2]  }
  0x68   :  { %s165_s3 = sshll.u32 %s3673_s20, 4  ;;  %s43_s9 = sshll.u32 %s3674_s26, 4  ;;  %s166_s3 = int_to_ptr.vmem [resolvable:$true] %s165_s3  ;;  %s44_s9 = int_to_ptr.vmem [resolvable:$true] %s43_s9 }
  0x69   :  { %s3452_s28 = scalar_lea.hbm %s4472_s16, 16 }
  0x6a   :  { %p3453_p12 = scmp.ne.s32.totalorder %s4472_s16, %s3452_s28  ;;  %p3456_p13 = scmp.lt.u32.totalorder %s3452_s28, %s4472_s16 }
  0x6c   :  { %p3458_p0 = pnand %p3456_p13, %p3453_p12 }
  0x6e   :  { %3461 = shalt.err (!%p3458_p0)
}
  0x6f   :  { %s3462_s14 = scalar_lea.vmem %s166_s3, 16  ;;  %s3466_s0 = scalar_lea.vmem %s166_s3, 32 }
  0x70   :  { %p3463_p1 = scmp.ne.s32.totalorder %s166_s3, %s3462_s14  ;;  %p3467_p2 = scmp.lt.s32.totalorder %s166_s3, %s166_s3 }
  0x71   :  { %p3468_p3 = scmp.lt.s32.totalorder %s3466_s0, %s3462_s14 }
  0x73   :  { %p3469_p4 = por %p3468_p3, %p3467_p2 }
  0x75   :  { %p3470_p5 = pnand %p3469_p4, %p3463_p1 }
  0x77   :  { %3473 = shalt.err (!%p3470_p5)
}
  0x78   :  { %168 = dma.hbm_to_vmem [thread:$0]  %s4472_s16, 16, %s166_s3, [#allocation20]  }
  0x79   :  { %s4489_s11 = sld [smem:[#allocation34_spill]] }
  0x7f   :  { %s3474_s22 = scalar_lea.hbm %s4489_s11, 16 }
  0x80   :  { %p3475_p6 = scmp.ne.s32.totalorder %s4489_s11, %s3474_s22  ;;  %p3478_p7 = scmp.lt.u32.totalorder %s3474_s22, %s4489_s11 }
  0x82   :  { %p3480_p8 = pnand %p3478_p7, %p3475_p6 }
  0x84   :  { %3483 = shalt.err (!%p3480_p8)
}
  0x85   :  { %s3484_s28 = scalar_lea.vmem %s44_s9, 16  ;;  %s3488_s7 = scalar_lea.vmem %s44_s9, 32 }
  0x86   :  { %p3485_p9 = scmp.ne.s32.totalorder %s44_s9, %s3484_s28  ;;  %p3489_p10 = scmp.lt.s32.totalorder %s44_s9, %s44_s9 }
  0x87   :  { %p3490_p11 = scmp.lt.s32.totalorder %s3488_s7, %s3484_s28 }
  0x89   :  { %p3491_p12 = por %p3490_p11, %p3489_p10 }
  0x8b   :  { %p3492_p13 = pnand %p3491_p12, %p3485_p9 }
  0x8d   :  { %3495 = shalt.err (!%p3492_p13)
}
  0x8e   :  { %46 = dma.hbm_to_vmem [thread:$0]  %s4489_s11, 16, %s44_s9, [#allocation3]  }
  0x8f   :  { %s3675_s23 = smov [#allocation6]   ;;  %s3676_s2 = smov [#allocation9]  }
  0x90   :  { %s67_s4 = sshll.u32 %s3675_s23, 4  ;;  %s88_s14 = sshll.u32 %s3676_s2, 4  ;;  %s68_s4 = int_to_ptr.vmem [resolvable:$true] %s67_s4  ;;  %s89_s14 = int_to_ptr.vmem [resolvable:$true] %s88_s14 }
  0x91   :  { %s3496_s1 = scalar_lea.hbm %s4461_s5, 16 }
  0x92   :  { %p3497_p0 = scmp.ne.s32.totalorder %s4461_s5, %s3496_s1  ;;  %p3500_p1 = scmp.lt.u32.totalorder %s3496_s1, %s4461_s5 }
  0x94   :  { %p3502_p2 = pnand %p3500_p1, %p3497_p0 }
  0x96   :  { %3505 = shalt.err (!%p3502_p2)
}
  0x97   :  { %s3506_s9 = scalar_lea.vmem %s68_s4, 16  ;;  %s3510_s11 = scalar_lea.vmem %s68_s4, 32 }
  0x98   :  { %p3507_p3 = scmp.ne.s32.totalorder %s68_s4, %s3506_s9  ;;  %p3511_p4 = scmp.lt.s32.totalorder %s68_s4, %s68_s4 }
  0x99   :  { %p3512_p5 = scmp.lt.s32.totalorder %s3510_s11, %s3506_s9 }
  0x9b   :  { %p3513_p6 = por %p3512_p5, %p3511_p4 }
  0x9d   :  { %p3514_p7 = pnand %p3513_p6, %p3507_p3 }
  0x9f   :  { %3517 = shalt.err (!%p3514_p7)
}
  0xa0   :  { %70 = dma.hbm_to_vmem [thread:$0]  %s4461_s5, 16, %s68_s4, [#allocation5]  }
  0xa1   :  { %s3518_s7 = scalar_lea.hbm %s4464_s8, 1024 }
  0xa2   :  { %p3519_p8 = scmp.ne.s32.totalorder %s4464_s8, %s3518_s7  ;;  %p3522_p9 = scmp.lt.u32.totalorder %s3518_s7, %s4464_s8 }
  0xa4   :  { %p3524_p10 = pnand %p3522_p9, %p3519_p8 }
  0xa6   :  { %3527 = shalt.err (!%p3524_p10)
}
  0xa7   :  { %s3528_s0 = scalar_lea.vmem %s89_s14, 1024  ;;  %p3533_p12 = scmp.lt.s32.totalorder %s89_s14, %s89_s14 }
  0xa8   :  { %p3529_p11 = scmp.ne.s32.totalorder %s89_s14, %s3528_s0  ;;  %p3534_p13 = scmp.lt.s32.totalorder %s3528_s0, %s3528_s0 }
  0xaa   :  { %p3535_p0 = por %p3534_p13, %p3533_p12 }
  0xac   :  { %p3536_p1 = pnand %p3535_p0, %p3529_p11 }
  0xae   :  { %3539 = shalt.err (!%p3536_p1)
}
  0xaf   :  { %94 = dma.hbm_to_vmem [thread:$0]  %s4464_s8, 1024, %s89_s14, [#allocation8], %s3667_s29, %s3667_s29, %s3668_s30  }
  0xb0   :  { %s3677_s21 = smov [#allocation12]   ;;  %s3678_s24 = smov [#allocation15]  }
  0xb1   :  { %s111_s1 = sshll.u32 %s3677_s21, 4  ;;  %s133_s19 = sshll.u32 %s3678_s24, 4  ;;  %s112_s1 = int_to_ptr.vmem [resolvable:$true] %s111_s1  ;;  %s134_s19 = int_to_ptr.vmem [resolvable:$true] %s133_s19 }
  0xb2   :  { %s3540_s9 = scalar_lea.hbm %s4466_s10, 16 }
  0xb3   :  { %p3541_p2 = scmp.ne.s32.totalorder %s4466_s10, %s3540_s9  ;;  %p3544_p3 = scmp.lt.u32.totalorder %s3540_s9, %s4466_s10 }
  0xb5   :  { %p3546_p4 = pnand %p3544_p3, %p3541_p2 }
  0xb7   :  { %3549 = shalt.err (!%p3546_p4)
}
  0xb8   :  { %s3550_s8 = scalar_lea.vmem %s112_s1, 16  ;;  %s3554_s30 = scalar_lea.vmem %s112_s1, 32 }
  0xb9   :  { %p3551_p5 = scmp.ne.s32.totalorder %s112_s1, %s3550_s8  ;;  %p3555_p6 = scmp.lt.s32.totalorder %s112_s1, %s112_s1 }
  0xba   :  { %p3556_p7 = scmp.lt.s32.totalorder %s3554_s30, %s3550_s8 }
  0xbc   :  { %p3557_p8 = por %p3556_p7, %p3555_p6 }
  0xbe   :  { %p3558_p9 = pnand %p3557_p8, %p3551_p5 }
  0xc0   :  { %3561 = shalt.err (!%p3558_p9)
}
  0xc1   :  { %114 = dma.hbm_to_vmem [thread:$0]  %s4466_s10, 16, %s112_s1, [#allocation11]  }
  0xc2   :  { %s3562_s3 = scalar_lea.hbm %s4469_s13, 64 }
  0xc3   :  { %p3563_p10 = scmp.ne.s32.totalorder %s4469_s13, %s3562_s3  ;;  %p3566_p11 = scmp.lt.u32.totalorder %s3562_s3, %s4469_s13 }
  0xc5   :  { %p3568_p12 = pnand %p3566_p11, %p3563_p10 }
  0xc7   :  { %3571 = shalt.err (!%p3568_p12)
}
  0xc8   :  { %s3572_s4 = scalar_lea.vmem %s134_s19, 64  ;;  %p3577_p0 = scmp.lt.s32.totalorder %s134_s19, %s134_s19 }
  0xc9   :  { %p3573_p13 = scmp.ne.s32.totalorder %s134_s19, %s3572_s4  ;;  %p3578_p1 = scmp.lt.s32.totalorder %s3572_s4, %s3572_s4 }
  0xcb   :  { %p3579_p2 = por %p3578_p1, %p3577_p0 }
  0xcd   :  { %p3580_p3 = pnand %p3579_p2, %p3573_p13 }
  0xcf   :  { %3583 = shalt.err (!%p3580_p3)
}
  0xd0   :  { %136 = dma.hbm_to_vmem [thread:$0]  %s4469_s13, 64, %s134_s19, [#allocation14]  }
  0xd1   :  { %s3679_s1 = smov [#allocation18]   ;;  %s3680_s22 = smov [#allocation21]  }
  0xd2   :  { %s155_s24 = sshll.u32 %s3679_s1, 4  ;;  %s175_s20 = sshll.u32 %s3680_s22, 4  ;;  %s156_s24 = int_to_ptr.vmem [resolvable:$true] %s155_s24  ;;  %s176_s20 = int_to_ptr.vmem [resolvable:$true] %s175_s20 }
  0xd3   :  { %s3584_s26 = scalar_lea.hbm %s4471_s15, 16 }
  0xd4   :  { %p3585_p4 = scmp.ne.s32.totalorder %s4471_s15, %s3584_s26  ;;  %p3588_p5 = scmp.lt.u32.totalorder %s3584_s26, %s4471_s15 }
  0xd6   :  { %p3590_p6 = pnand %p3588_p5, %p3585_p4 }
  0xd8   :  { %3593 = shalt.err (!%p3590_p6)
}
  0xd9   :  { %s3594_s13 = scalar_lea.vmem %s156_s24, 16  ;;  %s3598_s19 = scalar_lea.vmem %s156_s24, 32 }
  0xda   :  { %p3595_p7 = scmp.ne.s32.totalorder %s156_s24, %s3594_s13  ;;  %p3599_p8 = scmp.lt.s32.totalorder %s156_s24, %s156_s24 }
  0xdb   :  { %p3600_p9 = scmp.lt.s32.totalorder %s3598_s19, %s3594_s13 }
  0xdd   :  { %p3601_p10 = por %p3600_p9, %p3599_p8 }
  0xdf   :  { %p3602_p11 = pnand %p3601_p10, %p3595_p7 }
  0xe1   :  { %3605 = shalt.err (!%p3602_p11)
}
  0xe2   :  { %158 = dma.hbm_to_vmem [thread:$0]  %s4471_s15, 16, %s156_s24, [#allocation17]  }
  0xe3   :  { %s3606_s3 = scalar_lea.hbm %s4473_s17, 16 }
  0xe4   :  { %p3607_p12 = scmp.ne.s32.totalorder %s4473_s17, %s3606_s3  ;;  %p3610_p13 = scmp.lt.u32.totalorder %s3606_s3, %s4473_s17 }
  0xe6   :  { %p3612_p0 = pnand %p3610_p13, %p3607_p12 }
  0xe8   :  { %3615 = shalt.err (!%p3612_p0)
}
  0xe9   :  { %s3616_s4 = scalar_lea.vmem %s176_s20, 16  ;;  %s3620_s10 = scalar_lea.vmem %s176_s20, 32 }
  0xea   :  { %p3617_p1 = scmp.ne.s32.totalorder %s176_s20, %s3616_s4  ;;  %p3621_p2 = scmp.lt.s32.totalorder %s176_s20, %s176_s20 }
  0xeb   :  { %p3622_p3 = scmp.lt.s32.totalorder %s3620_s10, %s3616_s4 }
  0xed   :  { %p3623_p4 = por %p3622_p3, %p3621_p2 }
  0xef   :  { %p3624_p5 = pnand %p3623_p4, %p3617_p1 }
  0xf1   :  { %3627 = shalt.err (!%p3624_p5)
}
  0xf2   :  { %178 = dma.hbm_to_vmem [thread:$0]  %s4473_s17, 16, %s176_s20, [#allocation20]  }
  0xf3   :  { %s3681_s1 = smov [#allocation22]   ;;  %s3628_s11 = scalar_lea.hbm %s4474_s18, 2048 }
  0xf4   :  { %s184_s24 = sshll.u32 %s3681_s1, 4  ;;  %p3629_p6 = scmp.ne.s32.totalorder %s4474_s18, %s3628_s11  ;;  %s185_s24 = int_to_ptr.vmem [resolvable:$true] %s184_s24 }
  0xf5   :  { %p3632_p7 = scmp.lt.u32.totalorder %s3628_s11, %s4474_s18 }
  0xf7   :  { %p3634_p8 = pnand %p3632_p7, %p3629_p6 }
  0xf9   :  { %3637 = shalt.err (!%p3634_p8)
}
  0xfa   :  { %s3638_s30 = scalar_lea.vmem %s185_s24, 2048  ;;  %p3643_p10 = scmp.lt.s32.totalorder %s185_s24, %s185_s24 }
  0xfb   :  { %p3639_p9 = scmp.ne.s32.totalorder %s185_s24, %s3638_s30  ;;  %p3644_p11 = scmp.lt.s32.totalorder %s3638_s30, %s3638_s30 }
  0xfd   :  { %p3645_p12 = por %p3644_p11, %p3643_p10 }
  0xff   :  { %p3646_p13 = pnand %p3645_p12, %p3639_p9 }
 0x101   :  { %3649 = shalt.err (!%p3646_p13)
}
 0x102   :  { %s3682_s17 = smov 128   ;;  %s3683_s20 = smov 8  }
 0x103   :  { %190 = dma.hbm_to_vmem [thread:$0]  %s4474_s18, 2048, %s185_s24, [#allocation23], %s3682_s17, %s3682_s17, %s3683_s20  }
 0x104   :  { %3650 = dma.done.wait [#allocation3], 16  }
 0x105   :  { %3651 = vsyncadd [#allocation3], 4294967280 }
 0x106   :  { %3652 = dma.done.wait [#allocation5], 1040  }
 0x107   :  { %3653 = vsyncadd [#allocation5], 4294966256 }
 0x108   :  { %3654 = dma.done.wait [#allocation8], 1056  }
 0x109   :  { %3655 = vsyncadd [#allocation8], 4294966240 }
 0x10a   :  { %3656 = dma.done.wait [#allocation11], 32  }
 0x10b   :  { %3657 = vsyncadd [#allocation11], 4294967264 }
 0x10c   :  { %3658 = dma.done.wait [#allocation14], 80  }
 0x10d   :  { %3659 = vsyncadd [#allocation14], 4294967216 }
 0x10e   :  { %3660 = dma.done.wait [#allocation17], 4112  }
 0x10f   :  { %3661 = vsyncadd [#allocation17], 4294963184 }
 0x110   :  { %3662 = dma.done.wait [#allocation20], 32  }
 0x111   :  { %3663 = vsyncadd [#allocation20], 4294967264 }
 0x112   :  { %3664 = dma.done.wait [#allocation23], 2048  }
 0x113   :  { %3665 = vsyncadd [#allocation23], 4294965248  ;;  %s4490_s7 = sld [smem:[#allocation32_spill]]  ;;  %v3138_v2 = vld [vmem:[%s4462_s6 + $0x4] ss:$8 sps:$4 sm:$0xff]   ;;  %v3684_v5 = vmov 0.0   ;;  %v410_v53 = vlaneseq }
 0x114   :  { %v3140_v3 = vld [vmem:[#allocation4] sm:$0xff]   ;;  %2965 = vmatprep.subr.bf16.mxu0 %v3684_v5  ;;  %v3142_v6 = vld [vmem:[%s4462_s6 + $0x14] ss:$8 sps:$4 sm:$0xff]   ;;  %500 = vmatprep.subr.bf16.mxu1 %v3138_v2  ;;  %v3144_v15 = vld [vmem:[#allocation4 + $0x8] sm:$0xff]   ;;  %vm3685_vm0 = vmmov 0   ;;  %v3686_v27 = vmov 0  }
 0x115   :  { %v3141_v4 = vld [vmem:[%s4462_s6] ss:$8 sps:$4 sm:$0xff]   ;;  %2966 = vmatpush3.bf16.msra.mxu0 %v3140_v3  ;;  %v3145_v16 = vld [vmem:[%s4462_s6 + $0x10] ss:$8 sps:$4 sm:$0xff]   ;;  %v3146_v17 = vld [vmem:[%s4462_s6 + $0x24] ss:$8 sps:$4 sm:$0xff]   ;;  %2981 = vmatprep.mubr.msk.bf16.mxu0 %vm3685_vm0, %v3684_v5 }
 0x116   :  { %501 = vmatpush1.bf16.msra.mxu1 %v3141_v4  ;;  %2967 = vmatprep.subr.bf16.mxu0 %v3684_v5  ;;  %v3148_v18 = vld [vmem:[#allocation4 + $0x10] sm:$0xff]   ;;  %v3149_v19 = vld [vmem:[%s4462_s6 + $0x20] ss:$8 sps:$4 sm:$0xff]   ;;  %v3154_v23 = vld [vmem:[%s4462_s6 + $0x44] ss:$8 sps:$4 sm:$0xff]   ;;  %s4491_s4 = sld [smem:[#allocation35_spill]] }
 0x117   :  { %502 = vmatprep.subr.bf16.mxu1 %v3142_v6  ;;  %v3150_v20 = vld [vmem:[%s4462_s6 + $0x34] ss:$8 sps:$4 sm:$0xff]   ;;  %v3153_v22 = vld [vmem:[%s4462_s6 + $0x30] ss:$8 sps:$4 sm:$0xff]   ;;  %v3156_v24 = vld [vmem:[#allocation4 + $0x20] sm:$0xff]   ;;  %532 = vmatprep.mubr.bf16.mxu1 %v3686_v27  ;;  %v4063_v54 = vshrl.u32 %v410_v53, 7 }
 0x118   :  { %v3152_v21 = vld [vmem:[#allocation4 + $0x18] sm:$0xff]   ;;  %v3160_v28 = vld [vmem:[#allocation4 + $0x28] sm:$0xff]   ;;  %v3164_v31 = vld [vmem:[#allocation4 + $0x30] sm:$0xff]   ;;  %vm587_vm1 = vcmask 261120   ;;  %vm722_vm2 = vcmask 1043456   ;;  %s4492_s21 = sld [smem:[#allocation33_spill]] }
 0x119   :  { %v236_v0 = vld [vmem:[%s4490_s7] sm:$0xff]  ;;  %v237_v1 = vld [vmem:[%s4490_s7 + $0x8] sm:$0xff]  ;;  %2968 = vmatpush3.bf16.msra.mxu0 %v3144_v15  ;;  %v3158_v26 = vld [vmem:[%s4462_s6 + $0x54] ss:$8 sps:$4 sm:$0xff]   ;;  %v4066_v55 = vsub.s32 0, %v4063_v54  ;;  %v4070_v58 = vsub.s32 1, %v4063_v54 }
 0x11a   :  { %240 = vadd.xlane.f32.xlu0 %v236_v0  ;;  %503 = vmatpush1.bf16.msra.mxu1 %v3145_v16  ;;  %v3157_v25 = vld [vmem:[%s4462_s6 + $0x40] ss:$8 sps:$4 sm:$0xff]   ;;  %v3161_v29 = vld [vmem:[%s4462_s6 + $0x50] ss:$8 sps:$4 sm:$0xff]   ;;  %v3162_v30 = vld [vmem:[%s4462_s6 + $0x64] ss:$8 sps:$4 sm:$0xff]  }
 0x11b   :  { %2969 = vmatprep.subr.bf16.mxu0 %v3684_v5  ;;  %504 = vmatprep.subr.bf16.mxu1 %v3146_v17  ;;  %v3165_v32 = vld [vmem:[%s4462_s6 + $0x60] ss:$8 sps:$4 sm:$0xff]   ;;  %v3166_v33 = vld [vmem:[%s4462_s6 + $0x74] ss:$8 sps:$4 sm:$0xff]   ;;  %v3169_v35 = vld [vmem:[%s4462_s6 + $0x70] ss:$8 sps:$4 sm:$0xff]  }
 0x11c   :  { %v3168_v34 = vld [vmem:[#allocation4 + $0x38] sm:$0xff]   ;;  %v408_v56 = vld [vmem:[#allocation7] sm:$0x3]  ;;  %vm694_vm4 = vcmask 64512   ;;  %s3689_s1 = smov 96   ;;  %s3690_s24 = smov 32  }
 0x11d   :  { %2970 = vmatpush3.bf16.msra.mxu0 %v3148_v18  ;;  %v2715_v44 = vld [vmem:[#allocation2] ss:$0 sm:$0xff]  ;;  %v413_v57 = vrot.slane %v408_v56, %v4066_v55  ;;  %s4493_s25 = sld [smem:[#allocation37_spill]]  ;;  %s4494_s30 = sld [smem:[#allocation38_spill]] }
 0x11e   :  { %242 = vadd.xlane.f32.xlu0 %v237_v1  ;;  %505 = vmatpush1.bf16.msra.mxu1 %v3149_v19  ;;  %v2716_v48 = vld [vmem:[%s4491_s4] ss:$0 sm:$0xff] }
 0x11f   :  { %2971 = vmatprep.subr.bf16.mxu0 %v3684_v5  ;;  %506 = vmatprep.subr.bf16.mxu1 %v3150_v20  ;;  %v3687_v20 = vmov 1966171168  }
 0x121   :  { %2972 = vmatpush3.bf16.msra.mxu0 %v3152_v21  ;;  %v548_v21 = vunpack.c.l.s4 %v3687_v20 }
 0x122   :  { %507 = vmatpush1.bf16.msra.mxu1 %v3153_v22  ;;  %2973 = vmatprep.subr.bf16.mxu0 %v3684_v5  ;;  %v543_v22 = vld [vmem:[%s4492_s21] sm:$0x3] }
 0x123   :  { %508 = vmatprep.subr.bf16.mxu1 %v3154_v23  ;;  %v549_v23 = vunpack.c.0.s8 %v548_v21  ;;  %vm544_vm3 = vcmp.gt.f32.partialorder %v543_v22, 0.0 }
 0x125   :  { %2974 = vmatpush3.bf16.msra.mxu0 %v3156_v24  ;;  %v552_v24 = vsub.s32 %v549_v23, %v4063_v54 }
 0x126   :  { %509 = vmatpush1.bf16.msra.mxu1 %v3157_v25  ;;  %2975 = vmatprep.subr.bf16.mxu0 %v3684_v5  ;;  %v3688_v25 = vmov -1e+09  }
 0x127   :  { %510 = vmatprep.subr.bf16.mxu1 %v3158_v26  ;;  %v545_v26 = vsel %vm544_vm3, 0.0, %v3688_v25 }
 0x129   :  { %2976 = vmatpush3.bf16.msra.mxu0 %v3160_v28  ;;  %v553_v28 = vrot.slane %v545_v26, %v552_v24 }
 0x12a   :  { %511 = vmatpush1.bf16.msra.mxu1 %v3161_v29  ;;  %2977 = vmatprep.subr.bf16.mxu0 %v3684_v5 }
 0x12b   :  { %512 = vmatprep.subr.bf16.mxu1 %v3162_v30  ;;  %v561_v29 = vrot.slane %v553_v28, %v552_v24 }
 0x12d   :  { %2978 = vmatpush3.bf16.msra.mxu0 %v3164_v31  ;;  %v4107_v30 = vrot.slane %v561_v29, %v4066_v55  ;;  %v554_v31 = vcombine.high %v553_v28, %v553_v28 }
 0x12e   :  { %513 = vmatpush1.bf16.msra.mxu1 %v3165_v32  ;;  %2979 = vmatprep.subr.bf16.mxu0 %v3684_v5 }
 0x12f   :  { %514 = vmatprep.subr.bf16.mxu1 %v3166_v33 }
 0x131   :  { %2980 = vmatpush3.bf16.msra.mxu0 %v3168_v34 }
 0x132   :  { %515 = vmatpush1.bf16.msra.mxu1 %v3169_v35  ;;  %3009 = vmatprep.subr.bf16.mxu0 %v3684_v5 }
 0x133   :  { %2985 = vmatprep.subr.bf16.mxu1 %v3684_v5 }
 0x1a7   :  { %v241_v7 = vpop.xlane.xlu0 %240 }
 0x1a8   :  { %v245_v8 = vmul.f32 0.0078125, %v241_v7  ;;  %v2717_v7 = vld [vmem:[#allocation6] ss:$0 sm:$0xff] }
 0x1aa   :  { %v3990_v9 = vsub.f32 %v236_v0, %v245_v8  ;;  %v417_v0 = vrot.slane %v408_v56, %v4070_v58 }
 0x1ab   :  { %v243_v10 = vpop.xlane.xlu0 %242 }
 0x1ac   :  { %v246_v11 = vmul.f32 0.0078125, %v243_v10  ;;  %v249_v12 = vmul.f32 %v3990_v9, %v3990_v9 }
 0x1ae   :  { %v3994_v13 = vsub.f32 %v237_v1, %v246_v11  ;;  %251 = vadd.xlane.f32.xlu1 %v249_v12 }
 0x1b0   :  { %v250_v14 = vmul.f32 %v3994_v13, %v3994_v13 }
 0x1b2   :  { %253 = vadd.xlane.f32.xlu1 %v250_v14 }
 0x23b   :  { %v252_v36 = vpop.xlane.xlu1 %251 }
 0x23c   :  { %v255_v37 = vmul.f32 0.0078125, %v252_v36 }
 0x23e   :  { %v257_v38 = vadd.f32 1e-12, %v255_v37 }
 0x23f   :  { %v254_v39 = vpop.xlane.xlu1 %253 }
 0x240   :  { %3282 = vrsqrt.f32 %v257_v38  ;;  %v256_v40 = vmul.f32 0.0078125, %v254_v39  ;;  %v568_v38 = vrot.slane %v554_v31, %v552_v24 }
 0x242   :  { %v258_v41 = vadd.f32 1e-12, %v256_v40  ;;  %v4112_v40 = vrot.slane %v568_v38, %v4066_v55 }
 0x244   :  { %3284 = vrsqrt.f32 %v258_v41 }
 0x24a   :  { %v3283_v42 = vpop.eup %3282 }
 0x24b   :  { %v261_v43 = vmul.f32 %v3283_v42, %v3990_v9 }
 0x24d   :  { %v269_v47 = vmul.f32 %v2715_v44, %v261_v43 }
 0x24e   :  { %v3285_v45 = vpop.eup %3284 }
 0x24f   :  { %v262_v46 = vmul.f32 %v3285_v45, %v3994_v13  ;;  %v4053_v50 = vadd.f32 %v2716_v48, %v269_v47 }
 0x251   :  { %v270_v49 = vmul.f32 %v2715_v44, %v262_v46 }
 0x253   :  { %v4055_v51 = vadd.f32 %v2716_v48, %v270_v49 }
 0x255   :  { %v279_v52 = vpack.c.bf16 %v4055_v51, %v4053_v50 }
 0x257   :  { %2982 = vmatmul.mubr.bf16.vlgmr.msra.gmra.mrb[0].mxu0 %v279_v52  ;;  %533 = vmatmul.mubr.bf16.vlgmr.msra.gmra.mrb[0].mxu1 %v279_v52 }
 0x258   :  { %2987 = vmatprep.mubr.msk.bf16.mxu1 %vm3685_vm0, %v3684_v5  ;;  %3011 = vmatprep.mubr.msk.bf16.mxu0 %vm3685_vm0, %v3684_v5 }
 0x32a   :  { %v385_v59 = vpop.f32.mrb[0].mxu0  ;;  %v534_v60 = vpop.f32.mrb[0].mxu1 }
 0x32b   :  { %v535_v61 = vadd.f32 %v534_v60, %v413_v57  ;;  %v2983_v62 = vpop.f32.mrb[1].mxu0  ;;  %v536_v63 = vpop.f32.mrb[1].mxu1  ;;  %v386_v11 = vadd.f32 %v2717_v7, %v385_v59 }
 0x32c   :  { %v388_v1 = vpop.f32.mrb[2].mxu0  ;;  %v538_v2 = vpop.f32.mrb[2].mxu1  ;;  %v537_v14 = vadd.f32 %v536_v63, %v417_v0 }
 0x32d   :  { %v4073_v3 = vpack.c.bf16 %v535_v61, %v535_v61  ;;  %v2984_v4 = vpop.f32.mrb[3].mxu0  ;;  %v540_v6 = vpop.f32.mrb[3].mxu1  ;;  %v539_v9 = vadd.f32 %v538_v2, %v413_v57  ;;  %v4082_v13 = vpack.c.bf16 %v386_v11, %v386_v11  ;;  %v389_v16 = vadd.f32 %v2717_v7, %v388_v1 }
 0x32e   :  { %v4075_v8 = vadd.f32 %v540_v6, %v417_v0  ;;  %v4091_v17 = vpack.c.bf16 %v537_v14, %v537_v14 }
 0x32f   :  { %v592_v10 = vsel %vm587_vm1, %v4073_v3, 0  ;;  %v4080_v12 = vpack.c.bf16 %v539_v9, %v539_v9  ;;  %v4093_v18 = vpack.c.bf16 %v389_v16, %v389_v16 }
 0x330   :  { %2986 = vmatpush3.bf16.xpose.msra.mxu1 %v592_v10  ;;  %v724_v19 = vsel %vm722_vm2, %v4091_v17, 0  ;;  %v4130_v7 = vpack.c.bf16 %v4075_v8, %v4075_v8 }
 0x331   :  { %2991 = vmatprep.subr.bf16.mxu1 %v3684_v5  ;;  %v638_v15 = vsel %vm587_vm1, %v4080_v12, 0 }
 0x332   :  { %v770_v14 = vsel %vm722_vm2, %v4130_v7, 0 }
 0x337   :  { %2988 = vmatmul.mubr.msk.bf16.vlgmr.msra.gmra.mrb[4].mxu1 %vm587_vm1, %v4082_v13 }
 0x338   :  { %2992 = vmatpush3.bf16.xpose.msra.mxu1 %v638_v15  ;;  %2993 = vmatprep.mubr.msk.bf16.mxu1 %vm3685_vm0, %v3684_v5 }
 0x339   :  { %2997 = vmatprep.subr.bf16.mxu1 %v3684_v5 }
 0x33f   :  { %2994 = vmatmul.mubr.msk.bf16.vlgmr.msra.gmra.mrb[8].mxu1 %vm587_vm1, %v4093_v18 }
 0x340   :  { %2998 = vmatpush3.bf16.msra.mxu1 %v724_v19  ;;  %2999 = vmatprep.mubr.msk.bf16.mxu1 %vm3685_vm0, %v3684_v5 }
 0x341   :  { %3003 = vmatprep.subr.bf16.mxu1 %v3684_v5 }
 0x40a   :  { %v628_v32 = vpop.f32.mrb[4].mxu1 }
 0x40b   :  { %v680_v33 = vmul.f32 0.17677669, %v628_v32  ;;  %v2989_v34 = vpop.f32.mrb[5].mxu1 }
 0x40c   :  { %v631_v35 = vpop.f32.mrb[6].mxu1 }
 0x40d   :  { %v2990_v36 = vpop.f32.mrb[7].mxu1  ;;  %v692_v37 = vadd.f32 %v4107_v30, %v680_v33 }
 0x40f   :  { %v695_v39 = vsel %vm694_vm4, %v692_v37, -inf }
 0x410   :  { %696 = vmax.xlane.f32.xlu0 %v695_v39 }
 0x412   :  { %v674_v41 = vpop.f32.mrb[8].mxu1 }
 0x413   :  { %v681_v42 = vmul.f32 0.17677669, %v674_v41  ;;  %v2995_v43 = vpop.f32.mrb[9].mxu1 }
 0x414   :  { %v677_v44 = vpop.f32.mrb[10].mxu1 }
 0x415   :  { %v2996_v45 = vpop.f32.mrb[11].mxu1  ;;  %v693_v46 = vadd.f32 %v4112_v40, %v681_v42 }
 0x417   :  { %v698_v47 = vsel %vm694_vm4, %v693_v46, -inf }
 0x418   :  { %699 = vmax.xlane.f32.xlu1 %v698_v47 }
 0x429   :  { %869 = vrot.lane.b32.xlu1 %v4080_v12, %s3689_s1 }
 0x49d   :  { %v697_v48 = vpop.xlane.xlu0 %696 }
 0x49e   :  { %v701_v49 = vsub.f32 %v692_v37, %v697_v48 }
 0x4a0   :  { %v703_v52 = vmul.f32 1.442695, %v701_v49 }
 0x4a2   :  { %3286 = vpow2.f32 %v703_v52 }
 0x4a5   :  { %v700_v53 = vpop.xlane.xlu1 %699 }
 0x4a6   :  { %v702_v56 = vsub.f32 %v693_v46, %v700_v53 }
 0x4a8   :  { %v705_v57 = vmul.f32 1.442695, %v702_v56 }
 0x4a9   :  { %v870_v0 = vpop.permute.xlu1 %869 }
 0x4aa   :  { %3288 = vpow2.f32 %v705_v57  ;;  %v875_v19 = vsel %vm587_vm1, %v870_v0, 0 }
 0x4ac   :  { %v3287_v59 = vpop.eup %3286 }
 0x4ad   :  { %v707_v60 = vsel %vm694_vm4, %v3287_v59, 0.0 }
 0x4ae   :  { %708 = vadd.xlane.f32.xlu0 %v707_v60 }
 0x4b4   :  { %v3289_v61 = vpop.eup %3288 }
 0x4b5   :  { %v710_v62 = vsel %vm694_vm4, %v3289_v61, 0.0 }
 0x4b6   :  { %711 = vadd.xlane.f32.xlu1 %v710_v62 }
 0x4c4   :  { %819 = vrot.lane.b32.xlu0 %v4073_v3, %s3689_s1 }
 0x4c7   :  { %817 = vrot.lane.b32.xlu1 %v4082_v13, %s3689_s1 }
 0x4cb   :  { %867 = vrot.lane.b32.xlu1 %v4093_v18, %s3689_s1 }
 0x53b   :  { %v709_v63 = vpop.xlane.xlu0 %708 }
 0x53c   :  { %3290 = vrcp.f32 %v709_v63 }
 0x53f   :  { %v820_v1 = vpop.permute.xlu0 %819 }
 0x540   :  { %v825_v2 = vsel %vm587_vm1, %v820_v1, 0 }
 0x541   :  { %3010 = vmatpush3.bf16.xpose.msra.mxu0 %v825_v2 }
 0x542   :  { %3021 = vmatprep.subr.bf16.mxu0 %v3684_v5 }
 0x543   :  { %v712_v4 = vpop.xlane.xlu1 %711 }
 0x544   :  { %3292 = vrcp.f32 %v712_v4 }
 0x546   :  { %v3291_v6 = vpop.eup %3290 }
 0x547   :  { %v714_v9 = vmul.f32 %v3291_v6, %v3287_v59  ;;  %v818_v10 = vpop.permute.xlu1 %817 }
 0x548   :  { %3012 = vmatmul.mubr.msk.bf16.vlgmr.msra.gmra.mrb[4].mxu0 %vm587_vm1, %v818_v10  ;;  %v3172_v10 = vld [vmem:[#allocation9 + $0x10] sm:$0xff]  }
 0x549   :  { %v717_v11 = vpack.c.bf16 %v714_v9, %v714_v9  ;;  %3023 = vmatprep.mubr.msk.bf16.mxu0 %vm3685_vm0, %v3684_v5 }
 0x54b   :  { %3000 = vmatmul.mubr.msk.bf16.vlgmr.msra.gmra.mrb[12].mxu1 %vm694_vm4, %v717_v11  ;;  %v868_v20 = vpop.permute.xlu1 %867 }
 0x54c   :  { %3004 = vmatpush3.bf16.msra.mxu1 %v770_v14  ;;  %3005 = vmatprep.mubr.msk.bf16.mxu1 %vm3685_vm0, %v3684_v5 }
 0x54d   :  { %3015 = vmatprep.subr.bf16.mxu1 %v3684_v5 }
 0x54e   :  { %v3293_v8 = vpop.eup %3292 }
 0x54f   :  { %v716_v15 = vmul.f32 %v3293_v8, %v3289_v61 }
 0x551   :  { %v718_v16 = vpack.c.bf16 %v716_v15, %v716_v15  ;;  %v3170_v15 = vld [vmem:[#allocation9] sm:$0xff]  }
 0x553   :  { %3006 = vmatmul.mubr.msk.bf16.vlgmr.msra.gmra.mrb[16].mxu1 %vm694_vm4, %v718_v16 }
 0x554   :  { %3017 = vmatprep.mubr.msk.bf16.mxu1 %vm3685_vm0, %v3684_v5 }
 0x555   :  { %3016 = vmatpush3.bf16.xpose.msra.mxu1 %v875_v19  ;;  %v3171_v19 = vld [vmem:[#allocation9 + $0x8] sm:$0xff]  }
 0x556   :  { %3027 = vmatprep.subr.bf16.mxu1 %v3684_v5 }
 0x55c   :  { %3018 = vmatmul.mubr.msk.bf16.vlgmr.msra.gmra.mrb[20].mxu1 %vm587_vm1, %v868_v20 }
 0x55d   :  { %3029 = vmatprep.mubr.msk.bf16.mxu1 %vm3685_vm0, %v3684_v5 }
 0x61b   :  { %v861_v21 = vpop.f32.mrb[4].mxu0 }
 0x61c   :  { %v917_v22 = vmul.f32 0.17677669, %v861_v21  ;;  %v3013_v23 = vpop.f32.mrb[5].mxu0 }
 0x61d   :  { %v864_v24 = vpop.f32.mrb[6].mxu0 }
 0x61e   :  { %v4149_v25 = vpop.f32.mrb[12].mxu1  ;;  %v3014_v26 = vpop.f32.mrb[7].mxu0  ;;  %v919_v28 = vadd.f32 %v917_v22, %v4107_v30  ;;  %v3173_v24 = vld [vmem:[#allocation9 + $0x18] sm:$0xff]  }
 0x61f   :  { %v3001_v29 = vpop.f32.mrb[13].mxu1 }
 0x620   :  { %v763_v31 = vpop.f32.mrb[14].mxu1  ;;  %v921_v32 = vsel %vm694_vm4, %v919_v28, -inf }
 0x621   :  { %v3002_v33 = vpop.f32.mrb[15].mxu1  ;;  %922 = vmax.xlane.f32.xlu0 %v921_v32 }
 0x626   :  { %v4153_v34 = vpop.f32.mrb[16].mxu1 }
 0x627   :  { %v812_v35 = vpack.c.bf16 %v4153_v34, %v4149_v25  ;;  %v3007_v36 = vpop.f32.mrb[17].mxu1 }
 0x628   :  { %v809_v37 = vpop.f32.mrb[18].mxu1 }
 0x629   :  { %v3008_v38 = vpop.f32.mrb[19].mxu1 }
 0x62f   :  { %v911_v39 = vpop.f32.mrb[20].mxu1 }
 0x630   :  { %v918_v41 = vmul.f32 0.17677669, %v911_v39  ;;  %v3019_v42 = vpop.f32.mrb[21].mxu1 }
 0x631   :  { %v914_v43 = vpop.f32.mrb[22].mxu1 }
 0x632   :  { %v3020_v44 = vpop.f32.mrb[23].mxu1  ;;  %v920_v45 = vadd.f32 %v918_v41, %v4112_v40 }
 0x634   :  { %v924_v46 = vsel %vm694_vm4, %v920_v45, -inf }
 0x635   :  { %925 = vmax.xlane.f32.xlu1 %v924_v46 }
 0x646   :  { %993 = vrot.lane.b32.xlu1 %v4130_v7, %s3689_s1 }
 0x64a   :  { %1160 = vrot.lane.b32.xlu1 %v4073_v3, %s3667_s29 }
 0x64e   :  { %1210 = vrot.lane.b32.xlu1 %v4080_v12, %s3667_s29 }
 0x652   :  { %1208 = vrot.lane.b32.xlu1 %v4093_v18, %s3667_s29 }
 0x6ae   :  { %v923_v47 = vpop.xlane.xlu0 %922 }
 0x6af   :  { %v927_v48 = vsub.f32 %v919_v28, %v923_v47 }
 0x6b1   :  { %v929_v49 = vmul.f32 1.442695, %v927_v48 }
 0x6b3   :  { %3294 = vpow2.f32 %v929_v49 }
 0x6bd   :  { %v3295_v52 = vpop.eup %3294 }
 0x6be   :  { %v933_v53 = vsel %vm694_vm4, %v3295_v52, 0.0 }
 0x6bf   :  { %934 = vadd.xlane.f32.xlu0 %v933_v53 }
 0x6c2   :  { %v926_v56 = vpop.xlane.xlu1 %925 }
 0x6c3   :  { %v928_v57 = vsub.f32 %v920_v45, %v926_v56 }
 0x6c5   :  { %v931_v59 = vmul.f32 1.442695, %v928_v57 }
 0x6c6   :  { %v994_v60 = vpop.permute.xlu1 %993 }
 0x6c7   :  { %3296 = vpow2.f32 %v931_v59  ;;  %v999_v61 = vsel %vm722_vm2, %v994_v60, 0 }
 0x6c8   :  { %3028 = vmatpush3.bf16.msra.mxu1 %v999_v61 }
 0x6c9   :  { %3041 = vmatprep.subr.bf16.mxu1 %v3684_v5 }
 0x6ca   :  { %v1161_v20 = vpop.permute.xlu1 %1160 }
 0x6ce   :  { %v1211_v21 = vpop.permute.xlu1 %1210 }
 0x6cf   :  { %v1216_v22 = vsel %vm587_vm1, %v1211_v21, 0 }
 0x6d1   :  { %v3297_v62 = vpop.eup %3296 }
 0x6d2   :  { %v936_v63 = vsel %vm694_vm4, %v3297_v62, 0.0  ;;  %v1209_v23 = vpop.permute.xlu1 %1208 }
 0x6d3   :  { %937 = vadd.xlane.f32.xlu0 %v936_v63 }
 0x6e9   :  { %945 = vrot.lane.b32.xlu0 %v4091_v17, %s3689_s1 }
 0x6ed   :  { %1158 = vrot.lane.b32.xlu0 %v4082_v13, %s3667_s29 }
 0x74c   :  { %v935_v0 = vpop.xlane.xlu0 %934 }
 0x74d   :  { %3298 = vrcp.f32 %v935_v0 }
 0x757   :  { %v3299_v1 = vpop.eup %3298 }
 0x758   :  { %v940_v4 = vmul.f32 %v3299_v1, %v3295_v52 }
 0x75a   :  { %v943_v11 = vpack.c.bf16 %v940_v4, %v940_v4 }
 0x760   :  { %v938_v2 = vpop.xlane.xlu0 %937 }
 0x761   :  { %3300 = vrcp.f32 %v938_v2 }
 0x764   :  { %v946_v6 = vpop.permute.xlu0 %945 }
 0x765   :  { %v951_v9 = vsel %vm722_vm2, %v946_v6, 0 }
 0x766   :  { %3022 = vmatpush3.bf16.msra.mxu0 %v951_v9 }
 0x767   :  { %3033 = vmatprep.subr.bf16.mxu0 %v3684_v5 }
 0x768   :  { %v1159_v39 = vpop.permute.xlu0 %1158 }
 0x769   :  { %3024 = vmatmul.mubr.msk.bf16.vlgmr.msra.gmra.mrb[8].mxu0 %vm694_vm4, %v943_v11 }
 0x76a   :  { %3034 = vmatpush3.bf16.msra.mxu0 %v3172_v10  ;;  %3037 = vmatprep.mubr.msk.bf16.mxu0 %vm3685_vm0, %v3684_v5 }
 0x76b   :  { %v3301_v14 = vpop.eup %3300  ;;  %3035 = vmatprep.subr.bf16.mxu0 %v3684_v5 }
 0x76c   :  { %v942_v8 = vmul.f32 %v3301_v14, %v3297_v62 }
 0x76e   :  { %v944_v16 = vpack.c.bf16 %v942_v8, %v942_v8  ;;  %3036 = vmatpush3.bf16.msra.mxu0 %v3173_v24 }
 0x76f   :  { %3049 = vmatprep.subr.bf16.mxu0 %v3684_v5 }
 0x770   :  { %3030 = vmatmul.mubr.msk.bf16.vlgmr.msra.gmra.mrb[24].mxu1 %vm694_vm4, %v944_v16 }
 0x771   :  { %3042 = vmatpush3.bf16.msra.mxu1 %v3170_v15  ;;  %3045 = vmatprep.mubr.msk.bf16.mxu1 %vm3685_vm0, %v3684_v5 }
 0x772   :  { %3043 = vmatprep.subr.bf16.mxu1 %v3684_v5 }
 0x775   :  { %3044 = vmatpush3.bf16.msra.mxu1 %v3171_v19 }
 0x776   :  { %3055 = vmatprep.subr.bf16.mxu1 %v3684_v5 }
 0x778   :  { %3046 = vmatmul.mubr.msk.bf16.vlgmr.msra.gmra.mrb[28].mxu1 %vm587_vm1, %v812_v35  ;;  %v1166_v35 = vsel %vm587_vm1, %v1161_v20, 0 }
 0x779   :  { %3057 = vmatprep.mubr.msk.bf16.mxu1 %vm3685_vm0, %v3684_v5 }
 0x77e   :  { %3056 = vmatpush3.bf16.xpose.msra.mxu1 %v1216_v22 }
 0x77f   :  { %3067 = vmatprep.subr.bf16.mxu1 %v3684_v5 }
 0x785   :  { %3058 = vmatmul.mubr.msk.bf16.vlgmr.msra.gmra.mrb[32].mxu1 %vm587_vm1, %v1209_v23 }
 0x786   :  { %3069 = vmatprep.mubr.msk.bf16.mxu1 %vm3685_vm0, %v3684_v5 }
 0x83c   :  { %v987_v25 = vpop.f32.mrb[8].mxu0 }
 0x83d   :  { %v3025_v26 = vpop.f32.mrb[9].mxu0 }
 0x83e   :  { %v990_v28 = vpop.f32.mrb[10].mxu0 }
 0x83f   :  { %v3026_v29 = vpop.f32.mrb[11].mxu0 }
 0x843   :  { %v1035_v31 = vpop.f32.mrb[24].mxu1 }
 0x844   :  { %v1041_v32 = vpack.c.bf16 %v1035_v31, %v987_v25  ;;  %v3031_v33 = vpop.f32.mrb[25].mxu1 }
 0x845   :  { %v1038_v34 = vpop.f32.mrb[26].mxu1 }
 0x846   :  { %v3032_v36 = vpop.f32.mrb[27].mxu1  ;;  %3038 = vmatmul.mubr.msk.bf16.vlgmr.msra.gmra.mrb[12].mxu0 %vm587_vm1, %v1041_v32  ;;  %v3174_v34 = vld [vmem:[#allocation9 + $0x20] sm:$0xff]  }
 0x847   :  { %3050 = vmatpush3.bf16.xpose.msra.mxu0 %v1166_v35  ;;  %3051 = vmatprep.mubr.msk.bf16.mxu0 %vm3685_vm0, %v3684_v5 }
 0x848   :  { %3061 = vmatprep.subr.bf16.mxu0 %v3684_v5 }
 0x84b   :  { %v1151_v37 = vpop.f32.mrb[28].mxu1 }
 0x84c   :  { %v3047_v38 = vpop.f32.mrb[29].mxu1 }
 0x84d   :  { %v1154_v41 = vpop.f32.mrb[30].mxu1 }
 0x84e   :  { %v3048_v42 = vpop.f32.mrb[31].mxu1  ;;  %3052 = vmatmul.mubr.msk.bf16.vlgmr.msra.gmra.mrb[16].mxu0 %vm587_vm1, %v1159_v39  ;;  %v3175_v39 = vld [vmem:[#allocation9 + $0x28] sm:$0xff]  }
 0x84f   :  { %3063 = vmatprep.mubr.msk.bf16.mxu0 %vm3685_vm0, %v3684_v5 }
 0x858   :  { %v1252_v43 = vpop.f32.mrb[32].mxu1 }
 0x859   :  { %v1259_v44 = vmul.f32 0.17677669, %v1252_v43  ;;  %v3059_v45 = vpop.f32.mrb[33].mxu1 }
 0x85a   :  { %v1255_v46 = vpop.f32.mrb[34].mxu1 }
 0x85b   :  { %v3060_v47 = vpop.f32.mrb[35].mxu1  ;;  %v1261_v48 = vadd.f32 %v1259_v44, %v4112_v40 }
 0x85d   :  { %v1265_v49 = vsel %vm694_vm4, %v1261_v48, -inf }
 0x85e   :  { %1266 = vmax.xlane.f32.xlu1 %v1265_v49 }
 0x86f   :  { %1334 = vrot.lane.b32.xlu1 %v4130_v7, %s3667_s29 }
 0x873   :  { %1447 = vrot.lane.b32.xlu1 %v4073_v3, %s3690_s24 }
 0x877   :  { %1497 = vrot.lane.b32.xlu1 %v4080_v12, %s3690_s24 }
 0x87b   :  { %1495 = vrot.lane.b32.xlu1 %v4093_v18, %s3690_s24 }
 0x8eb   :  { %v1267_v52 = vpop.xlane.xlu1 %1266 }
 0x8ec   :  { %v1269_v57 = vsub.f32 %v1261_v48, %v1267_v52 }
 0x8ee   :  { %v1272_v59 = vmul.f32 1.442695, %v1269_v57 }
 0x8ef   :  { %v1335_v53 = vpop.permute.xlu1 %1334 }
 0x8f0   :  { %v1340_v56 = vsel %vm722_vm2, %v1335_v53, 0  ;;  %3302 = vpow2.f32 %v1272_v59 }
 0x8f1   :  { %3068 = vmatpush3.bf16.msra.mxu1 %v1340_v56 }
 0x8f2   :  { %3081 = vmatprep.subr.bf16.mxu1 %v3684_v5 }
 0x8f3   :  { %v1448_v23 = vpop.permute.xlu1 %1447 }
 0x8f4   :  { %v1453_v25 = vsel %vm587_vm1, %v1448_v23, 0 }
 0x8f7   :  { %v1498_v48 = vpop.permute.xlu1 %1497 }
 0x8f8   :  { %v1503_v57 = vsel %vm587_vm1, %v1498_v48, 0 }
 0x8fa   :  { %v3303_v10 = vpop.eup %3302 }
 0x8fb   :  { %v1277_v11 = vsel %vm694_vm4, %v3303_v10, 0.0 }
 0x919   :  { %v1095_v60 = vpop.f32.mrb[12].mxu0 }
 0x91a   :  { %v4218_v61 = vadd.f32 %v1151_v37, %v1095_v60  ;;  %v3039_v62 = vpop.f32.mrb[13].mxu0 }
 0x91b   :  { %v1098_v3 = vpop.f32.mrb[14].mxu0 }
 0x91c   :  { %v4220_v63 = vadd.f32 %v1154_v41, %v1098_v3  ;;  %v3040_v12 = vpop.f32.mrb[15].mxu0 }
 0x921   :  { %v1202_v0 = vpop.f32.mrb[16].mxu0 }
 0x922   :  { %v1258_v18 = vmul.f32 0.17677669, %v1202_v0  ;;  %v3053_v1 = vpop.f32.mrb[17].mxu0 }
 0x923   :  { %v1205_v2 = vpop.f32.mrb[18].mxu0 }
 0x924   :  { %v3054_v4 = vpop.f32.mrb[19].mxu0  ;;  %v1260_v6 = vadd.f32 %v1258_v18, %v4107_v30 }
 0x926   :  { %v1262_v9 = vsel %vm694_vm4, %v1260_v6, -inf }
 0x927   :  { %1263 = vmax.xlane.f32.xlu0 %v1262_v9 }
 0x92b   :  { %1278 = vadd.xlane.f32.xlu0 %v1277_v11 }
 0x9b4   :  { %v1264_v14 = vpop.xlane.xlu0 %1263 }
 0x9b5   :  { %v1268_v8 = vsub.f32 %v1260_v6, %v1264_v14 }
 0x9b7   :  { %v1270_v15 = vmul.f32 1.442695, %v1268_v8 }
 0x9b8   :  { %v1279_v16 = vpop.xlane.xlu0 %1278 }
 0x9b9   :  { %3304 = vpow2.f32 %v1270_v15 }
 0x9ba   :  { %3306 = vrcp.f32 %v1279_v16 }
 0x9c3   :  { %v3305_v19 = vpop.eup %3304 }
 0x9c4   :  { %v3307_v20 = vpop.eup %3306  ;;  %v1274_v21 = vsel %vm694_vm4, %v3305_v19, 0.0 }
 0x9c5   :  { %v1283_v22 = vmul.f32 %v3307_v20, %v3303_v10  ;;  %1275 = vadd.xlane.f32.xlu0 %v1274_v21 }
 0x9c7   :  { %v1285_v24 = vpack.c.bf16 %v1283_v22, %v1283_v22 }
 0x9c9   :  { %3070 = vmatmul.mubr.msk.bf16.vlgmr.msra.gmra.mrb[36].mxu1 %vm694_vm4, %v1285_v24 }
 0x9ca   :  { %3082 = vmatpush3.bf16.xpose.msra.mxu1 %v1453_v25  ;;  %3083 = vmatprep.mubr.msk.bf16.mxu1 %vm3685_vm0, %v3684_v5 }
 0x9cb   :  { %3093 = vmatprep.subr.bf16.mxu1 %v3684_v5 }
 0x9db   :  { %1286 = vrot.lane.b32.xlu0 %v4091_v17, %s3667_s29 }
 0x9df   :  { %1445 = vrot.lane.b32.xlu0 %v4082_v13, %s3690_s24 }
 0xa52   :  { %v1276_v26 = vpop.xlane.xlu0 %1275 }
 0xa53   :  { %3308 = vrcp.f32 %v1276_v26 }
 0xa56   :  { %v1287_v28 = vpop.permute.xlu0 %1286 }
 0xa57   :  { %v1292_v29 = vsel %vm722_vm2, %v1287_v28, 0 }
 0xa58   :  { %3062 = vmatpush3.bf16.msra.mxu0 %v1292_v29 }
 0xa59   :  { %3073 = vmatprep.subr.bf16.mxu0 %v3684_v5 }
 0xa5a   :  { %v1446_v31 = vpop.permute.xlu0 %1445 }
 0xa5b   :  { %3084 = vmatmul.mubr.msk.bf16.vlgmr.msra.gmra.mrb[40].mxu1 %vm587_vm1, %v1446_v31 }
 0xa5c   :  { %3095 = vmatprep.mubr.msk.bf16.mxu1 %vm3685_vm0, %v3684_v5 }
 0xa5d   :  { %v3309_v32 = vpop.eup %3308 }
 0xa5e   :  { %v1281_v33 = vmul.f32 %v3309_v32, %v3305_v19 }
 0xa60   :  { %v1284_v35 = vpack.c.bf16 %v1281_v33, %v1281_v33 }
 0xa62   :  { %3064 = vmatmul.mubr.msk.bf16.vlgmr.msra.gmra.mrb[20].mxu0 %vm694_vm4, %v1284_v35  ;;  %v3177_v35 = vld [vmem:[#allocation9 + $0x38] sm:$0xff]  }
 0xa63   :  { %3074 = vmatpush3.bf16.msra.mxu0 %v3174_v34  ;;  %3077 = vmatprep.mubr.msk.bf16.mxu0 %vm3685_vm0, %v3684_v5  ;;  %v3176_v34 = vld [vmem:[#allocation9 + $0x30] sm:$0xff]  }
 0xa64   :  { %3075 = vmatprep.subr.bf16.mxu0 %v3684_v5 }
 0xa67   :  { %3076 = vmatpush3.bf16.msra.mxu0 %v3175_v39 }
 0xa68   :  { %3087 = vmatprep.subr.bf16.mxu0 %v3684_v5 }
 0xa9c   :  { %v1376_v13 = vpop.f32.mrb[36].mxu1 }
 0xa9d   :  { %v3071_v36 = vpop.f32.mrb[37].mxu1 }
 0xa9e   :  { %v1379_v37 = vpop.f32.mrb[38].mxu1 }
 0xa9f   :  { %v3072_v38 = vpop.f32.mrb[39].mxu1 }
 0xb2e   :  { %v1489_v41 = vpop.f32.mrb[40].mxu1 }
 0xb2f   :  { %v1545_v42 = vmul.f32 0.17677669, %v1489_v41  ;;  %v3085_v43 = vpop.f32.mrb[41].mxu1 }
 0xb30   :  { %v1492_v44 = vpop.f32.mrb[42].mxu1 }
 0xb31   :  { %v3086_v45 = vpop.f32.mrb[43].mxu1  ;;  %v1547_v46 = vadd.f32 %v1545_v42, %v4107_v30  ;;  %v1496_v30 = vpop.permute.xlu1 %1495 }
 0xb33   :  { %v1549_v47 = vsel %vm694_vm4, %v1547_v46, -inf }
 0xb34   :  { %1550 = vmax.xlane.f32.xlu0 %v1549_v47 }
 0xb35   :  { %v1328_v49 = vpop.f32.mrb[20].mxu0 }
 0xb36   :  { %v1382_v52 = vpack.c.bf16 %v1376_v13, %v1328_v49  ;;  %v3065_v53 = vpop.f32.mrb[21].mxu0 }
 0xb37   :  { %v1331_v56 = vpop.f32.mrb[22].mxu0 }
 0xb38   :  { %v3066_v59 = vpop.f32.mrb[23].mxu0  ;;  %3078 = vmatmul.mubr.msk.bf16.vlgmr.msra.gmra.mrb[24].mxu0 %vm587_vm1, %v1382_v52 }
 0xb39   :  { %3088 = vmatpush3.bf16.xpose.msra.mxu0 %v1503_v57  ;;  %3089 = vmatprep.mubr.msk.bf16.mxu0 %vm3685_vm0, %v3684_v5 }
 0xb3a   :  { %3099 = vmatprep.subr.bf16.mxu0 %v3684_v5 }
 0xb40   :  { %3090 = vmatmul.mubr.msk.bf16.vlgmr.msra.gmra.mrb[28].mxu0 %vm587_vm1, %v1496_v30  ;;  %v3178_v30 = vld [vmem:[%s4468_s12] ss:$16 sps:$4 sm:$0xff]  }
 0xb41   :  { %3101 = vmatprep.mubr.msk.bf16.mxu0 %vm3685_vm0, %v3684_v5 }
 0xbc1   :  { %v1551_v60 = vpop.xlane.xlu0 %1550 }
 0xbc2   :  { %v1555_v62 = vsub.f32 %v1547_v46, %v1551_v60  ;;  %v3180_v60 = vld [vmem:[%s4468_s12 + $0x4] ss:$16 sps:$4 sm:$0xff]  }
 0xbc4   :  { %v1557_v3 = vmul.f32 1.442695, %v1555_v62  ;;  %v3186_v62 = vld [vmem:[%s4468_s12 + $0x24] ss:$16 sps:$4 sm:$0xff]  }
 0xbc6   :  { %3310 = vpow2.f32 %v1557_v3  ;;  %v3189_v3 = vld [vmem:[%s4468_s12 + $0x2c] ss:$16 sps:$4 sm:$0xff]  }
 0xbd0   :  { %v3311_v12 = vpop.eup %3310 }
 0xbd1   :  { %v1561_v0 = vsel %vm694_vm4, %v3311_v12, 0.0 }
 0xbd2   :  { %1562 = vadd.xlane.f32.xlu0 %v1561_v0  ;;  %v3187_v0 = vld [vmem:[%s4468_s12 + $0x28] ss:$16 sps:$4 sm:$0xff]  }
 0xc0b   :  { %v1436_v18 = vpop.f32.mrb[24].mxu0 }
 0xc0c   :  { %v1443_v1 = vadd.f32 %v1436_v18, %v4218_v61  ;;  %v3079_v2 = vpop.f32.mrb[25].mxu0 }
 0xc0d   :  { %v1439_v4 = vpop.f32.mrb[26].mxu0 }
 0xc0e   :  { %v1444_v6 = vadd.f32 %v1439_v4, %v4220_v63  ;;  %v3080_v9 = vpop.f32.mrb[27].mxu0 }
 0xc13   :  { %v1539_v10 = vpop.f32.mrb[28].mxu0 }
 0xc14   :  { %v1546_v11 = vmul.f32 0.17677669, %v1539_v10  ;;  %v3091_v14 = vpop.f32.mrb[29].mxu0 }
 0xc15   :  { %v1542_v8 = vpop.f32.mrb[30].mxu0  ;;  %v3192_v14 = vld [vmem:[%s4468_s12 + $0x44] ss:$16 sps:$4 sm:$0xff]  }
 0xc16   :  { %v3092_v15 = vpop.f32.mrb[31].mxu0  ;;  %v1548_v16 = vadd.f32 %v1546_v11, %v4112_v40  ;;  %v3195_v8 = vld [vmem:[%s4468_s12 + $0x4c] ss:$16 sps:$4 sm:$0xff]  }
 0xc17   :  { %v3190_v15 = vld [vmem:[%s4468_s12 + $0x40] ss:$16 sps:$4 sm:$0xff]  }
 0xc18   :  { %v1552_v19 = vsel %vm694_vm4, %v1548_v16, -inf }
 0xc19   :  { %1553 = vmax.xlane.f32.xlu1 %v1552_v19  ;;  %v3198_v19 = vld [vmem:[%s4468_s12 + $0x64] ss:$16 sps:$4 sm:$0xff]  }
 0xc2a   :  { %1621 = vrot.lane.b32.xlu1 %v4130_v7, %s3690_s24 }
 0xc5f   :  { %v1563_v40 = vpop.xlane.xlu0 %1562 }
 0xca6   :  { %v1554_v20 = vpop.xlane.xlu1 %1553 }
 0xca7   :  { %v1556_v61 = vsub.f32 %v1548_v16, %v1554_v20  ;;  %v3193_v16 = vld [vmem:[%s4468_s12 + $0x48] ss:$16 sps:$4 sm:$0xff]   ;;  %v3201_v20 = vld [vmem:[%s4468_s12 + $0x6c] ss:$16 sps:$4 sm:$0xff]  }
 0xca9   :  { %v1559_v21 = vmul.f32 1.442695, %v1556_v61  ;;  %v3196_v61 = vld [vmem:[%s4468_s12 + $0x60] ss:$16 sps:$4 sm:$0xff]  }
 0xcaa   :  { %v1622_v22 = vpop.permute.xlu1 %1621 }
 0xcab   :  { %3312 = vpow2.f32 %v1559_v21  ;;  %v1627_v63 = vsel %vm722_vm2, %v1622_v22, 0  ;;  %v3199_v21 = vld [vmem:[%s4468_s12 + $0x68] ss:$16 sps:$4 sm:$0xff]   ;;  %v3204_v22 = vld [vmem:[%s4468_s12 + $0x84] ss:$16 sps:$4 sm:$0xff]  }
 0xcac   :  { %3100 = vmatpush3.bf16.msra.mxu0 %v1627_v63  ;;  %3314 = vrcp.f32 %v1563_v40  ;;  %v3207_v63 = vld [vmem:[%s4468_s12 + $0x8c] ss:$16 sps:$4 sm:$0xff]   ;;  %v3210_v40 = vld [vmem:[%s4468_s12 + $0xa4] ss:$16 sps:$4 sm:$0xff]  }
 0xcad   :  { %1998 = vmatprep.subr.bf16.mxu0 %v3180_v60  ;;  %v3230_v60 = vld [vmem:[#allocation16 + $0x48] sm:$0xff]  }
 0xcb5   :  { %v3313_v23 = vpop.eup %3312 }
 0xcb6   :  { %v1564_v24 = vsel %vm694_vm4, %v3313_v23, 0.0  ;;  %v3315_v25 = vpop.eup %3314 }
 0xcb7   :  { %1565 = vadd.xlane.f32.xlu0 %v1564_v24  ;;  %v1568_v7 = vmul.f32 %v3315_v25, %v3311_v12  ;;  %v3184_v12 = vld [vmem:[%s4468_s12 + $0x20] ss:$16 sps:$4 sm:$0xff]   ;;  %v3205_v24 = vld [vmem:[%s4468_s12 + $0x88] ss:$16 sps:$4 sm:$0xff]   ;;  %v3213_v25 = vld [vmem:[%s4468_s12 + $0xac] ss:$16 sps:$4 sm:$0xff]  }
 0xcb9   :  { %v1571_v31 = vpack.c.bf16 %v1568_v7, %v1568_v7  ;;  %v3211_v7 = vld [vmem:[%s4468_s12 + $0xa8] ss:$16 sps:$4 sm:$0xff]  }
 0xccd   :  { %1573 = vrot.lane.b32.xlu0 %v4091_v17, %s3690_s24 }
 0xd44   :  { %v1566_v26 = vpop.xlane.xlu0 %1565 }
 0xd45   :  { %3316 = vrcp.f32 %v1566_v26  ;;  %v3208_v26 = vld [vmem:[%s4468_s12 + $0xa0] ss:$16 sps:$4 sm:$0xff]  }
 0xd48   :  { %v1574_v28 = vpop.permute.xlu0 %1573 }
 0xd49   :  { %v1579_v29 = vsel %vm722_vm2, %v1574_v28, 0  ;;  %v3214_v28 = vld [vmem:[%s4468_s12 + $0xc0] ss:$16 sps:$4 sm:$0xff]  }
 0xd4a   :  { %3094 = vmatpush3.bf16.msra.mxu1 %v1579_v29  ;;  %v3216_v29 = vld [vmem:[%s4468_s12 + $0xc4] ss:$16 sps:$4 sm:$0xff]  }
 0xd4b   :  { %3105 = vmatprep.subr.bf16.mxu1 %v3684_v5 }
 0xd4d   :  { %3096 = vmatmul.mubr.msk.bf16.vlgmr.msra.gmra.mrb[44].mxu1 %vm694_vm4, %v1571_v31  ;;  %v3217_v31 = vld [vmem:[%s4468_s12 + $0xc8] ss:$16 sps:$4 sm:$0xff]  }
 0xd4e   :  { %3109 = vmatprep.mubr.msk.bf16.mxu1 %vm3685_vm0, %v3684_v5  ;;  %3106 = vmatpush3.bf16.msra.mxu1 %v3176_v34  ;;  %v3220_v34 = vld [vmem:[%s4468_s12 + $0xe0] ss:$16 sps:$4 sm:$0xff]  }
 0xd4f   :  { %v3317_v32 = vpop.eup %3316  ;;  %3107 = vmatprep.subr.bf16.mxu1 %v3684_v5  ;;  %v2776_v5 = vld [vmem:[#allocation10] ss:$0 sm:$0xff] }
 0xd50   :  { %v1570_v17 = vmul.f32 %v3317_v32, %v3313_v23  ;;  %v3202_v23 = vld [vmem:[%s4468_s12 + $0x80] ss:$16 sps:$4 sm:$0xff]   ;;  %v3219_v32 = vld [vmem:[%s4468_s12 + $0xcc] ss:$16 sps:$4 sm:$0xff]  }
 0xd52   :  { %v1572_v33 = vpack.c.bf16 %v1570_v17, %v1570_v17  ;;  %3108 = vmatpush3.bf16.msra.mxu1 %v3177_v35  ;;  %v3222_v17 = vld [vmem:[%s4468_s12 + $0xe4] ss:$16 sps:$4 sm:$0xff]   ;;  %v3223_v35 = vld [vmem:[%s4468_s12 + $0xe8] ss:$16 sps:$4 sm:$0xff]  }
 0xd54   :  { %3102 = vmatmul.mubr.msk.bf16.vlgmr.msra.gmra.mrb[32].mxu0 %vm694_vm4, %v1572_v33  ;;  %v3225_v33 = vld [vmem:[%s4468_s12 + $0xec] ss:$16 sps:$4 sm:$0xff]  }
 0xd55   :  { %2030 = vmatprep.mubr.bf16.mxu0 %v3686_v27  ;;  %1999 = vmatpush1.bf16.msra.mxu0 %v3178_v30  ;;  %v3229_v30 = vld [vmem:[#allocation16 + $0x80] sm:$0xff]  }
 0xd56   :  { %2000 = vmatprep.subr.bf16.mxu0 %v3186_v62  ;;  %v3233_v62 = vld [vmem:[#allocation16 + $0x88] sm:$0xff]  }
 0xd59   :  { %2001 = vmatpush1.bf16.msra.mxu0 %v3184_v12  ;;  %v3235_v12 = vld [vmem:[#allocation16 + $0xd0] sm:$0xff]  }
 0xd5a   :  { %2002 = vmatprep.subr.bf16.mxu0 %v3192_v14  ;;  %v3245_v14 = vld [vmem:[#allocation16 + $0xa0] sm:$0xff]  }
 0xd5d   :  { %2003 = vmatpush1.bf16.msra.mxu0 %v3190_v15  ;;  %v3247_v15 = vld [vmem:[#allocation16 + $0xe8] sm:$0xff]  }
 0xd5e   :  { %2004 = vmatprep.subr.bf16.mxu0 %v3198_v19  ;;  %v3249_v19 = vld [vmem:[#allocation16 + $0xa8] sm:$0xff]  }
 0xd61   :  { %2005 = vmatpush1.bf16.msra.mxu0 %v3196_v61  ;;  %v3251_v61 = vld [vmem:[#allocation16 + $0xf0] sm:$0xff]  }
 0xd62   :  { %2006 = vmatprep.subr.bf16.mxu0 %v3204_v22  ;;  %v3253_v22 = vld [vmem:[#allocation16 + $0xb0] sm:$0xff]  }
 0xd65   :  { %2007 = vmatpush1.bf16.msra.mxu0 %v3202_v23  ;;  %v3255_v23 = vld [vmem:[#allocation16 + $0xf8] sm:$0xff]  }
 0xd66   :  { %2008 = vmatprep.subr.bf16.mxu0 %v3210_v40  ;;  %v3257_v40 = vld [vmem:[#allocation16 + $0xb8] sm:$0xff]  }
 0xd69   :  { %2009 = vmatpush1.bf16.msra.mxu0 %v3208_v26  ;;  %v1816_v26 = vld [vmem:[#allocation15] sm:$0xf] }
 0xd6a   :  { %2010 = vmatprep.subr.bf16.mxu0 %v3216_v29 }
 0xd6d   :  { %2011 = vmatpush1.bf16.msra.mxu0 %v3214_v28  ;;  %v1821_v28 = vrot.slane %v1816_v26, %v4066_v55 }
 0xd6e   :  { %2012 = vmatprep.subr.bf16.mxu0 %v3222_v17 }
 0xd71   :  { %2013 = vmatpush1.bf16.msra.mxu0 %v3220_v34 }
 0xe20   :  { %v1615_v13 = vpop.f32.mrb[44].mxu1 }
 0xe21   :  { %v3097_v36 = vpop.f32.mrb[45].mxu1 }
 0xe22   :  { %v1618_v37 = vpop.f32.mrb[46].mxu1 }
 0xe23   :  { %v3098_v38 = vpop.f32.mrb[47].mxu1 }
 0xe27   :  { %v1663_v39 = vpop.f32.mrb[32].mxu0 }
 0xe28   :  { %v1669_v41 = vpack.c.bf16 %v1663_v39, %v1615_v13  ;;  %v3103_v42 = vpop.f32.mrb[33].mxu0 }
 0xe29   :  { %v1666_v43 = vpop.f32.mrb[34].mxu0 }
 0xe2a   :  { %v3104_v44 = vpop.f32.mrb[35].mxu0  ;;  %3110 = vmatmul.mubr.msk.bf16.vlgmr.msra.gmra.mrb[48].mxu1 %vm587_vm1, %v1669_v41  ;;  %v2777_v43 = vld [vmem:[#allocation12] ss:$0 sm:$0xff] }
 0xe2b   :  { %2073 = vmatprep.mubr.bf16.mxu1 %v3686_v27 }
 0xefd   :  { %v1723_v45 = vpop.f32.mrb[48].mxu1 }
 0xefe   :  { %v1730_v46 = vadd.f32 %v1723_v45, %v1443_v1  ;;  %v3111_v47 = vpop.f32.mrb[49].mxu1 }
 0xeff   :  { %v1726_v48 = vpop.f32.mrb[50].mxu1 }
 0xf00   :  { %v1732_v49 = vadd.f32 %v1730_v46, %v4053_v50  ;;  %v1731_v52 = vadd.f32 %v1726_v48, %v1444_v6  ;;  %v3112_v53 = vpop.f32.mrb[51].mxu1  ;;  %v3181_v50 = vld [vmem:[%s4468_s12 + $0x8] ss:$16 sps:$4 sm:$0xff]  }
 0xf01   :  { %v2778_v48 = vld [vmem:[#allocation13] ss:$0 sm:$0xff] }
 0xf02   :  { %v1733_v56 = vadd.f32 %v1731_v52, %v4055_v51  ;;  %v1741_v57 = vadd.f32 %v2776_v5, %v1732_v49  ;;  %v3183_v51 = vld [vmem:[%s4468_s12 + $0xc] ss:$16 sps:$4 sm:$0xff]  }
 0xf03   :  { %2041 = vmatprep.subr.bf16.mxu1 %v3183_v51  ;;  %v3232_v51 = vld [vmem:[#allocation16 + $0x8] sm:$0xff]  }
 0xf04   :  { %1745 = vadd.xlane.f32.xlu1 %v1741_v57  ;;  %v1742_v59 = vadd.f32 %v2776_v5, %v1733_v56  ;;  %2042 = vmatpush1.bf16.msra.mxu1 %v3181_v50  ;;  %v3226_v56 = vld [vmem:[#allocation16 + $0x40] sm:$0xff]   ;;  %v3231_v50 = vld [vmem:[#allocation16 + $0xc8] sm:$0xff]  }
 0xf05   :  { %2043 = vmatprep.subr.bf16.mxu1 %v3189_v3  ;;  %2921 = vmatprep.subr.bf16.mxu0 %v3226_v56  ;;  %v3234_v3 = vld [vmem:[#allocation16 + $0x50] sm:$0xff]  }
 0xf06   :  { %1747 = vadd.xlane.f32.xlu0 %v1742_v59 }
 0xf08   :  { %2044 = vmatpush1.bf16.msra.mxu1 %v3187_v0  ;;  %v3236_v0 = vld [vmem:[#allocation16 + $0x10] sm:$0xff]  }
 0xf09   :  { %2045 = vmatprep.subr.bf16.mxu1 %v3195_v8  ;;  %v3246_v8 = vld [vmem:[#allocation16 + $0x68] sm:$0xff]  }
 0xf0c   :  { %2046 = vmatpush1.bf16.msra.mxu1 %v3193_v16  ;;  %v3248_v16 = vld [vmem:[#allocation16 + $0x28] sm:$0xff]  }
 0xf0d   :  { %2047 = vmatprep.subr.bf16.mxu1 %v3201_v20  ;;  %v3250_v20 = vld [vmem:[#allocation16 + $0x70] sm:$0xff]  }
 0xf10   :  { %2048 = vmatpush1.bf16.msra.mxu1 %v3199_v21  ;;  %v3252_v21 = vld [vmem:[#allocation16 + $0x30] sm:$0xff]  }
 0xf11   :  { %2049 = vmatprep.subr.bf16.mxu1 %v3207_v63  ;;  %v3254_v63 = vld [vmem:[#allocation16 + $0x78] sm:$0xff]  }
 0xf14   :  { %2050 = vmatpush1.bf16.msra.mxu1 %v3205_v24  ;;  %v3256_v24 = vld [vmem:[#allocation16 + $0x38] sm:$0xff]  }
 0xf15   :  { %2051 = vmatprep.subr.bf16.mxu1 %v3213_v25  ;;  %v1828_v25 = vsub.s32 2, %v4063_v54 }
 0xf17   :  { %v1829_v29 = vrot.slane %v1816_v26, %v1828_v25 }
 0xf18   :  { %2052 = vmatpush1.bf16.msra.mxu1 %v3211_v7  ;;  %v1832_v7 = vsub.s32 3, %v4063_v54 }
 0xf19   :  { %2053 = vmatprep.subr.bf16.mxu1 %v3219_v32 }
 0xf1a   :  { %v1833_v32 = vrot.slane %v1816_v26, %v1832_v7 }
 0xf1c   :  { %2054 = vmatpush1.bf16.msra.mxu1 %v3217_v31  ;;  %v1825_v31 = vrot.slane %v1816_v26, %v4070_v58 }
 0xf1d   :  { %2055 = vmatprep.subr.bf16.mxu1 %v3225_v33 }
 0xf20   :  { %2056 = vmatpush1.bf16.msra.mxu1 %v3223_v35 }
 0xf91   :  { %v1746_v18 = vpop.xlane.xlu1 %1745 }
 0xf92   :  { %v1749_v1 = vmul.f32 0.0078125, %v1746_v18  ;;  %v3237_v18 = vld [vmem:[#allocation16 + $0x90] sm:$0xff]  }
 0xf93   :  { %v1748_v2 = vpop.xlane.xlu0 %1747 }
 0xf94   :  { %v4302_v4 = vsub.f32 %v1741_v57, %v1749_v1  ;;  %v1750_v6 = vmul.f32 0.0078125, %v1748_v2  ;;  %v3227_v57 = vld [vmem:[#allocation16 + $0xc0] sm:$0xff]   ;;  %v3238_v1 = vld [vmem:[#allocation16 + $0x58] sm:$0xff]  }
 0xf95   :  { %2943 = vmatprep.subr.bf16.mxu1 %v3227_v57  ;;  %v3239_v2 = vld [vmem:[#allocation16 + $0xd8] sm:$0xff]  }
 0xf96   :  { %v4304_v9 = vsub.f32 %v1742_v59, %v1750_v6  ;;  %v1753_v10 = vmul.f32 %v4302_v4, %v4302_v4  ;;  %v3228_v59 = vld [vmem:[#allocation16] sm:$0xff]   ;;  %v3241_v6 = vld [vmem:[#allocation16 + $0x98] sm:$0xff]  }
 0xf98   :  { %1755 = vadd.xlane.f32.xlu0 %v1753_v10  ;;  %v1754_v11 = vmul.f32 %v4304_v9, %v4304_v9  ;;  %v3243_v10 = vld [vmem:[#allocation16 + $0xe0] sm:$0xff]  }
 0xf9a   :  { %1757 = vadd.xlane.f32.xlu1 %v1754_v11  ;;  %v3244_v11 = vld [vmem:[#allocation16 + $0x20] sm:$0xff]  }
0x1025   :  { %v1756_v13 = vpop.xlane.xlu0 %1755 }
0x1026   :  { %v1759_v36 = vmul.f32 0.0078125, %v1756_v13 }
0x1027   :  { %v1758_v37 = vpop.xlane.xlu1 %1757 }
0x1028   :  { %v1761_v38 = vadd.f32 1e-12, %v1759_v36  ;;  %v1760_v39 = vmul.f32 0.0078125, %v1758_v37 }
0x102a   :  { %3318 = vrsqrt.f32 %v1761_v38  ;;  %v1762_v41 = vadd.f32 1e-12, %v1760_v39 }
0x102c   :  { %3320 = vrsqrt.f32 %v1762_v41 }
0x1034   :  { %v3319_v42 = vpop.eup %3318 }
0x1035   :  { %v1765_v44 = vmul.f32 %v3319_v42, %v4302_v4  ;;  %v3240_v4 = vld [vmem:[#allocation16 + $0x18] sm:$0xff]  }
0x1036   :  { %v3321_v45 = vpop.eup %3320 }
0x1037   :  { %v1766_v46 = vmul.f32 %v3321_v45, %v4304_v9  ;;  %v1773_v47 = vmul.f32 %v2777_v43, %v1765_v44  ;;  %v3242_v9 = vld [vmem:[#allocation16 + $0x60] sm:$0xff]  }
0x1039   :  { %v1774_v5 = vmul.f32 %v2777_v43, %v1766_v46  ;;  %v4384_v49 = vadd.f32 %v2778_v48, %v1773_v47 }
0x103b   :  { %v4386_v52 = vadd.f32 %v2778_v48, %v1774_v5 }
0x103d   :  { %v1783_v53 = vpack.c.bf16 %v4386_v52, %v4384_v49 }
0x103f   :  { %2031 = vmatmul.mubr.bf16.vlgmr.msra.gmra.mrb[36].mxu0 %v1783_v53  ;;  %2074 = vmatmul.mubr.bf16.vlgmr.msra.gmra.mrb[52].mxu1 %v1783_v53 }
0x1040   :  { %2922 = vmatpush3.bf16.msra.mxu0 %v3228_v59  ;;  %2944 = vmatpush3.bf16.msra.mxu1 %v3229_v30 }
0x1041   :  { %2923 = vmatprep.subr.bf16.mxu0 %v3230_v60  ;;  %2945 = vmatprep.subr.bf16.mxu1 %v3231_v50 }
0x1044   :  { %2924 = vmatpush3.bf16.msra.mxu0 %v3232_v51  ;;  %2946 = vmatpush3.bf16.msra.mxu1 %v3233_v62 }
0x1045   :  { %2925 = vmatprep.subr.bf16.mxu0 %v3234_v3  ;;  %2947 = vmatprep.subr.bf16.mxu1 %v3235_v12 }
0x1048   :  { %2926 = vmatpush3.bf16.msra.mxu0 %v3236_v0  ;;  %2948 = vmatpush3.bf16.msra.mxu1 %v3237_v18 }
0x1049   :  { %2927 = vmatprep.subr.bf16.mxu0 %v3238_v1  ;;  %2949 = vmatprep.subr.bf16.mxu1 %v3239_v2 }
0x104c   :  { %2928 = vmatpush3.bf16.msra.mxu0 %v3240_v4  ;;  %2950 = vmatpush3.bf16.msra.mxu1 %v3241_v6 }
0x104d   :  { %2929 = vmatprep.subr.bf16.mxu0 %v3242_v9  ;;  %2951 = vmatprep.subr.bf16.mxu1 %v3243_v10 }
0x1050   :  { %2930 = vmatpush3.bf16.msra.mxu0 %v3244_v11  ;;  %2952 = vmatpush3.bf16.msra.mxu1 %v3245_v14 }
0x1051   :  { %2931 = vmatprep.subr.bf16.mxu0 %v3246_v8  ;;  %2953 = vmatprep.subr.bf16.mxu1 %v3247_v15 }
0x1054   :  { %2932 = vmatpush3.bf16.msra.mxu0 %v3248_v16  ;;  %2954 = vmatpush3.bf16.msra.mxu1 %v3249_v19 }
0x1055   :  { %2933 = vmatprep.subr.bf16.mxu0 %v3250_v20  ;;  %2955 = vmatprep.subr.bf16.mxu1 %v3251_v61 }
0x1058   :  { %2934 = vmatpush3.bf16.msra.mxu0 %v3252_v21  ;;  %2956 = vmatpush3.bf16.msra.mxu1 %v3253_v22 }
0x1059   :  { %2935 = vmatprep.subr.bf16.mxu0 %v3254_v63  ;;  %2957 = vmatprep.subr.bf16.mxu1 %v3255_v23 }
0x105c   :  { %2936 = vmatpush3.bf16.msra.mxu0 %v3256_v24  ;;  %2958 = vmatpush3.bf16.msra.mxu1 %v3257_v40 }
0x1112   :  { %v2032_v17 = vpop.f32.mrb[36].mxu0  ;;  %v2075_v33 = vpop.f32.mrb[52].mxu1 }
0x1113   :  { %v4394_v34 = vadd.f32 %v2032_v17, %v1821_v28  ;;  %v4396_v35 = vadd.f32 %v2075_v33, %v1829_v29  ;;  %v2034_v13 = vpop.f32.mrb[37].mxu0  ;;  %v2077_v36 = vpop.f32.mrb[53].mxu1 }
0x1114   :  { %v4398_v37 = vadd.f32 %v2034_v13, %v1825_v31  ;;  %v4400_v38 = vadd.f32 %v2077_v36, %v1833_v32  ;;  %v2036_v39 = vpop.f32.mrb[38].mxu0  ;;  %v2079_v54 = vpop.f32.mrb[54].mxu1 }
0x1115   :  { %v2092_v41 = vmul.f32 0.044715, %v4394_v34  ;;  %v2094_v42 = vmul.f32 0.044715, %v4396_v35  ;;  %v2037_v43 = vadd.f32 %v2036_v39, %v1821_v28  ;;  %v2080_v44 = vadd.f32 %v2079_v54, %v1829_v29  ;;  %v2038_v45 = vpop.f32.mrb[39].mxu0  ;;  %v2081_v46 = vpop.f32.mrb[55].mxu1 }
0x1116   :  { %v2093_v47 = vmul.f32 0.044715, %v4398_v37  ;;  %v2095_v48 = vmul.f32 0.044715, %v4400_v38  ;;  %v4406_v5 = vadd.f32 %v2038_v45, %v1825_v31  ;;  %v4408_v53 = vadd.f32 %v2081_v46, %v1833_v32 }
0x1117   :  { %v2100_v56 = vmul.f32 %v2092_v41, %v4394_v34  ;;  %v2102_v57 = vmul.f32 %v2094_v42, %v4396_v35  ;;  %v2096_v59 = vmul.f32 0.044715, %v2037_v43  ;;  %v2098_v30 = vmul.f32 0.044715, %v2080_v44 }
0x1118   :  { %v2101_v60 = vmul.f32 %v2093_v47, %v4398_v37  ;;  %v2103_v50 = vmul.f32 %v2095_v48, %v4400_v38  ;;  %v2097_v51 = vmul.f32 0.044715, %v4406_v5  ;;  %v2099_v62 = vmul.f32 0.044715, %v4408_v53 }
0x1119   :  { %v2108_v3 = vmul.f32 %v2100_v56, %v4394_v34  ;;  %v2110_v12 = vmul.f32 %v2102_v57, %v4396_v35  ;;  %v2104_v0 = vmul.f32 %v2096_v59, %v2037_v43  ;;  %v2106_v18 = vmul.f32 %v2098_v30, %v2080_v44 }
0x111a   :  { %v2109_v1 = vmul.f32 %v2101_v60, %v4398_v37  ;;  %v2111_v2 = vmul.f32 %v2103_v50, %v4400_v38  ;;  %v2105_v4 = vmul.f32 %v2097_v51, %v4406_v5  ;;  %v2107_v6 = vmul.f32 %v2099_v62, %v4408_v53 }
0x111b   :  { %v2116_v9 = vadd.f32 %v2108_v3, %v4394_v34  ;;  %v2118_v10 = vadd.f32 %v2110_v12, %v4396_v35  ;;  %v2112_v11 = vmul.f32 %v2104_v0, %v2037_v43  ;;  %v2114_v14 = vmul.f32 %v2106_v18, %v2080_v44 }
0x111c   :  { %v2113_v8 = vmul.f32 %v2105_v4, %v4406_v5  ;;  %v2115_v15 = vmul.f32 %v2107_v6, %v4408_v53  ;;  %v2117_v21 = vadd.f32 %v2109_v1, %v4398_v37  ;;  %v2119_v24 = vadd.f32 %v2111_v2, %v4400_v38 }
0x111d   :  { %v2124_v16 = vmul.f32 0.7978846, %v2116_v9  ;;  %v2126_v19 = vmul.f32 0.7978846, %v2118_v10  ;;  %v2120_v20 = vadd.f32 %v2112_v11, %v2037_v43  ;;  %v2122_v61 = vadd.f32 %v2114_v14, %v2080_v44 }
0x111e   :  { %v2121_v22 = vadd.f32 %v2113_v8, %v4406_v5  ;;  %v2125_v40 = vmul.f32 0.7978846, %v2117_v21  ;;  %v2123_v26 = vadd.f32 %v2115_v15, %v4408_v53  ;;  %v2127_v7 = vmul.f32 0.7978846, %v2119_v24 }
0x111f   :  { %3322 = vtanh.f32 %v2124_v16  ;;  %v2128_v63 = vmul.f32 0.7978846, %v2120_v20  ;;  %v2130_v23 = vmul.f32 0.7978846, %v2122_v61  ;;  %v2084_v36 = vmul.f32 0.5, %v4394_v34 }
0x1120   :  { %3324 = vtanh.f32 %v2126_v19  ;;  %v2129_v25 = vmul.f32 0.7978846, %v2121_v22  ;;  %v2131_v28 = vmul.f32 0.7978846, %v2123_v26  ;;  %v2088_v39 = vmul.f32 0.5, %v2037_v43 }
0x1121   :  { %3326 = vtanh.f32 %v2128_v63  ;;  %v2086_v42 = vmul.f32 0.5, %v4396_v35  ;;  %v2090_v45 = vmul.f32 0.5, %v2080_v44  ;;  %v2085_v48 = vmul.f32 0.5, %v4398_v37  ;;  %v3263_v26 = vld [vmem:[#allocation22 + $0x14] ss:$8 sps:$4 sm:$0xff]  }
0x1122   :  { %3328 = vtanh.f32 %v2130_v23  ;;  %v2089_v60 = vmul.f32 0.5, %v4406_v5  ;;  %v2087_v43 = vmul.f32 0.5, %v4400_v38  ;;  %v2091_v3 = vmul.f32 0.5, %v4408_v53  ;;  %v2811_v38 = vld [vmem:[#allocation18] ss:$0 sm:$0xff] }
0x1123   :  { %3330 = vtanh.f32 %v2125_v40  ;;  %v3258_v40 = vld [vmem:[#allocation22] ss:$8 sps:$4 sm:$0xff]  }
0x1124   :  { %3332 = vtanh.f32 %v2129_v25  ;;  %v3260_v25 = vld [vmem:[#allocation22 + $0x4] ss:$8 sps:$4 sm:$0xff]  }
0x1125   :  { %3334 = vtanh.f32 %v2127_v7  ;;  %2656 = vmatprep.subr.bf16.mxu0 %v3260_v25  ;;  %v3261_v7 = vld [vmem:[#allocation22 + $0x10] ss:$8 sps:$4 sm:$0xff]  }
0x1126   :  { %3336 = vtanh.f32 %v2131_v28 }
0x1129   :  { %v3323_v29 = vpop.eup %3322 }
0x112a   :  { %v3325_v31 = vpop.eup %3324  ;;  %v2140_v32 = vadd.f32 1.0, %v3323_v29 }
0x112b   :  { %v3327_v17 = vpop.eup %3326  ;;  %v2142_v33 = vadd.f32 1.0, %v3325_v31 }
0x112c   :  { %v3329_v13 = vpop.eup %3328  ;;  %v2144_v54 = vadd.f32 1.0, %v3327_v17  ;;  %v2148_v57 = vmul.f32 %v2140_v32, %v2084_v36  ;;  %v3264_v36 = vld [vmem:[#allocation22 + $0x20] ss:$8 sps:$4 sm:$0xff]  }
0x112d   :  { %v3331_v41 = vpop.eup %3330  ;;  %v2146_v46 = vadd.f32 1.0, %v3329_v13  ;;  %v2150_v51 = vmul.f32 %v2142_v33, %v2086_v42  ;;  %v3272_v42 = vld [vmem:[#allocation22 + $0x44] ss:$8 sps:$4 sm:$0xff]  }
0x112e   :  { %v3333_v47 = vpop.eup %3332  ;;  %v2141_v56 = vadd.f32 1.0, %v3331_v41  ;;  %v2152_v59 = vmul.f32 %v2144_v54, %v2088_v39  ;;  %v3269_v39 = vld [vmem:[#allocation22 + $0x34] ss:$8 sps:$4 sm:$0xff]   ;;  %v3267_v54 = vld [vmem:[#allocation22 + $0x30] ss:$8 sps:$4 sm:$0xff]  }
0x112f   :  { %v3335_v30 = vpop.eup %3334  ;;  %v2145_v50 = vadd.f32 1.0, %v3333_v47  ;;  %v2154_v62 = vmul.f32 %v2146_v46, %v2090_v45  ;;  %v3270_v41 = vld [vmem:[#allocation22 + $0x40] ss:$8 sps:$4 sm:$0xff]   ;;  %v3275_v45 = vld [vmem:[#allocation22 + $0x54] ss:$8 sps:$4 sm:$0xff]  }
0x1130   :  { %v3337_v34 = vpop.eup %3336  ;;  %v2143_v35 = vadd.f32 1.0, %v3335_v30  ;;  %v2156_v44 = vpack.c.bf16 %v2152_v59, %v2148_v57  ;;  %v2149_v12 = vmul.f32 %v2141_v56, %v2085_v48  ;;  %v3273_v46 = vld [vmem:[#allocation22 + $0x50] ss:$8 sps:$4 sm:$0xff]   ;;  %v3278_v47 = vld [vmem:[#allocation22 + $0x64] ss:$8 sps:$4 sm:$0xff]  }
0x1131   :  { %v2153_v0 = vmul.f32 %v2145_v50, %v2089_v60  ;;  %v2147_v18 = vadd.f32 1.0, %v3337_v34  ;;  %v2158_v37 = vpack.c.bf16 %v2154_v62, %v2150_v51  ;;  %v3276_v48 = vld [vmem:[#allocation22 + $0x60] ss:$8 sps:$4 sm:$0xff]   ;;  %v3281_v56 = vld [vmem:[#allocation22 + $0x74] ss:$8 sps:$4 sm:$0xff]  }
0x1132   :  { %v2151_v2 = vmul.f32 %v2143_v35, %v2087_v43  ;;  %v3279_v57 = vld [vmem:[#allocation22 + $0x70] ss:$8 sps:$4 sm:$0xff]   ;;  %v2844_v43 = vld [vmem:[#allocation19] ss:$0 sm:$0xff] }
0x1133   :  { %v2157_v1 = vpack.c.bf16 %v2153_v0, %v2149_v12  ;;  %v2155_v4 = vmul.f32 %v2147_v18, %v2091_v3  ;;  %v2845_v0 = vld [vmem:[#allocation21] ss:$0 sm:$0xff] }
0x1135   :  { %2455 = vmatprep.mubr.bf16.mxu0 %v2157_v1  ;;  %v2159_v6 = vpack.c.bf16 %v2155_v4, %v2151_v2  ;;  %v2564_v4 = vld [vmem:[%s4493_s25] sm:$0x3] }
0x1136   :  { %2456 = vmatmul.mubr.bf16.vlgmr.msra.gmra.mrb[40].mxu0 %v2156_v44 }
0x1137   :  { %2496 = vmatprep.mubr.bf16.mxu1 %v2159_v6  ;;  %2688 = vmatprep.mubr.bf16.mxu0 %v3686_v27  ;;  %v2569_v6 = vrot.slane %v2564_v4, %v4066_v55 }
0x1138   :  { %2497 = vmatmul.mubr.bf16.vlgmr.msra.gmra.mrb[56].mxu1 %v2158_v37  ;;  %2657 = vmatpush1.bf16.msra.mxu0 %v3258_v40 }
0x1139   :  { %2658 = vmatprep.subr.bf16.mxu0 %v3263_v26 }
0x113c   :  { %2659 = vmatpush1.bf16.msra.mxu0 %v3261_v7 }
0x1209   :  { %v2937_v5 = vpop.f32.mrb[40].mxu0 }
0x120a   :  { %v2938_v9 = vpop.f32.mrb[41].mxu0 }
0x120b   :  { %v2959_v53 = vpop.f32.mrb[56].mxu1  ;;  %v2939_v10 = vadd.f32 %v2938_v9, %v2937_v5  ;;  %v2940_v11 = vpop.f32.mrb[42].mxu0  ;;  %v2573_v5 = vrot.slane %v2564_v4, %v4070_v58 }
0x120c   :  { %v2960_v14 = vpop.f32.mrb[57].mxu1  ;;  %v2941_v8 = vpop.f32.mrb[43].mxu0 }
0x120d   :  { %v2458_v15 = vadd.f32 %v2939_v10, %v2811_v38  ;;  %v2961_v16 = vadd.f32 %v2960_v14, %v2959_v53  ;;  %v2962_v19 = vpop.f32.mrb[58].mxu1  ;;  %v2942_v20 = vadd.f32 %v2941_v8, %v2940_v11 }
0x120e   :  { %v2963_v61 = vpop.f32.mrb[59].mxu1 }
0x120f   :  { %v2499_v21 = vadd.f32 %v2961_v16, %v2458_v15  ;;  %v2461_v22 = vadd.f32 %v2942_v20, %v2811_v38  ;;  %v2964_v63 = vadd.f32 %v2963_v61, %v2962_v19 }
0x1211   :  { %v2502_v23 = vadd.f32 %v2964_v63, %v2461_v22  ;;  %v2505_v27 = vadd.f32 %v2499_v21, %v4384_v49 }
0x1213   :  { %2509 = vadd.xlane.f32.xlu0 %v2505_v27  ;;  %v2506_v24 = vadd.f32 %v2502_v23, %v4386_v52  ;;  %v3266_v52 = vld [vmem:[#allocation22 + $0x24] ss:$8 sps:$4 sm:$0xff]  }
0x1214   :  { %2660 = vmatprep.subr.bf16.mxu0 %v3266_v52 }
0x1215   :  { %2511 = vadd.xlane.f32.xlu1 %v2506_v24  ;;  %2661 = vmatpush1.bf16.msra.mxu0 %v3264_v36 }
0x1216   :  { %2662 = vmatprep.subr.bf16.mxu0 %v3269_v39 }
0x1219   :  { %2663 = vmatpush1.bf16.msra.mxu0 %v3267_v54 }
0x121a   :  { %2664 = vmatprep.subr.bf16.mxu0 %v3272_v42 }
0x121d   :  { %2665 = vmatpush1.bf16.msra.mxu0 %v3270_v41 }
0x121e   :  { %2666 = vmatprep.subr.bf16.mxu0 %v3275_v45 }
0x1221   :  { %2667 = vmatpush1.bf16.msra.mxu0 %v3273_v46 }
0x1222   :  { %2668 = vmatprep.subr.bf16.mxu0 %v3278_v47 }
0x1225   :  { %2669 = vmatpush1.bf16.msra.mxu0 %v3276_v48 }
0x1226   :  { %2670 = vmatprep.subr.bf16.mxu0 %v3281_v56 }
0x1229   :  { %2671 = vmatpush1.bf16.msra.mxu0 %v3279_v57 }
0x12a0   :  { %v2510_v28 = vpop.xlane.xlu0 %2509 }
0x12a1   :  { %v2513_v29 = vmul.f32 0.0078125, %v2510_v28 }
0x12a2   :  { %v2512_v31 = vpop.xlane.xlu1 %2511 }
0x12a3   :  { %v2515_v32 = vsub.f32 %v2505_v27, %v2513_v29  ;;  %v2514_v17 = vmul.f32 0.0078125, %v2512_v31 }
0x12a5   :  { %v2516_v33 = vsub.f32 %v2506_v24, %v2514_v17  ;;  %v2517_v13 = vmul.f32 %v2515_v32, %v2515_v32 }
0x12a7   :  { %2519 = vadd.xlane.f32.xlu0 %v2517_v13  ;;  %v2518_v49 = vmul.f32 %v2516_v33, %v2516_v33 }
0x12a9   :  { %2521 = vadd.xlane.f32.xlu1 %v2518_v49 }
0x1334   :  { %v2520_v59 = vpop.xlane.xlu0 %2519 }
0x1335   :  { %v2523_v30 = vmul.f32 0.0078125, %v2520_v59 }
0x1336   :  { %v2522_v60 = vpop.xlane.xlu1 %2521 }
0x1337   :  { %v2525_v50 = vadd.f32 1e-12, %v2523_v30  ;;  %v2524_v51 = vmul.f32 0.0078125, %v2522_v60 }
0x1339   :  { %3338 = vrsqrt.f32 %v2525_v50  ;;  %v2526_v62 = vadd.f32 1e-12, %v2524_v51 }
0x133b   :  { %3340 = vrsqrt.f32 %v2526_v62 }
0x1343   :  { %v3339_v34 = vpop.eup %3338 }
0x1344   :  { %v2529_v3 = vmul.f32 %v3339_v34, %v2515_v32 }
0x1345   :  { %v3341_v35 = vpop.eup %3340 }
0x1346   :  { %v2530_v44 = vmul.f32 %v3341_v35, %v2516_v33  ;;  %v2537_v12 = vmul.f32 %v2844_v43, %v2529_v3 }
0x1348   :  { %v2538_v18 = vmul.f32 %v2844_v43, %v2530_v44  ;;  %v2545_v37 = vadd.f32 %v2845_v0, %v2537_v12 }
0x134a   :  { %v2546_v1 = vadd.f32 %v2845_v0, %v2538_v18 }
0x134c   :  { %v2547_v2 = vpack.c.bf16 %v2546_v1, %v2545_v37 }
0x134e   :  { %2689 = vmatmul.mubr.bf16.vlgmr.msra.gmra.mrb[44].mxu0 %v2547_v2 }
0x1421   :  { %v2690_v38 = vpop.f32.mrb[44].mxu0 }
0x1422   :  { %v2691_v9 = vadd.f32 %v2690_v38, %v2569_v6  ;;  %v2692_v53 = vpop.f32.mrb[45].mxu0 }
0x1423   :  { %v2693_v10 = vadd.f32 %v2692_v53, %v2573_v5  ;;  %v2694_v11 = vpop.f32.mrb[46].mxu0 }
0x1424   :  { %2699 = vst [vmem:[%s4494_s30] sm:$0xff] %v2691_v9  ;;  %v2695_v14 = vadd.f32 %v2694_v11, %v2569_v6  ;;  %v2696_v8 = vpop.f32.mrb[47].mxu0 }
0x1425   :  { %2700 = vst [vmem:[%s4494_s30 + $0x8] sm:$0xff] %v2693_v10  ;;  %v2697_v15 = vadd.f32 %v2696_v8, %v2573_v5 }
0x1426   :  { %2701 = vst [vmem:[%s4494_s30 + $0x10] sm:$0xff] %v2695_v14 }
0x1427   :  { %2702 = vst [vmem:[%s4494_s30 + $0x18] sm:$0xff] %v2697_v15 }
0x1428   :  { %2707 = vsyncpa [#allocation3], 1 }
0x1429   :  { %2708 = vsyncpa [#allocation5], 1 }
0x142a   :  { %2709 = vsyncpa [#allocation8], 1 }
0x142b   :  { %2710 = vsyncpa [#allocation11], 1 }
0x142c   :  { %2711 = vsyncpa [#allocation14], 1 }
0x142d   :  { %2712 = vsyncpa [#allocation17], 1 }
0x142e   :  { %2713 = vsyncpa [#allocation20], 1 }
0x142f   :  { %2714 = vsyncpa [#allocation23], 1 }

// kernel: generate.3
= control target key start
LH: loop header
LB: loop body
LE: loop exit
PB: predicated region body
PF: predicated region fallthrough
CT: control target
= control target key end

     0   :  { %s6564_s6 = smov 1   ;;  %s6565_s10 = smov 2   ;;  %s7554_s0 = inlined_call_operand.smem [shape: u32[35], index: -1, kind: input, shape index: {}] }
   0x1   :  { %s6617_s5 = sld [smem:[%s7554_s0]]   ;;  %s6566_s14 = smov 3  }
   0x2   :  { %s6622_s9 = sld [smem:[%s7554_s0 + %s6564_s6]]   ;;  %s6567_s18 = smov 4  }
   0x3   :  { %s6627_s13 = sld [smem:[%s7554_s0 + %s6565_s10]]   ;;  %s6568_s22 = smov 5  }
   0x4   :  { %s6632_s17 = sld [smem:[%s7554_s0 + %s6566_s14]]   ;;  %s6569_s26 = smov 6  }
   0x5   :  { %s6637_s21 = sld [smem:[%s7554_s0 + %s6567_s18]]   ;;  %s6570_s30 = smov 7  }
   0x6   :  { %s6642_s25 = sld [smem:[%s7554_s0 + %s6568_s22]]   ;;  %s6571_s4 = smov 8  }
   0x7   :  { %7562 = sst [smem:[#allocation9_spill]] %s6617_s5  ;;  %s6572_s10 = smov 9  }
   0x8   :  { %7563 = sst [smem:[#allocation10_spill]] %s6622_s9  ;;  %s6573_s15 = smov 10  }
   0x9   :  { %7564 = sst [smem:[#allocation11_spill]] %s6627_s13  ;;  %s6574_s20 = smov 11  }
   0xa   :  { %s6647_s29 = sld [smem:[%s7554_s0 + %s6569_s26]]   ;;  %s6575_s26 = smov 12  }
   0xb   :  { %s6652_s3 = sld [smem:[%s7554_s0 + %s6570_s30]]   ;;  %s6576_s1 = smov 13  }
   0xc   :  { %s6657_s8 = sld [smem:[%s7554_s0 + %s6571_s4]]   ;;  %s6577_s7 = smov 14  }
   0xd   :  { %s6662_s14 = sld [smem:[%s7554_s0 + %s6572_s10]]   ;;  %s6579_s22 = smov 16  }
   0xe   :  { %s6667_s19 = sld [smem:[%s7554_s0 + %s6573_s15]]   ;;  %s6578_s15 = smov 15  }
   0xf   :  { %s6672_s24 = sld [smem:[%s7554_s0 + %s6574_s20]]   ;;  %s6580_s28 = smov 17  }
  0x10   :  { %s6677_s30 = sld [smem:[%s7554_s0 + %s6575_s26]]  }
  0x11   :  { %s6682_s6 = sld [smem:[%s7554_s0 + %s6576_s1]]  }
  0x12   :  { %s6687_s12 = sld [smem:[%s7554_s0 + %s6577_s7]]   ;;  %s6581_s7 = smov 18  }
  0x13   :  { %s6692_s20 = sld [smem:[%s7554_s0 + %s6578_s15]]   ;;  %s6582_s15 = smov 19  }
  0x14   :  { %s6697_s27 = sld [smem:[%s7554_s0 + %s6579_s22]]   ;;  %s6583_s22 = smov 20  }
  0x15   :  { %s6702_s4 = sld [smem:[%s7554_s0 + %s6580_s28]]   ;;  %s6584_s28 = smov 21  }
  0x16   :  { %s6707_s9 = sld [smem:[%s7554_s0 + %s6581_s7]]   ;;  %s6585_s7 = smov 22  }
  0x17   :  { %s6712_s13 = sld [smem:[%s7554_s0 + %s6582_s15]]   ;;  %s6586_s15 = smov 23  }
  0x18   :  { %s6717_s5 = sld [smem:[%s7554_s0 + %s6583_s22]]   ;;  %s6587_s22 = smov 24  }
  0x1b   :  { %7565 = sst [smem:[#allocation12_spill]] %s6702_s4 }
  0x1c   :  { %7566 = sst [smem:[#allocation13_spill]] %s6707_s9 }
  0x1d   :  { %7567 = sst [smem:[#allocation14_spill]] %s6712_s13 }
  0x1e   :  { %7568 = sst [smem:[#allocation15_spill]] %s6717_s5 }
  0x1f   :  { %s6722_s4 = sld [smem:[%s7554_s0 + %s6584_s28]]   ;;  %s6588_s28 = smov 25  }
  0x20   :  { %s6727_s9 = sld [smem:[%s7554_s0 + %s6585_s7]]   ;;  %s6589_s7 = smov 26  }
  0x21   :  { %s6732_s13 = sld [smem:[%s7554_s0 + %s6586_s15]]   ;;  %s6590_s15 = smov 27  }
  0x22   :  { %s6737_s5 = sld [smem:[%s7554_s0 + %s6587_s22]]   ;;  %s6591_s22 = smov 28  }
  0x25   :  { %7569 = sst [smem:[#allocation16_spill]] %s6722_s4 }
  0x26   :  { %7570 = sst [smem:[#allocation17_spill]] %s6727_s9 }
  0x27   :  { %7571 = sst [smem:[#allocation18_spill]] %s6732_s13 }
  0x28   :  { %7572 = sst [smem:[#allocation19_spill]] %s6737_s5 }
  0x29   :  { %s6742_s4 = sld [smem:[%s7554_s0 + %s6588_s28]]   ;;  %s6592_s28 = smov 29  }
  0x2a   :  { %s6747_s9 = sld [smem:[%s7554_s0 + %s6589_s7]]   ;;  %s6593_s7 = smov 30  }
  0x2b   :  { %s6752_s13 = sld [smem:[%s7554_s0 + %s6590_s15]]   ;;  %s6594_s15 = smov 31  }
  0x2c   :  { %s6757_s5 = sld [smem:[%s7554_s0 + %s6591_s22]]   ;;  %s6595_s22 = smov 32  }
  0x2f   :  { %7573 = sst [smem:[#allocation20_spill]] %s6742_s4 }
  0x30   :  { %7574 = sst [smem:[#allocation21_spill]] %s6747_s9 }
  0x31   :  { %7575 = sst [smem:[#allocation22_spill]] %s6752_s13 }
  0x32   :  { %7576 = sst [smem:[#allocation23_spill]] %s6757_s5 }
  0x33   :  { %s6762_s4 = sld [smem:[%s7554_s0 + %s6592_s28]]   ;;  %s6596_s28 = smov 33  }
  0x34   :  { %s6767_s9 = sld [smem:[%s7554_s0 + %s6593_s7]]   ;;  %s6597_s7 = smov 34  }
  0x35   :  { %s6772_s13 = sld [smem:[%s7554_s0 + %s6594_s15]]  }
  0x36   :  { %s6777_s5 = sld [smem:[%s7554_s0 + %s6595_s22]]  }
  0x39   :  { %7577 = sst [smem:[#allocation24_spill]] %s6762_s4 }
  0x3a   :  { %7578 = sst [smem:[#allocation25_spill]] %s6767_s9 }
  0x3b   :  { %s6782_s4 = sld [smem:[%s7554_s0 + %s6596_s28]]  }
  0x3c   :  { %s6787_s9 = sld [smem:[%s7554_s0 + %s6597_s7]]  }
  0x3d   :  { %74 = vsyncpa [#allocation7], 0  ;;  %s6789_s15 = smov 0  }
  0x3e LB: > { %s6795_s16 = sadd.s32 4294967295, %s6562_s15   ;;  %p5422_p0 = scmp.ge.s32.totalorder %s6562_s15, 1  ;;  %s6562_s15 = sphi %s6789_s15, %s80_s15  }
  0x3f   : > { %p933_p1 = scmp.lt.s32.totalorder %s6562_s15, 8 }
  0x41   : > { %p934_p2 = pnand %p5422_p0, %p933_p1 }
  0x42   : > { %p5423_p3 = scmp.ne.s32.totalorder (!%p934_p2), %s6795_s16, 0 }
  0x43   : > { %937 = sbr.rel (%p934_p2) target bundleno = 9814 (0x2656), region = 156 }
  0x4a   : > { %1013 = sbr.rel (%p5423_p3) target bundleno = 85 (0x55), region = 160  ;;  %vm1014_vm0 = vcmask (!%p5423_p3), 58368   ;;  %vm1016_vm1 = vcmask (!%p5423_p3), 1024   ;;  %vm1018_vm2 = vcmask (!%p5423_p3), 257024   ;;  %v6598_v0 = vmov (!%p5423_p3), 0  }
  0x4b   : > { %1015 = vst.msk [vmem:[#allocation4] sm:$0x3] (!%p5423_p3), %vm1014_vm0, %v6598_v0 }
  0x4c   : > { %1017 = vst.msk [vmem:[#allocation5] sm:$0x3] (!%p5423_p3), %vm1016_vm1, %v6598_v0 }
  0x4d   : > { %1019 = vst.msk [vmem:[#allocation2] sm:$0xf] (!%p5423_p3), %vm1018_vm2, %v6598_v0  ;;  %1020 = vst.msk [vmem:[#allocation2 + $0x4] sm:$0xf] (!%p5423_p3), %vm1018_vm2, %v6598_v0 }
  0x4e   : > { %1021 = vst.msk [vmem:[#allocation2 + $0x8] sm:$0xf] (!%p5423_p3), %vm1018_vm2, %v6598_v0  ;;  %1022 = vst.msk [vmem:[#allocation2 + $0xc] sm:$0xf] (!%p5423_p3), %vm1018_vm2, %v6598_v0 }
  0x4f   : > { %1023 = vst.msk [vmem:[#allocation2 + $0x10] sm:$0xf] (!%p5423_p3), %vm1018_vm2, %v6598_v0  ;;  %1024 = vst.msk [vmem:[#allocation2 + $0x14] sm:$0xf] (!%p5423_p3), %vm1018_vm2, %v6598_v0 }
  0x50   : > { %1025 = vst.msk [vmem:[#allocation2 + $0x18] sm:$0xf] (!%p5423_p3), %vm1018_vm2, %v6598_v0  ;;  %1026 = vst.msk [vmem:[#allocation2 + $0x1c] sm:$0xf] (!%p5423_p3), %vm1018_vm2, %v6598_v0 }
  0x51   : > { %1027 = vst.msk [vmem:[#allocation3] sm:$0xf] %vm1018_vm2, %v6598_v0  ;;  %1028 = vst.msk [vmem:[#allocation3 + $0x4] sm:$0xf] %vm1018_vm2, %v6598_v0 }
  0x52   : > { %1029 = vst.msk [vmem:[#allocation3 + $0x8] sm:$0xf] %vm1018_vm2, %v6598_v0  ;;  %1030 = vst.msk [vmem:[#allocation3 + $0xc] sm:$0xf] %vm1018_vm2, %v6598_v0 }
  0x53   : > { %1031 = vst.msk [vmem:[#allocation3 + $0x10] sm:$0xf] %vm1018_vm2, %v6598_v0  ;;  %1032 = vst.msk [vmem:[#allocation3 + $0x14] sm:$0xf] %vm1018_vm2, %v6598_v0 }
  0x54   : > { %1033 = vst.msk [vmem:[#allocation3 + $0x18] sm:$0xf] %vm1018_vm2, %v6598_v0  ;;  %1034 = vst.msk [vmem:[#allocation3 + $0x1c] sm:$0xf] %vm1018_vm2, %v6598_v0 }
  0x55 PF: > { %v1035_v2 = vlaneseq  ;;  %v6599_v3 = vmov 0   ;;  %v6600_v4 = vmov 0.0   ;;  %v6270_v5 = vld [vmem:[%s6632_s17] sm:$0xff]   ;;  %v6821_v6 = vstv %s6795_s16  ;;  %v6271_v7 = vld [vmem:[%s6632_s17 + $0x8] sm:$0xff]   ;;  %v6272_v11 = vld [vmem:[%s6632_s17 + $0x10] sm:$0xff]   ;;  %s6605_s0 = smov 32  }
  0x56   : > { %6269 = vset.pattern.permute.xlu0 %v6599_v3  ;;  %5852 = vmatprep.subr.bf16.mxu1 %v6600_v4  ;;  %vm6601_vm3 = vmmov 0   ;;  %vm1071_vm4 = vcmask 1043456   ;;  %v1066_v9 = vld [vmem:[%s6637_s21] sm:$0xf]  ;;  %vm1067_vm6 = vcmask 64512   ;;  %v6273_v14 = vld [vmem:[%s6632_s17 + $0x18] sm:$0xff]  }
  0x57   : > { %v1037_v1 = vld [vmem:[#allocation5] sm:$0x3]  ;;  %5846 = vmatprep.subr.bf16.mxu0 %v6600_v4  ;;  %5853 = vmatpush3.bf16.msra.mxu1 %v6270_v5  ;;  %v6826_v8 = vand.u32 127, %v1035_v2  ;;  %v1073_v12 = vsel %vm1071_vm4, %v1066_v9, 0  ;;  %v6275_v16 = vld [vmem:[%s6632_s17 + $0x28] sm:$0xff]   ;;  %v6276_v17 = vld [vmem:[%s6632_s17 + $0x30] sm:$0xff]  }
  0x58   : > { %1039 = vperm.xlu0 %6269, %v1037_v1   ;;  %5848 = vmatprep.mubr.msk.bf16.mxu0 %vm6601_vm3, %v6600_v4  ;;  %v6274_v15 = vld [vmem:[%s6632_s17 + $0x20] sm:$0xff]   ;;  %v6277_v18 = vld [vmem:[%s6632_s17 + $0x38] sm:$0xff]   ;;  %v6602_v20 = vmov 1.0|1.0   ;;  %v6854_v25 = vshrl.u32 %v1035_v2, 7  ;;  %vm1217_vm9 = vcmask 1041408  }
  0x59   : > { %5854 = vmatprep.subr.bf16.mxu1 %v6600_v4  ;;  %5868 = vmatprep.mubr.msk.bf16.mxu1 %vm6601_vm3, %v6600_v4  ;;  %vm1062_vm5 = vcmp.eq.s32.totalorder %v6826_v8, %v6821_v6  ;;  %v5437_v29 = vld [vmem:[%s6642_s25] ss:$0 sm:$0xff]  ;;  %v6280_v37 = vld [vmem:[%s6667_s19 + $0x4] ss:$8 sps:$4 sm:$0xff]   ;;  %v6284_v39 = vld [vmem:[%s6667_s19 + $0x14] ss:$8 sps:$4 sm:$0xff]   ;;  %vm1510_vm14 = vcmp.le.s32.totalorder %v6826_v8, %v6821_v6 }
  0x5a   : > { %v5425_v10 = vsel %vm1062_vm5, 1.0, %v6600_v4  ;;  %5847 = vmatpush3.bf16.msra.mxu0 %v1073_v12  ;;  %v6857_v26 = vsub.s32 0, %v6854_v25  ;;  %v6278_v36 = vld [vmem:[%s6667_s19] ss:$8 sps:$4 sm:$0xff]   ;;  %v6282_v41 = vld [vmem:[%s6667_s19 + $0x10] ss:$8 sps:$4 sm:$0xff]   ;;  %vm1509_vm10 = vcmp.eq.s32.totalorder %v6854_v25, %v6821_v6 }
  0x5b   : > { %5855 = vmatpush3.bf16.msra.mxu1 %v6271_v7  ;;  %v1065_v13 = vpack.c.bf16 %v5425_v10, %v5425_v10  ;;  %5872 = vmatprep.subr.bf16.mxu0 %v6600_v4  ;;  %v6281_v38 = vld [vmem:[%s6657_s8] sm:$0xff]   ;;  %v6285_v40 = vld [vmem:[%s6657_s8 + $0x8] sm:$0xff]   ;;  %v6289_v49 = vld [vmem:[%s6657_s8 + $0x10] sm:$0xff]   ;;  %vm1561_vm12 = vcmask 257024   ;;  %vm1637_vm13 = vcmask 261120   ;;  %vm1739_vm15 = vcmask 57344  }
  0x5c   : > { %5856 = vmatprep.subr.bf16.mxu1 %v6600_v4  ;;  %v6288_v42 = vld [vmem:[%s6667_s19 + $0x24] ss:$8 sps:$4 sm:$0xff]   ;;  %v6286_v43 = vld [vmem:[%s6667_s19 + $0x20] ss:$8 sps:$4 sm:$0xff]   ;;  %v6292_v50 = vld [vmem:[%s6667_s19 + $0x34] ss:$8 sps:$4 sm:$0xff]  }
  0x5d   : > { %5849 = vmatmul.mubr.msk.bf16.vlgmr.msra.gmra.mrb[0].mxu0 %vm1067_vm6, %v1065_v13  ;;  %v6290_v51 = vld [vmem:[%s6667_s19 + $0x30] ss:$8 sps:$4 sm:$0xff]   ;;  %v6296_v53 = vld [vmem:[%s6667_s19 + $0x44] ss:$8 sps:$4 sm:$0xff]   ;;  %v6294_v54 = vld [vmem:[%s6667_s19 + $0x40] ss:$8 sps:$4 sm:$0xff]  }
  0x5e   : > { %5888 = vmatprep.mubr.msk.bf16.mxu0 %vm6601_vm3, %v6600_v4  ;;  %5873 = vmatpush3.bf16.msra.mxu0 %v6281_v38  ;;  %v6293_v52 = vld [vmem:[%s6657_s8 + $0x18] sm:$0xff]   ;;  %v6297_v55 = vld [vmem:[%s6657_s8 + $0x20] sm:$0xff]   ;;  %v6301_v58 = vld [vmem:[%s6657_s8 + $0x28] sm:$0xff]   ;;  %s6606_s18 = smov 96   ;;  %vm2157_vm0 = vcmask 1041409   ;;  %s6607_s22 = smov 64  }
  0x5f   : > { %5857 = vmatpush3.bf16.msra.mxu1 %v6272_v11  ;;  %5874 = vmatprep.subr.bf16.mxu0 %v6600_v4  ;;  %v6300_v56 = vld [vmem:[%s6667_s19 + $0x54] ss:$8 sps:$4 sm:$0xff]   ;;  %v6298_v57 = vld [vmem:[%s6667_s19 + $0x50] ss:$8 sps:$4 sm:$0xff]   ;;  %v6304_v59 = vld [vmem:[%s6667_s19 + $0x64] ss:$8 sps:$4 sm:$0xff]  }
  0x60   : > { %5858 = vmatprep.subr.bf16.mxu1 %v6600_v4  ;;  %v6302_v60 = vld [vmem:[%s6667_s19 + $0x60] ss:$8 sps:$4 sm:$0xff]   ;;  %v6305_v61 = vld [vmem:[%s6657_s8 + $0x30] sm:$0xff]   ;;  %v6309_v0 = vld [vmem:[%s6657_s8 + $0x38] sm:$0xff]   ;;  %s7581_s23 = sld [smem:[#allocation9_spill]]  ;;  %s7582_s26 = sld [smem:[#allocation12_spill]] }
  0x61   : > { %v6308_v62 = vld [vmem:[%s6667_s19 + $0x74] ss:$8 sps:$4 sm:$0xff]   ;;  %v6306_v63 = vld [vmem:[%s6667_s19 + $0x70] ss:$8 sps:$4 sm:$0xff]   ;;  %v5438_v9 = vld [vmem:[%s6647_s29] ss:$0 sm:$0xff] }
  0x62   : > { %5875 = vmatpush3.bf16.msra.mxu0 %v6285_v40  ;;  %v5439_v11 = vld [vmem:[%s6652_s3] ss:$0 sm:$0xff]  ;;  %vm6924_vm11 = vmpackc.low %vm1509_vm10, %vm1509_vm10  ;;  %s7583_s28 = sld [smem:[#allocation11_spill]]  ;;  %s7584_s1 = sld [smem:[#allocation10_spill]]  ;;  %vm5341_vm2 = vcmask 1024  }
  0x63   : > { %5859 = vmatpush3.bf16.msra.mxu1 %v6273_v14  ;;  %5876 = vmatprep.subr.bf16.mxu0 %v6600_v4  ;;  %s7585_s2 = sld [smem:[#allocation13_spill]]  ;;  %s7586_s7 = sld [smem:[#allocation14_spill]] }
  0x64   : > { %5860 = vmatprep.subr.bf16.mxu1 %v6600_v4  ;;  %s7587_s10 = sld [smem:[#allocation17_spill]]  ;;  %s7588_s11 = sld [smem:[#allocation15_spill]] }
  0x65   : > { %p6214_p4 = scmp.eq.s32.totalorder %s6795_s16, 6 }
  0x66   : > { %5877 = vmatpush3.bf16.msra.mxu0 %v6289_v49 }
  0x67   : > { %5861 = vmatpush3.bf16.msra.mxu1 %v6274_v15  ;;  %5878 = vmatprep.subr.bf16.mxu0 %v6600_v4  ;;  %v6603_v15 = vmov 1966171168  }
  0x68   : > { %5862 = vmatprep.subr.bf16.mxu1 %v6600_v4 }
  0x6a   : > { %5879 = vmatpush3.bf16.msra.mxu0 %v6293_v52 }
  0x6b   : > { %5863 = vmatpush3.bf16.msra.mxu1 %v6275_v16  ;;  %5880 = vmatprep.subr.bf16.mxu0 %v6600_v4  ;;  %v1515_v16 = vunpack.c.l.s4 %v6603_v15 }
  0x6c   : > { %5864 = vmatprep.subr.bf16.mxu1 %v6600_v4 }
  0x6e   : > { %5881 = vmatpush3.bf16.msra.mxu0 %v6297_v55 }
  0x6f   : > { %5865 = vmatpush3.bf16.msra.mxu1 %v6276_v17  ;;  %5882 = vmatprep.subr.bf16.mxu0 %v6600_v4  ;;  %v1374_v17 = vld [vmem:[%s6672_s24] sm:$0x3] }
  0x70   : > { %5866 = vmatprep.subr.bf16.mxu1 %v6600_v4 }
  0x72   : > { %5883 = vmatpush3.bf16.msra.mxu0 %v6301_v58 }
  0x73   : > { %5867 = vmatpush3.bf16.msra.mxu1 %v6277_v18  ;;  %5884 = vmatprep.subr.bf16.mxu0 %v6600_v4  ;;  %v1382_v18 = vsub.s32 1, %v6854_v25 }
  0x74   : > { %1466 = vmatprep.subr.bf16.mxu1 %v6280_v37 }
  0x76   : > { %5885 = vmatpush3.bf16.msra.mxu0 %v6305_v61  ;;  %v1531_v61 = vld [vmem:[#allocation2 + $0x4] sm:$0xf] }
  0x77   : > { %5886 = vmatprep.subr.bf16.mxu0 %v6600_v4 }
  0x7a   : > { %5887 = vmatpush3.bf16.msra.mxu0 %v6309_v0 }
  0x7b   : > { %5892 = vmatprep.subr.bf16.mxu0 %v6600_v4 }
  0xd7   : > { %v1040_v19 = vpop.permute.xlu0 %1039 }
  0xd8   : > { %vm1041_vm7 = vcmp.eq.s32.totalorder %v6826_v8, %v1040_v19  ;;  %v1516_v19 = vunpack.c.0.s8 %v1515_v16 }
  0xd9   : > { %vm5435_vm8 = vmpackc.low %vm1041_vm7, %vm1041_vm7 }
  0xda   : > { %5869 = vmatmul.mubr.msk.bf16.vlgmr.msra.gmra.mrb[0].mxu1 %vm5435_vm8, %v6602_v20  ;;  %v1379_v20 = vrot.slane %v1374_v17, %v6857_v26 }
  0xdb   : > { %1498 = vmatprep.mubr.bf16.mxu1 %v6599_v3  ;;  %1467 = vmatpush1.bf16.msra.mxu1 %v6278_v36 }
  0xdc   : > { %1468 = vmatprep.subr.bf16.mxu1 %v6284_v39 }
  0xdf   : > { %1469 = vmatpush1.bf16.msra.mxu1 %v6282_v41  ;;  %v5440_v41 = vld [vmem:[%s6662_s14] ss:$0 sm:$0xff] }
  0xe0   : > { %1470 = vmatprep.subr.bf16.mxu1 %v6288_v42 }
  0xe3   : > { %1471 = vmatpush1.bf16.msra.mxu1 %v6286_v43 }
  0xe4   : > { %1472 = vmatprep.subr.bf16.mxu1 %v6292_v50 }
  0xe7   : > { %1473 = vmatpush1.bf16.msra.mxu1 %v6290_v51 }
  0xe8   : > { %1474 = vmatprep.subr.bf16.mxu1 %v6296_v53 }
  0xeb   : > { %1475 = vmatpush1.bf16.msra.mxu1 %v6294_v54  ;;  %v1530_v54 = vld [vmem:[#allocation2] sm:$0xf] }
  0xec   : > { %1476 = vmatprep.subr.bf16.mxu1 %v6300_v56 }
  0xef   : > { %1477 = vmatpush1.bf16.msra.mxu1 %v6298_v57 }
  0xf0   : > { %1478 = vmatprep.subr.bf16.mxu1 %v6304_v59  ;;  %v1582_v59 = vld [vmem:[#allocation3] sm:$0xf] }
  0xf3   : > { %1479 = vmatpush1.bf16.msra.mxu1 %v6302_v60 }
  0xf4   : > { %1480 = vmatprep.subr.bf16.mxu1 %v6308_v62 }
  0xf7   : > { %1481 = vmatpush1.bf16.msra.mxu1 %v6306_v63 }
  0xf8   : > { %5916 = vmatprep.subr.bf16.mxu1 %v6600_v4 }
 0x130   : > { %v1109_v21 = vpop.f32.mrb[0].mxu0 }
 0x131   : > { %v5850_v22 = vpop.f32.mrb[1].mxu0  ;;  %v1118_v27 = vrot.slane %v1109_v21, %v6857_v26  ;;  %v1383_v21 = vrot.slane %v1374_v17, %v1382_v18 }
 0x132   : > { %v1112_v23 = vpop.f32.mrb[2].mxu0 }
 0x133   : > { %v5851_v24 = vpop.f32.mrb[3].mxu0 }
 0x134   : > { %v6912_v24 = vsub.s32 %v1516_v19, %v6854_v25 }
 0x1ad   : > { %v1201_v28 = vpop.f32.mrb[0].mxu1 }
 0x1ae   : > { %v1202_v30 = vadd.f32 %v1201_v28, %v1118_v27  ;;  %v5870_v31 = vpop.f32.mrb[1].mxu1 }
 0x1af   : > { %v1204_v32 = vpop.f32.mrb[2].mxu1 }
 0x1b0   : > { %v5871_v33 = vpop.f32.mrb[3].mxu1  ;;  %v1214_v34 = vadd.f32 %v5437_v29, %v1202_v30 }
 0x1b2   : > { %v1218_v35 = vsel %vm1217_vm9, %v1214_v34, 0.0 }
 0x1b3   : > { %1219 = vadd.xlane.f32.xlu0 %v1218_v35 }
 0x240   : > { %v1220_v44 = vpop.xlane.xlu0 %1219 }
 0x241   : > { %v1222_v45 = vmul.f32 0.0078125, %v1220_v44 }
 0x243   : > { %v1223_v46 = vsub.f32 %v1214_v34, %v1222_v45 }
 0x245   : > { %v1224_v47 = vmul.f32 %v1223_v46, %v1223_v46 }
 0x247   : > { %v1225_v48 = vsel %vm1217_vm9, %v1224_v47, 0.0 }
 0x248   : > { %1226 = vadd.xlane.f32.xlu1 %v1225_v48 }
 0x2d5   : > { %v1227_v1 = vpop.xlane.xlu1 %1226 }
 0x2d6   : > { %v1228_v2 = vmul.f32 0.0078125, %v1227_v1 }
 0x2d8   : > { %v1229_v5 = vadd.f32 1e-12, %v1228_v2  ;;  %v1583_v2 = vld [vmem:[#allocation3 + $0x4] sm:$0xf] }
 0x2da   : > { %6442 = vrsqrt.f32 %v1229_v5 }
 0x2e4   : > { %v6443_v7 = vpop.eup %6442 }
 0x2e5   : > { %v1231_v10 = vmul.f32 %v6443_v7, %v1223_v46 }
 0x2e7   : > { %v1238_v12 = vmul.f32 %v5438_v9, %v1231_v10 }
 0x2e9   : > { %v6898_v13 = vadd.f32 %v5439_v11, %v1238_v12 }
 0x2eb   : > { %v1246_v14 = vpack.c.bf16 %v6898_v13, %v6898_v13 }
 0x2ed   : > { %5889 = vmatmul.mubr.bf16.vlgmr.msra.gmra.mrb[4].mxu0 %v1246_v14  ;;  %1499 = vmatmul.mubr.bf16.vlgmr.msra.gmra.mrb[4].mxu1 %v1246_v14 }
 0x2ee   : > { %5894 = vmatprep.mubr.msk.bf16.mxu0 %vm6601_vm3, %v6600_v4  ;;  %5918 = vmatprep.mubr.msk.bf16.mxu1 %vm6601_vm3, %v6600_v4 }
 0x3c0   : > { %v1352_v22 = vpop.f32.mrb[4].mxu0  ;;  %v1500_v23 = vpop.f32.mrb[4].mxu1 }
 0x3c1   : > { %v1501_v27 = vadd.f32 %v1500_v23, %v1379_v20  ;;  %v5890_v28 = vpop.f32.mrb[5].mxu0  ;;  %v1502_v29 = vpop.f32.mrb[5].mxu1  ;;  %v1353_v48 = vadd.f32 %v5440_v41, %v1352_v22 }
 0x3c2   : > { %v1503_v30 = vadd.f32 %v1502_v29, %v1383_v21  ;;  %v1355_v31 = vpop.f32.mrb[6].mxu0  ;;  %v1504_v32 = vpop.f32.mrb[6].mxu1  ;;  %v6604_v29 = vmov -1e+09  }
 0x3c3   : > { %v1512_v33 = vpack.c.bf16 %v1501_v27, %v1501_v27  ;;  %v5891_v34 = vpop.f32.mrb[7].mxu0  ;;  %v1505_v35 = vpop.f32.mrb[7].mxu1  ;;  %v1612_v60 = vpack.c.bf16 %v1353_v48, %v1353_v48 }
 0x3c4   : > { %v1564_v36 = vpack.c.bf16 %v1503_v30, %v1503_v30  ;;  %v6981_v30 = vsel %vm1510_vm14, 0.0, %v6604_v29 }
 0x3c5   : > { %v1520_v37 = vrot.slane %v1512_v33, %v6912_v24  ;;  %v1620_v10 = vrot.slane %v1612_v60, %v6912_v24 }
 0x3c6   : > { %v1572_v38 = vrot.slane %v1564_v36, %v6912_v24 }
 0x3c7   : > { %v1527_v39 = vrot.slane %v1520_v37, %v6912_v24  ;;  %v1627_v12 = vrot.slane %v1620_v10, %v6912_v24 }
 0x3c8   : > { %v1579_v40 = vrot.slane %v1572_v38, %v6912_v24 }
 0x3c9   : > { %v1529_v42 = vunpack.i.h.s16 %v1527_v39  ;;  %v5465_v43 = vpack.i.b16 %v1527_v39, %v1527_v39  ;;  %v5467_v16 = vpack.i.b16 %v1627_v12, %v1627_v12  ;;  %v1629_v19 = vunpack.i.h.s16 %v1627_v12 }
 0x3ca   : > { %v1581_v44 = vunpack.i.h.s16 %v1579_v40  ;;  %v5466_v45 = vpack.i.b16 %v1579_v40, %v1579_v40 }
 0x3cb   : > { %v1535_v46 = vpack.i.b16 %v1529_v42, %v1529_v42  ;;  %v1539_v47 = vrot.slane %v5465_v43, %v6857_v26  ;;  %v6962_v20 = vrot.slane %v5467_v16, %v6857_v26  ;;  %v1684_v22 = vpack.i.b16 %v1629_v19, %v1629_v19 }
 0x3cc   : > { %v1585_v49 = vpack.i.b16 %v1581_v44, %v1581_v44  ;;  %v1589_v50 = vrot.slane %v5466_v45, %v6857_v26  ;;  %v6310_v44 = vld [vmem:[#allocation2 + $0xc] ss:$0 sps:$4 sm:$0xff]   ;;  %v6311_v45 = vld [vmem:[#allocation2 + $0x8] ss:$0 sps:$4 sm:$0xff]  }
 0x3cd   : > { %v1543_v51 = vrot.slane %v1535_v46, %v6857_v26  ;;  %v1545_v52 = vpack.i.b16 %v1539_v47, %v1539_v47  ;;  %v6971_v27 = vrot.slane %v1684_v22, %v6857_v26 }
 0x3ce   : > { %v1593_v55 = vrot.slane %v1585_v49, %v6857_v26  ;;  %v1595_v56 = vpack.i.b16 %v1589_v50, %v1589_v50 }
 0x3cf   : > { %v6930_v57 = vrot.slane %v1545_v52, %v6857_v26  ;;  %v1552_v58 = vpack.i.b16 %v1543_v51, %v1543_v51 }
 0x3d0   : > { %v6933_v62 = vrot.slane %v1595_v56, %v6857_v26  ;;  %v1602_v63 = vpack.i.b16 %v1593_v55, %v1593_v55 }
 0x3d1   : > { %v6936_v0 = vrot.slane %v1552_v58, %v6857_v26  ;;  %v1559_v1 = vsel %vm6924_vm11, %v6930_v57, %v1530_v54 }
 0x3d2   : > { %1562 = vst.msk [vmem:[#allocation2] sm:$0xf] %vm1561_vm12, %v1559_v1  ;;  %v6943_v5 = vrot.slane %v1602_v63, %v6857_v26  ;;  %v1608_v7 = vsel %vm6924_vm11, %v6933_v62, %v1582_v59 }
 0x3d3   : > { %v1560_v9 = vsel %vm6924_vm11, %v6936_v0, %v1531_v61  ;;  %1610 = vst.msk [vmem:[#allocation3] sm:$0xf] %vm1561_vm12, %v1608_v7 }
 0x3d4   : > { %1563 = vst.msk [vmem:[#allocation2 + $0x4] sm:$0xf] %vm1561_vm12, %v1560_v9  ;;  %v1609_v11 = vsel %vm6924_vm11, %v6943_v5, %v1583_v2 }
 0x3d5   : > { %1611 = vst.msk [vmem:[#allocation3 + $0x4] sm:$0xf] %vm1561_vm12, %v1609_v11 }
 0x3d9   : > { %v1630_v14 = vld [vmem:[#allocation2] sm:$0xf] }
 0x3da   : > { %v1642_v15 = vsel %vm1637_vm13, %v1630_v14, 0  ;;  %v1764_v23 = vld [vmem:[#allocation3] sm:$0xf] }
 0x3db   : > { %5893 = vmatpush3.bf16.xpose.msra.mxu0 %v1642_v15  ;;  %v1631_v17 = vld [vmem:[#allocation2 + $0x4] sm:$0xf]  ;;  %v1770_v28 = vsel %vm1071_vm4, %v1764_v23, 0 }
 0x3dc   : > { %5898 = vmatprep.subr.bf16.mxu0 %v6600_v4  ;;  %v1693_v21 = vsel %vm1637_vm13, %v1631_v17, 0  ;;  %v1765_v11 = vld [vmem:[#allocation3 + $0x4] sm:$0xf] }
 0x3dd   : > { %v1816_v14 = vsel %vm1071_vm4, %v1765_v11, 0 }
 0x3e2   : > { %5895 = vmatmul.mubr.msk.bf16.vlgmr.msra.gmra.mrb[8].mxu0 %vm1637_vm13, %v6962_v20 }
 0x3e3   : > { %5899 = vmatpush3.bf16.xpose.msra.mxu0 %v1693_v21  ;;  %5900 = vmatprep.mubr.msk.bf16.mxu0 %vm6601_vm3, %v6600_v4 }
 0x3e4   : > { %5904 = vmatprep.subr.bf16.mxu0 %v6600_v4 }
 0x3ea   : > { %5901 = vmatmul.mubr.msk.bf16.vlgmr.msra.gmra.mrb[12].mxu0 %vm1637_vm13, %v6971_v27 }
 0x3eb   : > { %5905 = vmatpush3.bf16.msra.mxu0 %v1770_v28  ;;  %5906 = vmatprep.mubr.msk.bf16.mxu0 %vm6601_vm3, %v6600_v4 }
 0x3ec   : > { %5910 = vmatprep.subr.bf16.mxu0 %v6600_v4 }
 0x4b5   : > { %v1678_v31 = vpop.f32.mrb[8].mxu0 }
 0x4b6   : > { %v1735_v32 = vmul.f32 0.17677669, %v1678_v31  ;;  %v5896_v33 = vpop.f32.mrb[9].mxu0 }
 0x4b7   : > { %v1681_v34 = vpop.f32.mrb[10].mxu0 }
 0x4b8   : > { %v5897_v35 = vpop.f32.mrb[11].mxu0  ;;  %v1737_v36 = vadd.f32 %v1735_v32, %v6981_v30 }
 0x4ba   : > { %v1740_v37 = vsel %vm1739_vm15, %v1737_v36, -inf }
 0x4bb   : > { %1741 = vmax.xlane.f32.xlu1 %v1740_v37 }
 0x4bd   : > { %v1729_v38 = vpop.f32.mrb[12].mxu0 }
 0x4be   : > { %v1736_v39 = vmul.f32 0.17677669, %v1729_v38  ;;  %v5902_v40 = vpop.f32.mrb[13].mxu0 }
 0x4bf   : > { %v1732_v41 = vpop.f32.mrb[14].mxu0 }
 0x4c0   : > { %v5903_v42 = vpop.f32.mrb[15].mxu0  ;;  %v1738_v6 = vadd.f32 %v1736_v39, %v6981_v30 }
 0x4c2   : > { %v1743_v43 = vsel %vm1739_vm15, %v1738_v6, -inf }
 0x4c3   : > { %1744 = vmax.xlane.f32.xlu1 %v1743_v43 }
 0x4d4   : > { %1875 = vrot.lane.b32.xlu1 %v6310_v44, %s6605_s0 }
 0x4d8   : > { %1873 = vrot.lane.b32.xlu1 %v6311_v45, %s6605_s0 }
 0x548   : > { %v1742_v46 = vpop.xlane.xlu1 %1741 }
 0x549   : > { %v1746_v47 = vsub.f32 %v1737_v36, %v1742_v46 }
 0x54b   : > { %v1748_v48 = vmul.f32 1.442695, %v1746_v47 }
 0x54d   : > { %6444 = vpow2.f32 %v1748_v48 }
 0x550   : > { %v1745_v49 = vpop.xlane.xlu1 %1744 }
 0x551   : > { %v1747_v56 = vsub.f32 %v1738_v6, %v1745_v49 }
 0x553   : > { %v1750_v58 = vmul.f32 1.442695, %v1747_v56 }
 0x554   : > { %v1876_v50 = vpop.permute.xlu1 %1875 }
 0x555   : > { %v1880_v51 = vsel %vm6924_vm11, %v6936_v0, %v1876_v50  ;;  %6446 = vpow2.f32 %v1750_v58 }
 0x556   : > { %v5475_v52 = vcombine.low %v1880_v51, %v1880_v51 }
 0x557   : > { %v6445_v54 = vpop.eup %6444 }
 0x558   : > { %1889 = vrot.lane.b32.xlu0 %v5475_v52, %s6606_s18  ;;  %v1752_v55 = vsel %vm1739_vm15, %v6445_v54, 0.0  ;;  %v1874_v61 = vpop.permute.xlu1 %1873 }
 0x559   : > { %1753 = vadd.xlane.f32.xlu1 %v1752_v55  ;;  %v1879_v63 = vsel %vm6924_vm11, %v6930_v57, %v1874_v61 }
 0x55a   : > { %v5474_v1 = vcombine.low %v1879_v63, %v1879_v63  ;;  %v6312_v63 = vld [vmem:[#allocation3 + $0xc] ss:$0 sps:$4 sm:$0xff]  }
 0x55f   : > { %v6447_v59 = vpop.eup %6446 }
 0x560   : > { %v1755_v60 = vsel %vm1739_vm15, %v6447_v59, 0.0 }
 0x577   : > { %1756 = vadd.xlane.f32.xlu0 %v1755_v60 }
 0x58d   : > { %1887 = vrot.lane.b32.xlu0 %v5474_v1, %s6606_s18  ;;  %v6313_v1 = vld [vmem:[#allocation3 + $0x8] ss:$0 sps:$4 sm:$0xff]  }
 0x591   : > { %1976 = vrot.lane.b32.xlu0 %v6971_v27, %s6606_s18 }
 0x595   : > { %1928 = vrot.lane.b32.xlu0 %v6962_v20, %s6606_s18 }
 0x5ca   : > { %v1890_v2 = vpop.permute.xlu0 %1889 }
 0x5cb   : > { %1894 = vst.msk [vmem:[#allocation2 + $0xc] sm:$0xf] %vm1561_vm12, %v1890_v2 }
 0x5d2   : > { %v1927_v23 = vld [vmem:[#allocation2 + $0xc] sm:$0xf] }
 0x5d3   : > { %v1982_v31 = vsel %vm1637_vm13, %v1927_v23, 0 }
 0x5e6   : > { %v1754_v7 = vpop.xlane.xlu1 %1753 }
 0x5e7   : > { %6448 = vrcp.f32 %v1754_v7 }
 0x5f1   : > { %v6449_v9 = vpop.eup %6448 }
 0x5f2   : > { %v1759_v10 = vmul.f32 %v6449_v9, %v6445_v54 }
 0x5f4   : > { %v1762_v12 = vpack.c.bf16 %v1759_v10, %v1759_v10 }
 0x5f6   : > { %5907 = vmatmul.mubr.msk.bf16.vlgmr.msra.gmra.mrb[16].mxu0 %vm1067_vm6, %v1762_v12 }
 0x5f7   : > { %5911 = vmatpush3.bf16.msra.mxu0 %v1816_v14  ;;  %5912 = vmatprep.mubr.msk.bf16.mxu0 %vm6601_vm3, %v6600_v4 }
 0x5f8   : > { %5922 = vmatprep.subr.bf16.mxu0 %v6600_v4 }
 0x604   : > { %v1757_v15 = vpop.xlane.xlu0 %1756 }
 0x605   : > { %6450 = vrcp.f32 %v1757_v15 }
 0x608   : > { %v1888_v16 = vpop.permute.xlu0 %1887 }
 0x609   : > { %1893 = vst.msk [vmem:[#allocation2 + $0x8] sm:$0xf] %vm1561_vm12, %v1888_v16 }
 0x60c   : > { %v1977_v28 = vpop.permute.xlu0 %1976 }
 0x60f   : > { %v6451_v17 = vpop.eup %6450 }
 0x610   : > { %v1761_v19 = vmul.f32 %v6451_v17, %v6447_v59  ;;  %v1926_v21 = vld [vmem:[#allocation2 + $0x8] sm:$0xf]  ;;  %v1929_v32 = vpop.permute.xlu0 %1928 }
 0x611   : > { %v1934_v22 = vsel %vm1637_vm13, %v1926_v21, 0  ;;  %v6314_v21 = vld [vmem:[#allocation2 + $0x14] ss:$0 sps:$4 sm:$0xff]  }
 0x612   : > { %5917 = vmatpush3.bf16.xpose.msra.mxu1 %v1934_v22  ;;  %v1763_v29 = vpack.c.bf16 %v1761_v19, %v1761_v19 }
 0x613   : > { %5928 = vmatprep.subr.bf16.mxu1 %v6600_v4 }
 0x614   : > { %5913 = vmatmul.mubr.msk.bf16.vlgmr.msra.gmra.mrb[20].mxu0 %vm1067_vm6, %v1763_v29 }
 0x615   : > { %5923 = vmatpush3.bf16.xpose.msra.mxu0 %v1982_v31  ;;  %5924 = vmatprep.mubr.msk.bf16.mxu0 %vm6601_vm3, %v6600_v4 }
 0x616   : > { %5934 = vmatprep.subr.bf16.mxu0 %v6600_v4 }
 0x619   : > { %5919 = vmatmul.mubr.msk.bf16.vlgmr.msra.gmra.mrb[8].mxu1 %vm1637_vm13, %v1929_v32  ;;  %v6315_v32 = vld [vmem:[#allocation2 + $0x10] ss:$0 sps:$4 sm:$0xff]  }
 0x61a   : > { %5930 = vmatprep.mubr.msk.bf16.mxu1 %vm6601_vm3, %v6600_v4 }
 0x61c   : > { %5925 = vmatmul.mubr.msk.bf16.vlgmr.msra.gmra.mrb[24].mxu0 %vm1637_vm13, %v1977_v28 }
 0x61d   : > { %5936 = vmatprep.mubr.msk.bf16.mxu0 %vm6601_vm3, %v6600_v4 }
 0x6c9   : > { %v1806_v33 = vpop.f32.mrb[16].mxu0 }
 0x6ca   : > { %v5908_v34 = vpop.f32.mrb[17].mxu0  ;;  %v1858_v38 = vpack.c.bf16 %v1806_v33, %v1806_v33 }
 0x6cb   : > { %v1809_v35 = vpop.f32.mrb[18].mxu0 }
 0x6cc   : > { %v5909_v36 = vpop.f32.mrb[19].mxu0  ;;  %v2217_v43 = vunpack.c.l.b16 %v1858_v38 }
 0x6e7   : > { %v1852_v37 = vpop.f32.mrb[20].mxu0 }
 0x6e8   : > { %v1859_v39 = vpack.c.bf16 %v1852_v37, %v1852_v37  ;;  %v5914_v40 = vpop.f32.mrb[21].mxu0 }
 0x6e9   : > { %v1855_v41 = vpop.f32.mrb[22].mxu0 }
 0x6ea   : > { %v2218_v42 = vunpack.c.l.b16 %v1859_v39  ;;  %v5915_v6 = vpop.f32.mrb[23].mxu0 }
 0x6ec   : > { %v2219_v44 = vrot.slane %v2218_v42, 7  ;;  %v1970_v45 = vpop.f32.mrb[8].mxu1 }
 0x6ed   : > { %v2024_v46 = vmul.f32 0.17677669, %v1970_v45  ;;  %v5920_v47 = vpop.f32.mrb[9].mxu1 }
 0x6ee   : > { %v7024_v48 = vsel %vm2157_vm0, %v2219_v44, %v2217_v43  ;;  %v1973_v49 = vpop.f32.mrb[10].mxu1 }
 0x6ef   : > { %v5921_v50 = vpop.f32.mrb[11].mxu1  ;;  %v2018_v51 = vpop.f32.mrb[24].mxu0  ;;  %v2026_v52 = vadd.f32 %v2024_v46, %v6981_v30 }
 0x6f0   : > { %v2025_v54 = vmul.f32 0.17677669, %v2018_v51  ;;  %v5926_v55 = vpop.f32.mrb[25].mxu0  ;;  %v6316_v50 = vld [vmem:[%s6677_s30] sm:$0xff]  }
 0x6f1   : > { %v2021_v56 = vpop.f32.mrb[26].mxu0  ;;  %v2028_v58 = vsel %vm1739_vm15, %v2026_v52, -inf }
 0x6f2   : > { %2029 = vmax.xlane.f32.xlu0 %v2028_v58  ;;  %v5927_v59 = vpop.f32.mrb[27].mxu0  ;;  %v2027_v60 = vadd.f32 %v2025_v54, %v6981_v30  ;;  %v6318_v54 = vld [vmem:[%s6677_s30 + $0x10] sm:$0xff]   ;;  %v6317_v56 = vld [vmem:[%s6677_s30 + $0x8] sm:$0xff]   ;;  %v2221_v58 = vpack.c.b16 %v7024_v48, %v7024_v48 }
 0x6f3   : > { %v6319_v59 = vld [vmem:[%s6677_s30 + $0x18] sm:$0xff]  }
 0x6f4   : > { %v2031_v61 = vsel %vm1739_vm15, %v2027_v60, -inf }
 0x6f5   : > { %2032 = vmax.xlane.f32.xlu1 %v2031_v61 }
 0x706   : > { %1906 = vrot.lane.b32.xlu1 %v6312_v63, %s6605_s0 }
 0x70a   : > { %1904 = vrot.lane.b32.xlu1 %v6313_v1, %s6605_s0 }
 0x77f   : > { %v2030_v2 = vpop.xlane.xlu0 %2029 }
 0x780   : > { %v2034_v7 = vsub.f32 %v2026_v52, %v2030_v2 }
 0x782   : > { %v2036_v9 = vmul.f32 1.442695, %v2034_v7  ;;  %v2033_v10 = vpop.xlane.xlu1 %2032 }
 0x783   : > { %v2035_v11 = vsub.f32 %v2027_v60, %v2033_v10 }
 0x784   : > { %6452 = vpow2.f32 %v2036_v9 }
 0x785   : > { %v2038_v12 = vmul.f32 1.442695, %v2035_v11 }
 0x786   : > { %v1907_v19 = vpop.permute.xlu1 %1906 }
 0x787   : > { %6454 = vpow2.f32 %v2038_v12  ;;  %v1911_v22 = vsel %vm6924_vm11, %v6943_v5, %v1907_v19 }
 0x788   : > { %v5479_v28 = vcombine.low %v1911_v22, %v1911_v22 }
 0x78a   : > { %v1905_v23 = vpop.permute.xlu1 %1904 }
 0x78b   : > { %v1910_v29 = vsel %vm6924_vm11, %v6933_v62, %v1905_v23 }
 0x78c   : > { %v5478_v31 = vcombine.low %v1910_v29, %v1910_v29 }
 0x78e   : > { %v6453_v14 = vpop.eup %6452 }
 0x78f   : > { %v2040_v15 = vsel %vm1739_vm15, %v6453_v14, 0.0 }
 0x790   : > { %2041 = vadd.xlane.f32.xlu0 %v2040_v15 }
 0x791   : > { %v6455_v16 = vpop.eup %6454 }
 0x792   : > { %v2043_v17 = vsel %vm1739_vm15, %v6455_v16, 0.0 }
 0x793   : > { %2044 = vadd.xlane.f32.xlu1 %v2043_v17 }
 0x7a4   : > { %2288 = vrot.lane.b32.xlu1 %v6314_v21, %s6607_s22 }
 0x7a6   : > { %1920 = vrot.lane.b32.xlu0 %v5479_v28, %s6606_s18 }
 0x7a8   : > { %2341 = vrot.lane.b32.xlu1 %v6962_v20, %s6607_s22 }
 0x7aa   : > { %1918 = vrot.lane.b32.xlu0 %v5478_v31, %s6606_s18 }
 0x7ae   : > { %2286 = vrot.lane.b32.xlu0 %v6315_v32, %s6607_s22 }
 0x81d   : > { %v2042_v33 = vpop.xlane.xlu0 %2041 }
 0x81e   : > { %6456 = vrcp.f32 %v2042_v33 }
 0x820   : > { %v2045_v34 = vpop.xlane.xlu1 %2044 }
 0x821   : > { %6458 = vrcp.f32 %v2045_v34  ;;  %v1921_v35 = vpop.permute.xlu0 %1920 }
 0x822   : > { %1925 = vst.msk [vmem:[#allocation3 + $0xc] sm:$0xf] %vm1561_vm12, %v1921_v35 }
 0x824   : > { %v2289_v36 = vpop.permute.xlu1 %2288 }
 0x825   : > { %v2293_v37 = vsel %vm6924_vm11, %v6936_v0, %v2289_v36  ;;  %v1919_v38 = vpop.permute.xlu0 %1918 }
 0x826   : > { %v5493_v39 = vcombine.low %v2293_v37, %v2293_v37  ;;  %1924 = vst.msk [vmem:[#allocation3 + $0x8] sm:$0xf] %vm1561_vm12, %v1919_v38 }
 0x828   : > { %2302 = vrot.lane.b32.xlu0 %v5493_v39, %s6607_s22  ;;  %v6457_v40 = vpop.eup %6456  ;;  %v2342_v36 = vpop.permute.xlu1 %2341 }
 0x829   : > { %v2287_v41 = vpop.permute.xlu0 %2286  ;;  %v2053_v42 = vld [vmem:[#allocation3 + $0xc] sm:$0xf]  ;;  %v2047_v46 = vmul.f32 %v6457_v40, %v6453_v14 }
 0x82a   : > { %v2292_v6 = vsel %vm6924_vm11, %v6930_v57, %v2287_v41  ;;  %v2104_v43 = vsel %vm1071_vm4, %v2053_v42, 0 }
 0x82b   : > { %v6459_v44 = vpop.eup %6458  ;;  %v5492_v45 = vcombine.low %v2292_v6, %v2292_v6  ;;  %5935 = vmatpush3.bf16.msra.mxu0 %v2104_v43  ;;  %v2050_v55 = vpack.c.bf16 %v2047_v46, %v2047_v46  ;;  %v6320_v43 = vld [vmem:[#allocation3 + $0x14] ss:$0 sps:$4 sm:$0xff]  }
 0x82c   : > { %v2049_v47 = vmul.f32 %v6459_v44, %v6455_v16  ;;  %5948 = vmatprep.subr.bf16.mxu0 %v6600_v4 }
 0x82d   : > { %2300 = vrot.lane.b32.xlu0 %v5492_v45, %s6607_s22  ;;  %v2052_v49 = vld [vmem:[#allocation3 + $0x8] sm:$0xf] }
 0x82e   : > { %v2058_v51 = vsel %vm1071_vm4, %v2052_v49, 0  ;;  %v2051_v52 = vpack.c.bf16 %v2049_v47, %v2049_v47 }
 0x82f   : > { %5929 = vmatpush3.bf16.msra.mxu1 %v2058_v51 }
 0x830   : > { %5937 = vmatmul.mubr.msk.bf16.vlgmr.msra.gmra.mrb[28].mxu0 %vm1067_vm6, %v2051_v52  ;;  %5940 = vmatprep.subr.bf16.mxu1 %v6600_v4 }
 0x831   : > { %5949 = vmatpush3.bf16.msra.mxu0 %v6316_v50  ;;  %2389 = vrot.lane.b32.xlu0 %v6971_v27, %s6607_s22 }
 0x832   : > { %5931 = vmatmul.mubr.msk.bf16.vlgmr.msra.gmra.mrb[12].mxu1 %vm1067_vm6, %v2050_v55  ;;  %5950 = vmatprep.subr.bf16.mxu0 %v6600_v4 }
 0x833   : > { %5952 = vmatprep.mubr.msk.bf16.mxu0 %vm6601_vm3, %v6600_v4  ;;  %5941 = vmatpush3.bf16.msra.mxu1 %v6318_v54 }
 0x834   : > { %5942 = vmatprep.subr.bf16.mxu1 %v6600_v4  ;;  %5944 = vmatprep.mubr.msk.bf16.mxu1 %vm6601_vm3, %v6600_v4 }
 0x835   : > { %5951 = vmatpush3.bf16.msra.mxu0 %v6317_v56 }
 0x836   : > { %5962 = vmatprep.subr.bf16.mxu0 %v6600_v4 }
 0x837   : > { %5943 = vmatpush3.bf16.msra.mxu1 %v6319_v59  ;;  %v6321_v59 = vld [vmem:[#allocation3 + $0x10] ss:$0 sps:$4 sm:$0xff]  }
 0x838   : > { %5953 = vmatmul.mubr.msk.bf16.vlgmr.msra.gmra.mrb[32].mxu0 %vm1637_vm13, %v2221_v58  ;;  %5956 = vmatprep.subr.bf16.mxu1 %v6600_v4 }
 0x839   : > { %5964 = vmatprep.mubr.msk.bf16.mxu0 %vm6601_vm3, %v6600_v4 }
 0x89a   : > { %v2303_v60 = vpop.permute.xlu0 %2302 }
 0x89b   : > { %2307 = vst.msk [vmem:[#allocation2 + $0x14] sm:$0xf] %vm1561_vm12, %v2303_v60 }
 0x89f   : > { %v2301_v61 = vpop.permute.xlu0 %2300 }
 0x8a0   : > { %2306 = vst.msk [vmem:[#allocation2 + $0x10] sm:$0xf] %vm1561_vm12, %v2301_v61 }
 0x8a2   : > { %v2340_v63 = vld [vmem:[#allocation2 + $0x14] sm:$0xf] }
 0x8a3   : > { %v2395_v48 = vsel %vm1637_vm13, %v2340_v63, 0  ;;  %v2390_v1 = vpop.permute.xlu0 %2389 }
 0x8a4   : > { %5963 = vmatpush3.bf16.xpose.msra.mxu0 %v2395_v48 }
 0x8a5   : > { %5974 = vmatprep.subr.bf16.mxu0 %v6600_v4 }
 0x8a7   : > { %v2339_v28 = vld [vmem:[#allocation2 + $0x10] sm:$0xf] }
 0x8a8   : > { %v2347_v34 = vsel %vm1637_vm13, %v2339_v28, 0 }
 0x8ab   : > { %5965 = vmatmul.mubr.msk.bf16.vlgmr.msra.gmra.mrb[36].mxu0 %vm1637_vm13, %v2390_v1 }
 0x8ac   : > { %5976 = vmatprep.mubr.msk.bf16.mxu0 %vm6601_vm3, %v6600_v4 }
 0x903   : > { %v2140_v2 = vpop.f32.mrb[28].mxu0 }
 0x904   : > { %v2147_v7 = vpack.c.bf16 %v2140_v2, %v2140_v2  ;;  %v5938_v9 = vpop.f32.mrb[29].mxu0 }
 0x905   : > { %v2094_v10 = vpop.f32.mrb[12].mxu1  ;;  %v2143_v11 = vpop.f32.mrb[30].mxu0 }
 0x906   : > { %v2155_v12 = vunpack.c.l.b16 %v2147_v7  ;;  %v2146_v14 = vpack.c.bf16 %v2094_v10, %v2094_v10  ;;  %v5932_v15 = vpop.f32.mrb[13].mxu1  ;;  %v5939_v16 = vpop.f32.mrb[31].mxu0  ;;  %v6322_v10 = vld [vmem:[#allocation2 + $0x1c] ss:$0 sps:$4 sm:$0xff]  }
 0x907   : > { %v2097_v17 = vpop.f32.mrb[14].mxu1 }
 0x908   : > { %v2156_v19 = vrot.slane %v2155_v12, 7  ;;  %v2154_v21 = vunpack.c.l.b16 %v2146_v14  ;;  %v5933_v22 = vpop.f32.mrb[15].mxu1 }
 0x909   : > { %v6323_v22 = vld [vmem:[#allocation2 + $0x18] ss:$0 sps:$4 sm:$0xff]  }
 0x90a   : > { %v2158_v23 = vsel %vm2157_vm0, %v2156_v19, %v2154_v21 }
 0x90b   : > { %v2159_v29 = vpack.c.b16 %v2158_v23, %v2158_v23  ;;  %v2271_v31 = vpop.f32.mrb[32].mxu0 }
 0x90c   : > { %v5954_v32 = vpop.f32.mrb[33].mxu0 }
 0x90d   : > { %5945 = vmatmul.mubr.msk.bf16.vlgmr.msra.gmra.mrb[16].mxu1 %vm1637_vm13, %v2159_v29  ;;  %v2274_v33 = vpop.f32.mrb[34].mxu0 }
 0x90e   : > { %5957 = vmatpush3.bf16.xpose.msra.mxu1 %v2347_v34  ;;  %v5955_v35 = vpop.f32.mrb[35].mxu0  ;;  %5958 = vmatprep.mubr.msk.bf16.mxu1 %vm6601_vm3, %v6600_v4 }
 0x90f   : > { %5968 = vmatprep.subr.bf16.mxu1 %v6600_v4 }
 0x915   : > { %5959 = vmatmul.mubr.msk.bf16.vlgmr.msra.gmra.mrb[20].mxu1 %vm1637_vm13, %v2342_v36 }
 0x916   : > { %5970 = vmatprep.mubr.msk.bf16.mxu1 %vm6601_vm3, %v6600_v4 }
 0x97e   : > { %v2431_v37 = vpop.f32.mrb[36].mxu0 }
 0x97f   : > { %v2438_v38 = vmul.f32 0.17677669, %v2431_v37  ;;  %v5966_v39 = vpop.f32.mrb[37].mxu0 }
 0x980   : > { %v2434_v40 = vpop.f32.mrb[38].mxu0 }
 0x981   : > { %v5967_v41 = vpop.f32.mrb[39].mxu0  ;;  %v2440_v42 = vadd.f32 %v2438_v38, %v6981_v30 }
 0x983   : > { %v2444_v6 = vsel %vm1739_vm15, %v2440_v42, -inf }
 0x984   : > { %2445 = vmax.xlane.f32.xlu0 %v2444_v6 }
 0x99a   : > { %2319 = vrot.lane.b32.xlu0 %v6320_v43, %s6607_s22 }
 0x9e0   : > { %v2209_v44 = vpop.f32.mrb[16].mxu1 }
 0x9e1   : > { %v7100_v45 = vadd.f32 %v2271_v31, %v2209_v44  ;;  %v5946_v46 = vpop.f32.mrb[17].mxu1 }
 0x9e2   : > { %v2212_v47 = vpop.f32.mrb[18].mxu1  ;;  %v6324_v46 = vld [vmem:[%s6677_s30 + $0x20] sm:$0xff]  }
 0x9e3   : > { %v5947_v49 = vpop.f32.mrb[19].mxu1 }
 0x9e8   : > { %v2383_v50 = vpop.f32.mrb[20].mxu1 }
 0x9e9   : > { %v2437_v51 = vmul.f32 0.17677669, %v2383_v50  ;;  %v5960_v52 = vpop.f32.mrb[21].mxu1 }
 0x9ea   : > { %v2386_v54 = vpop.f32.mrb[22].mxu1 }
 0x9eb   : > { %v5961_v55 = vpop.f32.mrb[23].mxu1  ;;  %v2439_v56 = vadd.f32 %v2437_v51, %v6981_v30 }
 0x9ed   : > { %v2441_v58 = vsel %vm1739_vm15, %v2439_v56, -inf }
 0x9ee   : > { %2442 = vmax.xlane.f32.xlu1 %v2441_v58 }
 0x9ff   : > { %2317 = vrot.lane.b32.xlu1 %v6321_v59, %s6607_s22 }
 0xa11   : > { %v2446_v60 = vpop.xlane.xlu0 %2445 }
 0xa12   : > { %v2448_v61 = vsub.f32 %v2440_v42, %v2446_v60 }
 0xa14   : > { %v2451_v63 = vmul.f32 1.442695, %v2448_v61 }
 0xa15   : > { %v2320_v2 = vpop.permute.xlu0 %2319 }
 0xa16   : > { %6460 = vpow2.f32 %v2451_v63  ;;  %v2324_v7 = vsel %vm6924_vm11, %v6943_v5, %v2320_v2 }
 0xa17   : > { %v5497_v9 = vcombine.low %v2324_v7, %v2324_v7 }
 0xa20   : > { %v6461_v48 = vpop.eup %6460 }
 0xa21   : > { %v2456_v1 = vsel %vm1739_vm15, %v6461_v48, 0.0 }
 0xa22   : > { %2457 = vadd.xlane.f32.xlu0 %v2456_v1 }
 0xa38   : > { %2333 = vrot.lane.b32.xlu0 %v5497_v9, %s6607_s22 }
 0xa3c   : > { %2639 = vrot.lane.b32.xlu0 %v6322_v10, %s6606_s18 }
 0xa7b   : > { %v2443_v11 = vpop.xlane.xlu1 %2442 }
 0xa7c   : > { %v2447_v12 = vsub.f32 %v2439_v56, %v2443_v11 }
 0xa7e   : > { %v2449_v14 = vmul.f32 1.442695, %v2447_v12 }
 0xa7f   : > { %v2318_v17 = vpop.permute.xlu1 %2317 }
 0xa80   : > { %6462 = vpow2.f32 %v2449_v14  ;;  %v2323_v19 = vsel %vm6924_vm11, %v6933_v62, %v2318_v17 }
 0xa81   : > { %v5496_v21 = vcombine.low %v2323_v19, %v2323_v19 }
 0xa8a   : > { %v6463_v15 = vpop.eup %6462 }
 0xa8b   : > { %v2453_v16 = vsel %vm1739_vm15, %v6463_v15, 0.0 }
 0xa8c   : > { %2454 = vadd.xlane.f32.xlu1 %v2453_v16 }
 0xa9d   : > { %2331 = vrot.lane.b32.xlu1 %v5496_v21, %s6607_s22 }
 0xaa1   : > { %2637 = vrot.lane.b32.xlu1 %v6323_v22, %s6606_s18 }
 0xaaf   : > { %v2458_v23 = vpop.xlane.xlu0 %2457 }
 0xab0   : > { %6464 = vrcp.f32 %v2458_v23 }
 0xab3   : > { %v2334_v28 = vpop.permute.xlu0 %2333 }
 0xab4   : > { %2338 = vst.msk [vmem:[#allocation3 + $0x14] sm:$0xf] %vm1561_vm12, %v2334_v28  ;;  %v6326_v28 = vld [vmem:[#allocation3 + $0x18] ss:$0 sps:$4 sm:$0xff]  }
 0xab7   : > { %v2640_v29 = vpop.permute.xlu0 %2639 }
 0xab8   : > { %v2644_v31 = vsel %vm6924_vm11, %v6936_v0, %v2640_v29 }
 0xab9   : > { %v5508_v32 = vcombine.low %v2644_v31, %v2644_v31 }
 0xaba   : > { %v6465_v33 = vpop.eup %6464 }
 0xabb   : > { %v2462_v34 = vmul.f32 %v6465_v33, %v6461_v48  ;;  %2653 = vrot.lane.b32.xlu0 %v5508_v32, %s6605_s0  ;;  %v2466_v35 = vld [vmem:[#allocation3 + $0x14] sm:$0xf] }
 0xabc   : > { %v2517_v36 = vsel %vm1071_vm4, %v2466_v35, 0 }
 0xabd   : > { %5975 = vmatpush3.bf16.msra.mxu0 %v2517_v36  ;;  %v2464_v37 = vpack.c.bf16 %v2462_v34, %v2462_v34 }
 0xabe   : > { %5988 = vmatprep.subr.bf16.mxu0 %v6600_v4 }
 0xabf   : > { %2740 = vrot.lane.b32.xlu0 %v6971_v27, %s6605_s0 }
 0xac0   : > { %5977 = vmatmul.mubr.msk.bf16.vlgmr.msra.gmra.mrb[40].mxu0 %vm1067_vm6, %v2464_v37 }
 0xac1   : > { %5990 = vmatprep.mubr.msk.bf16.mxu0 %vm6601_vm3, %v6600_v4 }
 0xb19   : > { %v2455_v0 = vpop.xlane.xlu1 %2454 }
 0xb1a   : > { %6466 = vrcp.f32 %v2455_v0 }
 0xb1d   : > { %v2332_v38 = vpop.permute.xlu1 %2331 }
 0xb1e   : > { %2337 = vst.msk [vmem:[#allocation3 + $0x10] sm:$0xf] %vm1561_vm12, %v2332_v38 }
 0xb21   : > { %v2638_v39 = vpop.permute.xlu1 %2637 }
 0xb22   : > { %v2643_v40 = vsel %vm6924_vm11, %v6930_v57, %v2638_v39  ;;  %v6325_v57 = vld [vmem:[%s6677_s30 + $0x28] sm:$0xff]  }
 0xb23   : > { %v5507_v41 = vcombine.low %v2643_v40, %v2643_v40 }
 0xb24   : > { %v6467_v42 = vpop.eup %6466 }
 0xb25   : > { %v2460_v27 = vmul.f32 %v6467_v42, %v6463_v15  ;;  %2651 = vrot.lane.b32.xlu1 %v5507_v41, %s6605_s0  ;;  %v2465_v6 = vld [vmem:[#allocation3 + $0x10] sm:$0xf]  ;;  %v6327_v41 = vld [vmem:[#allocation3 + $0x1c] ss:$0 sps:$4 sm:$0xff]  }
 0xb26   : > { %v2471_v43 = vsel %vm1071_vm4, %v2465_v6, 0 }
 0xb27   : > { %5969 = vmatpush3.bf16.msra.mxu1 %v2471_v43  ;;  %v2463_v44 = vpack.c.bf16 %v2460_v27, %v2460_v27 }
 0xb28   : > { %5980 = vmatprep.subr.bf16.mxu1 %v6600_v4 }
 0xb29   : > { %2692 = vrot.lane.b32.xlu1 %v6962_v20, %s6605_s0 }
 0xb2a   : > { %5971 = vmatmul.mubr.msk.bf16.vlgmr.msra.gmra.mrb[24].mxu1 %vm1067_vm6, %v2463_v44 }
 0xb2b   : > { %5981 = vmatpush3.bf16.msra.mxu1 %v6324_v46  ;;  %5984 = vmatprep.mubr.msk.bf16.mxu1 %vm6601_vm3, %v6600_v4 }
 0xb2c   : > { %5982 = vmatprep.subr.bf16.mxu1 %v6600_v4 }
 0xb2d   : > { %v2654_v47 = vpop.permute.xlu0 %2653 }
 0xb2e   : > { %2658 = vst.msk [vmem:[#allocation2 + $0x1c] sm:$0xf] %vm1561_vm12, %v2654_v47 }
 0xb2f   : > { %5983 = vmatpush3.bf16.msra.mxu1 %v6325_v57 }
 0xb30   : > { %5994 = vmatprep.subr.bf16.mxu1 %v6600_v4 }
 0xb31   : > { %v2741_v14 = vpop.permute.xlu0 %2740 }
 0xb35   : > { %v2691_v10 = vld [vmem:[#allocation2 + $0x1c] sm:$0xf] }
 0xb36   : > { %v2746_v12 = vsel %vm1637_vm13, %v2691_v10, 0  ;;  %v6329_v10 = vld [vmem:[%s6677_s30 + $0x38] sm:$0xff]  }
 0xb93   : > { %v2553_v49 = vpop.f32.mrb[40].mxu0 }
 0xb94   : > { %v5978_v50 = vpop.f32.mrb[41].mxu0  ;;  %v2560_v58 = vpack.c.bf16 %v2553_v49, %v2553_v49 }
 0xb95   : > { %v2556_v51 = vpop.f32.mrb[42].mxu0 }
 0xb96   : > { %v5979_v52 = vpop.f32.mrb[43].mxu0  ;;  %v2568_v59 = vunpack.c.l.b16 %v2560_v58 }
 0xb97   : > { %v2652_v20 = vpop.permute.xlu1 %2651 }
 0xb98   : > { %2657 = vst.msk [vmem:[#allocation2 + $0x18] sm:$0xf] %vm1561_vm12, %v2652_v20  ;;  %v2569_v1 = vrot.slane %v2568_v59, 7 }
 0xb9b   : > { %v2693_v56 = vpop.permute.xlu1 %2692 }
 0xb9f   : > { %v2690_v54 = vld [vmem:[#allocation2 + $0x18] sm:$0xf] }
 0xba0   : > { %v2698_v55 = vsel %vm1637_vm13, %v2690_v54, 0 }
 0xba1   : > { %5989 = vmatpush3.bf16.xpose.msra.mxu0 %v2698_v55 }
 0xba2   : > { %6000 = vmatprep.subr.bf16.mxu0 %v6600_v4 }
 0xba8   : > { %5991 = vmatmul.mubr.msk.bf16.vlgmr.msra.gmra.mrb[44].mxu0 %vm1637_vm13, %v2693_v56 }
 0xba9   : > { %6002 = vmatprep.mubr.msk.bf16.mxu0 %vm6601_vm3, %v6600_v4 }
 0xbfd   : > { %v2507_v60 = vpop.f32.mrb[24].mxu1 }
 0xbfe   : > { %v2559_v61 = vpack.c.bf16 %v2507_v60, %v2507_v60  ;;  %v5972_v63 = vpop.f32.mrb[25].mxu1 }
 0xbff   : > { %v2510_v48 = vpop.f32.mrb[26].mxu1 }
 0xc00   : > { %v2567_v2 = vunpack.c.l.b16 %v2559_v61  ;;  %v5973_v7 = vpop.f32.mrb[27].mxu1 }
 0xc02   : > { %v2570_v9 = vsel %vm2157_vm0, %v2569_v1, %v2567_v2 }
 0xc03   : > { %v2571_v11 = vpack.c.b16 %v2570_v9, %v2570_v9  ;;  %v6328_v9 = vld [vmem:[%s6677_s30 + $0x30] sm:$0xff]  }
 0xc05   : > { %5985 = vmatmul.mubr.msk.bf16.vlgmr.msra.gmra.mrb[28].mxu1 %vm1637_vm13, %v2571_v11 }
 0xc06   : > { %5995 = vmatpush3.bf16.xpose.msra.mxu1 %v2746_v12  ;;  %5996 = vmatprep.mubr.msk.bf16.mxu1 %vm6601_vm3, %v6600_v4 }
 0xc07   : > { %6006 = vmatprep.subr.bf16.mxu1 %v6600_v4 }
 0xc0d   : > { %5997 = vmatmul.mubr.msk.bf16.vlgmr.msra.gmra.mrb[32].mxu1 %vm1637_vm13, %v2741_v14 }
 0xc0e   : > { %6008 = vmatprep.mubr.msk.bf16.mxu1 %vm6601_vm3, %v6600_v4 }
 0xc7b   : > { %v2734_v15 = vpop.f32.mrb[44].mxu0 }
 0xc7c   : > { %v2788_v16 = vmul.f32 0.17677669, %v2734_v15  ;;  %v5992_v17 = vpop.f32.mrb[45].mxu0 }
 0xc7d   : > { %v2737_v19 = vpop.f32.mrb[46].mxu0 }
 0xc7e   : > { %v5993_v21 = vpop.f32.mrb[47].mxu0  ;;  %v2790_v22 = vadd.f32 %v2788_v16, %v6981_v30 }
 0xc80   : > { %v2792_v23 = vsel %vm1739_vm15, %v2790_v22, -inf }
 0xc81   : > { %2793 = vmax.xlane.f32.xlu1 %v2792_v23 }
 0xc92   : > { %2668 = vrot.lane.b32.xlu1 %v6326_v28, %s6606_s18 }
 0xcd8   : > { %v2621_v29 = vpop.f32.mrb[28].mxu1 }
 0xcd9   : > { %v7165_v31 = vadd.f32 %v2621_v29, %v7100_v45  ;;  %v5986_v32 = vpop.f32.mrb[29].mxu1 }
 0xcda   : > { %v2624_v33 = vpop.f32.mrb[30].mxu1 }
 0xcdb   : > { %v5987_v34 = vpop.f32.mrb[31].mxu1 }
 0xce0   : > { %v2782_v35 = vpop.f32.mrb[32].mxu1 }
 0xce1   : > { %v2789_v36 = vmul.f32 0.17677669, %v2782_v35  ;;  %v5998_v37 = vpop.f32.mrb[33].mxu1 }
 0xce2   : > { %v2785_v0 = vpop.f32.mrb[34].mxu1 }
 0xce3   : > { %v5999_v38 = vpop.f32.mrb[35].mxu1  ;;  %v2791_v39 = vadd.f32 %v2789_v36, %v6981_v30 }
 0xce4   : > { %v5520_v38 = vld [vmem:[%s6682_s6] ss:$0 sm:$0xff] }
 0xce5   : > { %v2795_v40 = vsel %vm1739_vm15, %v2791_v39, -inf }
 0xce6   : > { %2796 = vmax.xlane.f32.xlu0 %v2795_v40 }
 0xcfc   : > { %2670 = vrot.lane.b32.xlu0 %v6327_v41, %s6606_s18 }
 0xd0e   : > { %v2794_v42 = vpop.xlane.xlu1 %2793 }
 0xd0f   : > { %v2798_v27 = vsub.f32 %v2790_v22, %v2794_v42 }
 0xd11   : > { %v2800_v45 = vmul.f32 1.442695, %v2798_v27  ;;  %v6330_v27 = vld [vmem:[%s6697_s27] sm:$0xff]  }
 0xd12   : > { %v2669_v44 = vpop.permute.xlu1 %2668 }
 0xd13   : > { %6468 = vpow2.f32 %v2800_v45  ;;  %v2674_v46 = vsel %vm6924_vm11, %v6933_v62, %v2669_v44  ;;  %v6331_v45 = vld [vmem:[%s6697_s27 + $0x8] sm:$0xff]  }
 0xd14   : > { %v5511_v30 = vcombine.low %v2674_v46, %v2674_v46  ;;  %v6332_v46 = vld [vmem:[%s6697_s27 + $0x10] sm:$0xff]  }
 0xd1d   : > { %v6469_v6 = vpop.eup %6468 }
 0xd1e   : > { %v2804_v43 = vsel %vm1739_vm15, %v6469_v6, 0.0 }
 0xd1f   : > { %2805 = vadd.xlane.f32.xlu1 %v2804_v43 }
 0xd30   : > { %2682 = vrot.lane.b32.xlu1 %v5511_v30, %s6605_s0  ;;  %v6333_v30 = vld [vmem:[%s6697_s27 + $0x18] sm:$0xff]  }
 0xd73   : > { %v2797_v57 = vpop.xlane.xlu0 %2796 }
 0xd74   : > { %v2799_v47 = vsub.f32 %v2791_v39, %v2797_v57  ;;  %v6334_v57 = vld [vmem:[%s6697_s27 + $0x20] sm:$0xff]  }
 0xd76   : > { %v2802_v49 = vmul.f32 1.442695, %v2799_v47  ;;  %v6335_v47 = vld [vmem:[%s6697_s27 + $0x28] sm:$0xff]  }
 0xd77   : > { %v2671_v52 = vpop.permute.xlu0 %2670 }
 0xd78   : > { %6470 = vpow2.f32 %v2802_v49  ;;  %v2675_v20 = vsel %vm6924_vm11, %v6943_v5, %v2671_v52  ;;  %v6336_v49 = vld [vmem:[%s6697_s27 + $0x30] sm:$0xff]  }
 0xd79   : > { %v5512_v54 = vcombine.low %v2675_v20, %v2675_v20 }
 0xd82   : > { %v6471_v50 = vpop.eup %6470 }
 0xd83   : > { %v2807_v51 = vsel %vm1739_vm15, %v6471_v50, 0.0 }
 0xd84   : > { %2808 = vadd.xlane.f32.xlu0 %v2807_v51 }
 0xd9a   : > { %2684 = vrot.lane.b32.xlu0 %v5512_v54, %s6605_s0 }
 0xdac   : > { %v2806_v62 = vpop.xlane.xlu1 %2805 }
 0xdad   : > { %6472 = vrcp.f32 %v2806_v62  ;;  %v5521_v62 = vld [vmem:[%s6687_s12] ss:$0 sm:$0xff] }
 0xdb0   : > { %v2683_v55 = vpop.permute.xlu1 %2682 }
 0xdb1   : > { %2688 = vst.msk [vmem:[#allocation3 + $0x18] sm:$0xf] %vm1561_vm12, %v2683_v55 }
 0xdb7   : > { %v6473_v56 = vpop.eup %6472 }
 0xdb8   : > { %v2811_v58 = vmul.f32 %v6473_v56, %v6469_v6  ;;  %v2816_v59 = vld [vmem:[#allocation3 + $0x18] sm:$0xf]  ;;  %v5522_v56 = vld [vmem:[%s6692_s20] ss:$0 sm:$0xff] }
 0xdb9   : > { %v2822_v60 = vsel %vm1071_vm4, %v2816_v59, 0 }
 0xdba   : > { %6001 = vmatpush3.bf16.msra.mxu0 %v2822_v60  ;;  %v2814_v61 = vpack.c.bf16 %v2811_v58, %v2811_v58 }
 0xdbb   : > { %6012 = vmatprep.subr.bf16.mxu0 %v6600_v4 }
 0xdbd   : > { %6003 = vmatmul.mubr.msk.bf16.vlgmr.msra.gmra.mrb[48].mxu0 %vm1067_vm6, %v2814_v61  ;;  %v3147_v61 = vld [vmem:[%s7581_s23] sm:$0xf] }
 0xdbe   : > { %6016 = vmatprep.mubr.msk.bf16.mxu0 %vm6601_vm3, %v6600_v4  ;;  %6013 = vmatpush3.bf16.msra.mxu0 %v6328_v9 }
 0xdbf   : > { %6014 = vmatprep.subr.bf16.mxu0 %v6600_v4 }
 0xdc2   : > { %6015 = vmatpush3.bf16.msra.mxu0 %v6329_v10 }
 0xdc3   : > { %6040 = vmatprep.subr.bf16.mxu0 %v6600_v4 }
 0xe11   : > { %v2809_v53 = vpop.xlane.xlu0 %2808 }
 0xe12   : > { %6474 = vrcp.f32 %v2809_v53  ;;  %v3158_v53 = vsel %vm1637_vm13, %v3147_v61, 0 }
 0xe15   : > { %v2685_v5 = vpop.permute.xlu0 %2684 }
 0xe16   : > { %2689 = vst.msk [vmem:[#allocation3 + $0x1c] sm:$0xf] %vm1561_vm12, %v2685_v5  ;;  %v5523_v5 = vld [vmem:[%s7582_s26] ss:$0 sm:$0xff]  ;;  %s7592_s26 = sld [smem:[#allocation20_spill]] }
 0xe1c   : > { %v6475_v63 = vpop.eup %6474 }
 0xe1d   : > { %v2813_v48 = vmul.f32 %v6475_v63, %v6471_v50  ;;  %v2817_v1 = vld [vmem:[#allocation3 + $0x1c] sm:$0xf] }
 0xe1e   : > { %v2868_v2 = vsel %vm1071_vm4, %v2817_v1, 0  ;;  %v6337_v50 = vld [vmem:[%s6697_s27 + $0x38] sm:$0xff]  }
 0xe1f   : > { %6007 = vmatpush3.bf16.msra.mxu1 %v2868_v2  ;;  %v2815_v7 = vpack.c.bf16 %v2813_v48, %v2813_v48 }
 0xe20   : > { %6020 = vmatprep.subr.bf16.mxu1 %v6600_v4 }
 0xe22   : > { %6009 = vmatmul.mubr.msk.bf16.vlgmr.msra.gmra.mrb[36].mxu1 %vm1067_vm6, %v2815_v7 }
 0xe23   : > { %6036 = vmatprep.mubr.msk.bf16.mxu1 %vm6601_vm3, %v6600_v4  ;;  %6021 = vmatpush3.bf16.msra.mxu1 %v6330_v27 }
 0xe24   : > { %6022 = vmatprep.subr.bf16.mxu1 %v6600_v4 }
 0xe27   : > { %6023 = vmatpush3.bf16.msra.mxu1 %v6331_v45 }
 0xe28   : > { %6024 = vmatprep.subr.bf16.mxu1 %v6600_v4 }
 0xe2b   : > { %6025 = vmatpush3.bf16.msra.mxu1 %v6332_v46 }
 0xe2c   : > { %6026 = vmatprep.subr.bf16.mxu1 %v6600_v4 }
 0xe2f   : > { %6027 = vmatpush3.bf16.msra.mxu1 %v6333_v30 }
 0xe30   : > { %6028 = vmatprep.subr.bf16.mxu1 %v6600_v4 }
 0xe33   : > { %6029 = vmatpush3.bf16.msra.mxu1 %v6334_v57  ;;  %v5537_v57 = vld [vmem:[%s7581_s23 + $0x8] sm:$0xf] }
 0xe34   : > { %6030 = vmatprep.subr.bf16.mxu1 %v6600_v4 }
 0xe37   : > { %6031 = vmatpush3.bf16.msra.mxu1 %v6335_v47  ;;  %v3390_v47 = vsel %vm1637_vm13, %v5537_v57, 0 }
 0xe38   : > { %6032 = vmatprep.subr.bf16.mxu1 %v6600_v4 }
 0xe3b   : > { %6033 = vmatpush3.bf16.msra.mxu1 %v6336_v49  ;;  %v3281_v49 = vld [vmem:[%s7584_s1] sm:$0xf] }
 0xe3c   : > { %6034 = vmatprep.subr.bf16.mxu1 %v6600_v4 }
 0xe3f   : > { %6035 = vmatpush3.bf16.msra.mxu1 %v6337_v50  ;;  %v3287_v50 = vsel %vm1071_vm4, %v3281_v49, 0 }
 0xe40   : > { %6064 = vmatprep.subr.bf16.mxu1 %v6600_v4 }
 0xe90   : > { %v2858_v11 = vpop.f32.mrb[48].mxu0 }
 0xe91   : > { %v6004_v12 = vpop.f32.mrb[49].mxu0  ;;  %v2910_v17 = vpack.c.bf16 %v2858_v11, %v2858_v11 }
 0xe92   : > { %v2861_v14 = vpop.f32.mrb[50].mxu0  ;;  %v3148_v12 = vld [vmem:[%s7581_s23 + $0x4] sm:$0xf] }
 0xe93   : > { %v6005_v15 = vpop.f32.mrb[51].mxu0  ;;  %v2918_v29 = vunpack.c.l.b16 %v2910_v17  ;;  %v3209_v17 = vsel %vm1637_vm13, %v3148_v12, 0 }
 0xef5   : > { %v2904_v16 = vpop.f32.mrb[36].mxu1 }
 0xef6   : > { %v2911_v19 = vpack.c.bf16 %v2904_v16, %v2904_v16  ;;  %v6010_v21 = vpop.f32.mrb[37].mxu1 }
 0xef7   : > { %v2907_v22 = vpop.f32.mrb[38].mxu1 }
 0xef8   : > { %v2919_v23 = vunpack.c.l.b16 %v2911_v19  ;;  %v6011_v28 = vpop.f32.mrb[39].mxu1  ;;  %v3253_v22 = vld [vmem:[%s7583_s28] sm:$0x1] }
 0xefa   : > { %v2920_v32 = vrot.slane %v2919_v23, 7 }
 0xefc   : > { %v2921_v33 = vsel %vm2157_vm0, %v2920_v32, %v2918_v29 }
 0xefd   : > { %v2922_v34 = vpack.c.b16 %v2921_v33, %v2921_v33 }
 0xeff   : > { %6017 = vmatmul.mubr.msk.bf16.vlgmr.msra.gmra.mrb[52].mxu0 %vm1637_vm13, %v2922_v34 }
 0xf00   : > { %6042 = vmatprep.mubr.msk.bf16.mxu0 %vm6601_vm3, %v6600_v4  ;;  %6041 = vmatpush3.bf16.xpose.msra.mxu0 %v3158_v53  ;;  %v5538_v53 = vld [vmem:[%s7581_s23 + $0xc] sm:$0xf] }
 0xf01   : > { %6046 = vmatprep.subr.bf16.mxu0 %v6600_v4 }
 0xfd2   : > { %v2972_v35 = vpop.f32.mrb[52].mxu0 }
 0xfd3   : > { %v2978_v36 = vadd.f32 %v2972_v35, %v7165_v31  ;;  %v6018_v37 = vpop.f32.mrb[53].mxu0 }
 0xfd4   : > { %v2975_v0 = vpop.f32.mrb[54].mxu0 }
 0xfd5   : > { %v2979_v39 = vadd.f32 %v2978_v36, %v6898_v13  ;;  %v6019_v40 = vpop.f32.mrb[55].mxu0  ;;  %v3254_v36 = vld [vmem:[%s7583_s28 + $0x1] sm:$0x1] }
 0xfd7   : > { %v2987_v41 = vadd.f32 %v5520_v38, %v2979_v39 }
 0xfd9   : > { %v2990_v42 = vsel %vm1217_vm9, %v2987_v41, 0.0 }
 0xfda   : > { %2991 = vadd.xlane.f32.xlu0 %v2990_v42 }
0x1067   : > { %v2992_v31 = vpop.xlane.xlu0 %2991 }
0x1068   : > { %v2993_v6 = vmul.f32 0.0078125, %v2992_v31 }
0x106a   : > { %v2994_v13 = vsub.f32 %v2987_v41, %v2993_v6 }
0x106c   : > { %v2995_v43 = vmul.f32 %v2994_v13, %v2994_v13 }
0x106e   : > { %v2996_v44 = vsel %vm1217_vm9, %v2995_v43, 0.0 }
0x106f   : > { %2997 = vadd.xlane.f32.xlu1 %v2996_v44 }
0x10fc   : > { %v2998_v51 = vpop.xlane.xlu1 %2997 }
0x10fd   : > { %v2999_v52 = vmul.f32 0.0078125, %v2998_v51 }
0x10ff   : > { %v3000_v20 = vadd.f32 1e-12, %v2999_v52 }
0x1101   : > { %6476 = vrsqrt.f32 %v3000_v20 }
0x110b   : > { %v6477_v54 = vpop.eup %6476 }
0x110c   : > { %v3002_v55 = vmul.f32 %v6477_v54, %v2994_v13  ;;  %v3282_v54 = vld [vmem:[%s7584_s1 + $0x4] sm:$0xf] }
0x110e   : > { %v3009_v58 = vmul.f32 %v5521_v62, %v3002_v55 }
0x1110   : > { %v7223_v59 = vadd.f32 %v5522_v56, %v3009_v58  ;;  %v3333_v58 = vsel %vm1071_vm4, %v3282_v54, 0 }
0x1112   : > { %v3017_v60 = vpack.c.bf16 %v7223_v59, %v7223_v59 }
0x1114   : > { %6037 = vmatmul.mubr.bf16.vlgmr.msra.gmra.mrb[40].mxu1 %v3017_v60 }
0x1115   : > { %6066 = vmatprep.mubr.msk.bf16.mxu1 %vm6601_vm3, %v6600_v4  ;;  %6065 = vmatpush3.bf16.xpose.msra.mxu1 %v3390_v47 }
0x1116   : > { %6076 = vmatprep.subr.bf16.mxu1 %v6600_v4 }
0x11e7   : > { %v3123_v63 = vpop.f32.mrb[40].mxu1 }
0x11e8   : > { %v3124_v48 = vadd.f32 %v5523_v5, %v3123_v63  ;;  %v6038_v1 = vpop.f32.mrb[41].mxu1  ;;  %v3438_v63 = vsel %vm1637_vm13, %v5538_v53, 0  ;;  %v6338_v53 = vld [vmem:[%s7585_s2] sm:$0xff]  }
0x11e9   : > { %v3126_v2 = vpop.f32.mrb[42].mxu1 }
0x11ea   : > { %v3129_v7 = vpack.c.bf16 %v3124_v48, %v3124_v48  ;;  %v6039_v9 = vpop.f32.mrb[43].mxu1  ;;  %v3482_v2 = vld [vmem:[%s7583_s28] sm:$0x1] }
0x11ec   : > { %v3137_v10 = vrot.slane %v3129_v7, %v6912_v24 }
0x11ee   : > { %v3144_v11 = vrot.slane %v3137_v10, %v6912_v24 }
0x11f0   : > { %v5532_v14 = vpack.i.b16 %v3144_v11, %v3144_v11  ;;  %v3146_v15 = vunpack.i.h.s16 %v3144_v11 }
0x11f2   : > { %v7237_v16 = vrot.slane %v5532_v14, %v6857_v26  ;;  %v3200_v19 = vpack.i.b16 %v3146_v15, %v3146_v15 }
0x11f4   : > { %6043 = vmatmul.mubr.msk.bf16.vlgmr.msra.gmra.mrb[56].mxu0 %vm1637_vm13, %v7237_v16  ;;  %v7246_v24 = vrot.slane %v3200_v19, %v6857_v26 }
0x11f5   : > { %6047 = vmatpush3.bf16.xpose.msra.mxu0 %v3209_v17  ;;  %6048 = vmatprep.mubr.msk.bf16.mxu0 %vm6601_vm3, %v6600_v4 }
0x11f6   : > { %6052 = vmatprep.subr.bf16.mxu0 %v6600_v4 }
0x11fc   : > { %6049 = vmatmul.mubr.msk.bf16.vlgmr.msra.gmra.mrb[60].mxu0 %vm1637_vm13, %v7246_v24 }
0x11fd   : > { %6054 = vmatprep.mubr.msk.bf16.mxu0 %vm6601_vm3, %v6600_v4  ;;  %6053 = vmatpush3.bf16.msra.mxu0 %v3287_v50  ;;  %v5541_v50 = vld [vmem:[%s7584_s1 + $0x8] sm:$0xf] }
0x11fe   : > { %6058 = vmatprep.subr.bf16.mxu0 %v6600_v4 }
0x12c7   : > { %v3194_v21 = vpop.f32.mrb[56].mxu0 }
0x12c8   : > { %v3251_v23 = vmul.f32 0.17677669, %v3194_v21  ;;  %v6044_v28 = vpop.f32.mrb[57].mxu0 }
0x12c9   : > { %v3197_v29 = vpop.f32.mrb[58].mxu0 }
0x12ca   : > { %v6045_v32 = vpop.f32.mrb[59].mxu0  ;;  %v3255_v33 = vadd.f32 %v3253_v22, %v3251_v23 }
0x12cc   : > { %v3257_v34 = vsel %vm1739_vm15, %v3255_v33, -inf }
0x12cd   : > { %3258 = vmax.xlane.f32.xlu0 %v3257_v34 }
0x12cf   : > { %v3245_v35 = vpop.f32.mrb[60].mxu0 }
0x12d0   : > { %v3252_v37 = vmul.f32 0.17677669, %v3245_v35  ;;  %v6050_v0 = vpop.f32.mrb[61].mxu0 }
0x12d1   : > { %v3248_v38 = vpop.f32.mrb[62].mxu0 }
0x12d2   : > { %v6051_v39 = vpop.f32.mrb[63].mxu0  ;;  %v3256_v40 = vadd.f32 %v3254_v36, %v3252_v37  ;;  %v3483_v38 = vld [vmem:[%s7583_s28 + $0x1] sm:$0x1] }
0x12d4   : > { %v3260_v41 = vsel %vm1739_vm15, %v3256_v40, -inf }
0x12d5   : > { %3261 = vmax.xlane.f32.xlu0 %v3260_v41 }
0x135a   : > { %v3259_v42 = vpop.xlane.xlu0 %3258 }
0x135b   : > { %v3263_v27 = vsub.f32 %v3255_v33, %v3259_v42 }
0x135d   : > { %v3265_v45 = vmul.f32 1.442695, %v3263_v27 }
0x135f   : > { %6478 = vpow2.f32 %v3265_v45 }
0x1362   : > { %v3262_v31 = vpop.xlane.xlu0 %3261 }
0x1363   : > { %v3264_v6 = vsub.f32 %v3256_v40, %v3262_v31 }
0x1365   : > { %v3267_v13 = vmul.f32 1.442695, %v3264_v6 }
0x1367   : > { %6480 = vpow2.f32 %v3267_v13 }
0x1369   : > { %v6479_v43 = vpop.eup %6478 }
0x136a   : > { %v3269_v44 = vsel %vm1739_vm15, %v6479_v43, 0.0 }
0x136b   : > { %3270 = vadd.xlane.f32.xlu1 %v3269_v44 }
0x1371   : > { %v6481_v46 = vpop.eup %6480 }
0x1372   : > { %v3272_v30 = vsel %vm1739_vm15, %v6481_v46, 0.0 }
0x1373   : > { %3273 = vadd.xlane.f32.xlu0 %v3272_v30 }
0x137c   : > { %3432 = vrot.lane.b32.xlu1 %v7246_v24, %s6606_s18 }
0x1389   : > { %3384 = vrot.lane.b32.xlu0 %v7237_v16, %s6606_s18  ;;  %s7590_s18 = sld [smem:[#allocation19_spill]] }
0x13f8   : > { %v3271_v51 = vpop.xlane.xlu1 %3270 }
0x13f9   : > { %6482 = vrcp.f32 %v3271_v51  ;;  %v3517_v51 = vsel %vm1071_vm4, %v5541_v50, 0  ;;  %v5556_v50 = vld [vmem:[%s7584_s1 + $0x14] sm:$0xf] }
0x13fc   : > { %v3433_v48 = vpop.permute.xlu1 %3432 }
0x1400   : > { %v3274_v52 = vpop.xlane.xlu0 %3273 }
0x1401   : > { %6484 = vrcp.f32 %v3274_v52  ;;  %v5542_v52 = vld [vmem:[%s7584_s1 + $0xc] sm:$0xf] }
0x1403   : > { %v6483_v20 = vpop.eup %6482 }
0x1404   : > { %v3276_v62 = vmul.f32 %v6483_v20, %v6479_v43  ;;  %v3385_v55 = vpop.permute.xlu0 %3384  ;;  %v3563_v20 = vsel %vm1071_vm4, %v5542_v52, 0 }
0x1405   : > { %6067 = vmatmul.mubr.msk.bf16.vlgmr.msra.gmra.mrb[44].mxu1 %vm1637_vm13, %v3385_v55 }
0x1406   : > { %v3279_v56 = vpack.c.bf16 %v3276_v62, %v3276_v62  ;;  %6078 = vmatprep.mubr.msk.bf16.mxu1 %vm6601_vm3, %v6600_v4  ;;  %6077 = vmatpush3.bf16.msra.mxu1 %v3517_v51  ;;  %v3917_v51 = vsel %vm1071_vm4, %v5556_v50, 0 }
0x1407   : > { %6088 = vmatprep.subr.bf16.mxu1 %v6600_v4 }
0x1408   : > { %6055 = vmatmul.mubr.msk.bf16.vlgmr.msra.gmra.mrb[64].mxu0 %vm1067_vm6, %v3279_v56 }
0x1409   : > { %6059 = vmatpush3.bf16.msra.mxu0 %v3333_v58  ;;  %6060 = vmatprep.mubr.msk.bf16.mxu0 %vm6601_vm3, %v6600_v4 }
0x140a   : > { %6070 = vmatprep.subr.bf16.mxu0 %v6600_v4 }
0x140b   : > { %v6485_v60 = vpop.eup %6484 }
0x140c   : > { %v3278_v61 = vmul.f32 %v6485_v60, %v6481_v46 }
0x140e   : > { %v3280_v5 = vpack.c.bf16 %v3278_v61, %v3278_v61 }
0x1410   : > { %6061 = vmatmul.mubr.msk.bf16.vlgmr.msra.gmra.mrb[68].mxu0 %vm1067_vm6, %v3280_v5 }
0x1411   : > { %6072 = vmatprep.mubr.msk.bf16.mxu0 %vm6601_vm3, %v6600_v4 }
0x1412   : > { %6071 = vmatpush3.bf16.xpose.msra.mxu0 %v3438_v63  ;;  %v6339_v63 = vld [vmem:[%s7585_s2 + $0x8] sm:$0xff]  }
0x1413   : > { %6082 = vmatprep.subr.bf16.mxu0 %v6600_v4 }
0x1419   : > { %6073 = vmatmul.mubr.msk.bf16.vlgmr.msra.gmra.mrb[72].mxu0 %vm1637_vm13, %v3433_v48 }
0x141a   : > { %6084 = vmatprep.mubr.msk.bf16.mxu0 %vm6601_vm3, %v6600_v4  ;;  %6083 = vmatpush3.bf16.msra.mxu0 %v3563_v20 }
0x141b   : > { %6096 = vmatprep.subr.bf16.mxu0 %v6600_v4 }
0x14d8   : > { %v3426_v1 = vpop.f32.mrb[44].mxu1 }
0x14d9   : > { %v3480_v7 = vmul.f32 0.17677669, %v3426_v1  ;;  %v6068_v9 = vpop.f32.mrb[45].mxu1  ;;  %v5552_v1 = vld [vmem:[%s7581_s23 + $0x14] sm:$0xf] }
0x14da   : > { %v3429_v10 = vpop.f32.mrb[46].mxu1  ;;  %v6340_v9 = vld [vmem:[%s7585_s2 + $0x10] sm:$0xff]  }
0x14db   : > { %v3323_v11 = vpop.f32.mrb[64].mxu0  ;;  %v6069_v12 = vpop.f32.mrb[47].mxu1  ;;  %v3484_v14 = vadd.f32 %v3482_v2, %v3480_v7  ;;  %v3792_v2 = vsel %vm1637_vm13, %v5552_v1, 0  ;;  %v6341_v10 = vld [vmem:[%s7585_s2 + $0x18] sm:$0xff]  }
0x14dc   : > { %v6056_v15 = vpop.f32.mrb[65].mxu0  ;;  %v3375_v23 = vpack.c.bf16 %v3323_v11, %v3323_v11 }
0x14dd   : > { %v3326_v17 = vpop.f32.mrb[66].mxu0  ;;  %v3486_v19 = vsel %vm1739_vm15, %v3484_v14, -inf }
0x14de   : > { %3487 = vmax.xlane.f32.xlu0 %v3486_v19  ;;  %v6057_v21 = vpop.f32.mrb[67].mxu0  ;;  %v3675_v35 = vunpack.c.l.b16 %v3375_v23 }
0x14e3   : > { %v3369_v22 = vpop.f32.mrb[68].mxu0 }
0x14e4   : > { %v3376_v28 = vpack.c.bf16 %v3369_v22, %v3369_v22  ;;  %v6062_v29 = vpop.f32.mrb[69].mxu0 }
0x14e5   : > { %v3372_v32 = vpop.f32.mrb[70].mxu0 }
0x14e6   : > { %v3676_v33 = vunpack.c.l.b16 %v3376_v28  ;;  %v6063_v34 = vpop.f32.mrb[71].mxu0 }
0x14e7   : > { %v5551_v34 = vld [vmem:[%s7581_s23 + $0x10] sm:$0xf] }
0x14e8   : > { %v3677_v36 = vrot.slane %v3676_v33, 7 }
0x14ea   : > { %v3678_v37 = vsel %vm2157_vm0, %v3677_v36, %v3675_v35 }
0x14eb   : > { %v3679_v48 = vpack.c.b16 %v3678_v37, %v3678_v37 }
0x14ec   : > { %v3474_v0 = vpop.f32.mrb[72].mxu0 }
0x14ed   : > { %v3481_v39 = vmul.f32 0.17677669, %v3474_v0  ;;  %v6074_v40 = vpop.f32.mrb[73].mxu0  ;;  %v3744_v0 = vsel %vm1637_vm13, %v5551_v34, 0 }
0x14ee   : > { %v3477_v41 = vpop.f32.mrb[74].mxu0 }
0x14ef   : > { %v6075_v42 = vpop.f32.mrb[75].mxu0  ;;  %v3485_v27 = vadd.f32 %v3483_v38, %v3481_v39 }
0x14f1   : > { %v3489_v45 = vsel %vm1739_vm15, %v3485_v27, -inf }
0x14f2   : > { %3490 = vmax.xlane.f32.xlu1 %v3489_v45 }
0x156b   : > { %v3488_v31 = vpop.xlane.xlu0 %3487 }
0x156c   : > { %v3492_v6 = vsub.f32 %v3484_v14, %v3488_v31 }
0x156e   : > { %v3494_v13 = vmul.f32 1.442695, %v3492_v6 }
0x1570   : > { %6486 = vpow2.f32 %v3494_v13 }
0x157a   : > { %v6487_v43 = vpop.eup %6486 }
0x157b   : > { %v3498_v44 = vsel %vm1739_vm15, %v6487_v43, 0.0 }
0x157c   : > { %3499 = vadd.xlane.f32.xlu0 %v3498_v44 }
0x157f   : > { %v3491_v46 = vpop.xlane.xlu1 %3490 }
0x1580   : > { %v3493_v30 = vsub.f32 %v3485_v27, %v3491_v46  ;;  %v3837_v27 = vld [vmem:[%s7583_s28 + $0x1] sm:$0x1] }
0x1582   : > { %v3496_v57 = vmul.f32 1.442695, %v3493_v30 }
0x1584   : > { %6488 = vpow2.f32 %v3496_v57 }
0x158e   : > { %v6489_v47 = vpop.eup %6488 }
0x158f   : > { %v3501_v49 = vsel %vm1739_vm15, %v6489_v47, 0.0 }
0x1590   : > { %3502 = vadd.xlane.f32.xlu1 %v3501_v49 }
0x1592   : > { %3738 = vrot.lane.b32.xlu0 %v7237_v16, %s6607_s22 }
0x15a1   : > { %3786 = vrot.lane.b32.xlu1 %v7246_v24, %s6607_s22  ;;  %s7591_s22 = sld [smem:[#allocation18_spill]] }
0x1609   : > { %v3500_v54 = vpop.xlane.xlu0 %3499 }
0x160a   : > { %6490 = vrcp.f32 %v3500_v54 }
0x160d   : > { %v3739_v41 = vpop.permute.xlu0 %3738 }
0x1614   : > { %v6491_v62 = vpop.eup %6490 }
0x1615   : > { %v3505_v55 = vmul.f32 %v6491_v62, %v6487_v43 }
0x1617   : > { %v3508_v56 = vpack.c.bf16 %v3505_v55, %v3505_v55 }
0x1619   : > { %6079 = vmatmul.mubr.msk.bf16.vlgmr.msra.gmra.mrb[48].mxu1 %vm1067_vm6, %v3508_v56 }
0x161a   : > { %6092 = vmatprep.mubr.msk.bf16.mxu1 %vm6601_vm3, %v6600_v4  ;;  %6089 = vmatpush3.bf16.msra.mxu1 %v6340_v9 }
0x161b   : > { %6090 = vmatprep.subr.bf16.mxu1 %v6600_v4 }
0x161d   : > { %v3503_v58 = vpop.xlane.xlu1 %3502 }
0x161e   : > { %6492 = vrcp.f32 %v3503_v58  ;;  %6091 = vmatpush3.bf16.msra.mxu1 %v6341_v10  ;;  %v3836_v58 = vld [vmem:[%s7583_s28] sm:$0x1] }
0x161f   : > { %6104 = vmatprep.subr.bf16.mxu1 %v6600_v4 }
0x1621   : > { %v3787_v7 = vpop.permute.xlu1 %3786 }
0x1628   : > { %v6493_v60 = vpop.eup %6492 }
0x1629   : > { %v3507_v61 = vmul.f32 %v6493_v60, %v6489_v47 }
0x162b   : > { %v3509_v5 = vpack.c.bf16 %v3507_v61, %v3507_v61 }
0x162d   : > { %6085 = vmatmul.mubr.msk.bf16.vlgmr.msra.gmra.mrb[76].mxu0 %vm1067_vm6, %v3509_v5 }
0x162e   : > { %6097 = vmatpush3.bf16.msra.mxu0 %v6338_v53  ;;  %6100 = vmatprep.mubr.msk.bf16.mxu0 %vm6601_vm3, %v6600_v4 }
0x162f   : > { %6098 = vmatprep.subr.bf16.mxu0 %v6600_v4 }
0x1632   : > { %6099 = vmatpush3.bf16.msra.mxu0 %v6339_v63 }
0x1633   : > { %6110 = vmatprep.subr.bf16.mxu0 %v6600_v4 }
0x1635   : > { %6101 = vmatmul.mubr.msk.bf16.vlgmr.msra.gmra.mrb[80].mxu0 %vm1637_vm13, %v3679_v48 }
0x1636   : > { %6112 = vmatprep.mubr.msk.bf16.mxu0 %vm6601_vm3, %v6600_v4 }
0x163b   : > { %6111 = vmatpush3.bf16.xpose.msra.mxu0 %v3792_v2  ;;  %v5562_v2 = vld [vmem:[%s7581_s23 + $0x18] sm:$0xf] }
0x163c   : > { %6122 = vmatprep.subr.bf16.mxu0 %v6600_v4  ;;  %v4037_v10 = vsel %vm1637_vm13, %v5562_v2, 0 }
0x1642   : > { %6113 = vmatmul.mubr.msk.bf16.vlgmr.msra.gmra.mrb[84].mxu0 %vm1637_vm13, %v3787_v7 }
0x1643   : > { %6124 = vmatprep.mubr.msk.bf16.mxu0 %vm6601_vm3, %v6600_v4  ;;  %6123 = vmatpush3.bf16.msra.mxu0 %v3917_v51 }
0x1644   : > { %6136 = vmatprep.subr.bf16.mxu0 %v6600_v4 }
0x16ec   : > { %v3553_v11 = vpop.f32.mrb[48].mxu1 }
0x16ed   : > { %v6080_v12 = vpop.f32.mrb[49].mxu1  ;;  %v3605_v19 = vpack.c.bf16 %v3553_v11, %v3553_v11 }
0x16ee   : > { %v3556_v14 = vpop.f32.mrb[50].mxu1 }
0x16ef   : > { %v6081_v15 = vpop.f32.mrb[51].mxu1  ;;  %v3613_v32 = vunpack.c.l.b16 %v3605_v19  ;;  %v5555_v19 = vld [vmem:[%s7584_s1 + $0x10] sm:$0xf] }
0x1700   : > { %v3599_v17 = vpop.f32.mrb[76].mxu0 }
0x1701   : > { %v3606_v21 = vpack.c.bf16 %v3599_v17, %v3599_v17  ;;  %v6086_v22 = vpop.f32.mrb[77].mxu0 }
0x1702   : > { %v3602_v23 = vpop.f32.mrb[78].mxu0 }
0x1703   : > { %v3614_v28 = vunpack.c.l.b16 %v3606_v21  ;;  %v6087_v29 = vpop.f32.mrb[79].mxu0  ;;  %v3871_v21 = vsel %vm1071_vm4, %v5555_v19, 0 }
0x1705   : > { %v3615_v33 = vrot.slane %v3614_v28, 7 }
0x1707   : > { %v3616_v35 = vsel %vm2157_vm0, %v3615_v33, %v3613_v32 }
0x1708   : > { %v3617_v36 = vpack.c.b16 %v3616_v35, %v3616_v35  ;;  %v3729_v37 = vpop.f32.mrb[80].mxu0 }
0x1709   : > { %v6102_v38 = vpop.f32.mrb[81].mxu0 }
0x170a   : > { %6093 = vmatmul.mubr.msk.bf16.vlgmr.msra.gmra.mrb[52].mxu1 %vm1637_vm13, %v3617_v36  ;;  %v3732_v39 = vpop.f32.mrb[82].mxu0  ;;  %v6342_v36 = vld [vmem:[%s7585_s2 + $0x20] sm:$0xff]  }
0x170b   : > { %v6103_v40 = vpop.f32.mrb[83].mxu0  ;;  %6105 = vmatpush3.bf16.xpose.msra.mxu1 %v3744_v0  ;;  %6106 = vmatprep.mubr.msk.bf16.mxu1 %vm6601_vm3, %v6600_v4  ;;  %v4129_v38 = vld [vmem:[%s7583_s28] sm:$0x1] }
0x170c   : > { %6116 = vmatprep.subr.bf16.mxu1 %v6600_v4 }
0x1712   : > { %6107 = vmatmul.mubr.msk.bf16.vlgmr.msra.gmra.mrb[56].mxu1 %vm1637_vm13, %v3739_v41 }
0x1713   : > { %6118 = vmatprep.mubr.msk.bf16.mxu1 %vm6601_vm3, %v6600_v4  ;;  %6117 = vmatpush3.bf16.msra.mxu1 %v3871_v21 }
0x1714   : > { %6128 = vmatprep.subr.bf16.mxu1 %v6600_v4 }
0x1715   : > { %v3828_v42 = vpop.f32.mrb[84].mxu0 }
0x1716   : > { %v3835_v45 = vmul.f32 0.17677669, %v3828_v42  ;;  %v6114_v31 = vpop.f32.mrb[85].mxu0 }
0x1717   : > { %v3831_v6 = vpop.f32.mrb[86].mxu0 }
0x1718   : > { %v6115_v13 = vpop.f32.mrb[87].mxu0  ;;  %v3839_v43 = vadd.f32 %v3837_v27, %v3835_v45 }
0x171a   : > { %v3843_v44 = vsel %vm1739_vm15, %v3839_v43, -inf }
0x171b   : > { %3844 = vmax.xlane.f32.xlu1 %v3843_v44 }
0x17a8   : > { %v3845_v46 = vpop.xlane.xlu1 %3844 }
0x17a9   : > { %v3847_v30 = vsub.f32 %v3839_v43, %v3845_v46 }
0x17ab   : > { %v3850_v57 = vmul.f32 1.442695, %v3847_v30 }
0x17ad   : > { %6494 = vpow2.f32 %v3850_v57 }
0x17b7   : > { %v6495_v47 = vpop.eup %6494 }
0x17b8   : > { %v3855_v49 = vsel %vm1739_vm15, %v6495_v47, 0.0 }
0x17b9   : > { %3856 = vadd.xlane.f32.xlu1 %v3855_v49  ;;  %v5563_v49 = vld [vmem:[%s7581_s23 + $0x1c] sm:$0xf] }
0x17ca   : > { %4079 = vrot.lane.b32.xlu1 %v7246_v24, %s6605_s0 }
0x17dd   : > { %v3667_v52 = vpop.f32.mrb[52].mxu1 }
0x17de   : > { %v7344_v20 = vadd.f32 %v3729_v37, %v3667_v52  ;;  %v6094_v54 = vpop.f32.mrb[53].mxu1  ;;  %v6343_v37 = vld [vmem:[%s7585_s2 + $0x28] sm:$0xff]   ;;  %v4085_v52 = vsel %vm1637_vm13, %v5563_v49, 0 }
0x17df   : > { %v3670_v62 = vpop.f32.mrb[54].mxu1 }
0x17e0   : > { %v6095_v55 = vpop.f32.mrb[55].mxu1 }
0x17e5   : > { %v3780_v56 = vpop.f32.mrb[56].mxu1 }
0x17e6   : > { %v3834_v60 = vmul.f32 0.17677669, %v3780_v56  ;;  %v6108_v61 = vpop.f32.mrb[57].mxu1 }
0x17e7   : > { %v3783_v53 = vpop.f32.mrb[58].mxu1  ;;  %v5566_v61 = vld [vmem:[%s7584_s1 + $0x18] sm:$0xf] }
0x17e8   : > { %v6109_v5 = vpop.f32.mrb[59].mxu1  ;;  %v3838_v24 = vadd.f32 %v3836_v58, %v3834_v60  ;;  %v4164_v53 = vsel %vm1071_vm4, %v5566_v61, 0  ;;  %v6348_v61 = vld [vmem:[%s7587_s10 + $0x4] ss:$16 sps:$4 sm:$0xff]  }
0x17ea   : > { %v3840_v63 = vsel %vm1739_vm15, %v3838_v24, -inf }
0x17eb   : > { %3841 = vmax.xlane.f32.xlu0 %v3840_v63 }
0x1846   : > { %v3857_v48 = vpop.xlane.xlu1 %3856 }
0x1847   : > { %6496 = vrcp.f32 %v3857_v48 }
0x184a   : > { %v4080_v54 = vpop.permute.xlu1 %4079 }
0x1851   : > { %v6497_v1 = vpop.eup %6496 }
0x1852   : > { %v3861_v7 = vmul.f32 %v6497_v1, %v6495_v47 }
0x1854   : > { %v3863_v9 = vpack.c.bf16 %v3861_v7, %v3861_v7  ;;  %v4130_v7 = vld [vmem:[%s7583_s28 + $0x1] sm:$0x1] }
0x1856   : > { %6125 = vmatmul.mubr.msk.bf16.vlgmr.msra.gmra.mrb[88].mxu0 %vm1067_vm6, %v3863_v9 }
0x1857   : > { %6137 = vmatpush3.bf16.xpose.msra.mxu0 %v4037_v10  ;;  %6138 = vmatprep.mubr.msk.bf16.mxu0 %vm6601_vm3, %v6600_v4 }
0x1858   : > { %6148 = vmatprep.subr.bf16.mxu0 %v6600_v4 }
0x1878   : > { %v3842_v11 = vpop.xlane.xlu0 %3841 }
0x1879   : > { %v3846_v12 = vsub.f32 %v3838_v24, %v3842_v11 }
0x187b   : > { %v3848_v14 = vmul.f32 1.442695, %v3846_v12 }
0x187d   : > { %6498 = vpow2.f32 %v3848_v14 }
0x1887   : > { %v6499_v15 = vpop.eup %6498 }
0x1888   : > { %v3852_v17 = vsel %vm1739_vm15, %v6499_v15, 0.0 }
0x1889   : > { %3853 = vadd.xlane.f32.xlu0 %v3852_v17 }
0x189f   : > { %4031 = vrot.lane.b32.xlu0 %v7237_v16, %s6605_s0  ;;  %s7589_s0 = sld [smem:[#allocation16_spill]] }
0x1916   : > { %v3854_v22 = vpop.xlane.xlu0 %3853 }
0x1917   : > { %6500 = vrcp.f32 %v3854_v22 }
0x191a   : > { %v4032_v23 = vpop.permute.xlu0 %4031 }
0x191b   : > { %6139 = vmatmul.mubr.msk.bf16.vlgmr.msra.gmra.mrb[92].mxu0 %vm1637_vm13, %v4032_v23 }
0x191c   : > { %6150 = vmatprep.mubr.msk.bf16.mxu0 %vm6601_vm3, %v6600_v4  ;;  %6149 = vmatpush3.bf16.msra.mxu0 %v4164_v53  ;;  %v6351_v53 = vld [vmem:[%s7587_s10 + $0xc] ss:$16 sps:$4 sm:$0xff]  }
0x191d   : > { %6160 = vmatprep.subr.bf16.mxu0 %v6600_v4 }
0x1921   : > { %v6501_v28 = vpop.eup %6500 }
0x1922   : > { %v3859_v29 = vmul.f32 %v6501_v28, %v6499_v15 }
0x1924   : > { %v3862_v16 = vpack.c.bf16 %v3859_v29, %v3859_v29 }
0x1926   : > { %6119 = vmatmul.mubr.msk.bf16.vlgmr.msra.gmra.mrb[60].mxu1 %vm1067_vm6, %v3862_v16 }
0x1927   : > { %6132 = vmatprep.mubr.msk.bf16.mxu1 %vm6601_vm3, %v6600_v4  ;;  %6129 = vmatpush3.bf16.msra.mxu1 %v6342_v36 }
0x1928   : > { %6130 = vmatprep.subr.bf16.mxu1 %v6600_v4 }
0x1929   : > { %v3953_v32 = vpop.f32.mrb[88].mxu0 }
0x192a   : > { %v6126_v33 = vpop.f32.mrb[89].mxu0  ;;  %v3960_v31 = vpack.c.bf16 %v3953_v32, %v3953_v32  ;;  %v5567_v32 = vld [vmem:[%s7584_s1 + $0x1c] sm:$0xf] }
0x192b   : > { %v3956_v34 = vpop.f32.mrb[90].mxu0  ;;  %6131 = vmatpush3.bf16.msra.mxu1 %v6343_v37  ;;  %v4210_v33 = vsel %vm1071_vm4, %v5567_v32, 0  ;;  %v6376_v32 = vld [vmem:[%s7587_s10 + $0xa0] ss:$16 sps:$4 sm:$0xff]   ;;  %vm5348_vm4 = vcmask 58368  }
0x192c   : > { %v6127_v35 = vpop.f32.mrb[91].mxu0  ;;  %6142 = vmatprep.subr.bf16.mxu1 %v6600_v4  ;;  %v3968_v6 = vunpack.c.l.b16 %v3960_v31 }
0x192e   : > { %v3969_v30 = vrot.slane %v3968_v6, 7 }
0x19ee   : > { %v4073_v0 = vpop.f32.mrb[92].mxu0 }
0x19ef   : > { %v4127_v39 = vmul.f32 0.17677669, %v4073_v0  ;;  %v6140_v40 = vpop.f32.mrb[93].mxu0 }
0x19f0   : > { %v4076_v41 = vpop.f32.mrb[94].mxu0 }
0x19f1   : > { %v6141_v42 = vpop.f32.mrb[95].mxu0  ;;  %v4131_v27 = vadd.f32 %v4129_v38, %v4127_v39  ;;  %v6344_v41 = vld [vmem:[%s7585_s2 + $0x30] sm:$0xff]  }
0x19f2   : > { %v6345_v42 = vld [vmem:[%s7585_s2 + $0x38] sm:$0xff]  }
0x19f3   : > { %v4133_v45 = vsel %vm1739_vm15, %v4131_v27, -inf }
0x19f4   : > { %4134 = vmax.xlane.f32.xlu0 %v4133_v45 }
0x19f9   : > { %v3907_v13 = vpop.f32.mrb[60].mxu1 }
0x19fa   : > { %v3959_v43 = vpack.c.bf16 %v3907_v13, %v3907_v13  ;;  %v6120_v44 = vpop.f32.mrb[61].mxu1 }
0x19fb   : > { %v3910_v46 = vpop.f32.mrb[62].mxu1 }
0x19fc   : > { %v3967_v57 = vunpack.c.l.b16 %v3959_v43  ;;  %v6121_v47 = vpop.f32.mrb[63].mxu1 }
0x19fe   : > { %v3970_v50 = vsel %vm2157_vm0, %v3969_v30, %v3967_v57 }
0x19ff   : > { %v3971_v51 = vpack.c.b16 %v3970_v50, %v3970_v50 }
0x1a01   : > { %6133 = vmatmul.mubr.msk.bf16.vlgmr.msra.gmra.mrb[64].mxu1 %vm1637_vm13, %v3971_v51 }
0x1a02   : > { %6143 = vmatpush3.bf16.xpose.msra.mxu1 %v4085_v52  ;;  %6144 = vmatprep.mubr.msk.bf16.mxu1 %vm6601_vm3, %v6600_v4 }
0x1a03   : > { %6154 = vmatprep.subr.bf16.mxu1 %v6600_v4 }
0x1a09   : > { %6145 = vmatmul.mubr.msk.bf16.vlgmr.msra.gmra.mrb[68].mxu1 %vm1637_vm13, %v4080_v54  ;;  %v5573_v54 = vld [vmem:[%s7586_s7] ss:$0 sm:$0xff]  ;;  %s7593_s7 = sld [smem:[#allocation23_spill]] }
0x1a0a   : > { %6156 = vmatprep.mubr.msk.bf16.mxu1 %vm6601_vm3, %v6600_v4  ;;  %6155 = vmatpush3.bf16.msra.mxu1 %v4210_v33  ;;  %v6379_v33 = vld [vmem:[%s7587_s10 + $0xa8] ss:$16 sps:$4 sm:$0xff]  }
0x1a0b   : > { %4574 = vmatprep.subr.bf16.mxu1 %v6348_v61  ;;  %v6407_v61 = vld [vmem:[%s7590_s18 + $0xd8] sm:$0xff]  }
0x1a81   : > { %v4135_v62 = vpop.xlane.xlu0 %4134 }
0x1a82   : > { %v4139_v55 = vsub.f32 %v4131_v27, %v4135_v62 }
0x1a84   : > { %v4141_v56 = vmul.f32 1.442695, %v4139_v55 }
0x1a86   : > { %6502 = vpow2.f32 %v4141_v56 }
0x1a90   : > { %v6503_v58 = vpop.eup %6502 }
0x1a91   : > { %v4145_v60 = vsel %vm1739_vm15, %v6503_v58, 0.0 }
0x1a92   : > { %4146 = vadd.xlane.f32.xlu0 %v4145_v60  ;;  %v6346_v60 = vld [vmem:[%s7587_s10] ss:$16 sps:$4 sm:$0xff]  }
0x1ad4   : > { %v4021_v5 = vpop.f32.mrb[64].mxu1 }
0x1ad5   : > { %v4027_v24 = vadd.f32 %v4021_v5, %v7344_v20  ;;  %v6134_v63 = vpop.f32.mrb[65].mxu1  ;;  %v6354_v5 = vld [vmem:[%s7587_s10 + $0x24] ss:$16 sps:$4 sm:$0xff]  }
0x1ad6   : > { %v4024_v48 = vpop.f32.mrb[66].mxu1  ;;  %v6355_v63 = vld [vmem:[%s7587_s10 + $0x28] ss:$16 sps:$4 sm:$0xff]  }
0x1ad7   : > { %v6135_v1 = vpop.f32.mrb[67].mxu1  ;;  %v6360_v48 = vld [vmem:[%s7587_s10 + $0x44] ss:$16 sps:$4 sm:$0xff]  }
0x1ad8   : > { %v6363_v1 = vld [vmem:[%s7587_s10 + $0x4c] ss:$16 sps:$4 sm:$0xff]  }
0x1adc   : > { %v4121_v2 = vpop.f32.mrb[68].mxu1 }
0x1add   : > { %v4128_v9 = vmul.f32 0.17677669, %v4121_v2  ;;  %v6146_v10 = vpop.f32.mrb[69].mxu1  ;;  %v6358_v2 = vld [vmem:[%s7587_s10 + $0x40] ss:$16 sps:$4 sm:$0xff]  }
0x1ade   : > { %v4124_v11 = vpop.f32.mrb[70].mxu1 }
0x1adf   : > { %v6147_v12 = vpop.f32.mrb[71].mxu1  ;;  %v4132_v14 = vadd.f32 %v4130_v7, %v4128_v9  ;;  %v6361_v7 = vld [vmem:[%s7587_s10 + $0x48] ss:$16 sps:$4 sm:$0xff]  }
0x1ae1   : > { %v4136_v15 = vsel %vm1739_vm15, %v4132_v14, -inf }
0x1ae2   : > { %4137 = vmax.xlane.f32.xlu1 %v4136_v15  ;;  %v6366_v15 = vld [vmem:[%s7587_s10 + $0x64] ss:$16 sps:$4 sm:$0xff]  }
0x1b1f   : > { %v4147_v17 = vpop.xlane.xlu0 %4146 }
0x1b20   : > { %6504 = vrcp.f32 %v4147_v17  ;;  %v6369_v17 = vld [vmem:[%s7587_s10 + $0x6c] ss:$16 sps:$4 sm:$0xff]  }
0x1b2a   : > { %v6505_v19 = vpop.eup %6504 }
0x1b2b   : > { %v4152_v21 = vmul.f32 %v6505_v19, %v6503_v58  ;;  %v6364_v19 = vld [vmem:[%s7587_s10 + $0x60] ss:$16 sps:$4 sm:$0xff]  }
0x1b2d   : > { %v4155_v22 = vpack.c.bf16 %v4152_v21, %v4152_v21  ;;  %v6367_v21 = vld [vmem:[%s7587_s10 + $0x68] ss:$16 sps:$4 sm:$0xff]  }
0x1b2f   : > { %6151 = vmatmul.mubr.msk.bf16.vlgmr.msra.gmra.mrb[96].mxu0 %vm1067_vm6, %v4155_v22  ;;  %v6372_v22 = vld [vmem:[%s7587_s10 + $0x84] ss:$16 sps:$4 sm:$0xff]  }
0x1b30   : > { %6164 = vmatprep.mubr.msk.bf16.mxu0 %vm6601_vm3, %v6600_v4  ;;  %6161 = vmatpush3.bf16.msra.mxu0 %v6344_v41 }
0x1b31   : > { %6162 = vmatprep.subr.bf16.mxu0 %v6600_v4 }
0x1b34   : > { %6163 = vmatpush3.bf16.msra.mxu0 %v6345_v42 }
0x1b35   : > { %4615 = vmatprep.subr.bf16.mxu0 %v6351_v53  ;;  %v6409_v53 = vld [vmem:[%s7590_s18 + $0x98] sm:$0xff]  }
0x1b6f   : > { %v4138_v20 = vpop.xlane.xlu1 %4137 }
0x1b70   : > { %v4140_v23 = vsub.f32 %v4132_v14, %v4138_v20  ;;  %v6375_v20 = vld [vmem:[%s7587_s10 + $0x8c] ss:$16 sps:$4 sm:$0xff]  }
0x1b72   : > { %v4143_v28 = vmul.f32 1.442695, %v4140_v23  ;;  %v6370_v23 = vld [vmem:[%s7587_s10 + $0x80] ss:$16 sps:$4 sm:$0xff]  }
0x1b74   : > { %6506 = vpow2.f32 %v4143_v28  ;;  %v6373_v28 = vld [vmem:[%s7587_s10 + $0x88] ss:$16 sps:$4 sm:$0xff]  }
0x1b7e   : > { %v6507_v29 = vpop.eup %6506 }
0x1b7f   : > { %v4148_v16 = vsel %vm1739_vm15, %v6507_v29, 0.0 }
0x1b80   : > { %4149 = vadd.xlane.f32.xlu1 %v4148_v16  ;;  %v6381_v16 = vld [vmem:[%s7587_s10 + $0xac] ss:$16 sps:$4 sm:$0xff]  }
0x1c02   : > { %v4200_v34 = vpop.f32.mrb[96].mxu0 }
0x1c03   : > { %v6152_v35 = vpop.f32.mrb[97].mxu0  ;;  %v4252_v45 = vpack.c.bf16 %v4200_v34, %v4200_v34  ;;  %v6384_v34 = vld [vmem:[%s7587_s10 + $0xc4] ss:$16 sps:$4 sm:$0xff]  }
0x1c04   : > { %v4203_v36 = vpop.f32.mrb[98].mxu0  ;;  %v6387_v35 = vld [vmem:[%s7587_s10 + $0xcc] ss:$16 sps:$4 sm:$0xff]  }
0x1c05   : > { %v6153_v37 = vpop.f32.mrb[99].mxu0  ;;  %v4260_v46 = vunpack.c.l.b16 %v4252_v45  ;;  %v6382_v36 = vld [vmem:[%s7587_s10 + $0xc0] ss:$16 sps:$4 sm:$0xff]  }
0x1c06   : > { %v6385_v37 = vld [vmem:[%s7587_s10 + $0xc8] ss:$16 sps:$4 sm:$0xff]  }
0x1c0d   : > { %v4150_v0 = vpop.xlane.xlu1 %4149 }
0x1c0e   : > { %6508 = vrcp.f32 %v4150_v0  ;;  %v6390_v0 = vld [vmem:[%s7587_s10 + $0xe4] ss:$16 sps:$4 sm:$0xff]  }
0x1c18   : > { %v6509_v38 = vpop.eup %6508 }
0x1c19   : > { %v4154_v39 = vmul.f32 %v6509_v38, %v6507_v29  ;;  %v6378_v29 = vld [vmem:[%s7587_s10 + $0xa4] ss:$16 sps:$4 sm:$0xff]   ;;  %v6393_v38 = vld [vmem:[%s7587_s10 + $0xec] ss:$16 sps:$4 sm:$0xff]  }
0x1c1b   : > { %v4156_v40 = vpack.c.bf16 %v4154_v39, %v4154_v39  ;;  %v6388_v39 = vld [vmem:[%s7587_s10 + $0xe0] ss:$16 sps:$4 sm:$0xff]  }
0x1c1d   : > { %6157 = vmatmul.mubr.msk.bf16.vlgmr.msra.gmra.mrb[72].mxu1 %vm1067_vm6, %v4156_v40  ;;  %v6391_v40 = vld [vmem:[%s7587_s10 + $0xe8] ss:$16 sps:$4 sm:$0xff]  }
0x1c1e   : > { %4606 = vmatprep.mubr.bf16.mxu1 %v6599_v3  ;;  %4575 = vmatpush1.bf16.msra.mxu1 %v6346_v60  ;;  %v6406_v60 = vld [vmem:[%s7590_s18 + $0x58] sm:$0xff]  }
0x1c1f   : > { %4576 = vmatprep.subr.bf16.mxu1 %v6354_v5  ;;  %v6410_v5 = vld [vmem:[%s7590_s18 + $0x60] sm:$0xff]  }
0x1cf0   : > { %v4246_v27 = vpop.f32.mrb[72].mxu1 }
0x1cf1   : > { %v4253_v31 = vpack.c.bf16 %v4246_v27, %v4246_v27  ;;  %v6158_v6 = vpop.f32.mrb[73].mxu1 }
0x1cf2   : > { %v4249_v13 = vpop.f32.mrb[74].mxu1 }
0x1cf3   : > { %v4261_v43 = vunpack.c.l.b16 %v4253_v31  ;;  %v6159_v44 = vpop.f32.mrb[75].mxu1  ;;  %v5574_v31 = vld [vmem:[%s7588_s11] ss:$0 sm:$0xff]  ;;  %s7594_s11 = sld [smem:[#allocation21_spill]] }
0x1cf4   : > { %v5575_v13 = vld [vmem:[%s7589_s0] ss:$0 sm:$0xff]  ;;  %s7595_s0 = sld [smem:[#allocation22_spill]] }
0x1cf5   : > { %v4262_v30 = vrot.slane %v4261_v43, 7 }
0x1cf7   : > { %v4263_v57 = vsel %vm2157_vm0, %v4262_v30, %v4260_v46  ;;  %v6394_v30 = vld [vmem:[%s7590_s18 + $0x40] sm:$0xff]  }
0x1cf8   : > { %v4264_v47 = vpack.c.b16 %v4263_v57, %v4263_v57  ;;  %v6395_v57 = vld [vmem:[%s7590_s18 + $0xc0] sm:$0xff]  }
0x1cfa   : > { %6165 = vmatmul.mubr.msk.bf16.vlgmr.msra.gmra.mrb[100].mxu0 %vm1637_vm13, %v4264_v47  ;;  %v6396_v47 = vld [vmem:[%s7590_s18] sm:$0xff]  }
0x1cfb   : > { %4647 = vmatprep.mubr.bf16.mxu0 %v6599_v3  ;;  %v6349_v3 = vld [vmem:[%s7587_s10 + $0x8] ss:$16 sps:$4 sm:$0xff]  }
0x1cfc   : > { %4616 = vmatpush1.bf16.msra.mxu0 %v6349_v3  ;;  %v6408_v3 = vld [vmem:[%s7590_s18 + $0x18] sm:$0xff]  }
0x1dcd   : > { %v4314_v49 = vpop.f32.mrb[100].mxu0 }
0x1dce   : > { %v4320_v50 = vadd.f32 %v4314_v49, %v4027_v24  ;;  %v6166_v51 = vpop.f32.mrb[101].mxu0  ;;  %v6357_v24 = vld [vmem:[%s7587_s10 + $0x2c] ss:$16 sps:$4 sm:$0xff]   ;;  %v6397_v49 = vld [vmem:[%s7590_s18 + $0x80] sm:$0xff]  }
0x1dcf   : > { %v4317_v52 = vpop.f32.mrb[102].mxu0  ;;  %4617 = vmatprep.subr.bf16.mxu0 %v6357_v24  ;;  %v6399_v51 = vld [vmem:[%s7590_s18 + $0xc8] sm:$0xff]   ;;  %v6411_v24 = vld [vmem:[%s7590_s18 + $0xe0] sm:$0xff]  }
0x1dd0   : > { %v4321_v62 = vadd.f32 %v4320_v50, %v7223_v59  ;;  %v6167_v55 = vpop.f32.mrb[103].mxu0  ;;  %v6352_v59 = vld [vmem:[%s7587_s10 + $0x20] ss:$16 sps:$4 sm:$0xff]   ;;  %4618 = vmatpush1.bf16.msra.mxu0 %v6355_v63  ;;  %v6398_v50 = vld [vmem:[%s7590_s18 + $0x48] sm:$0xff]  }
0x1dd1   : > { %4577 = vmatpush1.bf16.msra.mxu1 %v6352_v59  ;;  %4619 = vmatprep.subr.bf16.mxu0 %v6363_v1  ;;  %v6400_v52 = vld [vmem:[%s7590_s18 + $0x8] sm:$0xff]   ;;  %v6403_v55 = vld [vmem:[%s7590_s18 + $0xd0] sm:$0xff]   ;;  %v6412_v59 = vld [vmem:[%s7590_s18 + $0x20] sm:$0xff]  }
0x1dd2   : > { %v4329_v56 = vadd.f32 %v5573_v54, %v4321_v62  ;;  %4578 = vmatprep.subr.bf16.mxu1 %v6360_v48  ;;  %v6401_v54 = vld [vmem:[%s7590_s18 + $0x88] sm:$0xff]   ;;  %v6402_v62 = vld [vmem:[%s7590_s18 + $0x50] sm:$0xff]   ;;  %v6413_v63 = vld [vmem:[%s7590_s18 + $0xa0] sm:$0xff]  }
0x1dd3   : > { %v6414_v48 = vld [vmem:[%s7590_s18 + $0x68] sm:$0xff]  }
0x1dd4   : > { %v4332_v58 = vsel %vm1217_vm9, %v4329_v56, 0.0  ;;  %4620 = vmatpush1.bf16.msra.mxu0 %v6361_v7  ;;  %v6415_v1 = vld [vmem:[%s7590_s18 + $0xe8] sm:$0xff]  }
0x1dd5   : > { %4333 = vadd.xlane.f32.xlu1 %v4332_v58  ;;  %4579 = vmatpush1.bf16.msra.mxu1 %v6358_v2  ;;  %v6405_v58 = vld [vmem:[%s7590_s18 + $0x90] sm:$0xff]   ;;  %v6416_v2 = vld [vmem:[%s7590_s18 + $0x28] sm:$0xff]  }
0x1dd6   : > { %4580 = vmatprep.subr.bf16.mxu1 %v6366_v15  ;;  %4621 = vmatprep.subr.bf16.mxu0 %v6369_v17  ;;  %v6417_v7 = vld [vmem:[%s7590_s18 + $0xa8] sm:$0xff]   ;;  %v6423_v15 = vld [vmem:[%s7590_s18 + $0xf8] sm:$0xff]  }
0x1dd7   : > { %v6424_v17 = vld [vmem:[%s7590_s18 + $0x38] sm:$0xff]  }
0x1dd8   : > { %4622 = vmatpush1.bf16.msra.mxu0 %v6367_v21  ;;  %v4404_v21 = vsub.s32 2, %v6854_v25 }
0x1dd9   : > { %4581 = vmatpush1.bf16.msra.mxu1 %v6364_v19  ;;  %4623 = vmatprep.subr.bf16.mxu0 %v6375_v20  ;;  %v6425_v19 = vld [vmem:[%s7590_s18 + $0xb8] sm:$0xff]   ;;  %v4408_v20 = vsub.s32 3, %v6854_v25 }
0x1dda   : > { %4582 = vmatprep.subr.bf16.mxu1 %v6372_v22  ;;  %v4392_v22 = vld [vmem:[%s7591_s22] sm:$0xf]  ;;  %s7596_s22 = sld [smem:[#allocation24_spill]] }
0x1ddc   : > { %4624 = vmatpush1.bf16.msra.mxu0 %v6373_v28  ;;  %v4405_v28 = vrot.slane %v4392_v22, %v4404_v21  ;;  %v5608_v21 = vld [vmem:[%s7592_s26] ss:$0 sm:$0xff]  ;;  %s7597_s26 = sld [smem:[#allocation25_spill]] }
0x1ddd   : > { %4583 = vmatpush1.bf16.msra.mxu1 %v6370_v23  ;;  %4625 = vmatprep.subr.bf16.mxu0 %v6381_v16  ;;  %v4397_v23 = vrot.slane %v4392_v22, %v6857_v26  ;;  %v4409_v16 = vrot.slane %v4392_v22, %v4408_v20 }
0x1dde   : > { %4584 = vmatprep.subr.bf16.mxu1 %v6378_v29  ;;  %v4401_v29 = vrot.slane %v4392_v22, %v1382_v18 }
0x1de0   : > { %4626 = vmatpush1.bf16.msra.mxu0 %v6379_v33 }
0x1de1   : > { %4585 = vmatpush1.bf16.msra.mxu1 %v6376_v32  ;;  %4627 = vmatprep.subr.bf16.mxu0 %v6387_v35 }
0x1de2   : > { %4586 = vmatprep.subr.bf16.mxu1 %v6384_v34 }
0x1de4   : > { %4628 = vmatpush1.bf16.msra.mxu0 %v6385_v37 }
0x1de5   : > { %4587 = vmatpush1.bf16.msra.mxu1 %v6382_v36  ;;  %4629 = vmatprep.subr.bf16.mxu0 %v6393_v38 }
0x1de6   : > { %4588 = vmatprep.subr.bf16.mxu1 %v6390_v0 }
0x1de8   : > { %4630 = vmatpush1.bf16.msra.mxu0 %v6391_v40 }
0x1de9   : > { %4589 = vmatpush1.bf16.msra.mxu1 %v6388_v39  ;;  %5806 = vmatprep.subr.bf16.mxu0 %v6395_v57 }
0x1dea   : > { %5784 = vmatprep.subr.bf16.mxu1 %v6394_v30 }
0x1e62   : > { %v4334_v9 = vpop.xlane.xlu1 %4333 }
0x1e63   : > { %v4335_v10 = vmul.f32 0.0078125, %v4334_v9  ;;  %v6418_v9 = vld [vmem:[%s7590_s18 + $0x70] sm:$0xff]  }
0x1e65   : > { %v4336_v11 = vsub.f32 %v4329_v56, %v4335_v10  ;;  %v6404_v56 = vld [vmem:[%s7590_s18 + $0x10] sm:$0xff]  }
0x1e66   : > { %v6419_v10 = vld [vmem:[%s7590_s18 + $0xf0] sm:$0xff]  }
0x1e67   : > { %v4337_v12 = vmul.f32 %v4336_v11, %v4336_v11 }
0x1e69   : > { %v4338_v14 = vsel %vm1217_vm9, %v4337_v12, 0.0  ;;  %v6421_v12 = vld [vmem:[%s7590_s18 + $0xb0] sm:$0xff]  }
0x1e6a   : > { %4339 = vadd.xlane.f32.xlu0 %v4338_v14  ;;  %v6422_v14 = vld [vmem:[%s7590_s18 + $0x78] sm:$0xff]  }
0x1ef7   : > { %v4340_v41 = vpop.xlane.xlu0 %4339 }
0x1ef8   : > { %v4341_v42 = vmul.f32 0.0078125, %v4340_v41 }
0x1efa   : > { %v4342_v27 = vadd.f32 1e-12, %v4341_v42 }
0x1efc   : > { %6510 = vrsqrt.f32 %v4342_v27 }
0x1f06   : > { %v6511_v45 = vpop.eup %6510 }
0x1f07   : > { %v4344_v6 = vmul.f32 %v6511_v45, %v4336_v11  ;;  %v6420_v11 = vld [vmem:[%s7590_s18 + $0x30] sm:$0xff]  }
0x1f09   : > { %v4351_v43 = vmul.f32 %v5574_v31, %v4344_v6 }
0x1f0b   : > { %v7441_v44 = vadd.f32 %v5575_v13, %v4351_v43 }
0x1f0d   : > { %v4359_v46 = vpack.c.bf16 %v7441_v44, %v7441_v44 }
0x1f0f   : > { %4607 = vmatmul.mubr.bf16.vlgmr.msra.gmra.mrb[76].mxu1 %v4359_v46  ;;  %4648 = vmatmul.mubr.bf16.vlgmr.msra.gmra.mrb[104].mxu0 %v4359_v46 }
0x1f10   : > { %5785 = vmatpush3.bf16.msra.mxu1 %v6396_v47  ;;  %5807 = vmatpush3.bf16.msra.mxu0 %v6397_v49 }
0x1f11   : > { %5786 = vmatprep.subr.bf16.mxu1 %v6398_v50  ;;  %5808 = vmatprep.subr.bf16.mxu0 %v6399_v51 }
0x1f14   : > { %5787 = vmatpush3.bf16.msra.mxu1 %v6400_v52  ;;  %5809 = vmatpush3.bf16.msra.mxu0 %v6401_v54 }
0x1f15   : > { %5788 = vmatprep.subr.bf16.mxu1 %v6402_v62  ;;  %5810 = vmatprep.subr.bf16.mxu0 %v6403_v55 }
0x1f18   : > { %5789 = vmatpush3.bf16.msra.mxu1 %v6404_v56  ;;  %5811 = vmatpush3.bf16.msra.mxu0 %v6405_v58 }
0x1f19   : > { %5790 = vmatprep.subr.bf16.mxu1 %v6406_v60  ;;  %5812 = vmatprep.subr.bf16.mxu0 %v6407_v61 }
0x1f1c   : > { %5791 = vmatpush3.bf16.msra.mxu1 %v6408_v3  ;;  %5813 = vmatpush3.bf16.msra.mxu0 %v6409_v53 }
0x1f1d   : > { %5792 = vmatprep.subr.bf16.mxu1 %v6410_v5  ;;  %5814 = vmatprep.subr.bf16.mxu0 %v6411_v24 }
0x1f20   : > { %5793 = vmatpush3.bf16.msra.mxu1 %v6412_v59  ;;  %5815 = vmatpush3.bf16.msra.mxu0 %v6413_v63 }
0x1f21   : > { %5794 = vmatprep.subr.bf16.mxu1 %v6414_v48  ;;  %5816 = vmatprep.subr.bf16.mxu0 %v6415_v1 }
0x1f24   : > { %5795 = vmatpush3.bf16.msra.mxu1 %v6416_v2  ;;  %5817 = vmatpush3.bf16.msra.mxu0 %v6417_v7 }
0x1f25   : > { %5796 = vmatprep.subr.bf16.mxu1 %v6418_v9  ;;  %5818 = vmatprep.subr.bf16.mxu0 %v6419_v10 }
0x1f28   : > { %5797 = vmatpush3.bf16.msra.mxu1 %v6420_v11  ;;  %5819 = vmatpush3.bf16.msra.mxu0 %v6421_v12 }
0x1f29   : > { %5798 = vmatprep.subr.bf16.mxu1 %v6422_v14  ;;  %5820 = vmatprep.subr.bf16.mxu0 %v6423_v15 }
0x1f2c   : > { %5799 = vmatpush3.bf16.msra.mxu1 %v6424_v17  ;;  %5821 = vmatpush3.bf16.msra.mxu0 %v6425_v19 }
0x1f2d   : > { %6168 = vmatprep.subr.bf16.mxu1 %v6600_v4  ;;  %6188 = vmatprep.subr.bf16.mxu0 %v6600_v4 }
0x1fe2   : > { %v4608_v32 = vpop.f32.mrb[76].mxu1  ;;  %v4649_v33 = vpop.f32.mrb[104].mxu0 }
0x1fe3   : > { %v4609_v34 = vadd.f32 %v4608_v32, %v4397_v23  ;;  %v4650_v35 = vadd.f32 %v4649_v33, %v4405_v28  ;;  %v4610_v36 = vpop.f32.mrb[77].mxu1  ;;  %v4651_v37 = vpop.f32.mrb[105].mxu0 }
0x1fe4   : > { %v4611_v0 = vadd.f32 %v4610_v36, %v4401_v29  ;;  %v4652_v38 = vadd.f32 %v4651_v37, %v4409_v16  ;;  %v4612_v39 = vpop.f32.mrb[78].mxu1  ;;  %v4653_v40 = vpop.f32.mrb[106].mxu0 }
0x1fe5   : > { %v4660_v41 = vmul.f32 0.044715, %v4609_v34  ;;  %v4662_v42 = vmul.f32 0.044715, %v4650_v35  ;;  %v4613_v27 = vpop.f32.mrb[79].mxu1  ;;  %v4654_v45 = vpop.f32.mrb[107].mxu0 }
0x1fe6   : > { %v4661_v26 = vmul.f32 0.044715, %v4611_v0  ;;  %v4663_v31 = vmul.f32 0.044715, %v4652_v38  ;;  %v4656_v60 = vmul.f32 0.5, %v4609_v34  ;;  %v4657_v53 = vmul.f32 0.5, %v4611_v0 }
0x1fe7   : > { %v4664_v6 = vmul.f32 %v4660_v41, %v4609_v34  ;;  %v4666_v25 = vmul.f32 %v4662_v42, %v4650_v35  ;;  %v4659_v59 = vmul.f32 0.5, %v4652_v38  ;;  %v4658_v2 = vmul.f32 0.5, %v4650_v35  ;;  %v6428_v27 = vld [vmem:[%s7593_s7 + $0x10] sm:$0xff]   ;;  %v6429_v45 = vld [vmem:[%s7593_s7 + $0x18] sm:$0xff]  }
0x1fe8   : > { %v4665_v18 = vmul.f32 %v4661_v26, %v4611_v0  ;;  %v4667_v13 = vmul.f32 %v4663_v31, %v4652_v38  ;;  %v6430_v26 = vld [vmem:[%s7593_s7 + $0x20] sm:$0xff]   ;;  %v6431_v31 = vld [vmem:[%s7593_s7 + $0x28] sm:$0xff]  }
0x1fe9   : > { %v4668_v43 = vmul.f32 %v4664_v6, %v4609_v34  ;;  %v4670_v46 = vmul.f32 %v4666_v25, %v4650_v35  ;;  %v6432_v6 = vld [vmem:[%s7593_s7 + $0x30] sm:$0xff]   ;;  %v6433_v25 = vld [vmem:[%s7593_s7 + $0x38] sm:$0xff]  }
0x1fea   : > { %v4669_v30 = vmul.f32 %v4665_v18, %v4611_v0  ;;  %v4671_v57 = vmul.f32 %v4667_v13, %v4652_v38 }
0x1feb   : > { %v4672_v47 = vadd.f32 %v4668_v43, %v4609_v34  ;;  %v4674_v49 = vadd.f32 %v4670_v46, %v4650_v35 }
0x1fec   : > { %v4673_v50 = vadd.f32 %v4669_v30, %v4611_v0  ;;  %v4675_v51 = vadd.f32 %v4671_v57, %v4652_v38  ;;  %v6426_v0 = vld [vmem:[%s7593_s7] sm:$0xff]   ;;  %v6427_v38 = vld [vmem:[%s7593_s7 + $0x8] sm:$0xff]  }
0x1fed   : > { %v4676_v52 = vmul.f32 0.7978846, %v4672_v47  ;;  %v4678_v55 = vmul.f32 0.7978846, %v4674_v49  ;;  %v5641_v30 = vld [vmem:[%s7594_s11] ss:$0 sm:$0xff] }
0x1fee   : > { %v4677_v54 = vmul.f32 0.7978846, %v4673_v50  ;;  %v4679_v62 = vmul.f32 0.7978846, %v4675_v51  ;;  %v5642_v47 = vld [vmem:[%s7595_s0] ss:$0 sm:$0xff] }
0x1fef   : > { %6512 = vtanh.f32 %v4676_v52  ;;  %v5643_v52 = vld [vmem:[%s7596_s22] ss:$0 sm:$0xff]  ;;  %s5343_s11 = sadd.s32 1, %s6795_s16  ;;  %s6608_s0 = smov [#allocation6]  }
0x1ff0   : > { %6514 = vtanh.f32 %v4677_v54  ;;  %s5359_s22 = sshll.u32 %s6608_s0, 4  ;;  %s5360_s22 = int_to_ptr.vmem [resolvable:$true] %s5359_s22 }
0x1ff1   : > { %6516 = vtanh.f32 %v4679_v62  ;;  %p6533_p8 = scmp.lt.s32.totalorder %s5360_s22, %s5360_s22 }
0x1ff2   : > { %6518 = vtanh.f32 %v4678_v55 }
0x1ff9   : > { %v6513_v56 = vpop.eup %6512 }
0x1ffa   : > { %v6515_v58 = vpop.eup %6514  ;;  %v4684_v61 = vadd.f32 1.0, %v6513_v56 }
0x1ffb   : > { %v6517_v3 = vpop.eup %6516  ;;  %v4685_v5 = vadd.f32 1.0, %v6515_v58 }
0x1ffc   : > { %v6519_v24 = vpop.eup %6518  ;;  %v4687_v63 = vadd.f32 1.0, %v6517_v3  ;;  %v4688_v48 = vmul.f32 %v4684_v61, %v4656_v60 }
0x1ffd   : > { %v4689_v1 = vmul.f32 %v4685_v5, %v4657_v53  ;;  %v4686_v7 = vadd.f32 1.0, %v6519_v24 }
0x1ffe   : > { %v4691_v9 = vmul.f32 %v4687_v63, %v4659_v59  ;;  %v4692_v14 = vpack.c.bf16 %v4688_v48, %v4688_v48 }
0x1fff   : > { %v4693_v10 = vpack.c.bf16 %v4689_v1, %v4689_v1  ;;  %v4690_v11 = vmul.f32 %v4686_v7, %v4658_v2  ;;  %v6434_v2 = vld [vmem:[%s6777_s5] sm:$0xff]   ;;  %v6435_v7 = vld [vmem:[%s6777_s5 + $0x8] sm:$0xff]  }
0x2000   : > { %v4695_v12 = vpack.c.bf16 %v4691_v9, %v4691_v9 }
0x2001   : > { %4991 = vmatprep.mubr.bf16.mxu1 %v4693_v10  ;;  %v4694_v15 = vpack.c.bf16 %v4690_v11, %v4690_v11 }
0x2002   : > { %5031 = vmatprep.mubr.bf16.mxu0 %v4695_v12  ;;  %4992 = vmatmul.mubr.bf16.vlgmr.msra.gmra.mrb[80].mxu1 %v4692_v14 }
0x2003   : > { %5032 = vmatmul.mubr.bf16.vlgmr.msra.gmra.mrb[108].mxu0 %v4694_v15  ;;  %6184 = vmatprep.mubr.msk.bf16.mxu1 %vm6601_vm3, %v6600_v4  ;;  %v6436_v15 = vld [vmem:[%s6777_s5 + $0x10] sm:$0xff]  }
0x2004   : > { %6204 = vmatprep.mubr.msk.bf16.mxu0 %vm6601_vm3, %v6600_v4  ;;  %6169 = vmatpush3.bf16.msra.mxu1 %v6426_v0  ;;  %v5654_v0 = vld [vmem:[%s6782_s4] ss:$0 sm:$0xff] }
0x2005   : > { %6170 = vmatprep.subr.bf16.mxu1 %v6600_v4  ;;  %6189 = vmatpush3.bf16.msra.mxu0 %v6434_v2 }
0x2006   : > { %6190 = vmatprep.subr.bf16.mxu0 %v6600_v4 }
0x2008   : > { %6171 = vmatpush3.bf16.msra.mxu1 %v6427_v38 }
0x2009   : > { %6172 = vmatprep.subr.bf16.mxu1 %v6600_v4  ;;  %6191 = vmatpush3.bf16.msra.mxu0 %v6435_v7 }
0x200a   : > { %6192 = vmatprep.subr.bf16.mxu0 %v6600_v4 }
0x200c   : > { %6173 = vmatpush3.bf16.msra.mxu1 %v6428_v27 }
0x200d   : > { %6174 = vmatprep.subr.bf16.mxu1 %v6600_v4  ;;  %6193 = vmatpush3.bf16.msra.mxu0 %v6436_v15 }
0x200e   : > { %6194 = vmatprep.subr.bf16.mxu0 %v6600_v4 }
0x2010   : > { %6175 = vmatpush3.bf16.msra.mxu1 %v6429_v45 }
0x2011   : > { %6176 = vmatprep.subr.bf16.mxu1 %v6600_v4 }
0x2014   : > { %6177 = vmatpush3.bf16.msra.mxu1 %v6430_v26 }
0x2015   : > { %6178 = vmatprep.subr.bf16.mxu1 %v6600_v4 }
0x2018   : > { %6179 = vmatpush3.bf16.msra.mxu1 %v6431_v31  ;;  %v5344_v31 = vstv %s5343_s11 }
0x2019   : > { %6180 = vmatprep.subr.bf16.mxu1 %v6600_v4  ;;  %vm5345_vm3 = vcmp.eq.s32.totalorder %v6826_v8, %v5344_v31 }
0x201c   : > { %6181 = vmatpush3.bf16.msra.mxu1 %v6432_v6 }
0x201d   : > { %6182 = vmatprep.subr.bf16.mxu1 %v6600_v4 }
0x2020   : > { %6183 = vmatpush3.bf16.msra.mxu1 %v6433_v25 }
0x20d5   : > { %v5800_v17 = vpop.f32.mrb[80].mxu1 }
0x20d6   : > { %v5822_v19 = vpop.f32.mrb[108].mxu0  ;;  %v5801_v22 = vpop.f32.mrb[81].mxu1 }
0x20d7   : > { %v5802_v20 = vadd.f32 %v5801_v22, %v5800_v17  ;;  %v5823_v23 = vpop.f32.mrb[109].mxu0  ;;  %v5803_v28 = vpop.f32.mrb[82].mxu1  ;;  %v6437_v17 = vld [vmem:[%s6777_s5 + $0x18] sm:$0xff]   ;;  %v6440_v22 = vld [vmem:[%s6777_s5 + $0x30] sm:$0xff]  }
0x20d8   : > { %v5824_v29 = vadd.f32 %v5823_v23, %v5822_v19  ;;  %v5825_v16 = vpop.f32.mrb[110].mxu0  ;;  %v5804_v32 = vpop.f32.mrb[83].mxu1  ;;  %6195 = vmatpush3.bf16.msra.mxu0 %v6437_v17  ;;  %v6438_v19 = vld [vmem:[%s6777_s5 + $0x20] sm:$0xff]  }
0x20d9   : > { %v4994_v33 = vadd.f32 %v5802_v20, %v5608_v21  ;;  %v5826_v34 = vpop.f32.mrb[111].mxu0  ;;  %6196 = vmatprep.subr.bf16.mxu0 %v6600_v4  ;;  %v6439_v21 = vld [vmem:[%s6777_s5 + $0x28] sm:$0xff]   ;;  %v6441_v20 = vld [vmem:[%s6777_s5 + $0x38] sm:$0xff]   ;;  %v5652_v32 = vld [vmem:[%s7597_s26] ss:$0 sm:$0xff]  ;;  %s6526_s26 = scalar_lea.vmem %s5360_s22, 32 }
0x20da   : > { %v5653_v34 = vld [vmem:[%s6772_s13] ss:$0 sm:$0xff]  ;;  %p6527_p5 = scmp.ne.s32.totalorder %s5360_s22, %s6526_s26  ;;  %p6534_p9 = scmp.lt.s32.totalorder %s6526_s26, %s6526_s26 }
0x20db   : > { %v5034_v35 = vadd.f32 %v5824_v29, %v4994_v33 }
0x20dc   : > { %6197 = vmatpush3.bf16.msra.mxu0 %v6438_v19  ;;  %p6528_p6 = pnand %p6527_p5, %p6214_p4  ;;  %p6535_p10 = por %p6534_p9, %p6533_p8 }
0x20dd   : > { %v5039_v36 = vadd.f32 %v5034_v35, %v7441_v44  ;;  %6198 = vmatprep.subr.bf16.mxu0 %v6600_v4 }
0x20de   : > { %p6529_p7 = pneg %p6528_p6 }
0x20df   : > { %v5042_v37 = vsel %vm1217_vm9, %v5039_v36, 0.0 }
0x20e0   : > { %5043 = vadd.xlane.f32.xlu1 %v5042_v37  ;;  %6199 = vmatpush3.bf16.msra.mxu0 %v6439_v21  ;;  %p6536_p11 = pnand %p6535_p10, %p6529_p7 }
0x20e1   : > { %6200 = vmatprep.subr.bf16.mxu0 %v6600_v4 }
0x20e4   : > { %6201 = vmatpush3.bf16.msra.mxu0 %v6440_v22 }
0x20e5   : > { %6202 = vmatprep.subr.bf16.mxu0 %v6600_v4 }
0x20e8   : > { %6203 = vmatpush3.bf16.msra.mxu0 %v6441_v20 }
0x216d   : > { %v5044_v39 = vpop.xlane.xlu1 %5043 }
0x216e   : > { %v5045_v40 = vmul.f32 0.0078125, %v5044_v39 }
0x2170   : > { %v5046_v41 = vsub.f32 %v5039_v36, %v5045_v40 }
0x2172   : > { %v5047_v42 = vmul.f32 %v5046_v41, %v5046_v41 }
0x2174   : > { %v5048_v44 = vsel %vm1217_vm9, %v5047_v42, 0.0 }
0x2175   : > { %5049 = vadd.xlane.f32.xlu0 %v5048_v44  ;;  %v5334_v44 = vcvt.s32.f32 %v6826_v8 }
0x2202   : > { %v5050_v18 = vpop.xlane.xlu0 %5049 }
0x2203   : > { %v5051_v13 = vmul.f32 0.0078125, %v5050_v18  ;;  %v5346_v18 = vld [vmem:[#allocation4] sm:$0x3] }
0x2205   : > { %v5052_v43 = vadd.f32 1e-12, %v5051_v13 }
0x2207   : > { %6520 = vrsqrt.f32 %v5052_v43 }
0x2211   : > { %v6521_v46 = vpop.eup %6520 }
0x2212   : > { %v5054_v57 = vmul.f32 %v6521_v46, %v5046_v41 }
0x2214   : > { %v5061_v49 = vmul.f32 %v5641_v30, %v5054_v57 }
0x2216   : > { %v5068_v50 = vadd.f32 %v5642_v47, %v5061_v49 }
0x2218   : > { %v5069_v51 = vpack.c.bf16 %v5068_v50, %v5068_v50 }
0x221a   : > { %6185 = vmatmul.mubr.bf16.vlgmr.msra.gmra.mrb[84].mxu1 %v5069_v51 }
0x22ed   : > { %v5175_v54 = vpop.f32.mrb[84].mxu1 }
0x22ee   : > { %v5176_v62 = vadd.f32 %v5643_v52, %v5175_v54  ;;  %v6186_v55 = vpop.f32.mrb[85].mxu1 }
0x22ef   : > { %v5178_v56 = vpop.f32.mrb[86].mxu1 }
0x22f0   : > { %v5182_v58 = vmul.f32 0.044715, %v5176_v62  ;;  %v6187_v60 = vpop.f32.mrb[87].mxu1  ;;  %v5181_v59 = vmul.f32 0.5, %v5176_v62 }
0x22f2   : > { %v5183_v61 = vmul.f32 %v5182_v58, %v5176_v62 }
0x22f4   : > { %v5184_v3 = vmul.f32 %v5183_v61, %v5176_v62 }
0x22f6   : > { %v5185_v53 = vadd.f32 %v5184_v3, %v5176_v62 }
0x22f8   : > { %v5186_v5 = vmul.f32 0.7978846, %v5185_v53 }
0x22fa   : > { %6522 = vtanh.f32 %v5186_v5 }
0x2304   : > { %v6523_v24 = vpop.eup %6522 }
0x2305   : > { %v5188_v63 = vadd.f32 1.0, %v6523_v24 }
0x2307   : > { %v5189_v48 = vmul.f32 %v5188_v63, %v5181_v59 }
0x2309   : > { %v5192_v1 = vsel %vm1217_vm9, %v5189_v48, 0.0 }
0x230a   : > { %5193 = vadd.xlane.f32.xlu1 %v5192_v1 }
0x2397   : > { %v5194_v9 = vpop.xlane.xlu1 %5193 }
0x2398   : > { %v5195_v10 = vmul.f32 0.0078125, %v5194_v9 }
0x239a   : > { %v5196_v11 = vsub.f32 %v5189_v48, %v5195_v10 }
0x239c   : > { %v5197_v12 = vmul.f32 %v5196_v11, %v5196_v11 }
0x239e   : > { %v5198_v14 = vsel %vm1217_vm9, %v5197_v12, 0.0 }
0x239f   : > { %5199 = vadd.xlane.f32.xlu0 %v5198_v14 }
0x242c   : > { %v5200_v23 = vpop.xlane.xlu0 %5199 }
0x242d   : > { %v5201_v28 = vmul.f32 0.0078125, %v5200_v23 }
0x242f   : > { %v5202_v29 = vadd.f32 1e-12, %v5201_v28 }
0x2431   : > { %6524 = vrsqrt.f32 %v5202_v29 }
0x243b   : > { %v6525_v16 = vpop.eup %6524 }
0x243c   : > { %v5204_v33 = vmul.f32 %v6525_v16, %v5196_v11 }
0x243e   : > { %v5211_v35 = vmul.f32 %v5652_v32, %v5204_v33 }
0x2440   : > { %v5218_v36 = vadd.f32 %v5653_v34, %v5211_v35 }
0x2442   : > { %v5219_v37 = vpack.c.bf16 %v5218_v36, %v5218_v36 }
0x2444   : > { %6205 = vmatmul.mubr.bf16.vlgmr.msra.gmra.mrb[112].mxu0 %v5219_v37 }
0x2517   : > { %v5325_v38 = vpop.f32.mrb[112].mxu0 }
0x2518   : > { %v5326_v39 = vadd.f32 %v5654_v0, %v5325_v38  ;;  %v6206_v40 = vpop.f32.mrb[113].mxu0 }
0x2519   : > { %v5328_v41 = vpop.f32.mrb[114].mxu0 }
0x251a   : > { %v6207_v4 = vpop.f32.mrb[115].mxu0  ;;  %v5331_v42 = vsel %vm1217_vm9, %v5326_v39, -inf }
0x251b   : > { %5332 = vmax.xlane.f32.xlu1 %v5331_v42 }
0x25a8   : > { %v5333_v27 = vpop.xlane.xlu1 %5332 }
0x25a9   : > { %vm5335_vm1 = vcmp.ge.f32.partialorder %v5326_v39, %v5333_v27 }
0x25aa   : > { %v5336_v45 = vsel %vm5335_vm1, %v5334_v44, 128.0 }
0x25ab   : > { %v5337_v26 = vsel %vm1217_vm9, %v5336_v45, inf }
0x25ac   : > { %5338 = vmin.xlane.f32.xlu0 %v5337_v26 }
0x2639   : > { %v5339_v6 = vpop.xlane.xlu0 %5338 }
0x263a   : > { %v6208_v25 = vtrunc.f32 %v5339_v6 }
0x263c   : > { %v6209_v13 = vcvt.f32.s32 %v6208_v25 }
0x263e   : > { %5342 = vst.msk [vmem:[#allocation5] sm:$0x3] %vm5341_vm2, %v6209_v13  ;;  %v5347_v43 = vsel %vm5345_vm3, %v6209_v13, %v5346_v18 }
0x263f   : > { %5349 = vst.msk [vmem:[#allocation4] sm:$0x3] %vm5348_vm4, %v5347_v43 }
0x2646   : > { %v5350_v46 = vld [vmem:[#allocation4] sm:$0x3] }
0x2647   : > { %5351 = vst.msk [vmem:[#allocation6] sm:$0x3] %vm5348_vm4, %v5350_v46 }
0x2648   : > { %6539 = shalt.err (!%p6536_p11)
}
0x2649   : > { %s6540_s11 = scalar_lea.hbm %s6787_s9, 32 }
0x264a   : > { %p6541_p12 = scmp.ne.s32.totalorder %s6787_s9, %s6540_s11  ;;  %p6546_p1 = scmp.lt.u32.totalorder %s6540_s11, %s6787_s9 }
0x264c   : > { %p6542_p13 = pnand %p6541_p12, %p6214_p4 }
0x264e   : > { %p6543_p0 = pneg %p6542_p13 }
0x2650   : > { %p6548_p2 = pnand %p6546_p1, %p6543_p0 }
0x2652   : > { %6551 = shalt.err (!%p6548_p2)
}
0x2653   : > { %6211 = dma.vmem_to_hbm [thread:$0]  (%p6214_p4), %s5360_s22, 32, %s6787_s9, [#allocation7]  }
0x2654   : > { %6557 = dma.done.wait (%p6214_p4), [#allocation7], 32  }
0x2655   : > { %6559 = vsyncadd (%p6214_p4), [#allocation7], 4294967264 }
0x2656 PF: > { %s80_s15 = sadd.s32 1, %s6562_s15  }
0x2657   : > { %p77_p3 = scmp.ge.s32.totalorder %s80_s15, 9  }
0x2659   :  { %79 = sbr.rel (!%p77_p3) target bundleno = 62 (0x3e), region = 230 }
0x2660   :  { %5372 = vsyncpa [#allocation7], 1 }
0x2661   :  { %5374 = vsyncpa [#allocation7 + $0x1], 1 }

</bundles_post_ra>
